<compile_context>
chip_gen: v6e
topology: v6e:2x2x1
jax: 0.10.0
libtpu: 0.0.40
codegen_flags: <defaults>
</compile_context>

<pallas_src>
import functools

import jax
import jax.numpy as jnp
from jax import lax
from jax.experimental import pallas as pl
from jax.experimental.pallas import tpu as pltpu


def _num_tensorcores():
    """Best-effort TensorCore-per-chip count (v7x has 2; v5e/v6e have 1)."""
    try:
        kind = jax.devices()[0].device_kind.lower()
    except Exception:
        return 1
    return 2 if "v7" in kind else 1


def _same_conv_im2col(xf, w_cat, seg_len):
    """'Same' K=3 conv (stride 1, zero pad 1) over a row-flattened (n*seg_len, C)
    channels-last slab as a SINGLE MXU matmul.

    The +/-1 tap shifts are applied to the narrow input with pltpu.roll (XLU slot)
    and zeroed at segment edges (this covers both the conv zero padding and the
    batch-segment boundaries of the flattened slab); the three copies are
    lane-concatenated into (M, 3C) and contracted against the (3C, Cout) weight."""
    M, _ = xf.shape
    pos = lax.broadcasted_iota(jnp.int32, (M, 1), 0) % seg_len   # position in segment
    zero = jnp.zeros_like(xf)
    # x_m1[t] = x[t-1] (zero at segment start);  x_p1[t] = x[t+1] (zero at segment end)
    x_m1 = jnp.where(pos == 0, zero, pltpu.roll(xf, shift=1, axis=0))
    x_p1 = jnp.where(pos == seg_len - 1, zero, pltpu.roll(xf, shift=M - 1, axis=0))
    xcat = jnp.concatenate([x_m1, xf, x_p1], axis=1)              # (M, 3C)
    return jnp.dot(xcat, w_cat, preferred_element_type=jnp.float32)


def _cnn_kernel(x_ref, w1_ref, w2_ref, bn_ref, o_ref, *, seq_len, c_mid, c_out, mxu_dtype):
    # x_ref : (block_n * L, Cin)   channels-last rows, batch folded into M (mxu_dtype)
    # w1_ref: (3*Cin, Cmid)        im2col-reshaped conv1 weight (mxu_dtype)
    # w2_ref: (3*Cmid, Cout)       im2col-reshaped conv2 weight (mxu_dtype)
    # bn_ref: (4, Cpad) f32        rows = [scale1, shift1, scale2, shift2] (folded BN)
    # o_ref : (block_n * L // 4, Cout) f32
    L = seq_len
    M = x_ref.shape[0]

    bn = bn_ref[...]
    s1, b1 = bn[0:1, :c_mid], bn[1:2, :c_mid]
    s2, b2 = bn[2:3, :c_out], bn[3:4, :c_out]

    xf = x_ref[...]                                              # already mxu_dtype (wrapper cast)

    # ---- layer 1: conv1 + BN1 + ReLU + MaxPool1d(2, 2) ----
    h = _same_conv_im2col(xf, w1_ref[...], L)                    # (M, Cmid) f32
    h = jnp.maximum(h * s1 + b1, 0.0)
    # MaxPool over sublane pairs; pairs stay in-segment because L % 4 == 0.
    # (Kept as reshape+max — known to lower cleanly; strided-slice max is the
    #  alternative if the reshape ever shows up as a relayout copy in the bundle.)
    h = h.reshape(M // 2, 2, c_mid).max(axis=1)
    # dropout1: identity in eval mode

    # ---- layer 2: conv2 + BN2 + ReLU + MaxPool1d(2, 2) ----
    h2 = _same_conv_im2col(h.astype(mxu_dtype), w2_ref[...], L // 2)   # (M//2, Cout) f32
    z = jnp.maximum(h2 * s2 + b2, 0.0)
    z = z.reshape(M // 4, 2, c_out).max(axis=1)
    # dropout2: identity in eval mode
    # TODO(synk): training-mode dropout RNG masking not implemented (eval semantics only).

    o_ref[...] = z.astype(o_ref.dtype)


def simple_cnn2layer_pallas(x_ncl, w1_oik, w2_oik, scale1, shift1, scale2, shift2,
                            *, block_n=None, mxu_dtype=jnp.bfloat16):
    """x_ncl: (N, Cin, L) PyTorch NCL layout; w*_oik: (Cout, Cin, K) PyTorch conv weights.
    scale/shift: folded BatchNorm (y = x*scale + shift).  Returns (N, Cout, L // 4)."""
    N, Cin, L = x_ncl.shape
    Cmid, _, K = w1_oik.shape
    Cout, _, K2 = w2_oik.shape
    assert K == 3 and K2 == 3, "this kernel specializes kernel_size=3, padding=1"
    assert L % 4 == 0, "L must be divisible by 4 (two MaxPool(2,2) stages)"
    Lout = L // 4

    # --- generation-aware grid: single step on 1-TC chips, >= 2 parallel steps on v7x.
    if block_n is None:
        if _num_tensorcores() >= 2:
            divisors = [d for d in range(1, N + 1) if N % d == 0]
            ok = [d for d in divisors
                  if (d * Lout) % 8 == 0 and d * L >= 256 and N // d >= 2]
            block_n = min(ok) if ok else N
        else:
            block_n = N                     # one grid step: max M, min per-step overhead
    assert N % block_n == 0
    n_blocks = N // block_n
    if n_blocks > 1 and (block_n * Lout) % 8 != 0:   # sublane-aligned output blocks
        block_n, n_blocks = N, 1

    # --- wrapper-side layout glue.
    # Input: single fused XLA transpose+reshape NCL -> flat NLC, cast to the MXU dtype
    # (halves input DMA bytes for bf16).  Conv padding handled in-kernel.
    x_flat = jnp.transpose(x_ncl, (0, 2, 1)).reshape(N * L, Cin).astype(mxu_dtype)
    # Weights: PyTorch (Cout, Cin, K) -> im2col (K*Cin, Cout) so each layer is one dot.
    w1_cat = jnp.transpose(w1_oik, (2, 1, 0)).reshape(K * Cin, Cmid).astype(mxu_dtype)
    w2_cat = jnp.transpose(w2_oik, (2, 1, 0)).reshape(K * Cmid, Cout).astype(mxu_dtype)
    # BN params: merge the four (C,) vectors into one padded (4, Cpad) f32 array.
    Cpad = max(Cmid, Cout)

    def _pad_row(v):
        v = v.astype(jnp.float32).reshape(-1)
        return jnp.pad(v, (0, Cpad - v.shape[0]))

    bn = jnp.stack([_pad_row(scale1), _pad_row(shift1), _pad_row(scale2), _pad_row(shift2)])

    kernel = functools.partial(_cnn_kernel, seq_len=L, c_mid=Cmid, c_out=Cout,
                               mxu_dtype=mxu_dtype)

    out_flat = pl.pallas_call(
        kernel,
        out_shape=jax.ShapeDtypeStruct((N * Lout, Cout), jnp.float32),
        grid_spec=pltpu.PrefetchScalarGridSpec(
            num_scalar_prefetch=0,
            grid=(n_blocks,),
            in_specs=[
                pl.BlockSpec((block_n * L, Cin), lambda b: (b, 0)),
                pl.BlockSpec((K * Cin, Cmid), lambda b: (0, 0)),
                pl.BlockSpec((K * Cmid, Cout), lambda b: (0, 0)),
                pl.BlockSpec((4, Cpad), lambda b: (0, 0)),
            ],
            out_specs=pl.BlockSpec((block_n * Lout, Cout), lambda b: (b, 0)),
        ),
        compiler_params=pltpu.CompilerParams(
            dimension_semantics=("parallel",),
            vmem_limit_bytes=32 * 1024 * 1024,   # safe on 64 MiB (v7x) and 128 MiB parts
        ),
    )(x_flat, w1_cat, w2_cat, bn)

    # back to PyTorch NCL layout
    return jnp.transpose(out_flat.reshape(N, Lout, Cout), (0, 2, 1))


def _reference_forward(x_ncl, w1_oik, w2_oik, scale1, shift1, scale2, shift2):
    """Pure-JAX reference in PyTorch NCL layout (eval-mode BN / dropout)."""
    def conv1d(x, w):
        return lax.conv_general_dilated(
            x, w, window_strides=(1,), padding=[(1, 1)],
            dimension_numbers=('NCH', 'OIH', 'NCH'))

    def maxpool2(x):
        n, c, l = x.shape
        return x.reshape(n, c, l // 2, 2).max(axis=-1)

    y = conv1d(x_ncl, w1_oik)
    y = y * scale1[None, :, None] + shift1[None, :, None]
    y = jnp.maximum(y, 0.0)
    y = maxpool2(y)
    y = conv1d(y, w2_oik)
    y = y * scale2[None, :, None] + shift2[None, :, None]
    y = jnp.maximum(y, 0.0)
    y = maxpool2(y)
    return y


if __name__ == "__main__":
    # small shapes consistent with the module
    N, Cin, Cmid, Cout, L, K = 8, 16, 32, 64, 64, 3
    eps = 1e-5

    key = jax.random.PRNGKey(0)
    kx, kw1, kw2, kg1, kb1, km1, kv1, kg2, kb2, km2, kv2 = jax.random.split(key, 11)

    x = jax.random.normal(kx, (N, Cin, L), jnp.float32)

    # Conv1d weights in PyTorch layout (Cout, Cin, K), bias=False
    w1_oik = jax.random.normal(kw1, (Cmid, Cin, K), jnp.float32) * 0.1
    w2_oik = jax.random.normal(kw2, (Cout, Cmid, K), jnp.float32) * 0.1

    # BatchNorm1d parameters (inference / running-stats mode)
    g1 = 1.0 + 0.1 * jax.random.normal(kg1, (Cmid,), jnp.float32)
    beta1 = 0.1 * jax.random.normal(kb1, (Cmid,), jnp.float32)
    m1 = 0.1 * jax.random.normal(km1, (Cmid,), jnp.float32)
    v1 = jnp.abs(jax.random.normal(kv1, (Cmid,), jnp.float32)) + 0.5
    g2 = 1.0 + 0.1 * jax.random.normal(kg2, (Cout,), jnp.float32)
    beta2 = 0.1 * jax.random.normal(kb2, (Cout,), jnp.float32)
    m2 = 0.1 * jax.random.normal(km2, (Cout,), jnp.float32)
    v2 = jnp.abs(jax.random.normal(kv2, (Cout,), jnp.float32)) + 0.5

    # fold BN into scale/shift: y = x*scale + shift
    scale1 = g1 / jnp.sqrt(v1 + eps)
    shift1 = beta1 - m1 * scale1
    scale2 = g2 / jnp.sqrt(v2 + eps)
    shift2 = beta2 - m2 * scale2

    ref = _reference_forward(x, w1_oik, w2_oik, scale1, shift1, scale2, shift2)

    # f32-MXU path (tight numerical check)
    out_f32 = simple_cnn2layer_pallas(x, w1_oik, w2_oik, scale1, shift1, scale2, shift2,
                                      mxu_dtype=jnp.float32)
    out_f32 = jax.block_until_ready(out_f32)
    assert out_f32.shape == (N, Cout, L // 4), out_f32.shape
    err_f32 = float(jnp.abs(out_f32 - ref).max())
    assert jnp.allclose(out_f32, ref, atol=2e-3, rtol=2e-3), err_f32

    # bf16 MXU inputs / f32 accumulation (default path, all generations)
    out_bf16 = simple_cnn2layer_pallas(x, w1_oik, w2_oik, scale1, shift1, scale2, shift2,
                                       mxu_dtype=jnp.bfloat16)
    out_bf16 = jax.block_until_ready(out_bf16)
    assert out_bf16.shape == (N, Cout, L // 4), out_bf16.shape
    err_bf16 = float(jnp.abs(out_bf16 - ref).max())
    assert jnp.allclose(out_bf16, ref, atol=5e-2, rtol=5e-2), err_bf16

    print("KERNEL_OK")
</pallas_src>

<mosaic_0001>
module attributes {stable_mosaic.version = 11 : i64} {
  func.func @_cnn_kernel(%arg0: i32, %arg1: memref<512x16xf32, #tpu.memory_space<vmem>>, %arg2: memref<48x32xf32, #tpu.memory_space<vmem>>, %arg3: memref<96x64xf32, #tpu.memory_space<vmem>>, %arg4: memref<4x64xf32, #tpu.memory_space<vmem>>, %arg5: memref<128x64xf32, #tpu.memory_space<vmem>>) attributes {dimension_semantics = [#tpu.dimension_semantics<parallel>], iteration_bounds = array<i64: 1>, scalar_prefetch = 0 : i64, scratch_operands = 0 : i64, tpu.core_type = #tpu.core_type<tc>, window_params = [{transform_indices = @transform_0, window_bounds = array<i64: 512, 16>}, {pipeline_mode = #tpu.pipeline_mode<synchronous>, transform_indices = @transform_1, window_bounds = array<i64: 48, 32>}, {pipeline_mode = #tpu.pipeline_mode<synchronous>, transform_indices = @transform_2, window_bounds = array<i64: 96, 64>}, {pipeline_mode = #tpu.pipeline_mode<synchronous>, transform_indices = @transform_3, window_bounds = array<i64: 4, 64>}, {transform_indices = @transform_4, window_bounds = array<i64: 128, 64>}]} {
    %c0 = arith.constant 0 : index
    %c0_0 = arith.constant 0 : index
    %0 = vector.load %arg4[%c0, %c0_0] : memref<4x64xf32, #tpu.memory_space<vmem>>, vector<4x64xf32>
    %1 = vector.extract_strided_slice %0 {offsets = [0, 0], sizes = [1, 32], strides = [1, 1]} : vector<4x64xf32> to vector<1x32xf32>
    %2 = vector.extract_strided_slice %0 {offsets = [1, 0], sizes = [1, 32], strides = [1, 1]} : vector<4x64xf32> to vector<1x32xf32>
    %3 = vector.extract_strided_slice %0 {offsets = [2, 0], sizes = [1, 64], strides = [1, 1]} : vector<4x64xf32> to vector<1x64xf32>
    %4 = vector.extract_strided_slice %0 {offsets = [3, 0], sizes = [1, 64], strides = [1, 1]} : vector<4x64xf32> to vector<1x64xf32>
    %c0_1 = arith.constant 0 : index
    %c0_2 = arith.constant 0 : index
    %5 = vector.load %arg1[%c0_1, %c0_2] : memref<512x16xf32, #tpu.memory_space<vmem>>, vector<512x16xf32>
    %c0_3 = arith.constant 0 : index
    %c0_4 = arith.constant 0 : index
    %6 = vector.load %arg2[%c0_3, %c0_4] : memref<48x32xf32, #tpu.memory_space<vmem>>, vector<48x32xf32>
    %7 = tpu.iota {dimensions = array<i32: 0>} : vector<512x1xi32>
    %c64_i32 = arith.constant 64 : i32
    %c0_i32 = arith.constant 0 : i32
    %8 = arith.cmpi eq, %c64_i32, %c0_i32 : i32
    %c1_i32 = arith.constant 1 : i32
    %9 = arith.select %8, %c1_i32, %c64_i32 : i32
    %10 = vector.broadcast %9 : i32 to vector<512x1xi32>
    %11 = arith.remsi %7, %10 : vector<512x1xi32>
    %c0_i32_5 = arith.constant 0 : i32
    %12 = vector.broadcast %c0_i32_5 : i32 to vector<512x1xi32>
    %13 = arith.cmpi ne, %11, %12 : vector<512x1xi32>
    %c0_i32_6 = arith.constant 0 : i32
    %14 = vector.broadcast %c0_i32_6 : i32 to vector<512x1xi32>
    %15 = arith.cmpi slt, %11, %14 : vector<512x1xi32>
    %c0_i32_7 = arith.constant 0 : i32
    %16 = arith.cmpi slt, %9, %c0_i32_7 : i32
    %17 = vector.broadcast %16 : i1 to vector<512x1xi1>
    %18 = vector.broadcast %17 : vector<512x1xi1> to vector<512x1xi1>
    %19 = arith.xori %15, %18 : vector<512x1xi1>
    %20 = arith.andi %19, %13 : vector<512x1xi1>
    %21 = vector.broadcast %9 : i32 to vector<512x1xi32>
    %22 = arith.addi %11, %21 : vector<512x1xi32>
    %23 = arith.select %20, %22, %11 : vector<512x1xi1>, vector<512x1xi32>
    %cst = arith.constant 0.000000e+00 : f32
    %24 = vector.broadcast %cst : f32 to vector<512x16xf32>
    %c0_i32_8 = arith.constant 0 : i32
    %25 = vector.broadcast %c0_i32_8 : i32 to vector<512x1xi32>
    %26 = arith.cmpi eq, %23, %25 : vector<512x1xi32>
    %c1_i32_9 = arith.constant 1 : i32
    %27 = tpu.dynamic_rotate %5 by %c1_i32_9 dim 0 : vector<512x16xf32>, i32 -> vector<512x16xf32>
    %28 = vector.shape_cast %26 : vector<512x1xi1> to vector<512x1xi1>
    %29 = vector.broadcast %28 : vector<512x1xi1> to vector<512x16xi1>
    %30 = arith.select %29, %24, %27 : vector<512x16xi1>, vector<512x16xf32>
    %c63_i32 = arith.constant 63 : i32
    %31 = vector.broadcast %c63_i32 : i32 to vector<512x1xi32>
    %32 = arith.cmpi eq, %23, %31 : vector<512x1xi32>
    %c511_i32 = arith.constant 511 : i32
    %33 = tpu.dynamic_rotate %5 by %c511_i32 dim 0 : vector<512x16xf32>, i32 -> vector<512x16xf32>
    %34 = vector.shape_cast %32 : vector<512x1xi1> to vector<512x1xi1>
    %35 = vector.broadcast %34 : vector<512x1xi1> to vector<512x16xi1>
    %36 = arith.select %35, %24, %33 : vector<512x16xi1>, vector<512x16xf32>
    %37 = tpu.concatenate %30, %5, %36 in 1 : vector<512x16xf32>, vector<512x16xf32>, vector<512x16xf32> -> vector<512x48xf32>
    %cst_10 = arith.constant dense<0.000000e+00> : vector<512x32xf32>
    %38 = tpu.matmul %37, %6, %cst_10 {dimension_numbers = #tpu.dot_dimension_numbers<[1], [0], [0], [1], [0, 0, 1, 1], [], []>} : vector<512x48xf32>, vector<48x32xf32>, vector<512x32xf32> -> vector<512x32xf32>
    %39 = vector.broadcast %1 : vector<1x32xf32> to vector<512x32xf32>
    %40 = arith.mulf %38, %39 : vector<512x32xf32>
    %41 = vector.broadcast %2 : vector<1x32xf32> to vector<512x32xf32>
    %42 = arith.addf %40, %41 : vector<512x32xf32>
    %cst_11 = arith.constant 0.000000e+00 : f32
    %43 = vector.broadcast %cst_11 : f32 to vector<512x32xf32>
    %44 = arith.maximumf %42, %43 : vector<512x32xf32>
    %45 = vector.shape_cast %44 : vector<512x32xf32> to vector<256x2x32xf32>
    %cst_12 = arith.constant dense<0xFF800000> : vector<256x32xf32>
    %46 = vector.multi_reduction <maximumf>, %45, %cst_12 [1] : vector<256x2x32xf32> to vector<256x32xf32>
    %c0_13 = arith.constant 0 : index
    %c0_14 = arith.constant 0 : index
    %47 = vector.load %arg3[%c0_13, %c0_14] : memref<96x64xf32, #tpu.memory_space<vmem>>, vector<96x64xf32>
    %48 = tpu.iota {dimensions = array<i32: 0>} : vector<256x1xi32>
    %c32_i32 = arith.constant 32 : i32
    %c0_i32_15 = arith.constant 0 : i32
    %49 = arith.cmpi eq, %c32_i32, %c0_i32_15 : i32
    %c1_i32_16 = arith.constant 1 : i32
    %50 = arith.select %49, %c1_i32_16, %c32_i32 : i32
    %51 = vector.broadcast %50 : i32 to vector<256x1xi32>
    %52 = arith.remsi %48, %51 : vector<256x1xi32>
    %c0_i32_17 = arith.constant 0 : i32
    %53 = vector.broadcast %c0_i32_17 : i32 to vector<256x1xi32>
    %54 = arith.cmpi ne, %52, %53 : vector<256x1xi32>
    %c0_i32_18 = arith.constant 0 : i32
    %55 = vector.broadcast %c0_i32_18 : i32 to vector<256x1xi32>
    %56 = arith.cmpi slt, %52, %55 : vector<256x1xi32>
    %c0_i32_19 = arith.constant 0 : i32
    %57 = arith.cmpi slt, %50, %c0_i32_19 : i32
    %58 = vector.broadcast %57 : i1 to vector<256x1xi1>
    %59 = vector.broadcast %58 : vector<256x1xi1> to vector<256x1xi1>
    %60 = arith.xori %56, %59 : vector<256x1xi1>
    %61 = arith.andi %60, %54 : vector<256x1xi1>
    %62 = vector.broadcast %50 : i32 to vector<256x1xi32>
    %63 = arith.addi %52, %62 : vector<256x1xi32>
    %64 = arith.select %61, %63, %52 : vector<256x1xi1>, vector<256x1xi32>
    %cst_20 = arith.constant 0.000000e+00 : f32
    %65 = vector.broadcast %cst_20 : f32 to vector<256x32xf32>
    %c0_i32_21 = arith.constant 0 : i32
    %66 = vector.broadcast %c0_i32_21 : i32 to vector<256x1xi32>
    %67 = arith.cmpi eq, %64, %66 : vector<256x1xi32>
    %c1_i32_22 = arith.constant 1 : i32
    %68 = tpu.dynamic_rotate %46 by %c1_i32_22 dim 0 : vector<256x32xf32>, i32 -> vector<256x32xf32>
    %69 = vector.shape_cast %67 : vector<256x1xi1> to vector<256x1xi1>
    %70 = vector.broadcast %69 : vector<256x1xi1> to vector<256x32xi1>
    %71 = arith.select %70, %65, %68 : vector<256x32xi1>, vector<256x32xf32>
    %c31_i32 = arith.constant 31 : i32
    %72 = vector.broadcast %c31_i32 : i32 to vector<256x1xi32>
    %73 = arith.cmpi eq, %64, %72 : vector<256x1xi32>
    %c255_i32 = arith.constant 255 : i32
    %74 = tpu.dynamic_rotate %46 by %c255_i32 dim 0 : vector<256x32xf32>, i32 -> vector<256x32xf32>
    %75 = vector.shape_cast %73 : vector<256x1xi1> to vector<256x1xi1>
    %76 = vector.broadcast %75 : vector<256x1xi1> to vector<256x32xi1>
    %77 = arith.select %76, %65, %74 : vector<256x32xi1>, vector<256x32xf32>
    %78 = tpu.concatenate %71, %46, %77 in 1 : vector<256x32xf32>, vector<256x32xf32>, vector<256x32xf32> -> vector<256x96xf32>
    %cst_23 = arith.constant dense<0.000000e+00> : vector<256x64xf32>
    %79 = tpu.matmul %78, %47, %cst_23 {dimension_numbers = #tpu.dot_dimension_numbers<[1], [0], [0], [1], [0, 0, 1, 1], [], []>} : vector<256x96xf32>, vector<96x64xf32>, vector<256x64xf32> -> vector<256x64xf32>
    %80 = vector.broadcast %3 : vector<1x64xf32> to vector<256x64xf32>
    %81 = arith.mulf %79, %80 : vector<256x64xf32>
    %82 = vector.broadcast %4 : vector<1x64xf32> to vector<256x64xf32>
    %83 = arith.addf %81, %82 : vector<256x64xf32>
    %cst_24 = arith.constant 0.000000e+00 : f32
    %84 = vector.broadcast %cst_24 : f32 to vector<256x64xf32>
    %85 = arith.maximumf %83, %84 : vector<256x64xf32>
    %86 = vector.shape_cast %85 : vector<256x64xf32> to vector<128x2x64xf32>
    %cst_25 = arith.constant dense<0xFF800000> : vector<128x64xf32>
    %87 = vector.multi_reduction <maximumf>, %86, %cst_25 [1] : vector<128x2x64xf32> to vector<128x64xf32>
    %c0_26 = arith.constant 0 : index
    %c0_27 = arith.constant 0 : index
    %88 = vector.load %arg5[%c0_26, %c0_27] : memref<128x64xf32, #tpu.memory_space<vmem>>, vector<128x64xf32>
    tpu.vector_store %arg5[%c0_26, %c0_27], %87 {strides = array<i32>} : memref<128x64xf32, #tpu.memory_space<vmem>>, vector<128x64xf32>,
    return
  }
  func.func @transform_0(%arg0: i32) -> (i32, i32) {
    %c0_i32 = arith.constant 0 : i32
    %c0_i32_0 = arith.constant 0 : i32
    return %arg0, %c0_i32 : i32, i32
  }
  func.func @transform_1(%arg0: i32) -> (i32, i32) {
    %c0_i32 = arith.constant 0 : i32
    %c0_i32_0 = arith.constant 0 : i32
    %c0_i32_1 = arith.constant 0 : i32
    return %c0_i32, %c0_i32_0 : i32, i32
  }
  func.func @transform_2(%arg0: i32) -> (i32, i32) {
    %c0_i32 = arith.constant 0 : i32
    %c0_i32_0 = arith.constant 0 : i32
    %c0_i32_1 = arith.constant 0 : i32
    return %c0_i32, %c0_i32_0 : i32, i32
  }
  func.func @transform_3(%arg0: i32) -> (i32, i32) {
    %c0_i32 = arith.constant 0 : i32
    %c0_i32_0 = arith.constant 0 : i32
    %c0_i32_1 = arith.constant 0 : i32
    return %c0_i32, %c0_i32_0 : i32, i32
  }
  func.func @transform_4(%arg0: i32) -> (i32, i32) {
    %c0_i32 = arith.constant 0 : i32
    %c0_i32_0 = arith.constant 0 : i32
    return %arg0, %c0_i32 : i32, i32
  }
}

</mosaic_0001>

<bundles_post_ra>
// kernel: tpu_custom_call.1
= control target key start
LH: loop header
LB: loop body
LE: loop exit
PB: predicated region body
PF: predicated region fallthrough
CT: control target
= control target key end

     0   :  { %v88_v0 = vlaneseq  ;;  %s10610_s21 = smov 16   ;;  %s10611_s24 = smov 32   ;;  %vm2203_vm6 = vcmask 130048   ;;  %vm2268_vm7 = vcmask 261120   ;;  %vm2333_vm8 = vcmask 392192   ;;  %s14732_s0 = inlined_call_operand.vmem [shape: f32[512,16], index: 0, kind: input, shape index: {}]   ;;  %s14733_s1 = inlined_call_operand.vmem [shape: f32[48,32], index: 1, kind: input, shape index: {}]   ;;  %s14734_s3 = inlined_call_operand.vmem [shape: f32[4,64], index: 3, kind: input, shape index: {}]   ;;  %s14735_s2 = inlined_call_operand.vmem [shape: f32[96,64], index: 2, kind: input, shape index: {}]   ;;  %s14736_s4 = inlined_call_operand.vmem [shape: f32[128,64], index: 4, kind: output, shape index: {}]  }
   0x1   :  { %v10642_v1 = vld [vmem:[%s14732_s0] sm:$0xff]  ;;  %v10647_v2 = vld [vmem:[%s14732_s0 + $0x8] sm:$0xff]  ;;  %v10652_v3 = vld [vmem:[%s14732_s0 + $0x10] sm:$0xff]  ;;  %s10613_s6 = smov 64  }
   0x2   :  { %1755 = vrot.lane.b32.xlu0 %v10642_v1, %s10610_s21  ;;  %v1370_v4 = vrot.slane %v10642_v1, 1  ;;  %v1371_v5 = vrot.slane %v10647_v2, 1  ;;  %v10658_v6 = vshrl.u32 %v88_v0, 7  ;;  %v1372_v7 = vrot.slane %v10652_v3, 1  ;;  %v10664_v8 = vld [vmem:[%s14732_s0 + $0x18] sm:$0xff]  ;;  %v10680_v12 = vld [vmem:[%s14732_s0 + $0x20] sm:$0xff] }
   0x3   :  { %v1373_v10 = vrot.slane %v10664_v8, 1  ;;  %v1374_v14 = vrot.slane %v10680_v12, 1  ;;  %v10691_v15 = vld [vmem:[%s14732_s0 + $0x28] sm:$0xff]  ;;  %v86_v17 = vld [vmem:[%s14733_s1 + $0x20] sm:$0xff]  ;;  %v85_v18 = vld [vmem:[%s14733_s1 + $0x18] sm:$0xff]  ;;  %v986_v28 = vrot.slane %v10647_v2, 7 }
   0x4   :  { %vm1434_vm0 = vcmp.lt.s32.totalorder %v10658_v6, 7  ;;  %v87_v16 = vld [vmem:[%s14733_s1 + $0x28] sm:$0xff]  ;;  %v1375_v19 = vrot.slane %v10691_v15, 1  ;;  %v84_v21 = vld [vmem:[%s14733_s1 + $0x10] sm:$0xff]  ;;  %v25_v26 = vld [vmem:[%s14732_s0 + $0x38] sm:$0xff]  ;;  %v10733_v29 = vadd.s32 56, %v10658_v6 }
   0x5   :  { %v1497_v9 = vsel %vm1434_vm0, %v1370_v4, %v1371_v5  ;;  %v1496_v11 = vsel %vm1434_vm0, %v1371_v5, %v1372_v7  ;;  %v1495_v13 = vsel %vm1434_vm0, %v1372_v7, %v1373_v10  ;;  %10413 = vmatprep.subr.mxu0 %v87_v16  ;;  %10593 = vmatprep.subr.mxu1 %v87_v16  ;;  %v10714_v22 = vld [vmem:[%s14732_s0 + $0x30] sm:$0xff]  ;;  %v83_v23 = vld [vmem:[%s14733_s1 + $0x8] sm:$0xff]  ;;  %v82_v27 = vld [vmem:[%s14733_s1] sm:$0xff]  ;;  %v985_v31 = vrot.slane %v10642_v1, 7 }
   0x6   :  { %1757 = vrot.lane.b32.xlu0 %v10647_v2, %s10610_s21  ;;  %2011 = vrot.lane.b32.xlu1 %v1497_v9, %s10611_s24  ;;  %v1494_v20 = vsel %vm1434_vm0, %v1373_v10, %v1374_v14  ;;  %v1493_v24 = vsel %vm1434_vm0, %v1374_v14, %v1375_v19  ;;  %v1376_v25 = vrot.slane %v10714_v22, 1  ;;  %14840 = vst [vmem:[#allocation2_spill] sm:$0xff] %v10733_v29  ;;  %v26_v30 = vld [vmem:[%s14732_s0 + $0x40] sm:$0xff]  ;;  %v1377_v32 = vrot.slane %v25_v26, 1  ;;  %v27_v44 = vld [vmem:[%s14732_s0 + $0x48] sm:$0xff] }
   0x7   :  { %10414 = vmatpush3.msra.mxu0 %v87_v16  ;;  %10599 = vmatpush3.msra.mxu1 %v87_v16  ;;  %v987_v33 = vrot.slane %v10652_v3, 7  ;;  %vm1049_vm1 = vcmp.lt.s32.totalorder %v10658_v6, 1  ;;  %v1378_v35 = vrot.slane %v26_v30, 1  ;;  %v206_v36 = vand.u32 63, %v10733_v29  ;;  %v28_v55 = vld [vmem:[%s14732_s0 + $0x50] sm:$0xff]  ;;  %v29_v62 = vld [vmem:[%s14732_s0 + $0x58] sm:$0xff] }
   0x8   :  { %10415 = vmatprep.subr.mxu0 %v86_v17  ;;  %10594 = vmatprep.subr.mxu1 %v86_v17  ;;  %v1492_v34 = vsel %vm1434_vm0, %v1375_v19, %v1376_v25  ;;  %v10751_v37 = vsel %vm1049_vm1, %v985_v31, %v986_v28  ;;  %v989_v38 = vrot.slane %v10680_v12, 7  ;;  %v1491_v40 = vsel %vm1434_vm0, %v1376_v25, %v1377_v32  ;;  %v30_v63 = vld [vmem:[%s14732_s0 + $0x60] sm:$0xff]  ;;  %v31_v5 = vld [vmem:[%s14732_s0 + $0x68] sm:$0xff]  ;;  %v33_v19 = vld [vmem:[%s14732_s0 + $0x78] sm:$0xff] }
   0x9   :  { %10416 = vmatpush3.msra.mxu0 %v86_v17  ;;  %10600 = vmatpush3.msra.mxu1 %v86_v17  ;;  %v10758_v39 = vsel %vm1049_vm1, %v986_v28, %v987_v33  ;;  %v988_v41 = vrot.slane %v10664_v8, 7  ;;  %v991_v42 = vrot.slane %v10714_v22, 7  ;;  %v993_v43 = vrot.slane %v26_v30, 7  ;;  %v10908_v46 = vld [vmem:[%s14732_s0 + $0x98] sm:$0xff] }
   0xa   :  { %1759 = vrot.lane.b32.xlu0 %v10652_v3, %s10610_s21  ;;  %2013 = vrot.lane.b32.xlu1 %v1496_v11, %s10611_s24  ;;  %v990_v45 = vrot.slane %v10691_v15, 7  ;;  %vm10769_vm2 = vcmp.eq.s32.totalorder %v206_v36, 63  ;;  %v1490_v47 = vsel %vm1434_vm0, %v1377_v32, %v1378_v35  ;;  %v1379_v51 = vrot.slane %v27_v44, 1  ;;  %v32_v11 = vld [vmem:[%s14732_s0 + $0x70] sm:$0xff]  ;;  %v35_v32 = vld [vmem:[%s14732_s0 + $0x88] sm:$0xff] }
   0xb   :  { %10417 = vmatprep.subr.mxu0 %v85_v18  ;;  %10595 = vmatprep.subr.mxu1 %v85_v18  ;;  %v10777_v48 = vsel %vm1049_vm1, %v987_v33, %v988_v41  ;;  %v10781_v49 = vsel %vm1049_vm1, %v988_v41, %v989_v38  ;;  %v992_v53 = vrot.slane %v25_v26, 7  ;;  %v1634_v54 = vsel %vm10769_vm2, 0.0, %v1490_v47  ;;  %v36_v36 = vld [vmem:[%s14732_s0 + $0x90] sm:$0xff] }
   0xc   :  { %10418 = vmatpush3.msra.mxu0 %v85_v18  ;;  %10601 = vmatpush3.msra.mxu1 %v85_v18  ;;  %v10786_v50 = vsel %vm1049_vm1, %v989_v38, %v990_v45  ;;  %v10791_v52 = vsel %vm1049_vm1, %v990_v45, %v991_v42  ;;  %v995_v58 = vrot.slane %v28_v55, 7  ;;  %v994_v59 = vrot.slane %v27_v44, 7 }
   0xd   :  { %10419 = vmatprep.subr.mxu0 %v84_v21  ;;  %10596 = vmatprep.subr.mxu1 %v84_v21  ;;  %v10800_v56 = vsel %vm1049_vm1, %v991_v42, %v992_v53  ;;  %v10804_v57 = vsel %vm1049_vm1, %v992_v53, %v993_v43  ;;  %v1489_v60 = vsel %vm1434_vm0, %v1378_v35, %v1379_v51  ;;  %v1380_v61 = vrot.slane %v28_v55, 1 }
   0xe   :  { %2015 = vrot.lane.b32.xlu0 %v1495_v13, %s10611_s24  ;;  %1761 = vrot.lane.b32.xlu1 %v10664_v8, %s10610_s21  ;;  %v10818_v0 = vsel %vm1049_vm1, %v993_v43, %v994_v59  ;;  %v10822_v2 = vsel %vm1049_vm1, %v994_v59, %v995_v58  ;;  %v997_v3 = vrot.slane %v30_v63, 7  ;;  %v996_v7 = vrot.slane %v29_v62, 7 }
   0xf   :  { %10420 = vmatpush3.msra.mxu0 %v84_v21  ;;  %10602 = vmatpush3.msra.mxu1 %v84_v21  ;;  %v1381_v8 = vrot.slane %v29_v62, 1  ;;  %v998_v9 = vrot.slane %v31_v5, 7  ;;  %v1488_v10 = vsel %vm1434_vm0, %v1379_v51, %v1380_v61  ;;  %v999_v14 = vrot.slane %v32_v11, 7 }
  0x10   :  { %10421 = vmatprep.subr.mxu0 %v83_v23  ;;  %10597 = vmatprep.subr.mxu1 %v83_v23  ;;  %v10840_v13 = vsel %vm1049_vm1, %v996_v7, %v997_v3  ;;  %v1382_v18 = vrot.slane %v30_v63, 1  ;;  %v1383_v21 = vrot.slane %v31_v5, 1  ;;  %v1384_v28 = vrot.slane %v32_v11, 1 }
  0x11   :  { %10422 = vmatpush3.msra.mxu0 %v83_v23  ;;  %10603 = vmatpush3.msra.mxu1 %v83_v23  ;;  %v1487_v16 = vsel %vm1434_vm0, %v1380_v61, %v1381_v8  ;;  %v10852_v17 = vsel %vm1049_vm1, %v998_v9, %v999_v14  ;;  %v1000_v23 = vrot.slane %v33_v19, 7  ;;  %v1385_v33 = vrot.slane %v33_v19, 1  ;;  %v10930_v61 = vld [vmem:[%s14732_s0 + $0xa0] sm:$0xff] }
  0x12   :  { %1763 = vrot.lane.b32.xlu0 %v10680_v12, %s10610_s21  ;;  %2017 = vrot.lane.b32.xlu1 %v1494_v20, %s10611_s24  ;;  %v10836_v12 = vsel %vm1049_vm1, %v995_v58, %v996_v7  ;;  %v34_v20 = vld [vmem:[%s14732_s0 + $0x80] sm:$0xff]  ;;  %v1484_v35 = vsel %vm1434_vm0, %v1383_v21, %v1384_v28  ;;  %v1003_v41 = vrot.slane %v36_v36, 7  ;;  %v1387_v47 = vrot.slane %v35_v32, 1 }
  0x13   :  { %10423 = vmatprep.subr.mxu0 %v82_v27  ;;  %10598 = vmatprep.subr.mxu1 %v82_v27  ;;  %v10866_v25 = vsel %vm1049_vm1, %v999_v14, %v1000_v23  ;;  %v1386_v38 = vrot.slane %v34_v20, 1  ;;  %v1483_v43 = vsel %vm1434_vm0, %v1384_v28, %v1385_v33  ;;  %v1004_v51 = vrot.slane %v10908_v46, 7 }
  0x14   :  { %10424 = vmatpush3.msra.mxu0 %v82_v27  ;;  %10604 = vmatpush3.msra.mxu1 %v82_v27  ;;  %v1388_v58 = vrot.slane %v36_v36, 1  ;;  %v1389_v59 = vrot.slane %v10908_v46, 1  ;;  %v10965_v14 = vadd.s32 184, %v10658_v6 }
  0x15   :  { %v1482_v45 = vsel %vm1434_vm0, %v1385_v33, %v1386_v38 }
  0x16   :  { %2019 = vrot.lane.b32.xlu0 %v1493_v24, %s10611_s24  ;;  %1765 = vrot.lane.b32.xlu1 %v10691_v15, %s10610_s21  ;;  %v10844_v15 = vsel %vm1049_vm1, %v997_v3, %v998_v9  ;;  %v1486_v24 = vsel %vm1434_vm0, %v1381_v8, %v1382_v18  ;;  %v10940_v3 = vld [vmem:[%s14732_s0 + $0xa8] sm:$0xff]  ;;  %v10951_v8 = vld [vmem:[%s14732_s0 + $0xb0] sm:$0xff]  ;;  %14844 = vst [vmem:[#allocation4_spill] sm:$0xff] %v10965_v14 }
  0x1a   :  { %1767 = vrot.lane.b32.xlu0 %v10714_v22, %s10610_s21  ;;  %2021 = vrot.lane.b32.xlu1 %v1492_v34, %s10611_s24  ;;  %v1001_v22 = vrot.slane %v34_v20, 7  ;;  %v1002_v34 = vrot.slane %v35_v32, 7 }
  0x1c   :  { %v10874_v27 = vsel %vm1049_vm1, %v1000_v23, %v1001_v22  ;;  %v10892_v42 = vsel %vm1049_vm1, %v1001_v22, %v1002_v34  ;;  %v10988_v23 = vld [vmem:[%s14732_s0 + $0xc8] sm:$0xff] }
  0x1e   :  { %2023 = vrot.lane.b32.xlu0 %v1491_v40, %s10611_s24  ;;  %1769 = vrot.lane.b32.xlu1 %v25_v26, %s10610_s21  ;;  %v1485_v26 = vsel %vm1434_vm0, %v1382_v18, %v1383_v21  ;;  %v318_v21 = vand.u32 63, %v10965_v14 }
  0x20   :  { %vm1329_vm4 = vcmp.eq.s32.totalorder %v318_v21, 63 }
  0x22   :  { %1771 = vrot.lane.b32.xlu0 %v26_v30, %s10610_s21  ;;  %2025 = vrot.lane.b32.xlu1 %v1634_v54, %s10611_s24  ;;  %v10877_v30 = vadd.s32 120, %v10658_v6  ;;  %v10916_v54 = vsel %vm1049_vm1, %v1003_v41, %v1004_v51 }
  0x24   :  { %14843 = vst [vmem:[#allocation3_spill] sm:$0xff] %v10877_v30  ;;  %v262_v40 = vand.u32 63, %v10877_v30 }
  0x26   :  { %2027 = vrot.lane.b32.xlu0 %v1489_v60, %s10611_s24  ;;  %1773 = vrot.lane.b32.xlu1 %v27_v44, %s10610_s21  ;;  %v10900_v44 = vsel %vm1049_vm1, %v1002_v34, %v1003_v41  ;;  %vm1321_vm3 = vcmp.eq.s32.totalorder %v262_v40, 63  ;;  %v1480_v60 = vsel %vm1434_vm0, %v1387_v47, %v1388_v58  ;;  %v11021_v40 = vld [vmem:[%s14732_s0 + $0xe0] sm:$0xff]  ;;  %v11028_v41 = vld [vmem:[%s14732_s0 + $0x1f8] sm:$0xff] }
  0x27   :  { %v1642_v53 = vsel %vm1321_vm3, 0.0, %v1482_v45  ;;  %v1398_v45 = vrot.slane %v11021_v40, 1 }
  0x2a   :  { %1775 = vrot.lane.b32.xlu0 %v28_v55, %s10610_s21  ;;  %2029 = vrot.lane.b32.xlu1 %v1488_v10, %s10611_s24  ;;  %v1481_v55 = vsel %vm1434_vm0, %v1386_v38, %v1387_v47  ;;  %v1392_v10 = vrot.slane %v10951_v8, 1  ;;  %v11037_v47 = vld [vmem:[%s14732_s0 + $0xe8] sm:$0xff] }
  0x2e   :  { %2031 = vrot.lane.b32.xlu0 %v1487_v16, %s10611_s24  ;;  %1777 = vrot.lane.b32.xlu1 %v29_v62, %s10610_s21  ;;  %v1479_v62 = vsel %vm1434_vm0, %v1388_v58, %v1389_v59  ;;  %v10971_v16 = vld [vmem:[%s14732_s0 + $0xc0] sm:$0xff]  ;;  %v1399_v58 = vrot.slane %v11037_v47, 1 }
  0x32   :  { %1779 = vrot.lane.b32.xlu0 %v30_v63, %s10610_s21  ;;  %2033 = vrot.lane.b32.xlu1 %v1486_v24, %s10611_s24  ;;  %v1390_v63 = vrot.slane %v10930_v61, 1 }
  0x34   :  { %v1478_v7 = vsel %vm1434_vm0, %v1389_v59, %v1390_v63 }
  0x36   :  { %2035 = vrot.lane.b32.xlu0 %v1485_v26, %s10611_s24  ;;  %1781 = vrot.lane.b32.xlu1 %v31_v5, %s10610_s21  ;;  %v1391_v5 = vrot.slane %v10940_v3, 1  ;;  %v1395_v26 = vrot.slane %v10988_v23, 1 }
  0x38   :  { %v1477_v9 = vsel %vm1434_vm0, %v1390_v63, %v1391_v5  ;;  %v1469_v63 = vsel %vm1434_vm0, %v1398_v45, %v1399_v58 }
  0x3a   :  { %1783 = vrot.lane.b32.xlu0 %v32_v11, %s10610_s21  ;;  %2037 = vrot.lane.b32.xlu1 %v1484_v35, %s10611_s24  ;;  %v10962_v11 = vld [vmem:[%s14732_s0 + $0xb8] sm:$0xff] }
  0x3b   :  { %v1393_v18 = vrot.slane %v10962_v11, 1  ;;  %v11010_v35 = vld [vmem:[%s14732_s0 + $0xd8] sm:$0xff] }
  0x3d   :  { %v1475_v22 = vsel %vm1434_vm0, %v1392_v10, %v1393_v18 }
  0x3e   :  { %2039 = vrot.lane.b32.xlu0 %v1483_v43, %s10611_s24  ;;  %1785 = vrot.lane.b32.xlu1 %v33_v19, %s10610_s21  ;;  %v1476_v19 = vsel %vm1434_vm0, %v1391_v5, %v1392_v10  ;;  %v11070_v10 = vadd.s32 248, %v10658_v6 }
  0x40   :  { %14845 = vst [vmem:[#allocation5_spill] sm:$0xff] %v11070_v10 }
  0x42   :  { %1787 = vrot.lane.b32.xlu0 %v34_v20, %s10610_s21  ;;  %2041 = vrot.lane.b32.xlu1 %v1642_v53, %s10611_s24  ;;  %v1394_v20 = vrot.slane %v10971_v16, 1  ;;  %v157_v53 = vand.u32 63, %v10658_v6 }
  0x44   :  { %v1474_v24 = vsel %vm1434_vm0, %v1393_v18, %v1394_v20  ;;  %v1473_v33 = vsel %vm1434_vm0, %v1394_v20, %v1395_v26  ;;  %vm921_vm5 = vcmp.eq.s32.totalorder %v157_v53, 0  ;;  %v11076_v18 = vld [vmem:[%s14732_s0 + $0x100] sm:$0xff] }
  0x45   :  { %v1650_v28 = vsel %vm1329_vm4, 0.0, %v1474_v24 }
  0x46   :  { %2043 = vrot.lane.b32.xlu0 %v1481_v55, %s10611_s24  ;;  %1789 = vrot.lane.b32.xlu1 %v35_v32, %s10610_s21  ;;  %v10999_v32 = vld [vmem:[%s14732_s0 + $0xd0] sm:$0xff]  ;;  %v1048_v55 = vrot.slane %v11028_v41, 7 }
  0x47   :  { %v1396_v34 = vrot.slane %v10999_v32, 1 }
  0x49   :  { %v1472_v38 = vsel %vm1434_vm0, %v1395_v26, %v1396_v34  ;;  %v1402_v26 = vrot.slane %v11076_v18, 1 }
  0x4a   :  { %1791 = vrot.lane.b32.xlu0 %v36_v36, %s10610_s21  ;;  %2045 = vrot.lane.b32.xlu1 %v1480_v60, %s10611_s24  ;;  %v1397_v36 = vrot.slane %v11010_v35, 1  ;;  %v1113_v60 = vsel %vm1049_vm1, %v1048_v55, %v985_v31  ;;  %v11067_v31 = vld [vmem:[%s14732_s0 + $0xf8] sm:$0xff] }
  0x4b   :  { %v1401_v20 = vrot.slane %v11067_v31, 1 }
  0x4c   :  { %v1471_v43 = vsel %vm1434_vm0, %v1396_v34, %v1397_v36  ;;  %v1470_v59 = vsel %vm1434_vm0, %v1397_v36, %v1398_v45 }
  0x4d   :  { %v1466_v53 = vsel %vm1434_vm0, %v1401_v20, %v1402_v26 }
  0x4e   :  { %2047 = vrot.lane.b32.xlu0 %v1479_v62, %s10611_s24  ;;  %1793 = vrot.lane.b32.xlu1 %v10908_v46, %s10610_s21  ;;  %v11056_v62 = vld [vmem:[%s14732_s0 + $0xf0] sm:$0xff] }
  0x52   :  { %1795 = vrot.lane.b32.xlu0 %v10930_v61, %s10610_s21  ;;  %2049 = vrot.lane.b32.xlu1 %v1478_v7, %s10611_s24  ;;  %v1242_v7 = vsel %vm921_vm5, 0.0, %v1113_v60 }
  0x56   :  { %2051 = vrot.lane.b32.xlu0 %v1477_v9, %s10611_s24  ;;  %1797 = vrot.lane.b32.xlu1 %v10940_v3, %s10610_s21  ;;  %v1400_v9 = vrot.slane %v11056_v62, 1 }
  0x58   :  { %v1467_v36 = vsel %vm1434_vm0, %v1400_v9, %v1401_v20 }
  0x5a   :  { %1799 = vrot.lane.b32.xlu0 %v10951_v8, %s10610_s21  ;;  %2053 = vrot.lane.b32.xlu1 %v1476_v19, %s10611_s24 }
  0x5e   :  { %2055 = vrot.lane.b32.xlu0 %v1475_v22, %s10611_s24  ;;  %1801 = vrot.lane.b32.xlu1 %v10962_v11, %s10610_s21  ;;  %v1468_v22 = vsel %vm1434_vm0, %v1399_v58, %v1400_v9 }
  0x62   :  { %1803 = vrot.lane.b32.xlu0 %v10971_v16, %s10610_s21  ;;  %2057 = vrot.lane.b32.xlu1 %v1650_v28, %s10611_s24  ;;  %v374_v28 = vand.u32 63, %v11070_v10 }
  0x64   :  { %vm1337_vm9 = vcmp.eq.s32.totalorder %v374_v28, 63 }
  0x66   :  { %2059 = vrot.lane.b32.xlu0 %v1473_v33, %s10611_s24  ;;  %1805 = vrot.lane.b32.xlu1 %v10988_v23, %s10610_s21 }
  0x6a   :  { %1807 = vrot.lane.b32.xlu0 %v10999_v32, %s10610_s21  ;;  %2061 = vrot.lane.b32.xlu1 %v1472_v38, %s10611_s24 }
  0x6e   :  { %2063 = vrot.lane.b32.xlu0 %v1471_v43, %s10611_s24  ;;  %1809 = vrot.lane.b32.xlu1 %v11010_v35, %s10610_s21  ;;  %v11098_v43 = vld [vmem:[%s14732_s0 + $0x108] sm:$0xff] }
  0x72   :  { %1811 = vrot.lane.b32.xlu0 %v11021_v40, %s10610_s21  ;;  %2065 = vrot.lane.b32.xlu1 %v1470_v59, %s10611_s24  ;;  %v1403_v59 = vrot.slane %v11098_v43, 1 }
  0x74   :  { %v1756_v5 = vpop.permute.xlu0 %1755  ;;  %v1465_v9 = vsel %vm1434_vm0, %v1402_v26, %v1403_v59 }
  0x75   :  { %v2204_v19 = vsel %vm2203_vm6, %v1242_v7, %v1756_v5 }
  0x76   :  { %2067 = vrot.lane.b32.xlu0 %v1469_v63, %s10611_s24  ;;  %1813 = vrot.lane.b32.xlu1 %v11037_v47, %s10610_s21  ;;  %v1658_v63 = vsel %vm1337_vm9, 0.0, %v1466_v53  ;;  %vm4519_vm9 = vcmask 254976  }
  0x78   :  { %v1758_v21 = vpop.permute.xlu0 %1757  ;;  %v2012_v24 = vpop.permute.xlu1 %2011 }
  0x79   :  { %v2269_v33 = vsel %vm2268_vm7, %v2204_v19, %v2012_v24  ;;  %v2205_v34 = vsel %vm2203_vm6, %v10751_v37, %v1758_v21  ;;  %v11126_v21 = vld [vmem:[%s14732_s0 + $0x118] sm:$0xff] }
  0x7a   :  { %1815 = vrot.lane.b32.xlu0 %v11056_v62, %s10610_s21  ;;  %2069 = vrot.lane.b32.xlu1 %v1468_v22, %s10611_s24  ;;  %v1405_v26 = vrot.slane %v11126_v21, 1 }
  0x7b   :  { %10425 = vmatprep.mubr.msk.f32.mxu0 %vm2333_vm8, %v2269_v33 }
  0x7c   :  { %v1760_v38 = vpop.permute.xlu0 %1759  ;;  %v2014_v45 = vpop.permute.xlu1 %2013 }
  0x7d   :  { %v2206_v37 = vsel %vm2203_vm6, %v10758_v39, %v1760_v38  ;;  %v2270_v58 = vsel %vm2268_vm7, %v2205_v34, %v2014_v45  ;;  %v11114_v39 = vld [vmem:[%s14732_s0 + $0x110] sm:$0xff]  ;;  %v11147_v45 = vld [vmem:[%s14732_s0 + $0x120] sm:$0xff] }
  0x7e   :  { %2071 = vrot.lane.b32.xlu0 %v1467_v36, %s10611_s24  ;;  %1817 = vrot.lane.b32.xlu1 %v11067_v31, %s10610_s21  ;;  %v1404_v20 = vrot.slane %v11114_v39, 1  ;;  %v1021_v1 = vrot.slane %v11147_v45, 7 }
  0x7f   :  { %10426 = vmatmul.mubr.msk.f32.vlgmr.msra.gmra.mxu0 %vm2333_vm8, %v2270_v58  ;;  %v1406_v58 = vrot.slane %v11147_v45, 1 }
  0x80   :  { %v2016_v60 = vpop.permute.xlu0 %2015  ;;  %v1762_v7 = vpop.permute.xlu1 %1761  ;;  %v1464_v36 = vsel %vm1434_vm0, %v1403_v59, %v1404_v20  ;;  %v1463_v53 = vsel %vm1434_vm0, %v1404_v20, %v1405_v26 }
  0x81   :  { %v2271_v5 = vsel %vm2268_vm7, %v2206_v37, %v2016_v60  ;;  %v2207_v22 = vsel %vm2203_vm6, %v10777_v48, %v1762_v7  ;;  %v11141_v48 = vadd.s32 64, %v10658_v6  ;;  %v11160_v60 = vld [vmem:[%s14732_s0 + $0x128] sm:$0xff] }
  0x82   :  { %1819 = vrot.lane.b32.xlu0 %v11076_v18, %s10610_s21  ;;  %10428 = vmatprep.mubr.msk.f32.mxu0 %vm2333_vm8, %v2271_v5 }
  0x83   :  { %2073 = vrot.lane.b32.xlu1 %v1658_v63, %s10611_s24  ;;  %14846 = vst [vmem:[#allocation6_spill] sm:$0xff] %v11141_v48  ;;  %v213_v59 = vand.u32 63, %v11141_v48 }
  0x84   :  { %v1764_v19 = vpop.permute.xlu0 %1763  ;;  %v2018_v24 = vpop.permute.xlu1 %2017 }
  0x85   :  { %v2208_v28 = vsel %vm2203_vm6, %v10781_v49, %v1764_v19  ;;  %v2272_v33 = vsel %vm2268_vm7, %v2207_v22, %v2018_v24  ;;  %v1407_v19 = vrot.slane %v11160_v60, 1  ;;  %v1462_v22 = vsel %vm1434_vm0, %v1405_v26, %v1406_v58 }
  0x86   :  { %2075 = vrot.lane.b32.xlu0 %v1465_v9, %s10611_s24  ;;  %10429 = vmatmul.mubr.msk.f32.gmra.mxu0 %vm2333_vm8, %v2272_v33  ;;  %vm929_vm10 = vcmp.eq.s32.totalorder %v213_v59, 0 }
  0x87   :  { %1821 = vrot.lane.b32.xlu1 %v11098_v43, %s10610_s21  ;;  %v1461_v33 = vsel %vm1434_vm0, %v1406_v58, %v1407_v19  ;;  %v128_v58 = vadd.s32 312, %v10658_v6 }
  0x88   :  { %v2020_v34 = vpop.permute.xlu0 %2019  ;;  %v1766_v38 = vpop.permute.xlu1 %1765 }
  0x89   :  { %v2273_v49 = vsel %vm2268_vm7, %v2208_v28, %v2020_v34  ;;  %v2209_v63 = vsel %vm2203_vm6, %v10786_v50, %v1766_v38  ;;  %v1250_v28 = vsel %vm929_vm10, 0.0, %v10804_v57 }
  0x8a   :  { %1823 = vrot.lane.b32.xlu0 %v11114_v39, %s10610_s21  ;;  %10431 = vmatprep.mubr.msk.f32.mxu0 %vm2333_vm8, %v2273_v49 }
  0x8b   :  { %2077 = vrot.lane.b32.xlu1 %v1464_v36, %s10611_s24 }
  0x8c   :  { %v1768_v37 = vpop.permute.xlu0 %1767  ;;  %v2022_v5 = vpop.permute.xlu1 %2021 }
  0x8d   :  { %v2210_v7 = vsel %vm2203_vm6, %v10791_v52, %v1768_v37  ;;  %v2274_v9 = vsel %vm2268_vm7, %v2209_v63, %v2022_v5  ;;  %v11178_v52 = vld [vmem:[%s14732_s0 + $0x130] sm:$0xff]  ;;  %v11208_v5 = vld [vmem:[%s14732_s0 + $0x140] sm:$0xff] }
  0x8e   :  { %2079 = vrot.lane.b32.xlu0 %v1463_v53, %s10611_s24  ;;  %10432 = vmatmul.mubr.msk.f32.gmra.mxu0 %vm2333_vm8, %v2274_v9  ;;  %v1408_v34 = vrot.slane %v11178_v52, 1 }
  0x8f   :  { %1825 = vrot.lane.b32.xlu1 %v11126_v21, %s10610_s21 }
  0x90   :  { %v2024_v20 = vpop.permute.xlu0 %2023  ;;  %v1770_v24 = vpop.permute.xlu1 %1769  ;;  %v1460_v37 = vsel %vm1434_vm0, %v1407_v19, %v1408_v34  ;;  %v11218_v19 = vld [vmem:[%s14732_s0 + $0x180] sm:$0xff] }
  0x91   :  { %v2275_v50 = vsel %vm2268_vm7, %v2210_v7, %v2024_v20  ;;  %v2211_v36 = vsel %vm2203_vm6, %v10800_v56, %v1770_v24  ;;  %v11201_v56 = vld [vmem:[%s14732_s0 + $0x138] sm:$0xff]  ;;  %v430_v20 = vand.u32 63, %v128_v58  ;;  %v11250_v58 = vld [vmem:[%s14732_s0 + $0x190] sm:$0xff] }
  0x92   :  { %1827 = vrot.lane.b32.xlu0 %v11147_v45, %s10610_s21  ;;  %10434 = vmatprep.mubr.msk.f32.mxu0 %vm2333_vm8, %v2275_v50  ;;  %v1409_v7 = vrot.slane %v11201_v56, 1 }
  0x93   :  { %2081 = vrot.lane.b32.xlu1 %v1462_v22, %s10611_s24  ;;  %v1410_v22 = vrot.slane %v11208_v5, 1  ;;  %vm11240_vm11 = vcmp.eq.s32.totalorder %v430_v20, 63 }
  0x94   :  { %v1772_v26 = vpop.permute.xlu0 %1771  ;;  %v2026_v49 = vpop.permute.xlu1 %2025 }
  0x95   :  { %v2212_v38 = vsel %vm2203_vm6, %v1250_v28, %v1772_v26  ;;  %v2276_v53 = vsel %vm2268_vm7, %v2211_v36, %v2026_v49  ;;  %v11226_v28 = vld [vmem:[%s14732_s0 + $0x188] sm:$0xff]  ;;  %v1418_v36 = vrot.slane %v11218_v19, 1 }
  0x96   :  { %2083 = vrot.lane.b32.xlu0 %v1461_v33, %s10611_s24  ;;  %10435 = vmatmul.mubr.msk.f32.gmra.mxu0 %vm2333_vm8, %v2276_v53  ;;  %v1458_v53 = vsel %vm1434_vm0, %v1409_v7, %v1410_v22 }
  0x97   :  { %1829 = vrot.lane.b32.xlu1 %v11160_v60, %s10610_s21 }
  0x98   :  { %v2028_v57 = vpop.permute.xlu0 %2027  ;;  %v1774_v63 = vpop.permute.xlu1 %1773 }
  0x99   :  { %v2277_v59 = vsel %vm2268_vm7, %v2212_v38, %v2028_v57  ;;  %v2213_v50 = vsel %vm2203_vm6, %v10818_v0, %v1774_v63  ;;  %v1459_v0 = vsel %vm1434_vm0, %v1408_v34, %v1409_v7  ;;  %v1419_v38 = vrot.slane %v11226_v28, 1 }
  0x9a   :  { %1831 = vrot.lane.b32.xlu0 %v11178_v52, %s10610_s21  ;;  %10437 = vmatprep.mubr.msk.f32.mxu0 %vm2333_vm8, %v2277_v59  ;;  %v1666_v34 = vsel %vm11240_vm11, 0.0, %v1458_v53  ;;  %v1420_v7 = vrot.slane %v11250_v58, 1  ;;  %vm6996_vm11 = vcmask 1041409  }
  0x9b   :  { %2085 = vrot.lane.b32.xlu1 %v1460_v37, %s10611_s24  ;;  %v1449_v63 = vsel %vm1434_vm0, %v1418_v36, %v1419_v38 }
  0x9c   :  { %v1776_v9 = vpop.permute.xlu0 %1775  ;;  %v2030_v24 = vpop.permute.xlu1 %2029 }
  0x9d   :  { %v2214_v33 = vsel %vm2203_vm6, %v10822_v2, %v1776_v9  ;;  %v2278_v26 = vsel %vm2268_vm7, %v2213_v50, %v2030_v24 }
  0x9e   :  { %1833 = vrot.lane.b32.xlu0 %v11201_v56, %s10610_s21  ;;  %10438 = vmatmul.mubr.msk.f32.gmra.mxu0 %vm2333_vm8, %v2278_v26  ;;  %v1448_v26 = vsel %vm1434_vm0, %v1419_v38, %v1420_v7 }
  0x9f   :  { %1851 = vrot.lane.b32.xlu1 %v11218_v19, %s10610_s21 }
  0xa0   :  { %v2032_v49 = vpop.permute.xlu0 %2031  ;;  %v1778_v37 = vpop.permute.xlu1 %1777 }
  0xa1   :  { %v2279_v57 = vsel %vm2268_vm7, %v2214_v33, %v2032_v49  ;;  %v2215_v9 = vsel %vm2203_vm6, %v10836_v12, %v1778_v37  ;;  %v11276_v12 = vld [vmem:[%s14732_s0 + $0x148] sm:$0xff] }
  0xa2   :  { %2087 = vrot.lane.b32.xlu0 %v1459_v0, %s10611_s24  ;;  %10440 = vmatprep.mubr.msk.f32.mxu0 %vm2333_vm8, %v2279_v57  ;;  %v11279_v0 = vadd.s32 128, %v10658_v6  ;;  %v1411_v38 = vrot.slane %v11276_v12, 1  ;;  %v11291_v57 = vld [vmem:[%s14732_s0 + $0x150] sm:$0xff] }
  0xa3   :  { %1853 = vrot.lane.b32.xlu1 %v11226_v28, %s10610_s21 }
  0xa4   :  { %v1780_v59 = vpop.permute.xlu0 %1779  ;;  %v2034_v20 = vpop.permute.xlu1 %2033  ;;  %14849 = vst [vmem:[#allocation7_spill] sm:$0xff] %v11279_v0  ;;  %v269_v53 = vand.u32 63, %v11279_v0 }
  0xa5   :  { %v2216_v50 = vsel %vm2203_vm6, %v10840_v13, %v1780_v59  ;;  %v2280_v24 = vsel %vm2268_vm7, %v2215_v9, %v2034_v20  ;;  %v11298_v59 = vld [vmem:[%s14732_s0 + $0x198] sm:$0xff]  ;;  %v1412_v20 = vrot.slane %v11291_v57, 1 }
  0xa6   :  { %2089 = vrot.lane.b32.xlu0 %v1666_v34, %s10611_s24  ;;  %10441 = vmatmul.mubr.msk.f32.gmra.mxu0 %vm2333_vm8, %v2280_v24  ;;  %v1421_v24 = vrot.slane %v11298_v59, 1  ;;  %vm937_vm12 = vcmp.eq.s32.totalorder %v269_v53, 0 }
  0xa7   :  { %2107 = vrot.lane.b32.xlu1 %v1449_v63, %s10611_s24 }
  0xa8   :  { %v2036_v33 = vpop.permute.xlu0 %2035  ;;  %v1782_v49 = vpop.permute.xlu1 %1781 }
  0xa9   :  { %v2281_v13 = vsel %vm2268_vm7, %v2216_v50, %v2036_v33  ;;  %v2217_v37 = vsel %vm2203_vm6, %v10844_v15, %v1782_v49  ;;  %v1457_v15 = vsel %vm1434_vm0, %v1410_v22, %v1411_v38  ;;  %v1258_v22 = vsel %vm937_vm12, 0.0, %v10874_v27 }
  0xaa   :  { %1835 = vrot.lane.b32.xlu0 %v11208_v5, %s10610_s21  ;;  %10443 = vmatprep.mubr.msk.f32.mxu0 %vm2333_vm8, %v2281_v13  ;;  %v1456_v13 = vsel %vm1434_vm0, %v1411_v38, %v1412_v20  ;;  %v11340_v38 = vld [vmem:[%s14732_s0 + $0x158] sm:$0xff]  ;;  %vm6998_vm12 = vcmask 1042434  }
  0xab   :  { %2109 = vrot.lane.b32.xlu1 %v1448_v26, %s10611_s24  ;;  %v11316_v26 = vld [vmem:[%s14732_s0 + $0x1a0] sm:$0xff] }
  0xac   :  { %v1784_v2 = vpop.permute.xlu0 %1783  ;;  %v2038_v34 = vpop.permute.xlu1 %2037  ;;  %v1422_v53 = vrot.slane %v11316_v26, 1 }
  0xad   :  { %v2218_v63 = vsel %vm2203_vm6, %v10852_v17, %v1784_v2  ;;  %v2282_v9 = vsel %vm2268_vm7, %v2217_v37, %v2038_v34  ;;  %v1447_v2 = vsel %vm1434_vm0, %v1420_v7, %v1421_v24 }
  0xae   :  { %1837 = vrot.lane.b32.xlu0 %v11276_v12, %s10610_s21  ;;  %10444 = vmatmul.mubr.msk.f32.gmra.mxu0 %vm2333_vm8, %v2282_v9  ;;  %v1446_v7 = vsel %vm1434_vm0, %v1421_v24, %v1422_v53  ;;  %v11351_v24 = vld [vmem:[%s14732_s0 + $0x160] sm:$0xff] }
  0xaf   :  { %1855 = vrot.lane.b32.xlu1 %v11250_v58, %s10610_s21 }
  0xb0   :  { %v2040_v50 = vpop.permute.xlu0 %2039  ;;  %v1786_v33 = vpop.permute.xlu1 %1785 }
  0xb1   :  { %v2283_v17 = vsel %vm2268_vm7, %v2218_v63, %v2040_v50  ;;  %v2219_v37 = vsel %vm2203_vm6, %v10866_v25, %v1786_v33  ;;  %v1413_v50 = vrot.slane %v11340_v38, 1 }
  0xb2   :  { %2091 = vrot.lane.b32.xlu0 %v1457_v15, %s10611_s24  ;;  %10446 = vmatprep.mubr.msk.f32.mxu0 %vm2333_vm8, %v2283_v17 }
  0xb3   :  { %1857 = vrot.lane.b32.xlu1 %v11298_v59, %s10610_s21 }
  0xb4   :  { %v1788_v49 = vpop.permute.xlu0 %1787  ;;  %v2042_v34 = vpop.permute.xlu1 %2041 }
  0xb5   :  { %v2220_v63 = vsel %vm2203_vm6, %v1258_v22, %v1788_v49  ;;  %v2284_v9 = vsel %vm2268_vm7, %v2219_v37, %v2042_v34  ;;  %v1414_v37 = vrot.slane %v11351_v24, 1 }
  0xb6   :  { %2093 = vrot.lane.b32.xlu0 %v1456_v13, %s10611_s24  ;;  %10447 = vmatmul.mubr.msk.f32.gmra.mxu0 %vm2333_vm8, %v2284_v9  ;;  %v11358_v13 = vld [vmem:[%s14732_s0 + $0x1a8] sm:$0xff] }
  0xb7   :  { %2111 = vrot.lane.b32.xlu1 %v1447_v2, %s10611_s24 }
  0xb8   :  { %v2044_v27 = vpop.permute.xlu0 %2043  ;;  %v1790_v15 = vpop.permute.xlu1 %1789 }
  0xb9   :  { %v2285_v25 = vsel %vm2268_vm7, %v2220_v63, %v2044_v27  ;;  %v2221_v33 = vsel %vm2203_vm6, %v10892_v42, %v1790_v15  ;;  %v1455_v42 = vsel %vm1434_vm0, %v1412_v20, %v1413_v50  ;;  %v1423_v63 = vrot.slane %v11358_v13, 1 }
  0xba   :  { %1839 = vrot.lane.b32.xlu0 %v11291_v57, %s10610_s21  ;;  %10449 = vmatprep.mubr.msk.f32.mxu0 %vm2333_vm8, %v2285_v25  ;;  %v1454_v20 = vsel %vm1434_vm0, %v1413_v50, %v1414_v37 }
  0xbb   :  { %2113 = vrot.lane.b32.xlu1 %v1446_v7, %s10611_s24  ;;  %v11377_v7 = vld [vmem:[%s14732_s0 + $0x1b0] sm:$0xff]  ;;  %v1445_v15 = vsel %vm1434_vm0, %v1422_v53, %v1423_v63 }
  0xbc   :  { %v1792_v17 = vpop.permute.xlu0 %1791  ;;  %v2046_v22 = vpop.permute.xlu1 %2045 }
  0xbd   :  { %v2222_v49 = vsel %vm2203_vm6, %v10900_v44, %v1792_v17  ;;  %v2286_v2 = vsel %vm2268_vm7, %v2221_v33, %v2046_v22  ;;  %v1005_v44 = vrot.slane %v10930_v61, 7  ;;  %v1424_v17 = vrot.slane %v11377_v7, 1 }
  0xbe   :  { %1841 = vrot.lane.b32.xlu0 %v11340_v38, %s10610_s21  ;;  %10450 = vmatmul.mubr.msk.f32.gmra.mxu0 %vm2333_vm8, %v2286_v2  ;;  %v11408_v2 = vadd.s32 192, %v10658_v6 }
  0xbf   :  { %1859 = vrot.lane.b32.xlu1 %v11316_v26, %s10610_s21  ;;  %v1093_v61 = vsel %vm1049_vm1, %v1004_v51, %v1005_v44  ;;  %v1006_v51 = vrot.slane %v10940_v3, 7  ;;  %v1444_v53 = vsel %vm1434_vm0, %v1423_v63, %v1424_v17 }
  0xc0   :  { %v2048_v34 = vpop.permute.xlu0 %2047  ;;  %v1794_v27 = vpop.permute.xlu1 %1793  ;;  %14850 = vst [vmem:[#allocation8_spill] sm:$0xff] %v11408_v2 }
  0xc1   :  { %v2287_v9 = vsel %vm2268_vm7, %v2222_v49, %v2048_v34  ;;  %v2223_v33 = vsel %vm2203_vm6, %v10916_v54, %v1794_v27  ;;  %v11405_v54 = vld [vmem:[%s14732_s0 + $0x168] sm:$0xff] }
  0xc2   :  { %2095 = vrot.lane.b32.xlu0 %v1455_v42, %s10611_s24  ;;  %10452 = vmatprep.mubr.msk.f32.mxu0 %vm2333_vm8, %v2287_v9  ;;  %v1007_v42 = vrot.slane %v10951_v8, 7  ;;  %v1092_v9 = vsel %vm1049_vm1, %v1005_v44, %v1006_v51  ;;  %v1415_v27 = vrot.slane %v11405_v54, 1  ;;  %v1009_v8 = vrot.slane %v10971_v16, 7  ;;  %v11426_v44 = vld [vmem:[%s14732_s0 + $0x170] sm:$0xff] }
  0xc3   :  { %1861 = vrot.lane.b32.xlu1 %v11358_v13, %s10610_s21 }
  0xc4   :  { %v1796_v25 = vpop.permute.xlu0 %1795  ;;  %v2050_v22 = vpop.permute.xlu1 %2049  ;;  %v1091_v63 = vsel %vm1049_vm1, %v1006_v51, %v1007_v42  ;;  %v11443_v51 = vld [vmem:[%s14732_s0 + $0x1c0] sm:$0xff] }
  0xc5   :  { %v2224_v49 = vsel %vm2203_vm6, %v1093_v61, %v1796_v25  ;;  %v2288_v46 = vsel %vm2268_vm7, %v2223_v33, %v2050_v22  ;;  %v11432_v33 = vld [vmem:[%s14732_s0 + $0x1b8] sm:$0xff]  ;;  %v144_v22 = vadd.s32 440, %v10658_v6 }
  0xc6   :  { %2097 = vrot.lane.b32.xlu0 %v1454_v20, %s10611_s24  ;;  %10453 = vmatmul.mubr.msk.f32.gmra.mxu0 %vm2333_vm8, %v2288_v46  ;;  %v325_v20 = vand.u32 63, %v11408_v2  ;;  %v1008_v46 = vrot.slane %v10962_v11, 7 }
  0xc7   :  { %2115 = vrot.lane.b32.xlu1 %v1445_v15, %s10611_s24 }
  0xc8   :  { %v2052_v50 = vpop.permute.xlu0 %2051  ;;  %v1798_v34 = vpop.permute.xlu1 %1797  ;;  %vm11452_vm13 = vcmp.eq.s32.totalorder %v325_v20, 0 }
  0xc9   :  { %v2289_v3 = vsel %vm2268_vm7, %v2224_v49, %v2052_v50  ;;  %v2225_v25 = vsel %vm2203_vm6, %v1092_v9, %v1798_v34  ;;  %v1453_v50 = vsel %vm1434_vm0, %v1414_v37, %v1415_v27  ;;  %v1425_v34 = vrot.slane %v11432_v33, 1 }
  0xca   :  { %1843 = vrot.lane.b32.xlu0 %v11351_v24, %s10610_s21  ;;  %10455 = vmatprep.mubr.msk.f32.mxu0 %vm2333_vm8, %v2289_v3  ;;  %v1089_v9 = vsel %vm1049_vm1, %v1008_v46, %v1009_v8  ;;  %v1090_v37 = vsel %vm1049_vm1, %v1007_v42, %v1008_v46 }
  0xcb   :  { %2117 = vrot.lane.b32.xlu1 %v1444_v53, %s10611_s24  ;;  %v1416_v53 = vrot.slane %v11426_v44, 1  ;;  %v1266_v20 = vsel %vm11452_vm13, 0.0, %v1089_v9  ;;  %vm7000_vm13 = vcmask 1043459  }
  0xcc   :  { %v1800_v61 = vpop.permute.xlu0 %1799  ;;  %v2054_v15 = vpop.permute.xlu1 %2053 }
  0xcd   :  { %v2226_v16 = vsel %vm2203_vm6, %v1091_v63, %v1800_v61  ;;  %v2290_v49 = vsel %vm2268_vm7, %v2225_v25, %v2054_v15  ;;  %v542_v25 = vand.u32 63, %v144_v22  ;;  %v1426_v15 = vrot.slane %v11443_v51, 1 }
  0xce   :  { %1845 = vrot.lane.b32.xlu0 %v11405_v54, %s10610_s21  ;;  %10456 = vmatmul.mubr.msk.f32.gmra.mxu0 %vm2333_vm8, %v2290_v49  ;;  %v1443_v22 = vsel %vm1434_vm0, %v1424_v17, %v1425_v34 }
  0xcf   :  { %1863 = vrot.lane.b32.xlu1 %v11377_v7, %s10610_s21  ;;  %vm11473_vm14 = vcmp.eq.s32.totalorder %v542_v25, 63  ;;  %v1011_v25 = vrot.slane %v10999_v32, 7 }
  0xd0   :  { %v2056_v3 = vpop.permute.xlu0 %2055  ;;  %v1802_v61 = vpop.permute.xlu1 %1801 }
  0xd1   :  { %v2291_v63 = vsel %vm2268_vm7, %v2226_v16, %v2056_v3  ;;  %v1452_v16 = vsel %vm1434_vm0, %v1415_v27, %v1416_v53  ;;  %v2227_v3 = vsel %vm2203_vm6, %v1090_v37, %v1802_v61  ;;  %v1010_v27 = vrot.slane %v10988_v23, 7 }
  0xd2   :  { %2099 = vrot.lane.b32.xlu0 %v1453_v50, %s10611_s24  ;;  %10458 = vmatprep.mubr.msk.f32.mxu0 %vm2333_vm8, %v2291_v63  ;;  %v1442_v50 = vsel %vm1434_vm0, %v1425_v34, %v1426_v15  ;;  %v11490_v34 = vld [vmem:[%s14732_s0 + $0x178] sm:$0xff]  ;;  %v136_v61 = vadd.s32 376, %v10658_v6 }
  0xd3   :  { %1865 = vrot.lane.b32.xlu1 %v11432_v33, %s10610_s21  ;;  %v1682_v63 = vsel %vm11473_vm14, 0.0, %v1442_v50  ;;  %vm7002_vm14 = vcmask 1044484  }
  0xd4   :  { %v1804_v49 = vpop.permute.xlu0 %1803  ;;  %v2058_v42 = vpop.permute.xlu1 %2057  ;;  %v486_v32 = vand.u32 63, %v136_v61  ;;  %v1013_v61 = vrot.slane %v11021_v40, 7 }
  0xd5   :  { %v2228_v11 = vsel %vm2203_vm6, %v1266_v20, %v1804_v49  ;;  %v2292_v9 = vsel %vm2268_vm7, %v2227_v3, %v2058_v42  ;;  %v1088_v20 = vsel %vm1049_vm1, %v1009_v8, %v1010_v27  ;;  %v1417_v49 = vrot.slane %v11490_v34, 1  ;;  %v11508_v8 = vld [vmem:[%s14732_s0 + $0x1c8] sm:$0xff] }
  0xd6   :  { %2101 = vrot.lane.b32.xlu0 %v1452_v16, %s10611_s24  ;;  %10459 = vmatmul.mubr.msk.f32.gmra.mxu0 %vm2333_vm8, %v2292_v9  ;;  %v1087_v16 = vsel %vm1049_vm1, %v1010_v27, %v1011_v25  ;;  %vm11521_vm15 = vcmp.eq.s32.totalorder %v486_v32, 63 }
  0xd7   :  { %2119 = vrot.lane.b32.xlu1 %v1443_v22, %s10611_s24  ;;  %v1451_v9 = vsel %vm1434_vm0, %v1416_v53, %v1417_v49  ;;  %v11534_v53 = vld [vmem:[%s14732_s0 + $0x1d0] sm:$0xff] }
  0xd8   :  { %v2060_v17 = vpop.permute.xlu0 %2059  ;;  %v1806_v23 = vpop.permute.xlu1 %1805 }
  0xd9   :  { %v2293_v37 = vsel %vm2268_vm7, %v2228_v11, %v2060_v17  ;;  %v2229_v3 = vsel %vm2203_vm6, %v1088_v20, %v1806_v23  ;;  %v1012_v11 = vrot.slane %v11010_v35, 7  ;;  %v1427_v17 = vrot.slane %v11508_v8, 1 }
  0xda   :  { %1847 = vrot.lane.b32.xlu0 %v11426_v44, %s10610_s21  ;;  %10461 = vmatprep.mubr.msk.f32.mxu0 %vm2333_vm8, %v2293_v37  ;;  %v1450_v35 = vsel %vm1434_vm0, %v1417_v49, %v1418_v36 }
  0xdb   :  { %2121 = vrot.lane.b32.xlu1 %v1682_v63, %s10611_s24  ;;  %v1086_v20 = vsel %vm1049_vm1, %v1011_v25, %v1012_v11  ;;  %v1085_v40 = vsel %vm1049_vm1, %v1012_v11, %v1013_v61  ;;  %v1674_v36 = vsel %vm11521_vm15, 0.0, %v1450_v35  ;;  %v1441_v49 = vsel %vm1434_vm0, %v1426_v15, %v1427_v17  ;;  %v11552_v25 = vld [vmem:[%s14732_s0 + $0x1d8] sm:$0xff] }
  0xdc   :  { %v1808_v22 = vpop.permute.xlu0 %1807  ;;  %v2062_v42 = vpop.permute.xlu1 %2061  ;;  %v1429_v15 = vrot.slane %v11552_v25, 1  ;;  %v1015_v63 = vrot.slane %v11056_v62, 7  ;;  %vm7004_vm15 = vcmask 1045509  }
  0xdd   :  { %v2230_v46 = vsel %vm2203_vm6, %v1087_v16, %v1808_v22  ;;  %v2294_v50 = vsel %vm2268_vm7, %v2229_v3, %v2062_v42  ;;  %v1428_v22 = vrot.slane %v11534_v53, 1 }
  0xde   :  { %1849 = vrot.lane.b32.xlu0 %v11490_v34, %s10610_s21  ;;  %10462 = vmatmul.mubr.msk.f32.gmra.mxu0 %vm2333_vm8, %v2294_v50  ;;  %v1014_v50 = vrot.slane %v11037_v47, 7  ;;  %v11570_v47 = vld [vmem:[%s14732_s0 + $0x1e0] sm:$0xff] }
  0xdf   :  { %1867 = vrot.lane.b32.xlu1 %v11443_v51, %s10610_s21 }
  0xe0   :  { %v2064_v27 = vpop.permute.xlu0 %2063  ;;  %v1810_v23 = vpop.permute.xlu1 %1809  ;;  %v1083_v62 = vsel %vm1049_vm1, %v1014_v50, %v1015_v63 }
  0xe1   :  { %v2295_v37 = vsel %vm2268_vm7, %v2230_v46, %v2064_v27  ;;  %v2231_v32 = vsel %vm2203_vm6, %v1086_v20, %v1810_v23  ;;  %v121_v27 = vadd.s32 256, %v10658_v6  ;;  %v1084_v23 = vsel %vm1049_vm1, %v1013_v61, %v1014_v50  ;;  %v11587_v61 = vld [vmem:[%s14732_s0 + $0x1e8] sm:$0xff] }
  0xe2   :  { %2103 = vrot.lane.b32.xlu0 %v1451_v9, %s10611_s24  ;;  %10464 = vmatprep.mubr.msk.f32.mxu0 %vm2333_vm8, %v2295_v37  ;;  %v1440_v9 = vsel %vm1434_vm0, %v1427_v17, %v1428_v22  ;;  %v1439_v17 = vsel %vm1434_vm0, %v1428_v22, %v1429_v15  ;;  %v1017_v20 = vrot.slane %v11076_v18, 7  ;;  %v1016_v22 = vrot.slane %v11067_v31, 7 }
  0xe3   :  { %1869 = vrot.lane.b32.xlu1 %v11508_v8, %s10610_s21  ;;  %v1431_v18 = vrot.slane %v11587_v61, 1 }
  0xe4   :  { %v1812_v16 = vpop.permute.xlu0 %1811  ;;  %v2066_v3 = vpop.permute.xlu1 %2065  ;;  %v1081_v31 = vsel %vm1049_vm1, %v1016_v22, %v1017_v20 }
  0xe5   :  { %v2232_v42 = vsel %vm2203_vm6, %v1085_v40, %v1812_v16  ;;  %v2296_v46 = vsel %vm2268_vm7, %v2231_v32, %v2066_v3  ;;  %v381_v16 = vand.u32 63, %v121_v27 }
  0xe6   :  { %2105 = vrot.lane.b32.xlu0 %v1674_v36, %s10611_s24  ;;  %10465 = vmatmul.mubr.msk.f32.gmra.mxu0 %vm2333_vm8, %v2296_v46  ;;  %v1430_v36 = vrot.slane %v11570_v47, 1 }
  0xe7   :  { %2123 = vrot.lane.b32.xlu1 %v1441_v49, %s10611_s24  ;;  %vm11600_vm2 = vcmp.eq.s32.totalorder %v381_v16, 0 }
  0xe8   :  { %v2068_v11 = vpop.permute.xlu0 %2067  ;;  %v1814_v37 = vpop.permute.xlu1 %1813  ;;  %v1438_v50 = vsel %vm1434_vm0, %v1429_v15, %v1430_v36  ;;  %v1274_v15 = vsel %vm11600_vm2, 0.0, %v1081_v31  ;;  %vm7006_vm2 = vcmask 1046534  }
  0xe9   :  { %v2297_v35 = vsel %vm2268_vm7, %v2232_v42, %v2068_v11  ;;  %v2233_v49 = vsel %vm2203_vm6, %v1084_v23, %v1814_v37  ;;  %v1082_v37 = vsel %vm1049_vm1, %v1015_v63, %v1016_v22  ;;  %v1437_v23 = vsel %vm1434_vm0, %v1430_v36, %v1431_v18 }
  0xea   :  { %1871 = vrot.lane.b32.xlu0 %v11534_v53, %s10610_s21  ;;  %10467 = vmatprep.mubr.msk.f32.mxu0 %vm2333_vm8, %v2297_v35  ;;  %v11610_v35 = vld [vmem:[%s14732_s0 + $0x1f0] sm:$0xff]  ;;  %v152_v63 = vadd.s32 504, %v10658_v6  ;;  %v1433_v36 = vrot.slane %v11028_v41, 1 }
  0xeb   :  { %2125 = vrot.lane.b32.xlu1 %v1440_v9, %s10611_s24 }
  0xec   :  { %v1816_v40 = vpop.permute.xlu0 %1815  ;;  %v2070_v32 = vpop.permute.xlu1 %2069  ;;  %v598_v31 = vand.u32 63, %v152_v63 }
  0xed   :  { %v2234_v3 = vsel %vm2203_vm6, %v1083_v62, %v1816_v40  ;;  %v2298_v42 = vsel %vm2268_vm7, %v2233_v49, %v2070_v32 }
  0xee   :  { %2127 = vrot.lane.b32.xlu0 %v1439_v17, %s10611_s24  ;;  %10468 = vmatmul.mubr.msk.f32.gmra.mxu0 %vm2333_vm8, %v2298_v42  ;;  %v1432_v17 = vrot.slane %v11610_v35, 1  ;;  %vm1369_vm3 = vcmp.eq.s32.totalorder %v598_v31, 63  ;;  %v1023_v31 = vrot.slane %v11178_v52, 7 }
  0xef   :  { %1873 = vrot.lane.b32.xlu1 %v11552_v25, %s10610_s21 }
  0xf0   :  { %v2072_v46 = vpop.permute.xlu0 %2071  ;;  %v1818_v27 = vpop.permute.xlu1 %1817  ;;  %v1436_v22 = vsel %vm1434_vm0, %v1431_v18, %v1432_v17 }
  0xf1   :  { %v2299_v9 = vsel %vm2268_vm7, %v2234_v3, %v2072_v46  ;;  %v2235_v40 = vsel %vm2203_vm6, %v1082_v37, %v1818_v27  ;;  %v1018_v3 = vrot.slane %v11098_v43, 7  ;;  %v1019_v46 = vrot.slane %v11114_v39, 7 }
  0xf2   :  { %1875 = vrot.lane.b32.xlu0 %v11570_v47, %s10610_s21  ;;  %10470 = vmatprep.mubr.msk.f32.mxu0 %vm2333_vm8, %v2299_v9  ;;  %v1435_v39 = vsel %vm1434_vm0, %v1432_v17, %v1433_v36 }
  0xf3   :  { %2129 = vrot.lane.b32.xlu1 %v1438_v50, %s10611_s24  ;;  %v1080_v43 = vsel %vm1049_vm1, %v1017_v20, %v1018_v3  ;;  %v1079_v9 = vsel %vm1049_vm1, %v1018_v3, %v1019_v46  ;;  %v1498_v20 = vsel %vm1434_vm0, %v1433_v36, %v1370_v4 }
  0xf4   :  { %v1820_v62 = vpop.permute.xlu0 %1819 }
  0xf5   :  { %v2074_v16 = vpop.permute.xlu1 %2073  ;;  %v2236_v49 = vsel %vm2203_vm6, %v1274_v15, %v1820_v62  ;;  %v1020_v62 = vrot.slane %v11126_v21, 7 }
  0xf6   :  { %v2300_v32 = vsel %vm2268_vm7, %v2235_v40, %v2074_v16  ;;  %2131 = vrot.lane.b32.xlu0 %v1437_v23, %s10611_s24  ;;  %v1690_v40 = vsel %vm1369_vm3, 0.0, %v1498_v20  ;;  %v1032_v20 = vrot.slane %v11490_v34, 7  ;;  %vm7008_vm3 = vcmask 1047559  }
  0xf7   :  { %1877 = vrot.lane.b32.xlu1 %v11587_v61, %s10610_s21  ;;  %10471 = vmatmul.mubr.msk.f32.gmra.mxu0 %vm2333_vm8, %v2300_v32  ;;  %v1078_v63 = vsel %vm1049_vm1, %v1019_v46, %v1020_v62  ;;  %v1077_v21 = vsel %vm1049_vm1, %v1020_v62, %v1021_v1 }
  0xf8   :  { %v2076_v42 = vpop.permute.xlu0 %2075 }
  0xf9   :  { %v2301_v50 = vsel %vm2268_vm7, %v2236_v49, %v2076_v42  ;;  %v1822_v11 = vpop.permute.xlu1 %1821  ;;  %v1022_v42 = vrot.slane %v11160_v60, 7  ;;  %v1024_v60 = vrot.slane %v11201_v56, 7 }
  0xfa   :  { %1879 = vrot.lane.b32.xlu0 %v11610_v35, %s10610_s21  ;;  %10473 = vmatprep.mubr.msk.f32.mxu0 %vm2333_vm8, %v2301_v50  ;;  %v2237_v27 = vsel %vm2203_vm6, %v1080_v43, %v1822_v11  ;;  %v137_v43 = vadd.s32 384, %v10658_v6 }
  0xfb   :  { %2133 = vrot.lane.b32.xlu1 %v1436_v22, %s10611_s24  ;;  %v1076_v11 = vsel %vm1049_vm1, %v1021_v1, %v1022_v42  ;;  %v129_v1 = vadd.s32 320, %v10658_v6 }
  0xfc   :  { %v1824_v18 = vpop.permute.xlu0 %1823  ;;  %v493_v52 = vand.u32 63, %v137_v43 }
  0xfd   :  { %v2078_v37 = vpop.permute.xlu1 %2077  ;;  %v2238_v15 = vsel %vm2203_vm6, %v1079_v9, %v1824_v18 }
  0xfe   :  { %v2302_v23 = vsel %vm2268_vm7, %v2237_v27, %v2078_v37  ;;  %2135 = vrot.lane.b32.xlu0 %v1435_v39, %s10611_s24  ;;  %v1033_v37 = vrot.slane %v11218_v19, 7  ;;  %vm969_vm4 = vcmp.eq.s32.totalorder %v493_v52, 0 }
  0xff   :  { %1881 = vrot.lane.b32.xlu1 %v11028_v41, %s10610_s21  ;;  %10474 = vmatmul.mubr.msk.f32.gmra.mxu0 %vm2333_vm8, %v2302_v23 }
 0x100   :  { %v2080_v17 = vpop.permute.xlu0 %2079  ;;  %v1065_v56 = vsel %vm1049_vm1, %v1032_v20, %v1033_v37 }
 0x101   :  { %v2303_v16 = vsel %vm2268_vm7, %v2238_v15, %v2080_v17  ;;  %v1826_v4 = vpop.permute.xlu1 %1825  ;;  %v1075_v15 = vsel %vm1049_vm1, %v1022_v42, %v1023_v31 }
 0x102   :  { %10476 = vmatprep.mubr.msk.f32.mxu0 %vm2333_vm8, %v2303_v16  ;;  %v2239_v32 = vsel %vm2203_vm6, %v1078_v63, %v1826_v4  ;;  %v1034_v63 = vrot.slane %v11226_v28, 7 }
 0x103   :  { %2137 = vrot.lane.b32.xlu1 %v1690_v40, %s10611_s24  ;;  %v1074_v40 = vsel %vm1049_vm1, %v1023_v31, %v1024_v60 }
 0x104   :  { %v1828_v49 = vpop.permute.xlu0 %1827 }
 0x105   :  { %v2082_v3 = vpop.permute.xlu1 %2081  ;;  %v2240_v36 = vsel %vm2203_vm6, %v1077_v21, %v1828_v49  ;;  %v1290_v49 = vsel %vm969_vm4, 0.0, %v1065_v56 }
 0x106   :  { %v2304_v45 = vsel %vm2268_vm7, %v2239_v32, %v2082_v3  ;;  %v437_v3 = vand.u32 63, %v129_v1 }
 0x107   :  { %10477 = vmatmul.mubr.msk.f32.gmra.mxu0 %vm2333_vm8, %v2304_v45 }
 0x108   :  { %v2084_v22 = vpop.permute.xlu0 %2083  ;;  %vm961_vm5 = vcmp.eq.s32.totalorder %v437_v3, 0  ;;  %v1028_v3 = vrot.slane %v11340_v38, 7  ;;  %v1038_v38 = vrot.slane %v11358_v13, 7 }
 0x109   :  { %v2305_v46 = vsel %vm2268_vm7, %v2240_v36, %v2084_v22  ;;  %v1830_v50 = vpop.permute.xlu1 %1829  ;;  %v1025_v36 = vrot.slane %v11208_v5, 7 }
 0x10a   :  { %10479 = vmatprep.mubr.msk.f32.mxu0 %vm2333_vm8, %v2305_v46  ;;  %v2241_v39 = vsel %vm2203_vm6, %v1076_v11, %v1830_v50  ;;  %v1064_v46 = vsel %vm1049_vm1, %v1033_v37, %v1034_v63 }
 0x10b   :  { %v1073_v50 = vsel %vm1049_vm1, %v1024_v60, %v1025_v36 }
 0x10c   :  { %v1832_v9 = vpop.permute.xlu0 %1831 }
 0x10d   :  { %v2086_v18 = vpop.permute.xlu1 %2085  ;;  %v2242_v17 = vsel %vm2203_vm6, %v1075_v15, %v1832_v9  ;;  %v1026_v9 = vrot.slane %v11276_v12, 7  ;;  %v1035_v15 = vrot.slane %v11250_v58, 7 }
 0x10e   :  { %v2306_v27 = vsel %vm2268_vm7, %v2241_v39, %v2086_v18  ;;  %v1282_v39 = vsel %vm961_vm5, 0.0, %v1073_v50 }
 0x10f   :  { %10480 = vmatmul.mubr.msk.f32.gmra.mxu0 %vm2333_vm8, %v2306_v27  ;;  %v1072_v60 = vsel %vm1049_vm1, %v1025_v36, %v1026_v9 }
 0x110   :  { %v1834_v23 = vpop.permute.xlu0 %1833 }
 0x111   :  { %v1852_v62 = vpop.permute.xlu1 %1851  ;;  %v2243_v21 = vsel %vm2203_vm6, %v1074_v40, %v1834_v23  ;;  %v1063_v40 = vsel %vm1049_vm1, %v1034_v63, %v1035_v15 }
 0x112   :  { %v2252_v45 = vsel %vm2203_vm6, %v1290_v49, %v1852_v62 }
 0x114   :  { %v2088_v19 = vpop.permute.xlu0 %2087 }
 0x115   :  { %v2307_v16 = vsel %vm2268_vm7, %v2242_v17, %v2088_v19  ;;  %v1854_v4 = vpop.permute.xlu1 %1853  ;;  %v1036_v17 = vrot.slane %v11298_v59, 7  ;;  %v1027_v59 = vrot.slane %v11291_v57, 7 }
 0x116   :  { %10482 = vmatprep.mubr.msk.f32.mxu0 %vm2333_vm8, %v2307_v16  ;;  %v2253_v5 = vsel %vm2203_vm6, %v1064_v46, %v1854_v4  ;;  %v1037_v46 = vrot.slane %v11316_v26, 7 }
 0x117   :  { %v1062_v16 = vsel %vm1049_vm1, %v1035_v15, %v1036_v17  ;;  %v1071_v36 = vsel %vm1049_vm1, %v1026_v9, %v1027_v59  ;;  %v1070_v57 = vsel %vm1049_vm1, %v1027_v59, %v1028_v3  ;;  %v2913_v9 = vsub.s32 0, %v10658_v6 }
 0x118   :  { %v2090_v32 = vpop.permute.xlu0 %2089 }
 0x119   :  { %v2308_v42 = vsel %vm2268_vm7, %v2243_v21, %v2090_v32  ;;  %v2108_v22 = vpop.permute.xlu1 %2107 }
 0x11a   :  { %10483 = vmatmul.mubr.msk.f32.gmra.mxu0 %vm2333_vm8, %v2308_v42  ;;  %v2317_v28 = vsel %vm2268_vm7, %v2252_v45, %v2108_v22 }
 0x11b   :  { %10497 = vmatprep.mubr.msk.f32.mxu1 %vm2333_vm8, %v2317_v28 }
 0x11c   :  { %v1836_v11 = vpop.permute.xlu0 %1835 }
 0x11d   :  { %v2110_v31 = vpop.permute.xlu1 %2109  ;;  %v2244_v37 = vsel %vm2203_vm6, %v1282_v39, %v1836_v11 }
 0x11e   :  { %v2318_v43 = vsel %vm2268_vm7, %v2253_v5, %v2110_v31  ;;  %v1061_v31 = vsel %vm1049_vm1, %v1036_v17, %v1037_v46 }
 0x11f   :  { %10498 = vmatmul.mubr.msk.f32.vlgmr.msra.gmra.mxu1 %vm2333_vm8, %v2318_v43 }
 0x120   :  { %v1838_v18 = vpop.permute.xlu0 %1837 }
 0x121   :  { %v1856_v27 = vpop.permute.xlu1 %1855  ;;  %v2245_v12 = vsel %vm2203_vm6, %v1072_v60, %v1838_v18  ;;  %v2981_v60 = vsub.s32 1, %v10658_v6 }
 0x122   :  { %v2254_v19 = vsel %vm2203_vm6, %v1063_v40, %v1856_v27  ;;  %v17_v27 = vld [vmem:[%s14734_s3] sm:$0xf] }
 0x124   :  { %v2092_v52 = vpop.permute.xlu0 %2091 }
 0x125   :  { %v2309_v23 = vsel %vm2268_vm7, %v2244_v37, %v2092_v52  ;;  %v1858_v62 = vpop.permute.xlu1 %1857  ;;  %v1060_v37 = vsel %vm1049_vm1, %v1037_v46, %v1038_v38  ;;  %v10612_v52 = vmov 1983009808  }
 0x126   :  { %10485 = vmatprep.mubr.msk.f32.mxu0 %vm2333_vm8, %v2309_v23  ;;  %v2255_v21 = vsel %vm2203_vm6, %v1062_v16, %v1858_v62  ;;  %v3177_v23 = vunpack.c.l.s4 %v10612_v52  ;;  %v1029_v62 = vrot.slane %v11351_v24, 7  ;;  %v1030_v16 = vrot.slane %v11405_v54, 7 }
 0x128   :  { %v2094_v56 = vpop.permute.xlu0 %2093  ;;  %v1068_v54 = vsel %vm1049_vm1, %v1029_v62, %v1030_v16 }
 0x129   :  { %v2310_v58 = vsel %vm2268_vm7, %v2245_v12, %v2094_v56  ;;  %v2112_v1 = vpop.permute.xlu1 %2111  ;;  %v11761_v12 = vrot.slane %v17_v27, %v2913_v9 }
 0x12a   :  { %v2319_v4 = vsel %vm2268_vm7, %v2254_v19, %v2112_v1  ;;  %10486 = vmatmul.mubr.msk.f32.gmra.mxu0 %vm2333_vm8, %v2310_v58  ;;  %v11765_v58 = vrot.slane %v17_v27, %v2981_v60  ;;  %v3178_v1 = vunpack.c.0.s8 %v3177_v23  ;;  %v1040_v60 = vrot.slane %v11432_v33, 7 }
 0x12b   :  { %10500 = vmatprep.mubr.msk.f32.mxu1 %vm2333_vm8, %v2319_v4  ;;  %v1069_v4 = vsel %vm1049_vm1, %v1028_v3, %v1029_v62  ;;  %v1041_v62 = vrot.slane %v11443_v51, 7 }
 0x12c   :  { %v1840_v63 = vpop.permute.xlu0 %1839 }
 0x12d   :  { %v2114_v49 = vpop.permute.xlu1 %2113  ;;  %v2246_v22 = vsel %vm2203_vm6, %v1071_v36, %v1840_v63  ;;  %v11775_v36 = vsub.s32 %v3178_v1, %v10658_v6  ;;  %v1044_v1 = vrot.slane %v11552_v25, 7  ;;  %v11817_v25 = vsel %vm1049_vm1, %v1040_v60, %v1041_v62 }
 0x12e   :  { %v2320_v32 = vsel %vm2268_vm7, %v2255_v21, %v2114_v49 }
 0x12f   :  { %10501 = vmatmul.mubr.msk.f32.gmra.mxu1 %vm2333_vm8, %v2320_v32  ;;  %14859 = vst [vmem:[#allocation9_spill] sm:$0xff] %v11775_v36 }
 0x130   :  { %v1842_v45 = vpop.permute.xlu0 %1841 }
 0x131   :  { %v1860_v42 = vpop.permute.xlu1 %1859  ;;  %v2247_v5 = vsel %vm2203_vm6, %v1070_v57, %v1842_v45 }
 0x132   :  { %v2256_v26 = vsel %vm2203_vm6, %v1061_v31, %v1860_v42 }
 0x134   :  { %v2096_v28 = vpop.permute.xlu0 %2095 }
 0x135   :  { %v2311_v50 = vsel %vm2268_vm7, %v2246_v22, %v2096_v28  ;;  %v1862_v11 = vpop.permute.xlu1 %1861 }
 0x136   :  { %10488 = vmatprep.mubr.msk.f32.mxu0 %vm2333_vm8, %v2311_v50  ;;  %v2257_v40 = vsel %vm2203_vm6, %v1060_v37, %v1862_v11 }
 0x138   :  { %v2098_v43 = vpop.permute.xlu0 %2097 }
 0x139   :  { %v2312_v39 = vsel %vm2268_vm7, %v2247_v5, %v2098_v43  ;;  %v2116_v18 = vpop.permute.xlu1 %2115  ;;  %v145_v5 = vadd.s32 448, %v10658_v6 }
 0x13a   :  { %v2321_v15 = vsel %vm2268_vm7, %v2256_v26, %v2116_v18  ;;  %10489 = vmatmul.mubr.msk.f32.gmra.mxu0 %vm2333_vm8, %v2312_v39  ;;  %v1039_v18 = vrot.slane %v11377_v7, 7 }
 0x13b   :  { %10503 = vmatprep.mubr.msk.f32.mxu1 %vm2333_vm8, %v2321_v15  ;;  %v549_v23 = vand.u32 63, %v145_v5 }
 0x13c   :  { %v1844_v17 = vpop.permute.xlu0 %1843  ;;  %v1059_v51 = vsel %vm1049_vm1, %v1038_v38, %v1039_v18 }
 0x13d   :  { %v2118_v56 = vpop.permute.xlu1 %2117  ;;  %v2248_v49 = vsel %vm2203_vm6, %v1069_v4, %v1844_v17  ;;  %v1046_v4 = vrot.slane %v11587_v61, 7  ;;  %vm11811_vm10 = vcmp.eq.s32.totalorder %v549_v23, 0  ;;  %v1043_v61 = vrot.slane %v11534_v53, 7 }
 0x13e   :  { %v2322_v19 = vsel %vm2268_vm7, %v2257_v40, %v2118_v56 }
 0x13f   :  { %v10427_v59 = vpop.f32.mrf.mxu0  ;;  %10504 = vmatmul.mubr.msk.f32.gmra.mxu1 %vm2333_vm8, %v2322_v19  ;;  %v1042_v19 = vrot.slane %v11508_v8, 7 }
 0x140   :  { %v2916_v24 = vmul.f32 %v10427_v59, %v11761_v12  ;;  %v1846_v63 = vpop.permute.xlu0 %1845 }
 0x141   :  { %v2592_v21 = vpop.f32.mrf.mxu0  ;;  %v1864_v42 = vpop.permute.xlu1 %1863  ;;  %v2249_v50 = vsel %vm2203_vm6, %v1068_v54, %v1846_v63  ;;  %v1058_v63 = vsel %vm1049_vm1, %v1039_v18, %v1040_v60  ;;  %v1045_v18 = vrot.slane %v11570_v47, 7 }
 0x142   :  { %v2984_v32 = vadd.f32 %v11765_v58, %v2916_v24  ;;  %v2915_v45 = vmul.f32 %v11761_v12, %v2592_v21  ;;  %v1031_v24 = vrot.slane %v11426_v44, 7 }
 0x144   :  { %v3048_v3 = vmax.f32 %v2984_v32, 0.0  ;;  %v2983_v22 = vadd.f32 %v11765_v58, %v2915_v45  ;;  %v2100_v46 = vpop.permute.xlu0 %2099  ;;  %v11834_v53 = vsel %vm1049_vm1, %v1031_v24, %v1032_v20 }
 0x145   :  { %v2313_v57 = vsel %vm2268_vm7, %v2248_v49, %v2100_v46  ;;  %v11791_v52 = vpop.permute.xlu1 %1865  ;;  %v1298_v46 = vsel %vm11811_vm10, 0.0, %v11817_v25 }
 0x146   :  { %v3199_v28 = vrot.slane %v3048_v3, %v11775_v36  ;;  %v3047_v11 = vmax.f32 %v2983_v22, 0.0  ;;  %10491 = vmatprep.mubr.msk.f32.mxu0 %vm2333_vm8, %v2313_v57  ;;  %v3192_v31 = vcombine.high %v3048_v3, %v3048_v3  ;;  %v10430_v37 = vpop.f32.mrf.mxu0  ;;  %v11828_v22 = vsel %vm1049_vm1, %v1030_v16, %v1031_v24 }
 0x147   :  { %v2918_v33 = vmul.f32 %v10430_v37, %v11761_v12  ;;  %v11841_v57 = vsel %vm1049_vm1, %v1041_v62, %v1042_v19  ;;  %v11856_v37 = vsel %vm1049_vm1, %v1043_v61, %v1044_v1 }
 0x148   :  { %v4548_v43 = vsel %vm4519_vm9, %v3199_v28, -inf  ;;  %v3175_v9 = vcombine.high %v3047_v11, %v3047_v11  ;;  %v2102_v26 = vpop.permute.xlu0 %2101  ;;  %v3207_v39 = vcombine.high %v3199_v28, %v3199_v28  ;;  %v3182_v27 = vrot.slane %v3047_v11, %v11775_v36  ;;  %v2602_v5 = vpop.f32.mrf.mxu0 }
 0x149   :  { %v2314_v15 = vsel %vm2268_vm7, %v2249_v50, %v2102_v26  ;;  %v11796_v17 = vrot.slane %v3192_v31, %v11775_v36  ;;  %v4549_v40 = vrot.slane %v4548_v43, 4  ;;  %v2986_v54 = vadd.f32 %v11765_v58, %v2918_v33  ;;  %v2120_v3 = vpop.permute.xlu1 %2119 }
 0x14a   :  { %10492 = vmatmul.mubr.msk.f32.gmra.mxu0 %vm2333_vm8, %v2314_v15  ;;  %v3189_v7 = vrot.slane %v3175_v9, %v11775_v36  ;;  %v3190_v56 = vcombine.high %v3182_v27, %v3182_v27  ;;  %v4555_v59 = vsel %vm4519_vm9, %v3207_v39, -inf  ;;  %v4520_v32 = vsel %vm4519_vm9, %v3182_v27, -inf }
 0x14b   :  { %v4550_v21 = vmax.f32 %v4548_v43, %v4549_v40  ;;  %v4562_v13 = vsel %vm4519_vm9, %v11796_v17, -inf  ;;  %v4556_v49 = vrot.slane %v4555_v59, 4  ;;  %v2258_v50 = vsel %vm2203_vm6, %v1059_v51, %v1864_v42 }
 0x14c   :  { %v3191_v38 = vcombine.high %v3189_v7, %v3189_v7  ;;  %v4527_v44 = vsel %vm4519_vm9, %v3190_v56, -inf  ;;  %v4534_v45 = vsel %vm4519_vm9, %v3189_v7, -inf  ;;  %v4563_v28 = vrot.slane %v4562_v13, 4 }
 0x14d   :  { %v4528_v11 = vrot.slane %v4527_v44, 4  ;;  %v3050_v16 = vmax.f32 %v2986_v54, 0.0  ;;  %v4521_v31 = vrot.slane %v4520_v32, 4  ;;  %v4535_v34 = vrot.slane %v4534_v45, 4 }
 0x14e   :  { %v4541_v43 = vsel %vm4519_vm9, %v3191_v38, -inf  ;;  %v2323_v20 = vsel %vm2268_vm7, %v2258_v50, %v2120_v3  ;;  %v4551_v9 = vrot.slane %v4550_v21, 2  ;;  %v4557_v26 = vmax.f32 %v4555_v59, %v4556_v49 }
 0x14f   :  { %10506 = vmatprep.mubr.msk.f32.mxu1 %vm2333_vm8, %v2323_v20  ;;  %v11849_v39 = vsel %vm1049_vm1, %v1042_v19, %v1043_v61  ;;  %v3233_v42 = vrot.slane %v3050_v16, %v11775_v36  ;;  %v2917_v27 = vmul.f32 %v11761_v12, %v2602_v5  ;;  %v1047_v15 = vrot.slane %v11610_v35, 7  ;;  %v2122_v61 = vpop.permute.xlu1 %2121 }
 0x150   :  { %v3208_v60 = vcombine.high %v11796_v17, %v11796_v17  ;;  %v4529_v23 = vmax.f32 %v4527_v44, %v4528_v11  ;;  %v4542_v62 = vrot.slane %v4541_v43, 4  ;;  %v3226_v40 = vcombine.high %v3050_v16, %v3050_v16 }
 0x151   :  { %v4564_v7 = vmax.f32 %v4562_v13, %v4563_v28  ;;  %v4522_v56 = vmax.f32 %v4520_v32, %v4521_v31  ;;  %v4536_v19 = vmax.f32 %v4534_v45, %v4535_v34  ;;  %v2985_v47 = vadd.f32 %v11765_v58, %v2917_v27  ;;  %v10433_v13 = vpop.f32.mrf.mxu0 }
 0x152   :  { %v4552_v33 = vmax.f32 %v4550_v21, %v4551_v9  ;;  %v4558_v59 = vrot.slane %v4557_v26, 2  ;;  %v11864_v51 = vsel %vm1049_vm1, %v1044_v1, %v1045_v18  ;;  %v11868_v35 = vsel %vm1049_vm1, %v1045_v18, %v1046_v4 }
 0x153   :  { %v2259_v17 = vsel %vm2203_vm6, %v1058_v63, %v11791_v52  ;;  %v3241_v24 = vcombine.high %v3233_v42, %v3233_v42  ;;  %v11874_v38 = vsel %vm1049_vm1, %v1046_v4, %v1047_v15  ;;  %v11880_v1 = vsel %vm1049_vm1, %v1047_v15, %v1048_v55 }
 0x154   :  { %v11883_v21 = vsel %vm4519_vm9, %v3208_v60, -inf  ;;  %v4530_v44 = vrot.slane %v4529_v23, 2  ;;  %v4543_v49 = vmax.f32 %v4541_v43, %v4542_v62  ;;  %v3240_v52 = vrot.slane %v3226_v40, %v11775_v36  ;;  %v1848_v62 = vpop.permute.xlu0 %1847 }
 0x155   :  { %v4565_v63 = vrot.slane %v4564_v7, 2  ;;  %v4523_v32 = vrot.slane %v4522_v56, 2  ;;  %v4537_v45 = vrot.slane %v4536_v19, 2  ;;  %v3049_v54 = vmax.f32 %v2985_v47, 0.0 }
 0x156   :  { %v4553_v3 = vrot.slane %v4552_v33, 1  ;;  %v11886_v4 = vmax.f32 %v4557_v26, %v4558_v59  ;;  %v2324_v41 = vsel %vm2268_vm7, %v2259_v17, %v2122_v61  ;;  %v2920_v28 = vmul.f32 %v10433_v13, %v11761_v12 }
 0x157   :  { %v4604_v55 = vsel %vm4519_vm9, %v3233_v42, -inf  ;;  %v4611_v50 = vsel %vm4519_vm9, %v3241_v24, -inf  ;;  %v3209_v11 = vcombine.high %v3049_v54, %v3049_v54  ;;  %v3216_v16 = vrot.slane %v3049_v54, %v11775_v36  ;;  %10507 = vmatmul.mubr.msk.f32.gmra.mxu1 %vm2333_vm8, %v2324_v41 }
 0x158   :  { %v4531_v5 = vmax.f32 %v4529_v23, %v4530_v44  ;;  %v4544_v31 = vrot.slane %v4543_v49, 2  ;;  %v4618_v34 = vsel %vm4519_vm9, %v3240_v52, -inf  ;;  %v2988_v43 = vadd.f32 %v11765_v58, %v2920_v28 }
 0x159   :  { %v4524_v20 = vmax.f32 %v4522_v56, %v4523_v32  ;;  %v4538_v9 = vmax.f32 %v4536_v19, %v4537_v45  ;;  %v3223_v26 = vrot.slane %v3209_v11, %v11775_v36  ;;  %v3224_v18 = vcombine.high %v3216_v16, %v3216_v16 }
 0x15a   :  { %v11897_v42 = vmax.f32 %v4564_v7, %v4565_v63  ;;  %v4605_v15 = vrot.slane %v4604_v55, 4  ;;  %v4612_v60 = vrot.slane %v4611_v50, 4  ;;  %v4619_v40 = vrot.slane %v4618_v34, 4 }
 0x15b   :  { %v3225_v23 = vcombine.high %v3223_v26, %v3223_v26  ;;  %v4583_v47 = vsel %vm4519_vm9, %v3224_v18, -inf  ;;  %v3052_v59 = vmax.f32 %v2988_v43, 0.0  ;;  %v11901_v17 = vmax.f32 %v4552_v33, %v4553_v3  ;;  %v2612_v3 = vpop.f32.mrf.mxu0  ;;  %v1850_v18 = vpop.permute.xlu0 %1849 }
 0x15c   :  { %v4532_v56 = vrot.slane %v4531_v5, 1  ;;  %v4545_v19 = vmax.f32 %v4543_v49, %v4544_v31  ;;  %v4576_v24 = vsel %vm4519_vm9, %v3216_v16, -inf  ;;  %v4525_v7 = vrot.slane %v4524_v20, 1 }
 0x15d   :  { %v4539_v13 = vrot.slane %v4538_v9, 1  ;;  %v4584_v44 = vrot.slane %v4583_v47, 4  ;;  %v3242_v63 = vcombine.high %v3240_v52, %v3240_v52  ;;  %v4606_v32 = vmax.f32 %v4604_v55, %v4605_v15 }
 0x15e   :  { %v4590_v45 = vsel %vm4519_vm9, %v3223_v26, -inf  ;;  %v4597_v54 = vsel %vm4519_vm9, %v3225_v23, -inf  ;;  %v4613_v41 = vmax.f32 %v4611_v50, %v4612_v60  ;;  %v4620_v28 = vmax.f32 %v4618_v34, %v4619_v40  ;;  %v1868_v26 = vpop.permute.xlu1 %1867 }
 0x15f   :  { %v4577_v11 = vrot.slane %v4576_v24, 4  ;;  %v3267_v33 = vrot.slane %v3052_v59, %v11775_v36  ;;  %v4533_v49 = vmax.f32 %v4531_v5, %v4532_v56  ;;  %v4546_v31 = vrot.slane %v4545_v19, 1 }
 0x160   :  { %v2250_v16 = vsel %vm2203_vm6, %v11828_v22, %v1848_v62  ;;  %v3260_v43 = vcombine.high %v3052_v59, %v3052_v59  ;;  %v4526_v61 = vmax.f32 %v4524_v20, %v4525_v7  ;;  %v4585_v52 = vmax.f32 %v4583_v47, %v4584_v44 }
 0x161   :  { %v4591_v55 = vrot.slane %v4590_v45, 4  ;;  %v4598_v15 = vrot.slane %v4597_v54, 4  ;;  %v11910_v27 = vmax.f32 %v4538_v9, %v4539_v13  ;;  %v4607_v50 = vrot.slane %v4606_v32, 2 }
 0x162   :  { %v11913_v34 = vsel %vm4519_vm9, %v3242_v63, -inf  ;;  %v2919_v60 = vmul.f32 %v11761_v12, %v2612_v3  ;;  %v4614_v5 = vrot.slane %v4613_v41, 2  ;;  %v4621_v40 = vrot.slane %v4620_v28, 2 }
 0x163   :  { %v4578_v23 = vmax.f32 %v4576_v24, %v4577_v11  ;;  %v4660_v22 = vsel %vm4519_vm9, %v3267_v33, -inf  ;;  %v11917_v62 = vmax.f32 %v4545_v19, %v4546_v31  ;;  %v11920_v20 = vsel %vm6996_vm11, %v4533_v49, %v4526_v61  ;;  %v2104_v61 = vpop.permute.xlu0 %2103  ;;  %v10436_v49 = vpop.f32.mrf.mxu0 }
 0x164   :  { %v3274_v47 = vrot.slane %v3260_v43, %v11775_v36  ;;  %v3275_v9 = vcombine.high %v3267_v33, %v3267_v33  ;;  %v4586_v56 = vrot.slane %v4585_v52, 2  ;;  %v4592_v7 = vmax.f32 %v4590_v45, %v4591_v55 }
 0x165   :  { %v4599_v13 = vmax.f32 %v4597_v54, %v4598_v15  ;;  %v4661_v44 = vrot.slane %v4660_v22, 4  ;;  %v2251_v63 = vsel %vm2203_vm6, %v11834_v53, %v1850_v18  ;;  %v2260_v19 = vsel %vm2203_vm6, %v1298_v46, %v1868_v26  ;;  %v11936_v54 = vpop.permute.xlu1 %1869 }
 0x166   :  { %v2987_v24 = vadd.f32 %v11765_v58, %v2919_v60  ;;  %v4608_v11 = vmax.f32 %v4606_v32, %v4607_v50  ;;  %v11932_v33 = vmax.f32 %v4613_v41, %v4614_v5  ;;  %v11934_v3 = vmax.f32 %v4620_v28, %v4621_v40 }
 0x167   :  { %v4579_v45 = vrot.slane %v4578_v23, 2  ;;  %v4667_v53 = vsel %vm4519_vm9, %v3275_v9, -inf  ;;  %v4674_v8 = vsel %vm4519_vm9, %v3274_v47, -inf  ;;  %v2315_v25 = vsel %vm2268_vm7, %v2250_v16, %v2104_v61 }
 0x168   :  { %v3051_v31 = vmax.f32 %v2987_v24, 0.0  ;;  %v4587_v46 = vmax.f32 %v4585_v52, %v4586_v56  ;;  %v4593_v43 = vrot.slane %v4592_v7, 2  ;;  %v4600_v18 = vrot.slane %v4599_v13, 2  ;;  %10494 = vmatprep.mubr.msk.f32.mxu0 %vm2333_vm8, %v2315_v25 }
 0x169   :  { %v3276_v55 = vcombine.high %v3274_v47, %v3274_v47  ;;  %v4662_v32 = vmax.f32 %v4660_v22, %v4661_v44  ;;  %v2922_v15 = vmul.f32 %v10436_v49, %v11761_v12  ;;  %v4609_v26 = vrot.slane %v4608_v11, 1  ;;  %v2106_v47 = vpop.permute.xlu0 %2105  ;;  %v2124_v61 = vpop.permute.xlu1 %2123 }
 0x16a   :  { %v3243_v41 = vcombine.high %v3051_v31, %v3051_v31  ;;  %v3250_v28 = vrot.slane %v3051_v31, %v11775_v36  ;;  %v4580_v50 = vmax.f32 %v4578_v23, %v4579_v45  ;;  %v4668_v60 = vrot.slane %v4667_v53, 4 }
 0x16b   :  { %v4675_v5 = vrot.slane %v4674_v8, 4  ;;  %v2990_v52 = vadd.f32 %v11765_v58, %v2922_v15  ;;  %v4588_v56 = vrot.slane %v4587_v46, 1  ;;  %v4594_v24 = vmax.f32 %v4592_v7, %v4593_v43 }
 0x16c   :  { %v3257_v40 = vrot.slane %v3243_v41, %v11775_v36  ;;  %v3258_v9 = vcombine.high %v3250_v28, %v3250_v28  ;;  %v4632_v16 = vsel %vm4519_vm9, %v3250_v28, -inf  ;;  %v4681_v22 = vsel %vm4519_vm9, %v3276_v55, -inf }
 0x16d   :  { %v4633_v44 = vrot.slane %v4632_v16, 4  ;;  %v4601_v31 = vmax.f32 %v4599_v13, %v4600_v18  ;;  %v4663_v49 = vrot.slane %v4662_v32, 2  ;;  %v3054_v45 = vmax.f32 %v2990_v52, 0.0 }
 0x16e   :  { %v4639_v23 = vsel %vm4519_vm9, %v3258_v9, -inf  ;;  %v3259_v25 = vcombine.high %v3257_v40, %v3257_v40  ;;  %v4646_v41 = vsel %vm4519_vm9, %v3257_v40, -inf  ;;  %v2316_v28 = vsel %vm2268_vm7, %v2251_v63, %v2106_v47 }
 0x16f   :  { %v4640_v59 = vrot.slane %v4639_v23, 4  ;;  %v4669_v2 = vmax.f32 %v4667_v53, %v4668_v60  ;;  %v4676_v15 = vmax.f32 %v4674_v8, %v4675_v5  ;;  %v3301_v0 = vrot.slane %v3054_v45, %v11775_v36  ;;  %10495 = vmatmul.mubr.msk.f32.gmra.mxu0 %vm2333_vm8, %v2316_v28  ;;  %v2622_v53 = vpop.f32.mrf.mxu0 }
 0x170   :  { %v2325_v7 = vsel %vm2268_vm7, %v2260_v19, %v2124_v61  ;;  %v11954_v43 = vmax.f32 %v4608_v11, %v4609_v26  ;;  %v4581_v18 = vrot.slane %v4580_v50, 1  ;;  %v4634_v55 = vmax.f32 %v4632_v16, %v4633_v44 }
 0x171   :  { %10509 = vmatprep.mubr.msk.f32.mxu1 %vm2333_vm8, %v2325_v7  ;;  %v4595_v9 = vrot.slane %v4594_v24, 1  ;;  %v4682_v40 = vrot.slane %v4681_v22, 4  ;;  %v4647_v52 = vrot.slane %v4646_v41, 4  ;;  %v3294_v63 = vcombine.high %v3054_v45, %v3054_v45 }
 0x172   :  { %v4589_v8 = vmax.f32 %v4587_v46, %v4588_v56  ;;  %v4602_v60 = vrot.slane %v4601_v31, 1  ;;  %v4641_v5 = vmax.f32 %v4639_v23, %v4640_v59  ;;  %v4653_v19 = vsel %vm4519_vm9, %v3259_v25, -inf }
 0x173   :  { %v4664_v47 = vmax.f32 %v4662_v32, %v4663_v49  ;;  %v4670_v61 = vrot.slane %v4669_v2, 2  ;;  %v4677_v11 = vrot.slane %v4676_v15, 2  ;;  %v4716_v26 = vsel %vm4519_vm9, %v3301_v0, -inf }
 0x174   :  { %v4582_v28 = vmax.f32 %v4580_v50, %v4581_v18  ;;  %v4635_v13 = vrot.slane %v4634_v55, 2  ;;  %v3309_v16 = vcombine.high %v3301_v0, %v3301_v0  ;;  %v2921_v44 = vmul.f32 %v11761_v12, %v2622_v53  ;;  %v2126_v0 = vpop.permute.xlu1 %2125 }
 0x175   :  { %v11961_v7 = vmax.f32 %v4594_v24, %v4595_v9  ;;  %v4648_v48 = vmax.f32 %v4646_v41, %v4647_v52  ;;  %v4654_v45 = vrot.slane %v4653_v19, 4  ;;  %v3308_v46 = vrot.slane %v3294_v63, %v11775_v36  ;;  %v10439_v63 = vpop.f32.mrf.mxu0 }
 0x176   :  { %v11964_v56 = vmax.f32 %v4601_v31, %v4602_v60  ;;  %v4683_v59 = vmax.f32 %v4681_v22, %v4682_v40  ;;  %v4642_v23 = vrot.slane %v4641_v5, 2  ;;  %v4717_v32 = vrot.slane %v4716_v26, 4 }
 0x177   :  { %v11967_v49 = vsel %vm6996_vm11, %v4589_v8, %v4582_v28  ;;  %v4665_v25 = vrot.slane %v4664_v47, 1  ;;  %v4671_v50 = vmax.f32 %v4669_v2, %v4670_v61  ;;  %v11969_v18 = vmax.f32 %v4676_v15, %v4677_v11 }
 0x178   :  { %v4636_v53 = vmax.f32 %v4634_v55, %v4635_v13  ;;  %v2261_v24 = vsel %vm2203_vm6, %v11841_v57, %v11936_v54  ;;  %v4723_v41 = vsel %vm4519_vm9, %v3309_v16, -inf  ;;  %v2989_v31 = vadd.f32 %v11765_v58, %v2921_v44 }
 0x179   :  { %v4649_v22 = vrot.slane %v4648_v48, 2  ;;  %v4655_v9 = vmax.f32 %v4653_v19, %v4654_v45  ;;  %v3310_v40 = vcombine.high %v3308_v46, %v3308_v46  ;;  %v4730_v52 = vsel %vm4519_vm9, %v3308_v46, -inf }
 0x17a   :  { %v4643_v8 = vmax.f32 %v4641_v5, %v4642_v23  ;;  %v4718_v2 = vmax.f32 %v4716_v26, %v4717_v32  ;;  %v3053_v15 = vmax.f32 %v2989_v31, 0.0  ;;  %v2326_v60 = vsel %vm2268_vm7, %v2261_v24, %v2126_v0 }
 0x17b   :  { %v11978_v13 = vmax.f32 %v4664_v47, %v4665_v25  ;;  %v4672_v55 = vrot.slane %v4671_v50, 1  ;;  %v4684_v61 = vrot.slane %v4683_v59, 2  ;;  %v4724_v57 = vrot.slane %v4723_v41, 4  ;;  %10510 = vmatmul.mubr.msk.f32.gmra.mxu1 %vm2333_vm8, %v2326_v60 }
 0x17c   :  { %v4731_v54 = vrot.slane %v4730_v52, 4  ;;  %v3277_v11 = vcombine.high %v3053_v15, %v3053_v15  ;;  %v3284_v19 = vrot.slane %v3053_v15, %v11775_v36  ;;  %v2924_v28 = vmul.f32 %v10439_v63, %v11761_v12 }
 0x17d   :  { %v4679_v16 = vrot.slane %v11969_v18, 1  ;;  %v4650_v5 = vmax.f32 %v4648_v48, %v4649_v22  ;;  %v4656_v26 = vrot.slane %v4655_v9, 2  ;;  %v4737_v44 = vsel %vm4519_vm9, %v3310_v40, -inf }
 0x17e   :  { %v4637_v45 = vrot.slane %v4636_v53, 1  ;;  %v4644_v47 = vrot.slane %v4643_v8, 1  ;;  %v4719_v46 = vrot.slane %v4718_v2, 2  ;;  %v3291_v23 = vrot.slane %v3277_v11, %v11775_v36 }
 0x17f   :  { %v11986_v32 = vmax.f32 %v4683_v59, %v4684_v61  ;;  %v4725_v25 = vmax.f32 %v4723_v41, %v4724_v57  ;;  %v3292_v0 = vcombine.high %v3284_v19, %v3284_v19  ;;  %v2992_v24 = vadd.f32 %v11765_v58, %v2924_v28 }
 0x180   :  { %v4732_v31 = vmax.f32 %v4730_v52, %v4731_v54  ;;  %v4738_v63 = vrot.slane %v4737_v44, 4  ;;  %v3293_v15 = vcombine.high %v3291_v23, %v3291_v23  ;;  %v4688_v48 = vsel %vm4519_vm9, %v3284_v19, -inf }
 0x181   :  { %v11990_v22 = vmax.f32 %v4671_v50, %v4672_v55  ;;  %v4651_v40 = vrot.slane %v4650_v5, 1  ;;  %v4657_v60 = vmax.f32 %v4655_v9, %v4656_v26  ;;  %v3056_v10 = vmax.f32 %v2992_v24, 0.0 }
 0x182   :  { %v4638_v14 = vmax.f32 %v4636_v53, %v4637_v45  ;;  %v4645_v30 = vmax.f32 %v4643_v8, %v4644_v47  ;;  %v4720_v11 = vmax.f32 %v4718_v2, %v4719_v46  ;;  %v14862_v59 = vrot.slane %v11883_v21, 4 }
 0x183   :  { %v4726_v61 = vrot.slane %v4725_v25, 2  ;;  %v4689_v57 = vrot.slane %v4688_v48, 4  ;;  %v4695_v52 = vsel %vm4519_vm9, %v3292_v0, -inf  ;;  %v4702_v54 = vsel %vm4519_vm9, %v3291_v23, -inf }
 0x184   :  { %v4571_v41 = vmax.f32 %v11883_v21, %v14862_v59  ;;  %v4733_v28 = vrot.slane %v4732_v31, 2  ;;  %v4739_v19 = vmax.f32 %v4737_v44, %v4738_v63  ;;  %v4709_v50 = vsel %vm4519_vm9, %v3293_v15, -inf  ;;  %v1872_v15 = vpop.permute.xlu0 %1871 }
 0x185   :  { %v3328_v55 = vcombine.high %v3056_v10, %v3056_v10  ;;  %v4652_v9 = vmax.f32 %v4650_v5, %v4651_v40  ;;  %v4658_v53 = vrot.slane %v4657_v60, 1  ;;  %v3335_v8 = vrot.slane %v3056_v10, %v11775_v36 }
 0x186   :  { %v4572_v2 = vrot.slane %v4571_v41, 2  ;;  %v7017_v21 = vsel %vm6996_vm11, %v4645_v30, %v4638_v14  ;;  %v4721_v26 = vrot.slane %v4720_v11, 1  ;;  %v4696_v45 = vrot.slane %v4695_v52, 4 }
 0x187   :  { %v4703_v47 = vrot.slane %v4702_v54, 4  ;;  %v12001_v46 = vmax.f32 %v11969_v18, %v4679_v16  ;;  %v4727_v44 = vmax.f32 %v4725_v25, %v4726_v61  ;;  %v4690_v23 = vmax.f32 %v4688_v48, %v4689_v57  ;;  %v1874_v61 = vpop.permute.xlu1 %1873 }
 0x188   :  { %v4710_v0 = vrot.slane %v4709_v50, 4  ;;  %v4734_v24 = vmax.f32 %v4732_v31, %v4733_v28  ;;  %v4740_v63 = vrot.slane %v4739_v19, 2  ;;  %v3342_v10 = vrot.slane %v3328_v55, %v11775_v36 }
 0x189   :  { %v12005_v30 = vmax.f32 %v4657_v60, %v4658_v53  ;;  %v12008_v14 = vsel %vm6998_vm12, %v4652_v9, %v7017_v21  ;;  %v3343_v40 = vcombine.high %v3335_v8, %v3335_v8  ;;  %v4573_v18 = vmax.f32 %v4571_v41, %v4572_v2 }
 0x18a   :  { %v12010_v16 = vmax.f32 %v4720_v11, %v4721_v26  ;;  %v4697_v25 = vmax.f32 %v4695_v52, %v4696_v45  ;;  %v4704_v48 = vmax.f32 %v4702_v54, %v4703_v47  ;;  %v4567_v59 = vrot.slane %v11897_v42, 1  ;;  %v2632_v26 = vpop.f32.mrf.mxu0  ;;  %v2128_v45 = vpop.permute.xlu0 %2127 }
 0x18b   :  { %v4728_v31 = vrot.slane %v4727_v44, 1  ;;  %v4691_v57 = vrot.slane %v4690_v23, 2  ;;  %v4711_v28 = vmax.f32 %v4709_v50, %v4710_v0  ;;  %v4772_v55 = vsel %vm4519_vm9, %v3335_v8, -inf }
 0x18c   :  { %v4735_v5 = vrot.slane %v4734_v24, 1  ;;  %v12014_v60 = vmax.f32 %v4739_v19, %v4740_v63  ;;  %v3344_v53 = vcombine.high %v3342_v10, %v3342_v10  ;;  %v2262_v9 = vsel %vm2203_vm6, %v11849_v39, %v1872_v15 }
 0x18d   :  { %v4779_v11 = vsel %vm4519_vm9, %v3343_v40, -inf  ;;  %v14863_v41 = vrot.slane %v11886_v4, 1  ;;  %v4574_v54 = vrot.slane %v4573_v18, 1  ;;  %v6999_v50 = vsel %vm6998_vm12, %v11910_v27, %v11920_v20  ;;  %v2130_v40 = vpop.permute.xlu1 %2129 }
 0x18e   :  { %v4698_v2 = vrot.slane %v4697_v25, 2  ;;  %v4705_v8 = vrot.slane %v4704_v48, 2  ;;  %v4773_v21 = vrot.slane %v4772_v55, 4  ;;  %v4568_v19 = vmax.f32 %v11897_v42, %v4567_v59 }
 0x18f   :  { %v4561_v52 = vmax.f32 %v11886_v4, %v14863_v41  ;;  %v4692_v47 = vmax.f32 %v4690_v23, %v4691_v57  ;;  %v4712_v39 = vrot.slane %v4711_v28, 2  ;;  %v4786_v0 = vsel %vm4519_vm9, %v3342_v10, -inf }
 0x190   :  { %v7001_v63 = vsel %vm7000_vm13, %v11917_v62, %v6999_v50  ;;  %v4780_v4 = vrot.slane %v4779_v11, 4  ;;  %v4793_v15 = vsel %vm4519_vm9, %v3344_v53, -inf  ;;  %v2263_v20 = vsel %vm2203_vm6, %v11856_v37, %v1874_v61  ;;  %v10442_v53 = vpop.f32.mrf.mxu0 }
 0x191   :  { %v7003_v27 = vsel %vm7002_vm14, %v11901_v17, %v7001_v63  ;;  %v4575_v42 = vmax.f32 %v4573_v18, %v4574_v54  ;;  %v2923_v23 = vmul.f32 %v11761_v12, %v2632_v26  ;;  %v2327_v10 = vsel %vm2268_vm7, %v2262_v9, %v2128_v45 }
 0x192   :  { %v7005_v59 = vsel %vm7004_vm15, %v4561_v52, %v7003_v27  ;;  %v4699_v57 = vmax.f32 %v4697_v25, %v4698_v2  ;;  %v4706_v41 = vmax.f32 %v4704_v48, %v4705_v8  ;;  %v4774_v62 = vmax.f32 %v4772_v55, %v4773_v21  ;;  %10512 = vmatprep.mubr.msk.f32.mxu1 %vm2333_vm8, %v2327_v10 }
 0x193   :  { %v7007_v50 = vsel %vm7006_vm2, %v4568_v19, %v7005_v59  ;;  %v4787_v17 = vrot.slane %v4786_v0, 4  ;;  %v2991_v37 = vadd.f32 %v11765_v58, %v2923_v23  ;;  %v2328_v18 = vsel %vm2268_vm7, %v2263_v20, %v2130_v40 }
 0x194   :  { %v12040_v63 = vsel %vm7008_vm3, %v4575_v42, %v7007_v50  ;;  %v12044_v61 = vmax.f32 %v4727_v44, %v4728_v31  ;;  %v4713_v52 = vmax.f32 %v4711_v28, %v4712_v39  ;;  %v4781_v9 = vmax.f32 %v4779_v11, %v4780_v4  ;;  %10513 = vmatmul.mubr.msk.f32.gmra.mxu1 %vm2333_vm8, %v2328_v18  ;;  %v1876_v42 = vpop.permute.xlu0 %1875 }
 0x195   :  { %14864 = vst [vmem:[#allocation10_spill] sm:$0xff] %v12040_v63  ;;  %v4794_v25 = vrot.slane %v4793_v15, 4  ;;  %7611 = vrot.lane.b32.xlu0 %v12040_v63, %s10611_s24  ;;  %v12049_v48 = vmax.f32 %v4734_v24, %v4735_v5  ;;  %v4693_v55 = vrot.slane %v4692_v47, 1  ;;  %v3055_v54 = vmax.f32 %v2991_v37, 0.0  ;;  %v2642_v37 = vpop.f32.mrf.mxu0 }
 0x196   :  { %v2926_v2 = vmul.f32 %v10442_v53, %v11761_v12  ;;  %v4700_v8 = vrot.slane %v4699_v57, 1  ;;  %v4707_v21 = vrot.slane %v4706_v41, 1  ;;  %v4775_v19 = vrot.slane %v4774_v62, 2 }
 0x197   :  { %v14865_v44 = vrot.slane %v11913_v34, 4  ;;  %v4788_v28 = vmax.f32 %v4786_v0, %v4787_v17  ;;  %v3311_v11 = vcombine.high %v3055_v54, %v3055_v54  ;;  %v3318_v26 = vrot.slane %v3055_v54, %v11775_v36  ;;  %v1878_v54 = vpop.permute.xlu1 %1877 }
 0x198   :  { %v2994_v45 = vadd.f32 %v11765_v58, %v2926_v2  ;;  %v4714_v39 = vrot.slane %v4713_v52, 1  ;;  %v4782_v5 = vrot.slane %v4781_v9, 2  ;;  %v4795_v24 = vmax.f32 %v4793_v15, %v4794_v25 }
 0x199   :  { %v4627_v31 = vmax.f32 %v11913_v34, %v14865_v44  ;;  %v7011_v4 = vsel %vm6998_vm12, %v11961_v7, %v11967_v49  ;;  %v3325_v27 = vrot.slane %v3311_v11, %v11775_v36  ;;  %v3326_v20 = vcombine.high %v3318_v26, %v3318_v26 }
 0x19a   :  { %v4744_v40 = vsel %vm4519_vm9, %v3318_v26, -inf  ;;  %v4694_v59 = vmax.f32 %v4692_v47, %v4693_v55  ;;  %v4701_v23 = vmax.f32 %v4699_v57, %v4700_v8  ;;  %v3058_v10 = vmax.f32 %v2994_v45, 0.0 }
 0x19b   :  { %v4628_v34 = vrot.slane %v4627_v31, 2  ;;  %v4708_v50 = vmax.f32 %v4706_v41, %v4707_v21  ;;  %v4776_v53 = vmax.f32 %v4774_v62, %v4775_v19  ;;  %v4789_v17 = vrot.slane %v4788_v28, 2 }
 0x19c   :  { %v7012_v15 = vsel %vm7000_vm13, %v11964_v56, %v7011_v4  ;;  %v4796_v7 = vrot.slane %v4795_v24, 2  ;;  %v3327_v49 = vcombine.high %v3325_v27, %v3325_v27  ;;  %v4745_v18 = vrot.slane %v4744_v40, 4 }
 0x19d   :  { %v4751_v25 = vsel %vm4519_vm9, %v3326_v20, -inf  ;;  %v12066_v2 = vmax.f32 %v4713_v52, %v4714_v39  ;;  %v4783_v44 = vmax.f32 %v4781_v9, %v4782_v5  ;;  %v4623_v47 = vrot.slane %v11934_v3, 1  ;;  %v2132_v9 = vpop.permute.xlu0 %2131 }
 0x19e   :  { %v4629_v57 = vmax.f32 %v4627_v31, %v4628_v34  ;;  %v4758_v41 = vsel %vm4519_vm9, %v3325_v27, -inf  ;;  %v3362_v62 = vcombine.high %v3058_v10, %v3058_v10  ;;  %v7013_v55 = vsel %vm7002_vm14, %v11954_v43, %v7012_v15 }
 0x19f   :  { %v2925_v56 = vmul.f32 %v11761_v12, %v2642_v37  ;;  %v7024_v8 = vsel %vm6996_vm11, %v4701_v23, %v4694_v59  ;;  %v4777_v21 = vrot.slane %v4776_v53, 1  ;;  %v4752_v19 = vrot.slane %v4751_v25, 4 }
 0x1a0   :  { %v14866_v11 = vrot.slane %v11932_v33, 1  ;;  %v4790_v26 = vmax.f32 %v4788_v28, %v4789_v17  ;;  %v12077_v45 = vmax.f32 %v4795_v24, %v4796_v7  ;;  %v4746_v31 = vmax.f32 %v4744_v40, %v4745_v18  ;;  %v2134_v28 = vpop.permute.xlu1 %2133 }
 0x1a1   :  { %v4765_v39 = vsel %vm4519_vm9, %v3327_v49, -inf  ;;  %v4759_v5 = vrot.slane %v4758_v41, 4  ;;  %v3369_v43 = vrot.slane %v3058_v10, %v11775_v36  ;;  %v4630_v4 = vrot.slane %v4629_v57, 1 }
 0x1a2   :  { %v4617_v52 = vmax.f32 %v11932_v33, %v14866_v11  ;;  %14867 = vst [vmem:[#allocation11_spill] sm:$0xff] %v12077_v45  ;;  %v4784_v20 = vrot.slane %v4783_v44, 1  ;;  %v12083_v34 = vrot.slane %v3362_v62, %v11775_v36  ;;  %v4624_v59 = vmax.f32 %v11934_v3, %v4623_v47  ;;  %v1880_v62 = vpop.permute.xlu0 %1879 }
 0x1a3   :  { %v2993_v33 = vadd.f32 %v11765_v58, %v2925_v56  ;;  %v12088_v24 = vsel %vm6998_vm12, %v4708_v50, %v7024_v8  ;;  %v12090_v40 = vmax.f32 %v4776_v53, %v4777_v21  ;;  %v4753_v23 = vmax.f32 %v4751_v25, %v4752_v19  ;;  %v10445_v56 = vpop.f32.mrf.mxu0 }
 0x1a4   :  { %v7014_v27 = vsel %vm7004_vm15, %v4617_v52, %v7013_v55  ;;  %v4766_v17 = vrot.slane %v4765_v39, 4  ;;  %v4791_v10 = vrot.slane %v4790_v26, 1  ;;  %v4747_v37 = vrot.slane %v4746_v31, 2 }
 0x1a5   :  { %14868 = vst [vmem:[#allocation12_spill] sm:$0xff] %v12090_v40  ;;  %v7015_v7 = vsel %vm7006_vm2, %v4624_v59, %v7014_v27  ;;  %v4760_v49 = vmax.f32 %v4758_v41, %v4759_v5  ;;  %v3377_v18 = vcombine.high %v3369_v43, %v3369_v43  ;;  %v4828_v3 = vsel %vm4519_vm9, %v3369_v43, -inf }
 0x1a6   :  { %v4631_v47 = vmax.f32 %v4629_v57, %v4630_v4  ;;  %v12095_v55 = vmax.f32 %v4783_v44, %v4784_v20  ;;  %v4842_v50 = vsel %vm4519_vm9, %v12083_v34, -inf  ;;  %v2264_v53 = vsel %vm2203_vm6, %v11864_v51, %v1876_v42  ;;  %v1882_v51 = vpop.permute.xlu1 %1881 }
 0x1a7   :  { %v3057_v25 = vmax.f32 %v2993_v33, 0.0  ;;  %v4754_v8 = vrot.slane %v4753_v23, 2  ;;  %v4767_v21 = vmax.f32 %v4765_v39, %v4766_v17  ;;  %v2265_v41 = vsel %vm2203_vm6, %v11868_v35, %v1878_v54  ;;  %v2136_v33 = vpop.permute.xlu0 %2135 }
 0x1a8   :  { %14869 = vst [vmem:[#allocation13_spill] sm:$0xff] %v12095_v55  ;;  %v12102_v19 = vsel %vm7008_vm3, %v4631_v47, %v7015_v7  ;;  %v12106_v57 = vmax.f32 %v4790_v26, %v4791_v10  ;;  %v4748_v44 = vmax.f32 %v4746_v31, %v4747_v37  ;;  %v3378_v11 = vcombine.high %v12083_v34, %v12083_v34  ;;  %v2652_v31 = vpop.f32.mrf.mxu0 }
 0x1a9   :  { %14870 = vst [vmem:[#allocation14_spill] sm:$0xff] %v12102_v19  ;;  %v4829_v52 = vrot.slane %v4828_v3, 4  ;;  %7613 = vrot.lane.b32.xlu1 %v12102_v19, %s10611_s24  ;;  %v4761_v42 = vrot.slane %v4760_v49, 2  ;;  %v4835_v39 = vsel %vm4519_vm9, %v3377_v18, -inf  ;;  %v4843_v5 = vrot.slane %v4842_v50, 4 }
 0x1aa   :  { %14871 = vst [vmem:[#allocation15_spill] sm:$0xff] %v12106_v57  ;;  %v3345_v43 = vcombine.high %v3057_v25, %v3057_v25  ;;  %v3352_v4 = vrot.slane %v3057_v25, %v11775_v36  ;;  %v2329_v35 = vsel %vm2268_vm7, %v2264_v53, %v2132_v9  ;;  %v2330_v54 = vsel %vm2268_vm7, %v2265_v41, %v2134_v28 }
 0x1ab   :  { %v2928_v26 = vmul.f32 %v10445_v56, %v11761_v12  ;;  %v4755_v27 = vmax.f32 %v4753_v23, %v4754_v8  ;;  %v4768_v20 = vrot.slane %v4767_v21, 2  ;;  %v2266_v59 = vsel %vm2203_vm6, %v11874_v38, %v1880_v62  ;;  %10515 = vmatprep.mubr.msk.f32.mxu1 %vm2333_vm8, %v2329_v35  ;;  %v2138_v62 = vpop.permute.xlu1 %2137 }
 0x1ac   :  { %v3359_v34 = vrot.slane %v3345_v43, %v11775_v36  ;;  %v4830_v17 = vmax.f32 %v4828_v3, %v4829_v52  ;;  %v4836_v10 = vrot.slane %v4835_v39, 4  ;;  %v3360_v37 = vcombine.high %v3352_v4, %v3352_v4  ;;  %10516 = vmatmul.mubr.msk.f32.gmra.mxu1 %vm2333_vm8, %v2330_v54 }
 0x1ad   :  { %v4800_v9 = vsel %vm4519_vm9, %v3352_v4, -inf  ;;  %v2996_v23 = vadd.f32 %v11765_v58, %v2928_v26  ;;  %v2927_v18 = vmul.f32 %v11761_v12, %v2652_v31  ;;  %v4762_v47 = vmax.f32 %v4760_v49, %v4761_v42 }
 0x1ae   :  { %v3361_v28 = vcombine.high %v3359_v34, %v3359_v34  ;;  %v4814_v7 = vsel %vm4519_vm9, %v3359_v34, -inf  ;;  %v4801_v53 = vrot.slane %v4800_v9, 4  ;;  %v2267_v38 = vsel %vm2203_vm6, %v11880_v1, %v1882_v51 }
 0x1af   :  { %v2331_v3 = vsel %vm2268_vm7, %v2266_v59, %v2136_v33  ;;  %v4844_v25 = vmax.f32 %v4842_v50, %v4843_v5  ;;  %v4807_v56 = vsel %vm4519_vm9, %v3360_v37, -inf  ;;  %v4815_v8 = vrot.slane %v4814_v7, 4 }
 0x1b0   :  { %v2995_v41 = vadd.f32 %v11765_v58, %v2927_v18  ;;  %10518 = vmatprep.mubr.msk.f32.mxu1 %vm2333_vm8, %v2331_v3  ;;  %v4749_v52 = vrot.slane %v4748_v44, 1  ;;  %v4756_v43 = vrot.slane %v4755_v27, 1  ;;  %v4769_v4 = vmax.f32 %v4767_v21, %v4768_v20 }
 0x1b1   :  { %v4831_v35 = vrot.slane %v4830_v17, 2  ;;  %v4837_v49 = vmax.f32 %v4835_v39, %v4836_v10  ;;  %v4821_v42 = vsel %vm4519_vm9, %v3361_v28, -inf  ;;  %v3060_v54 = vmax.f32 %v2996_v23, 0.0 }
 0x1b2   :  { %v2332_v1 = vsel %vm2268_vm7, %v2267_v38, %v2138_v62  ;;  %v4802_v50 = vmax.f32 %v4800_v9, %v4801_v53  ;;  %v4808_v5 = vrot.slane %v4807_v56, 4  ;;  %v3059_v26 = vmax.f32 %v2995_v41, 0.0 }
 0x1b3   :  { %10519 = vmatmul.mubr.msk.f32.gmra.mxu1 %vm2333_vm8, %v2332_v1  ;;  %v4763_v31 = vrot.slane %v4762_v47, 1  ;;  %v4845_v34 = vrot.slane %v4844_v25, 2  ;;  %v12137_v59 = vsel %vm4519_vm9, %v3378_v11, -inf  ;;  %v4816_v21 = vmax.f32 %v4814_v7, %v4815_v8 }
 0x1b4   :  { %14872 = vst [vmem:[#allocation16_spill] sm:$0xff] %v12137_v59  ;;  %v4757_v20 = vmax.f32 %v4755_v27, %v4756_v43  ;;  %v4770_v39 = vrot.slane %v4769_v4, 1  ;;  %v4832_v33 = vmax.f32 %v4830_v17, %v4831_v35  ;;  %v4822_v10 = vrot.slane %v4821_v42, 4 }
 0x1b5   :  { %v4750_v28 = vmax.f32 %v4748_v44, %v4749_v52  ;;  %v4838_v23 = vrot.slane %v4837_v49, 2  ;;  %v3403_v9 = vrot.slane %v3060_v54, %v11775_v36  ;;  %v4803_v18 = vrot.slane %v4802_v50, 2  ;;  %v10448_v44 = vpop.f32.mrf.mxu0 }
 0x1b6   :  { %v4809_v53 = vmax.f32 %v4807_v56, %v4808_v5  ;;  %v3396_v38 = vcombine.high %v3060_v54, %v3060_v54  ;;  %v3379_v3 = vcombine.high %v3059_v26, %v3059_v26  ;;  %v4764_v62 = vmax.f32 %v4762_v47, %v4763_v31 }
 0x1b7   :  { %v12141_v41 = vmax.f32 %v4844_v25, %v4845_v34  ;;  %v4817_v7 = vrot.slane %v4816_v21, 2  ;;  %v12144_v27 = vmax.f32 %v4769_v4, %v4770_v39  ;;  %v7031_v17 = vsel %vm6996_vm11, %v4757_v20, %v4750_v28 }
 0x1b8   :  { %v4833_v8 = vrot.slane %v4832_v33, 1  ;;  %v4823_v43 = vmax.f32 %v4821_v42, %v4822_v10  ;;  %v12147_v52 = vmax.f32 %v4837_v49, %v4838_v23  ;;  %v3411_v35 = vcombine.high %v3403_v9, %v3403_v9 }
 0x1b9   :  { %14873 = vst [vmem:[#allocation17_spill] sm:$0xff] %v12141_v41  ;;  %14874 = vst [vmem:[#allocation18_spill] sm:$0xff] %v12144_v27  ;;  %v4884_v56 = vsel %vm4519_vm9, %v3403_v9, -inf  ;;  %v3386_v54 = vrot.slane %v3059_v26, %v11775_v36  ;;  %v4804_v47 = vmax.f32 %v4802_v50, %v4803_v18  ;;  %v4810_v25 = vrot.slane %v4809_v53, 2  ;;  %v2662_v26 = vpop.f32.mrf.mxu0 }
 0x1ba   :  { %14875 = vst [vmem:[#allocation19_spill] sm:$0xff] %v12147_v52  ;;  %v3410_v1 = vrot.slane %v3396_v38, %v11775_v36  ;;  %v3393_v5 = vrot.slane %v3379_v3, %v11775_v36  ;;  %v4818_v34 = vmax.f32 %v4816_v21, %v4817_v7  ;;  %v12156_v49 = vsel %vm6998_vm12, %v4764_v62, %v7031_v17 }
 0x1bb   :  { %v3394_v42 = vcombine.high %v3386_v54, %v3386_v54  ;;  %14876 = vst [vmem:[#allocation20_spill] sm:$0xff] %v12156_v49  ;;  %v12158_v20 = vmax.f32 %v4832_v33, %v4833_v8  ;;  %v4824_v39 = vrot.slane %v4823_v43, 2  ;;  %v4885_v10 = vrot.slane %v4884_v56, 4 }
 0x1bc   :  { %v4891_v28 = vsel %vm4519_vm9, %v3411_v35, -inf  ;;  %v3395_v23 = vcombine.high %v3393_v5, %v3393_v5  ;;  %v2930_v9 = vmul.f32 %v10448_v44, %v11761_v12  ;;  %v4805_v18 = vrot.slane %v4804_v47, 1 }
 0x1bd   :  { %14877 = vst [vmem:[#allocation21_spill] sm:$0xff] %v12158_v20  ;;  %v4811_v38 = vmax.f32 %v4809_v53, %v4810_v25  ;;  %v3412_v3 = vcombine.high %v3410_v1, %v3410_v1  ;;  %v4898_v21 = vsel %vm4519_vm9, %v3410_v1, -inf  ;;  %v4819_v7 = vrot.slane %v4818_v34, 1 }
 0x1be   :  { %v4863_v62 = vsel %vm4519_vm9, %v3394_v42, -inf  ;;  %v2998_v33 = vadd.f32 %v11765_v58, %v2930_v9  ;;  %v2929_v17 = vmul.f32 %v11761_v12, %v2662_v26  ;;  %v4825_v8 = vmax.f32 %v4823_v43, %v4824_v39 }
 0x1bf   :  { %v4886_v11 = vmax.f32 %v4884_v56, %v4885_v10  ;;  %v4892_v50 = vrot.slane %v4891_v28, 4  ;;  %v4856_v35 = vsel %vm4519_vm9, %v3386_v54, -inf  ;;  %v4870_v15 = vsel %vm4519_vm9, %v3393_v5, -inf }
 0x1c0   :  { %v4877_v44 = vsel %vm4519_vm9, %v3395_v23, -inf  ;;  %v3062_v53 = vmax.f32 %v2998_v33, 0.0  ;;  %v2997_v25 = vadd.f32 %v11765_v58, %v2929_v17  ;;  %v4806_v1 = vmax.f32 %v4804_v47, %v4805_v18 }
 0x1c1   :  { %v4812_v0 = vrot.slane %v4811_v38, 1  ;;  %v4899_v37 = vrot.slane %v4898_v21, 4  ;;  %v4864_v42 = vrot.slane %v4863_v62, 4  ;;  %v12172_v9 = vsel %vm4519_vm9, %v3412_v3, -inf }
 0x1c2   :  { %14878 = vst [vmem:[#allocation22_spill] sm:$0xff] %v12172_v9  ;;  %v4857_v26 = vrot.slane %v4856_v35, 4  ;;  %v3430_v43 = vcombine.high %v3062_v53, %v3062_v53  ;;  %v3437_v56 = vrot.slane %v3062_v53, %v11775_v36  ;;  %v12175_v39 = vmax.f32 %v4818_v34, %v4819_v7  ;;  %v10451_v7 = vpop.f32.mrf.mxu0 }
 0x1c3   :  { %v4826_v54 = vrot.slane %v4825_v8, 1  ;;  %v4871_v5 = vrot.slane %v4870_v15, 4  ;;  %v4878_v10 = vrot.slane %v4877_v44, 4  ;;  %v3061_v18 = vmax.f32 %v2997_v25, 0.0 }
 0x1c4   :  { %14879 = vst [vmem:[#allocation23_spill] sm:$0xff] %v12175_v39  ;;  %v3444_v23 = vrot.slane %v3430_v43, %v11775_v36  ;;  %v3445_v33 = vcombine.high %v3437_v56, %v3437_v56  ;;  %v4940_v47 = vsel %vm4519_vm9, %v3437_v56, -inf  ;;  %v4887_v17 = vrot.slane %v4886_v11, 2 }
 0x1c5   :  { %v4893_v31 = vmax.f32 %v4891_v28, %v4892_v50  ;;  %v4865_v51 = vmax.f32 %v4863_v62, %v4864_v42  ;;  %v4941_v3 = vrot.slane %v4940_v47, 4  ;;  %v4813_v4 = vmax.f32 %v4811_v38, %v4812_v0 }
 0x1c6   :  { %v4858_v29 = vmax.f32 %v4856_v35, %v4857_v26  ;;  %v4947_v20 = vsel %vm4519_vm9, %v3445_v33, -inf  ;;  %v4954_v34 = vsel %vm4519_vm9, %v3444_v23, -inf  ;;  %v4900_v53 = vmax.f32 %v4898_v21, %v4899_v37 }
 0x1c7   :  { %v4872_v39 = vmax.f32 %v4870_v15, %v4871_v5  ;;  %v4948_v43 = vrot.slane %v4947_v20, 4  ;;  %v4879_v41 = vmax.f32 %v4877_v44, %v4878_v10  ;;  %v3446_v59 = vcombine.high %v3444_v23, %v3444_v23 }
 0x1c8   :  { %v4955_v56 = vrot.slane %v4954_v34, 4  ;;  %v3413_v25 = vcombine.high %v3061_v18, %v3061_v18  ;;  %v12182_v57 = vmax.f32 %v4825_v8, %v4826_v54  ;;  %v4866_v50 = vrot.slane %v4865_v51, 2 }
 0x1c9   :  { %v4942_v28 = vmax.f32 %v4940_v47, %v4941_v3  ;;  %v2932_v0 = vmul.f32 %v10451_v7, %v11761_v12  ;;  %v4888_v38 = vmax.f32 %v4886_v11, %v4887_v17  ;;  %v4894_v62 = vrot.slane %v4893_v31, 2 }
 0x1ca   :  { %14880 = vst [vmem:[#allocation24_spill] sm:$0xff] %v12182_v57  ;;  %v4859_v35 = vrot.slane %v4858_v29, 2  ;;  %v3420_v42 = vrot.slane %v3061_v18, %v11775_v36  ;;  %v12187_v37 = vsel %vm6996_vm11, %v4813_v4, %v4806_v1  ;;  %v4873_v15 = vrot.slane %v4872_v39, 2 }
 0x1cb   :  { %14881 = vst [vmem:[#allocation25_spill] sm:$0xff] %v12187_v37  ;;  %v4949_v21 = vmax.f32 %v4947_v20, %v4948_v43  ;;  %v3427_v44 = vrot.slane %v3413_v25, %v11775_v36  ;;  %v4880_v26 = vrot.slane %v4879_v41, 2  ;;  %v4956_v5 = vmax.f32 %v4954_v34, %v4955_v56 }
 0x1cc   :  { %v4961_v8 = vsel %vm4519_vm9, %v3446_v59, -inf  ;;  %v3428_v54 = vcombine.high %v3420_v42, %v3420_v42  ;;  %v4867_v10 = vmax.f32 %v4865_v51, %v4866_v50  ;;  %v4943_v23 = vrot.slane %v4942_v28, 2 }
 0x1cd   :  { %v4912_v11 = vsel %vm4519_vm9, %v3420_v42, -inf  ;;  %v3000_v33 = vadd.f32 %v11765_v58, %v2932_v0  ;;  %v4889_v47 = vrot.slane %v4888_v38, 1  ;;  %v4901_v18 = vrot.slane %v4900_v53, 2 }
 0x1ce   :  { %v4860_v17 = vmax.f32 %v4858_v29, %v4859_v35  ;;  %v4919_v4 = vsel %vm4519_vm9, %v3428_v54, -inf  ;;  %v4874_v1 = vmax.f32 %v4872_v39, %v4873_v15  ;;  %v4950_v20 = vrot.slane %v4949_v21, 2  ;;  %v2672_v39 = vpop.f32.mrf.mxu0 }
 0x1cf   :  { %v4962_v3 = vrot.slane %v4961_v8, 4  ;;  %v4926_v7 = vsel %vm4519_vm9, %v3427_v44, -inf  ;;  %v4881_v34 = vmax.f32 %v4879_v41, %v4880_v26  ;;  %v4957_v43 = vrot.slane %v4956_v5, 2 }
 0x1d0   :  { %v3429_v59 = vcombine.high %v3427_v44, %v3427_v44  ;;  %v4913_v56 = vrot.slane %v4912_v11, 4  ;;  %v4868_v51 = vrot.slane %v4867_v10, 1  ;;  %v4944_v25 = vmax.f32 %v4942_v28, %v4943_v23  ;;  %v10454_v28 = vpop.f32.mrf.mxu0 }
 0x1d1   :  { %v4920_v50 = vrot.slane %v4919_v4, 4  ;;  %v3064_v42 = vmax.f32 %v3000_v33, 0.0  ;;  %v12195_v52 = vmax.f32 %v4888_v38, %v4889_v47  ;;  %v12197_v0 = vmax.f32 %v4893_v31, %v4894_v62 }
 0x1d2   :  { %v12199_v29 = vmax.f32 %v4900_v53, %v4901_v18  ;;  %v4927_v35 = vrot.slane %v4926_v7, 4  ;;  %v4861_v15 = vrot.slane %v4860_v17, 1  ;;  %v4875_v54 = vrot.slane %v4874_v1, 1 }
 0x1d3   :  { %14882 = vst [vmem:[#allocation26_spill] sm:$0xff] %v12195_v52  ;;  %14883 = vst [vmem:[#allocation27_spill] sm:$0xff] %v12197_v0  ;;  %v4951_v9 = vmax.f32 %v4949_v21, %v4950_v20  ;;  %v4963_v57 = vmax.f32 %v4961_v8, %v4962_v3  ;;  %v4882_v41 = vrot.slane %v4881_v34, 1  ;;  %v4958_v26 = vmax.f32 %v4956_v5, %v4957_v43  ;;  %v2682_v43 = vpop.f32.mrf.mxu0 }
 0x1d4   :  { %14884 = vst [vmem:[#allocation28_spill] sm:$0xff] %v12199_v29  ;;  %v4914_v44 = vmax.f32 %v4912_v11, %v4913_v56  ;;  %v4933_v37 = vsel %vm4519_vm9, %v3429_v59, -inf  ;;  %v4869_v23 = vmax.f32 %v4867_v10, %v4868_v51  ;;  %v4945_v33 = vrot.slane %v4944_v25, 1 }
 0x1d5   :  { %v4921_v38 = vmax.f32 %v4919_v4, %v4920_v50  ;;  %v3464_v47 = vcombine.high %v3064_v42, %v3064_v42  ;;  %v4928_v53 = vmax.f32 %v4926_v7, %v4927_v35  ;;  %v3471_v62 = vrot.slane %v3064_v42, %v11775_v36 }
 0x1d6   :  { %v2931_v18 = vmul.f32 %v11761_v12, %v2672_v39  ;;  %v4862_v52 = vmax.f32 %v4860_v17, %v4861_v15  ;;  %v4952_v21 = vrot.slane %v4951_v9, 1  ;;  %v4964_v8 = vrot.slane %v4963_v57, 2 }
 0x1d7   :  { %v4934_v20 = vrot.slane %v4933_v37, 4  ;;  %v12205_v5 = vmax.f32 %v4874_v1, %v4875_v54  ;;  %v12207_v11 = vmax.f32 %v4881_v34, %v4882_v41  ;;  %v4959_v3 = vrot.slane %v4958_v26, 1 }
 0x1d8   :  { %v4915_v10 = vrot.slane %v4914_v44, 2  ;;  %v12210_v4 = vsel %vm6996_vm11, %v4869_v23, %v4862_v52  ;;  %v12212_v59 = vmax.f32 %v4944_v25, %v4945_v33  ;;  %v4922_v7 = vrot.slane %v4921_v38, 2 }
 0x1d9   :  { %14885 = vst [vmem:[#allocation29_spill] sm:$0xff] %v12205_v5  ;;  %14886 = vst [vmem:[#allocation30_spill] sm:$0xff] %v12207_v11  ;;  %v3478_v56 = vrot.slane %v3464_v47, %v11775_v36  ;;  %v4929_v51 = vrot.slane %v4928_v53, 2  ;;  %v4996_v17 = vsel %vm4519_vm9, %v3471_v62, -inf  ;;  %v2999_v50 = vadd.f32 %v11765_v58, %v2931_v18 }
 0x1da   :  { %14887 = vst [vmem:[#allocation31_spill] sm:$0xff] %v12210_v4  ;;  %14888 = vst [vmem:[#allocation32_spill] sm:$0xff] %v12212_v59  ;;  %v2934_v1 = vmul.f32 %v10454_v28, %v11761_v12  ;;  %v12218_v34 = vmax.f32 %v4951_v9, %v4952_v21  ;;  %v12220_v42 = vmax.f32 %v4963_v57, %v4964_v8  ;;  %v4997_v23 = vrot.slane %v4996_v17, 4 }
 0x1db   :  { %v4935_v35 = vmax.f32 %v4933_v37, %v4934_v20  ;;  %v2933_v52 = vmul.f32 %v11761_v12, %v2682_v43  ;;  %v12223_v39 = vmax.f32 %v4958_v26, %v4959_v3  ;;  %v4916_v25 = vmax.f32 %v4914_v44, %v4915_v10 }
 0x1dc   :  { %14889 = vst [vmem:[#allocation33_spill] sm:$0xff] %v12218_v34  ;;  %14890 = vst [vmem:[#allocation34_spill] sm:$0xff] %v12220_v42  ;;  %v3479_v15 = vcombine.high %v3471_v62, %v3471_v62  ;;  %v3063_v54 = vmax.f32 %v2999_v50, 0.0  ;;  %v4923_v41 = vmax.f32 %v4921_v38, %v4922_v7  ;;  %v5010_v33 = vsel %vm4519_vm9, %v3478_v56, -inf }
 0x1dd   :  { %14891 = vst [vmem:[#allocation35_spill] sm:$0xff] %v12223_v39  ;;  %v3002_v47 = vadd.f32 %v11765_v58, %v2934_v1  ;;  %v4930_v18 = vmax.f32 %v4928_v53, %v4929_v51  ;;  %v3480_v28 = vcombine.high %v3478_v56, %v3478_v56  ;;  %v4936_v21 = vrot.slane %v4935_v35, 2 }
 0x1de   :  { %v3447_v9 = vcombine.high %v3063_v54, %v3063_v54  ;;  %v3454_v57 = vrot.slane %v3063_v54, %v11775_v36  ;;  %v3001_v26 = vadd.f32 %v11765_v58, %v2933_v52  ;;  %v4917_v44 = vrot.slane %v4916_v25, 1 }
 0x1df   :  { %v3066_v8 = vmax.f32 %v3002_v47, 0.0  ;;  %v5011_v62 = vrot.slane %v5010_v33, 4  ;;  %v4924_v3 = vrot.slane %v4923_v41, 1  ;;  %v4998_v10 = vmax.f32 %v4996_v17, %v4997_v23 }
 0x1e0   :  { %v3461_v38 = vrot.slane %v3447_v9, %v11775_v36  ;;  %v3462_v20 = vcombine.high %v3454_v57, %v3454_v57  ;;  %v5003_v43 = vsel %vm4519_vm9, %v3479_v15, -inf  ;;  %v4931_v7 = vrot.slane %v4930_v18, 1 }
 0x1e1   :  { %v3505_v53 = vrot.slane %v3066_v8, %v11775_v36  ;;  %v12234_v56 = vsel %vm4519_vm9, %v3480_v28, -inf  ;;  %v3498_v50 = vcombine.high %v3066_v8, %v3066_v8  ;;  %v4937_v1 = vmax.f32 %v4935_v35, %v4936_v21 }
 0x1e2   :  { %14892 = vst [vmem:[#allocation36_spill] sm:$0xff] %v12234_v56  ;;  %v3463_v51 = vcombine.high %v3461_v38, %v3461_v38  ;;  %v4968_v52 = vsel %vm4519_vm9, %v3454_v57, -inf  ;;  %v4975_v54 = vsel %vm4519_vm9, %v3462_v20, -inf  ;;  %v3065_v47 = vmax.f32 %v3001_v26, 0.0 }
 0x1e3   :  { %v4918_v9 = vmax.f32 %v4916_v25, %v4917_v44  ;;  %v5004_v37 = vrot.slane %v5003_v43, 4  ;;  %v5012_v31 = vmax.f32 %v5010_v33, %v5011_v62  ;;  %v4982_v17 = vsel %vm4519_vm9, %v3461_v38, -inf }
 0x1e4   :  { %v4925_v15 = vmax.f32 %v4923_v41, %v4924_v3  ;;  %v4999_v23 = vrot.slane %v4998_v10, 2  ;;  %v4989_v39 = vsel %vm4519_vm9, %v3463_v51, -inf  ;;  %v3513_v42 = vcombine.high %v3505_v53, %v3505_v53  ;;  %v10457_v41 = vpop.f32.mrf.mxu0 }
 0x1e5   :  { %v4969_v34 = vrot.slane %v4968_v52, 4  ;;  %v4976_v8 = vrot.slane %v4975_v54, 4  ;;  %v3512_v35 = vrot.slane %v3498_v50, %v11775_v36  ;;  %v4932_v57 = vmax.f32 %v4930_v18, %v4931_v7 }
 0x1e6   :  { %v4938_v21 = vrot.slane %v4937_v1, 1  ;;  %v4983_v20 = vrot.slane %v4982_v17, 4  ;;  %v3481_v26 = vcombine.high %v3065_v47, %v3065_v47  ;;  %v5005_v25 = vmax.f32 %v5003_v43, %v5004_v37 }
 0x1e7   :  { %v5013_v44 = vrot.slane %v5012_v31, 2  ;;  %v4990_v33 = vrot.slane %v4989_v39, 4  ;;  %v5052_v62 = vsel %vm4519_vm9, %v3505_v53, -inf  ;;  %v7052_v38 = vsel %vm6996_vm11, %v4925_v15, %v4918_v9  ;;  %v2692_v15 = vpop.f32.mrf.mxu0 }
 0x1e8   :  { %v5000_v3 = vmax.f32 %v4998_v10, %v4999_v23  ;;  %v5059_v51 = vsel %vm4519_vm9, %v3513_v42, -inf  ;;  %v3488_v28 = vrot.slane %v3065_v47, %v11775_v36  ;;  %v4970_v56 = vmax.f32 %v4968_v52, %v4969_v34 }
 0x1e9   :  { %v4977_v59 = vmax.f32 %v4975_v54, %v4976_v8  ;;  %v3514_v50 = vcombine.high %v3512_v35, %v3512_v35  ;;  %v5066_v18 = vsel %vm4519_vm9, %v3512_v35, -inf  ;;  %v12247_v7 = vmax.f32 %v4937_v1, %v4938_v21 }
 0x1ea   :  { %v4984_v37 = vmax.f32 %v4982_v17, %v4983_v20  ;;  %v5053_v43 = vrot.slane %v5052_v62, 4  ;;  %v3495_v0 = vrot.slane %v3481_v26, %v11775_v36  ;;  %v12251_v53 = vsel %vm6998_vm12, %v4932_v57, %v7052_v38 }
 0x1eb   :  { %14893 = vst [vmem:[#allocation37_spill] sm:$0xff] %v12247_v7  ;;  %14894 = vst [vmem:[#allocation38_spill] sm:$0xff] %v12251_v53  ;;  %v4991_v9 = vmax.f32 %v4989_v39, %v4990_v33  ;;  %v5060_v10 = vrot.slane %v5059_v51, 4  ;;  %v2936_v42 = vmul.f32 %v10457_v41, %v11761_v12  ;;  %v5006_v47 = vrot.slane %v5005_v25, 2 }
 0x1ec   :  { %v12254_v34 = vmax.f32 %v5012_v31, %v5013_v44  ;;  %v5067_v52 = vrot.slane %v5066_v18, 4  ;;  %v3496_v54 = vcombine.high %v3488_v28, %v3488_v28  ;;  %v5001_v23 = vrot.slane %v5000_v3, 1 }
 0x1ed   :  { %v4971_v1 = vrot.slane %v4970_v56, 2  ;;  %v4978_v8 = vrot.slane %v4977_v59, 2  ;;  %v5073_v17 = vsel %vm4519_vm9, %v3514_v50, -inf  ;;  %v4985_v35 = vrot.slane %v4984_v37, 2 }
 0x1ee   :  { %14895 = vst [vmem:[#allocation39_spill] sm:$0xff] %v12254_v34  ;;  %v5054_v21 = vmax.f32 %v5052_v62, %v5053_v43  ;;  %v3497_v20 = vcombine.high %v3495_v0, %v3495_v0  ;;  %v2935_v57 = vmul.f32 %v11761_v12, %v2692_v15  ;;  %v4992_v39 = vrot.slane %v4991_v9, 2 }
 0x1ef   :  { %v5061_v26 = vmax.f32 %v5059_v51, %v5060_v10  ;;  %v5024_v33 = vsel %vm4519_vm9, %v3488_v28, -inf  ;;  %v3004_v41 = vadd.f32 %v11765_v58, %v2936_v42  ;;  %v5068_v31 = vmax.f32 %v5066_v18, %v5067_v52 }
 0x1f0   :  { %v5074_v44 = vrot.slane %v5073_v17, 4  ;;  %v5031_v38 = vsel %vm4519_vm9, %v3496_v54, -inf  ;;  %v5038_v34 = vsel %vm4519_vm9, %v3495_v0, -inf  ;;  %v12262_v7 = vmax.f32 %v5005_v25, %v5006_v47 }
 0x1f1   :  { %v4972_v50 = vmax.f32 %v4970_v56, %v4971_v1  ;;  %v4979_v53 = vmax.f32 %v4977_v59, %v4978_v8  ;;  %v5032_v62 = vrot.slane %v5031_v38, 4  ;;  %v4986_v43 = vmax.f32 %v4984_v37, %v4985_v35  ;;  %v10460_v1 = vpop.f32.mrf.mxu0 }
 0x1f2   :  { %14896 = vst [vmem:[#allocation40_spill] sm:$0xff] %v12262_v7  ;;  %v5055_v11 = vrot.slane %v5054_v21, 2  ;;  %v5025_v15 = vrot.slane %v5024_v33, 4  ;;  %v5045_v51 = vsel %vm4519_vm9, %v3497_v20, -inf  ;;  %v4993_v10 = vmax.f32 %v4991_v9, %v4992_v39 }
 0x1f3   :  { %v5062_v28 = vrot.slane %v5061_v26, 2  ;;  %v5039_v29 = vrot.slane %v5038_v34, 4  ;;  %v3003_v18 = vadd.f32 %v11765_v58, %v2935_v57  ;;  %v12266_v42 = vmax.f32 %v5000_v3, %v5001_v23 }
 0x1f4   :  { %v5069_v52 = vrot.slane %v5068_v31, 2  ;;  %v5075_v54 = vmax.f32 %v5073_v17, %v5074_v44  ;;  %v3068_v0 = vmax.f32 %v3004_v41, 0.0  ;;  %v4973_v25 = vrot.slane %v4972_v50, 1 }
 0x1f5   :  { %14897 = vst [vmem:[#allocation41_spill] sm:$0xff] %v12266_v42  ;;  %v4980_v47 = vrot.slane %v4979_v53, 1  ;;  %v5033_v56 = vmax.f32 %v5031_v38, %v5032_v62  ;;  %v5046_v59 = vrot.slane %v5045_v51, 4  ;;  %v4987_v8 = vrot.slane %v4986_v43, 1 }
 0x1f6   :  { %v5026_v35 = vmax.f32 %v5024_v33, %v5025_v15  ;;  %v3067_v20 = vmax.f32 %v3003_v18, 0.0  ;;  %v4994_v9 = vrot.slane %v4993_v10, 1  ;;  %v5056_v39 = vmax.f32 %v5054_v21, %v5055_v11 }
 0x1f7   :  { %v5063_v5 = vmax.f32 %v5061_v26, %v5062_v28  ;;  %v5040_v4 = vmax.f32 %v5038_v34, %v5039_v29  ;;  %v5070_v57 = vmax.f32 %v5068_v31, %v5069_v52  ;;  %v5076_v3 = vrot.slane %v5075_v54, 2 }
 0x1f8   :  { %v3539_v23 = vrot.slane %v3068_v0, %v11775_v36  ;;  %v2938_v17 = vmul.f32 %v10460_v1, %v11761_v12  ;;  %v4974_v41 = vmax.f32 %v4972_v50, %v4973_v25  ;;  %v4981_v44 = vmax.f32 %v4979_v53, %v4980_v47 }
 0x1f9   :  { %v5034_v38 = vrot.slane %v5033_v56, 2  ;;  %v5047_v62 = vmax.f32 %v5045_v51, %v5046_v59  ;;  %v12271_v42 = vmax.f32 %v4986_v43, %v4987_v8  ;;  %v5027_v37 = vrot.slane %v5026_v35, 2 }
 0x1fa   :  { %v3532_v7 = vcombine.high %v3068_v0, %v3068_v0  ;;  %v3515_v33 = vcombine.high %v3067_v20, %v3067_v20  ;;  %v12273_v15 = vmax.f32 %v4993_v10, %v4994_v9  ;;  %v5057_v11 = vrot.slane %v5056_v39, 1 }
 0x1fb   :  { %14898 = vst [vmem:[#allocation42_spill] sm:$0xff] %v12271_v42  ;;  %v5064_v21 = vrot.slane %v5063_v5, 1  ;;  %v5041_v29 = vrot.slane %v5040_v4, 2  ;;  %v5071_v34 = vrot.slane %v5070_v57, 1  ;;  %v12275_v26 = vmax.f32 %v5075_v54, %v5076_v3 }
 0x1fc   :  { %14899 = vst [vmem:[#allocation43_spill] sm:$0xff] %v12273_v15  ;;  %v3547_v31 = vcombine.high %v3539_v23, %v3539_v23  ;;  %v3006_v28 = vadd.f32 %v11765_v58, %v2938_v17  ;;  %v5035_v50 = vmax.f32 %v5033_v56, %v5034_v38  ;;  %v5048_v53 = vrot.slane %v5047_v62, 2  ;;  %v2702_v56 = vpop.f32.mrf.mxu0 }
 0x1fd   :  { %14900 = vst [vmem:[#allocation44_spill] sm:$0xff] %v12275_v26  ;;  %v5108_v51 = vsel %vm4519_vm9, %v3539_v23, -inf  ;;  %v3522_v43 = vrot.slane %v3067_v20, %v11775_v36  ;;  %v12281_v18 = vsel %vm6996_vm11, %v4981_v44, %v4974_v41  ;;  %v5028_v10 = vmax.f32 %v5026_v35, %v5027_v37 }
 0x1fe   :  { %14901 = vst [vmem:[#allocation45_spill] sm:$0xff] %v12281_v18  ;;  %v3546_v52 = vrot.slane %v3532_v7, %v11775_v36  ;;  %v3529_v0 = vrot.slane %v3515_v33, %v11775_v36  ;;  %v12285_v25 = vmax.f32 %v5056_v39, %v5057_v11  ;;  %v12287_v54 = vmax.f32 %v5063_v5, %v5064_v21 }
 0x1ff   :  { %v5042_v47 = vmax.f32 %v5040_v4, %v5041_v29  ;;  %v3530_v59 = vcombine.high %v3522_v43, %v3522_v43  ;;  %v5109_v1 = vrot.slane %v5108_v51, 4  ;;  %v5115_v8 = vsel %vm4519_vm9, %v3547_v31, -inf }
 0x200   :  { %14902 = vst [vmem:[#allocation46_spill] sm:$0xff] %v12285_v25  ;;  %14903 = vst [vmem:[#allocation47_spill] sm:$0xff] %v12287_v54  ;;  %v3531_v9 = vcombine.high %v3529_v0, %v3529_v0  ;;  %v3070_v20 = vmax.f32 %v3006_v28, 0.0  ;;  %v12290_v3 = vmax.f32 %v5070_v57, %v5071_v34  ;;  %v5036_v35 = vrot.slane %v5035_v50, 1  ;;  %v10463_v25 = vpop.f32.mrf.mxu0 }
 0x201   :  { %v5049_v7 = vmax.f32 %v5047_v62, %v5048_v53  ;;  %v5029_v23 = vrot.slane %v5028_v10, 1  ;;  %v3548_v17 = vcombine.high %v3546_v52, %v3546_v52  ;;  %v5122_v39 = vsel %vm4519_vm9, %v3546_v52, -inf }
 0x202   :  { %14904 = vst [vmem:[#allocation48_spill] sm:$0xff] %v12290_v3  ;;  %v2937_v5 = vmul.f32 %v11761_v12, %v2702_v56  ;;  %v5116_v4 = vrot.slane %v5115_v8, 4  ;;  %v5080_v41 = vsel %vm4519_vm9, %v3522_v43, -inf  ;;  %v5087_v44 = vsel %vm4519_vm9, %v3530_v59, -inf }
 0x203   :  { %v5094_v38 = vsel %vm4519_vm9, %v3529_v0, -inf  ;;  %v5043_v33 = vrot.slane %v5042_v47, 1  ;;  %v5110_v57 = vmax.f32 %v5108_v51, %v5109_v1  ;;  %v5101_v11 = vsel %vm4519_vm9, %v3531_v9, -inf }
 0x204   :  { %v3573_v21 = vrot.slane %v3070_v20, %v11775_v36  ;;  %v5037_v62 = vmax.f32 %v5035_v50, %v5036_v35  ;;  %v5050_v29 = vrot.slane %v5049_v7, 1  ;;  %v5123_v34 = vrot.slane %v5122_v39, 4 }
 0x205   :  { %v3566_v31 = vcombine.high %v3070_v20, %v3070_v20  ;;  %v5081_v28 = vrot.slane %v5080_v41, 4  ;;  %v5088_v53 = vrot.slane %v5087_v44, 4  ;;  %v5095_v52 = vrot.slane %v5094_v38, 4 }
 0x206   :  { %v3581_v56 = vcombine.high %v3573_v21, %v3573_v21  ;;  %v5030_v37 = vmax.f32 %v5028_v10, %v5029_v23  ;;  %v5117_v43 = vmax.f32 %v5115_v8, %v5116_v4  ;;  %v12301_v59 = vsel %vm4519_vm9, %v3548_v17, -inf }
 0x207   :  { %14905 = vst [vmem:[#allocation49_spill] sm:$0xff] %v12301_v59  ;;  %v5102_v0 = vrot.slane %v5101_v11, 4  ;;  %v5044_v3 = vmax.f32 %v5042_v47, %v5043_v33  ;;  %v5111_v51 = vrot.slane %v5110_v57, 2  ;;  %v5164_v1 = vsel %vm4519_vm9, %v3573_v21, -inf }
 0x208   :  { %v3005_v9 = vadd.f32 %v11765_v58, %v2937_v5  ;;  %v12305_v50 = vmax.f32 %v5049_v7, %v5050_v29  ;;  %v7066_v20 = vsel %vm6996_vm11, %v5037_v62, %v5030_v37  ;;  %v5124_v35 = vmax.f32 %v5122_v39, %v5123_v34 }
 0x209   :  { %v3580_v54 = vrot.slane %v3566_v31, %v11775_v36  ;;  %v5082_v10 = vmax.f32 %v5080_v41, %v5081_v28  ;;  %v5089_v8 = vmax.f32 %v5087_v44, %v5088_v53  ;;  %v5096_v23 = vmax.f32 %v5094_v38, %v5095_v52 }
 0x20a   :  { %14906 = vst [vmem:[#allocation50_spill] sm:$0xff] %v12305_v50  ;;  %v5171_v17 = vsel %vm4519_vm9, %v3581_v56, -inf  ;;  %v5118_v4 = vrot.slane %v5117_v43, 2  ;;  %v5103_v33 = vmax.f32 %v5101_v11, %v5102_v0  ;;  %v5165_v21 = vrot.slane %v5164_v1, 4 }
 0x20b   :  { %v12312_v5 = vsel %vm6998_vm12, %v5044_v3, %v7066_v20  ;;  %v5112_v7 = vmax.f32 %v5110_v57, %v5111_v51  ;;  %v3069_v29 = vmax.f32 %v3005_v9, 0.0  ;;  %v2940_v37 = vmul.f32 %v10463_v25, %v11761_v12 }
 0x20c   :  { %14907 = vst [vmem:[#allocation51_spill] sm:$0xff] %v12312_v5  ;;  %v5125_v39 = vrot.slane %v5124_v35, 2  ;;  %v3582_v62 = vcombine.high %v3580_v54, %v3580_v54  ;;  %v5172_v34 = vrot.slane %v5171_v17, 4  ;;  %v5178_v41 = vsel %vm4519_vm9, %v3580_v54, -inf }
 0x20d   :  { %v5083_v44 = vrot.slane %v5082_v10, 2  ;;  %v5090_v38 = vrot.slane %v5089_v8, 2  ;;  %v5097_v31 = vrot.slane %v5096_v23, 2  ;;  %v3549_v28 = vcombine.high %v3069_v29, %v3069_v29 }
 0x20e   :  { %v12316_v53 = vmax.f32 %v5117_v43, %v5118_v4  ;;  %v5104_v11 = vrot.slane %v5103_v33, 2  ;;  %v5166_v52 = vmax.f32 %v5164_v1, %v5165_v21  ;;  %v3556_v3 = vrot.slane %v3069_v29, %v11775_v36  ;;  %v2712_v1 = vpop.f32.mrf.mxu0 }
 0x20f   :  { %v5113_v56 = vrot.slane %v5112_v7, 1  ;;  %v5179_v57 = vrot.slane %v5178_v41, 4  ;;  %v3563_v0 = vrot.slane %v3549_v28, %v11775_v36  ;;  %v3008_v25 = vadd.f32 %v11765_v58, %v2940_v37 }
 0x210   :  { %14908 = vst [vmem:[#allocation52_spill] sm:$0xff] %v12316_v53  ;;  %v12321_v51 = vmax.f32 %v5124_v35, %v5125_v39  ;;  %v5173_v9 = vmax.f32 %v5171_v17, %v5172_v34  ;;  %v5185_v54 = vsel %vm4519_vm9, %v3582_v62, -inf  ;;  %v3564_v20 = vcombine.high %v3556_v3, %v3556_v3 }
 0x211   :  { %v5084_v47 = vmax.f32 %v5082_v10, %v5083_v44  ;;  %v5091_v59 = vmax.f32 %v5089_v8, %v5090_v38  ;;  %v5098_v43 = vmax.f32 %v5096_v23, %v5097_v31  ;;  %v5136_v4 = vsel %vm4519_vm9, %v3556_v3, -inf }
 0x212   :  { %14909 = vst [vmem:[#allocation53_spill] sm:$0xff] %v12321_v51  ;;  %v5105_v21 = vmax.f32 %v5103_v33, %v5104_v11  ;;  %v5167_v29 = vrot.slane %v5166_v52, 2  ;;  %v3565_v50 = vcombine.high %v3563_v0, %v3563_v0  ;;  %v5143_v5 = vsel %vm4519_vm9, %v3564_v20, -inf }
 0x213   :  { %v5180_v28 = vmax.f32 %v5178_v41, %v5179_v57  ;;  %v5186_v26 = vrot.slane %v5185_v54, 4  ;;  %v5150_v35 = vsel %vm4519_vm9, %v3563_v0, -inf  ;;  %v3072_v37 = vmax.f32 %v3008_v25, 0.0 }
 0x214   :  { %v5174_v39 = vrot.slane %v5173_v9, 2  ;;  %v5137_v62 = vrot.slane %v5136_v4, 4  ;;  %v2939_v10 = vmul.f32 %v11761_v12, %v2712_v1  ;;  %v5085_v8 = vrot.slane %v5084_v47, 1 }
 0x215   :  { %v5092_v23 = vrot.slane %v5091_v59, 1  ;;  %v5099_v34 = vrot.slane %v5098_v43, 1  ;;  %v5144_v44 = vrot.slane %v5143_v5, 4  ;;  %v5106_v33 = vrot.slane %v5105_v21, 1 }
 0x216   :  { %v5168_v38 = vmax.f32 %v5166_v52, %v5167_v29  ;;  %v5151_v31 = vrot.slane %v5150_v35, 4  ;;  %v5157_v11 = vsel %vm4519_vm9, %v3565_v50, -inf  ;;  %v12330_v41 = vmax.f32 %v5112_v7, %v5113_v56  ;;  %v10466_v56 = vpop.f32.mrf.mxu0 }
 0x217   :  { %v5181_v3 = vrot.slane %v5180_v28, 2  ;;  %v5187_v57 = vmax.f32 %v5185_v54, %v5186_v26  ;;  %v3607_v0 = vrot.slane %v3072_v37, %v11775_v36  ;;  %v5175_v25 = vmax.f32 %v5173_v9, %v5174_v39 }
 0x218   :  { %14910 = vst [vmem:[#allocation54_spill] sm:$0xff] %v12330_v41  ;;  %v5138_v20 = vmax.f32 %v5136_v4, %v5137_v62  ;;  %v3600_v17 = vcombine.high %v3072_v37, %v3072_v37  ;;  %v3007_v1 = vadd.f32 %v11765_v58, %v2939_v10  ;;  %v5086_v53 = vmax.f32 %v5084_v47, %v5085_v8 }
 0x219   :  { %v5093_v51 = vmax.f32 %v5091_v59, %v5092_v23  ;;  %v5145_v15 = vmax.f32 %v5143_v5, %v5144_v44  ;;  %v5158_v42 = vrot.slane %v5157_v11, 4  ;;  %v12334_v18 = vmax.f32 %v5098_v43, %v5099_v34 }
 0x21a   :  { %v12336_v52 = vmax.f32 %v5105_v21, %v5106_v33  ;;  %v5169_v50 = vrot.slane %v5168_v38, 1  ;;  %v5152_v7 = vmax.f32 %v5150_v35, %v5151_v31  ;;  %v5182_v29 = vmax.f32 %v5180_v28, %v5181_v3  ;;  %v2722_v33 = vpop.f32.mrf.mxu0 }
 0x21b   :  { %14911 = vst [vmem:[#allocation55_spill] sm:$0xff] %v12334_v18  ;;  %v5188_v26 = vrot.slane %v5187_v57, 2  ;;  %v3615_v54 = vcombine.high %v3607_v0, %v3607_v0  ;;  %v5220_v9 = vsel %vm4519_vm9, %v3607_v0, -inf  ;;  %v5176_v4 = vrot.slane %v5175_v25, 1 }
 0x21c   :  { %14912 = vst [vmem:[#allocation56_spill] sm:$0xff] %v12336_v52  ;;  %v5139_v37 = vrot.slane %v5138_v20, 2  ;;  %v3614_v39 = vrot.slane %v3600_v17, %v11775_v36  ;;  %v3071_v47 = vmax.f32 %v3007_v1, 0.0  ;;  %v12341_v59 = vsel %vm6996_vm11, %v5093_v51, %v5086_v53 }
 0x21d   :  { %14913 = vst [vmem:[#allocation57_spill] sm:$0xff] %v12341_v59  ;;  %v5146_v5 = vrot.slane %v5145_v15, 2  ;;  %v5159_v43 = vmax.f32 %v5157_v11, %v5158_v42  ;;  %v2942_v21 = vmul.f32 %v10466_v56, %v11761_v12  ;;  %v12344_v62 = vmax.f32 %v5168_v38, %v5169_v50 }
 0x21e   :  { %v5153_v35 = vrot.slane %v5152_v7, 2  ;;  %v5221_v28 = vrot.slane %v5220_v9, 4  ;;  %v3583_v10 = vcombine.high %v3071_v47, %v3071_v47  ;;  %v5183_v8 = vrot.slane %v5182_v29, 1 }
 0x21f   :  { %14914 = vst [vmem:[#allocation58_spill] sm:$0xff] %v12344_v62  ;;  %v12346_v23 = vmax.f32 %v5187_v57, %v5188_v26  ;;  %v5227_v34 = vsel %vm4519_vm9, %v3615_v54, -inf  ;;  %v3590_v17 = vrot.slane %v3071_v47, %v11775_v36  ;;  %v12350_v44 = vmax.f32 %v5175_v25, %v5176_v4 }
 0x220   :  { %v5140_v53 = vmax.f32 %v5138_v20, %v5139_v37  ;;  %v3616_v51 = vcombine.high %v3614_v39, %v3614_v39  ;;  %v3597_v42 = vrot.slane %v3583_v10, %v11775_v36  ;;  %v5147_v31 = vmax.f32 %v5145_v15, %v5146_v5 }
 0x221   :  { %14915 = vst [vmem:[#allocation59_spill] sm:$0xff] %v12346_v23  ;;  %14916 = vst [vmem:[#allocation60_spill] sm:$0xff] %v12350_v44  ;;  %v5160_v38 = vrot.slane %v5159_v43, 2  ;;  %v5234_v11 = vsel %vm4519_vm9, %v3614_v39, -inf  ;;  %v3010_v3 = vadd.f32 %v11765_v58, %v2942_v21  ;;  %v5154_v0 = vmax.f32 %v5152_v7, %v5153_v35 }
 0x222   :  { %v5222_v57 = vmax.f32 %v5220_v9, %v5221_v28  ;;  %v5228_v1 = vrot.slane %v5227_v34, 4  ;;  %v3598_v50 = vcombine.high %v3590_v17, %v3590_v17  ;;  %v3599_v56 = vcombine.high %v3597_v42, %v3597_v42 }
 0x223   :  { %v5192_v26 = vsel %vm4519_vm9, %v3590_v17, -inf  ;;  %v3074_v25 = vmax.f32 %v3010_v3, 0.0  ;;  %v2941_v20 = vmul.f32 %v11761_v12, %v2722_v33  ;;  %v12357_v54 = vmax.f32 %v5182_v29, %v5183_v8 }
 0x224   :  { %v5141_v4 = vrot.slane %v5140_v53, 1  ;;  %v5235_v37 = vrot.slane %v5234_v11, 4  ;;  %v12360_v15 = vsel %vm4519_vm9, %v3616_v51, -inf  ;;  %v5161_v39 = vmax.f32 %v5159_v43, %v5160_v38 }
 0x225   :  { %14917 = vst [vmem:[#allocation61_spill] sm:$0xff] %v12357_v54  ;;  %14918 = vst [vmem:[#allocation62_spill] sm:$0xff] %v12360_v15  ;;  %v5206_v47 = vsel %vm4519_vm9, %v3597_v42, -inf  ;;  %v3634_v7 = vcombine.high %v3074_v25, %v3074_v25  ;;  %v3641_v9 = vrot.slane %v3074_v25, %v11775_v36  ;;  %v5148_v5 = vrot.slane %v5147_v31, 1 }
 0x226   :  { %v5193_v21 = vrot.slane %v5192_v26, 4  ;;  %v5199_v35 = vsel %vm4519_vm9, %v3598_v50, -inf  ;;  %v3009_v28 = vadd.f32 %v11765_v58, %v2941_v20  ;;  %v5155_v10 = vrot.slane %v5154_v0, 1 }
 0x227   :  { %v5223_v29 = vrot.slane %v5222_v57, 2  ;;  %v5229_v8 = vmax.f32 %v5227_v34, %v5228_v1  ;;  %v5213_v17 = vsel %vm4519_vm9, %v3599_v56, -inf  ;;  %v5207_v33 = vrot.slane %v5206_v47, 4 }
 0x228   :  { %v3648_v43 = vrot.slane %v3634_v7, %v11775_v36  ;;  %v3649_v42 = vcombine.high %v3641_v9, %v3641_v9  ;;  %v5162_v38 = vrot.slane %v5161_v39, 1  ;;  %v5236_v3 = vmax.f32 %v5234_v11, %v5235_v37 }
 0x229   :  { %v5200_v54 = vrot.slane %v5199_v35, 4  ;;  %v5149_v44 = vmax.f32 %v5147_v31, %v5148_v5  ;;  %v5194_v50 = vmax.f32 %v5192_v26, %v5193_v21  ;;  %v5214_v62 = vrot.slane %v5213_v17, 4  ;;  %v10469_v31 = vpop.f32.mrf.mxu0 }
 0x22a   :  { %v3073_v20 = vmax.f32 %v3009_v28, 0.0  ;;  %v5142_v41 = vmax.f32 %v5140_v53, %v5141_v4  ;;  %v5156_v52 = vmax.f32 %v5154_v0, %v5155_v10  ;;  %v5224_v34 = vmax.f32 %v5222_v57, %v5223_v29 }
 0x22b   :  { %v5230_v1 = vrot.slane %v5229_v8, 2  ;;  %v5208_v56 = vmax.f32 %v5206_v47, %v5207_v33  ;;  %v5276_v51 = vsel %vm4519_vm9, %v3641_v9, -inf  ;;  %v5283_v23 = vsel %vm4519_vm9, %v3649_v42, -inf }
 0x22c   :  { %v5290_v7 = vsel %vm4519_vm9, %v3648_v43, -inf  ;;  %v12373_v18 = vmax.f32 %v5161_v39, %v5162_v38  ;;  %v5237_v11 = vrot.slane %v5236_v3, 2  ;;  %v5201_v37 = vmax.f32 %v5199_v35, %v5200_v54 }
 0x22d   :  { %v3650_v25 = vcombine.high %v3648_v43, %v3648_v43  ;;  %v7080_v26 = vsel %vm6996_vm11, %v5149_v44, %v5142_v41  ;;  %v5195_v5 = vrot.slane %v5194_v50, 2  ;;  %v5215_v53 = vmax.f32 %v5213_v17, %v5214_v62 }
 0x22e   :  { %14919 = vst [vmem:[#allocation63_spill] sm:$0xff] %v12373_v18  ;;  %v3617_v0 = vcombine.high %v3073_v20, %v3073_v20  ;;  %v5277_v57 = vrot.slane %v5276_v51, 4  ;;  %v5284_v4 = vrot.slane %v5283_v23, 4  ;;  %v5291_v47 = vrot.slane %v5290_v7, 4 }
 0x22f   :  { %v3624_v9 = vrot.slane %v3073_v20, %v11775_v36  ;;  %v5225_v21 = vrot.slane %v5224_v34, 1  ;;  %v5209_v28 = vrot.slane %v5208_v56, 2  ;;  %v2944_v39 = vmul.f32 %v10469_v31, %v11761_v12 }
 0x230   :  { %v3631_v10 = vrot.slane %v3617_v0, %v11775_v36  ;;  %v5202_v29 = vrot.slane %v5201_v37, 2  ;;  %v5297_v54 = vsel %vm4519_vm9, %v3650_v25, -inf  ;;  %v12382_v62 = vsel %vm6998_vm12, %v5156_v52, %v7080_v26  ;;  %v2732_v26 = vpop.f32.mrf.mxu0 }
 0x231   :  { %v3632_v35 = vcombine.high %v3624_v9, %v3624_v9  ;;  %v5248_v41 = vsel %vm4519_vm9, %v3624_v9, -inf  ;;  %14920 = vst [vmem:[#allocation64_spill] sm:$0xff] %v12382_v62  ;;  %v5196_v44 = vmax.f32 %v5194_v50, %v5195_v5  ;;  %v5216_v17 = vrot.slane %v5215_v53, 2 }
 0x232   :  { %v5249_v33 = vrot.slane %v5248_v41, 4  ;;  %v5278_v43 = vmax.f32 %v5276_v51, %v5277_v57  ;;  %v5285_v42 = vmax.f32 %v5283_v23, %v5284_v4  ;;  %v5292_v38 = vmax.f32 %v5290_v7, %v5291_v47 }
 0x233   :  { %v5255_v20 = vsel %vm4519_vm9, %v3632_v35, -inf  ;;  %v5298_v0 = vrot.slane %v5297_v54, 4  ;;  %v3633_v15 = vcombine.high %v3631_v10, %v3631_v10  ;;  %v5262_v31 = vsel %vm4519_vm9, %v3631_v10, -inf }
 0x234   :  { %v3012_v25 = vadd.f32 %v11765_v58, %v2944_v39  ;;  %v12387_v18 = vmax.f32 %v5229_v8, %v5230_v1  ;;  %v5203_v9 = vmax.f32 %v5201_v37, %v5202_v29  ;;  %v5210_v59 = vmax.f32 %v5208_v56, %v5209_v28 }
 0x235   :  { %v5250_v52 = vmax.f32 %v5248_v41, %v5249_v33  ;;  %v12389_v50 = vmax.f32 %v5236_v3, %v5237_v11  ;;  %v5197_v5 = vrot.slane %v5196_v44, 1  ;;  %v5217_v51 = vmax.f32 %v5215_v53, %v5216_v17  ;;  %v10472_v33 = vpop.f32.mrf.mxu0 }
 0x236   :  { %14921 = vst [vmem:[#allocation65_spill] sm:$0xff] %v12387_v18  ;;  %v5256_v23 = vrot.slane %v5255_v20, 4  ;;  %v5279_v7 = vrot.slane %v5278_v43, 2  ;;  %v5286_v57 = vrot.slane %v5285_v42, 2  ;;  %v5293_v4 = vrot.slane %v5292_v38, 2 }
 0x237   :  { %14922 = vst [vmem:[#allocation66_spill] sm:$0xff] %v12389_v50  ;;  %v5263_v47 = vrot.slane %v5262_v31, 4  ;;  %v5299_v35 = vmax.f32 %v5297_v54, %v5298_v0  ;;  %v5269_v10 = vsel %vm4519_vm9, %v3633_v15, -inf  ;;  %v3076_v62 = vmax.f32 %v3012_v25, 0.0 }
 0x238   :  { %v2943_v8 = vmul.f32 %v11761_v12, %v2732_v26  ;;  %v12393_v1 = vmax.f32 %v5224_v34, %v5225_v21  ;;  %v5204_v56 = vrot.slane %v5203_v9, 1  ;;  %v5211_v37 = vrot.slane %v5210_v59, 1 }
 0x239   :  { %v5251_v28 = vrot.slane %v5250_v52, 2  ;;  %v5218_v11 = vrot.slane %v5217_v51, 1  ;;  %v5257_v53 = vmax.f32 %v5255_v20, %v5256_v23  ;;  %v5280_v29 = vmax.f32 %v5278_v43, %v5279_v7 }
 0x23a   :  { %14923 = vst [vmem:[#allocation67_spill] sm:$0xff] %v12393_v1  ;;  %v3011_v39 = vadd.f32 %v11765_v58, %v2943_v8  ;;  %v5287_v41 = vmax.f32 %v5285_v42, %v5286_v57  ;;  %v5264_v17 = vmax.f32 %v5262_v31, %v5263_v47  ;;  %v5270_v54 = vrot.slane %v5269_v10, 4 }
 0x23b   :  { %v5198_v15 = vmax.f32 %v5196_v44, %v5197_v5  ;;  %v5294_v0 = vmax.f32 %v5292_v38, %v5293_v4  ;;  %v5300_v25 = vrot.slane %v5299_v35, 2  ;;  %v3675_v34 = vrot.slane %v3076_v62, %v11775_v36 }
 0x23c   :  { %v5205_v21 = vmax.f32 %v5203_v9, %v5204_v56  ;;  %v12398_v26 = vmax.f32 %v5210_v59, %v5211_v37  ;;  %v5252_v1 = vmax.f32 %v5250_v52, %v5251_v28  ;;  %v3668_v50 = vcombine.high %v3076_v62, %v3076_v62  ;;  %v2742_v56 = vpop.f32.mrf.mxu0 }
 0x23d   :  { %v12400_v3 = vmax.f32 %v5217_v51, %v5218_v11  ;;  %v5258_v20 = vrot.slane %v5257_v53, 2  ;;  %v3075_v23 = vmax.f32 %v3011_v39, 0.0  ;;  %v2946_v43 = vmul.f32 %v10472_v33, %v11761_v12 }
 0x23e   :  { %14924 = vst [vmem:[#allocation68_spill] sm:$0xff] %v12398_v26  ;;  %v5281_v42 = vrot.slane %v5280_v29, 1  ;;  %v5288_v31 = vrot.slane %v5287_v41, 1  ;;  %v5265_v7 = vrot.slane %v5264_v17, 2  ;;  %v5271_v57 = vmax.f32 %v5269_v10, %v5270_v54 }
 0x23f   :  { %14925 = vst [vmem:[#allocation69_spill] sm:$0xff] %v12400_v3  ;;  %v5295_v44 = vrot.slane %v5294_v0, 1  ;;  %v12403_v38 = vmax.f32 %v5299_v35, %v5300_v25  ;;  %v5332_v5 = vsel %vm4519_vm9, %v3675_v34, -inf  ;;  %v3651_v9 = vcombine.high %v3075_v23, %v3075_v23 }
 0x240   :  { %v12407_v59 = vsel %vm6996_vm11, %v5205_v21, %v5198_v15  ;;  %v5253_v62 = vrot.slane %v5252_v1, 1  ;;  %v3682_v52 = vrot.slane %v3668_v50, %v11775_v36  ;;  %v3683_v51 = vcombine.high %v3675_v34, %v3675_v34 }
 0x241   :  { %14926 = vst [vmem:[#allocation70_spill] sm:$0xff] %v12403_v38  ;;  %14927 = vst [vmem:[#allocation71_spill] sm:$0xff] %v12407_v59  ;;  %v5259_v4 = vmax.f32 %v5257_v53, %v5258_v20  ;;  %v3658_v47 = vrot.slane %v3075_v23, %v11775_v36  ;;  %v3665_v8 = vrot.slane %v3651_v9, %v11775_v36  ;;  %v5272_v28 = vrot.slane %v5271_v57, 2 }
 0x242   :  { %v3014_v10 = vadd.f32 %v11765_v58, %v2946_v43  ;;  %v12413_v35 = vmax.f32 %v5280_v29, %v5281_v42  ;;  %v5266_v37 = vmax.f32 %v5264_v17, %v5265_v7  ;;  %v5333_v11 = vrot.slane %v5332_v5, 4 }
 0x243   :  { %v12415_v39 = vmax.f32 %v5287_v41, %v5288_v31  ;;  %v12417_v54 = vmax.f32 %v5294_v0, %v5295_v44  ;;  %v3666_v33 = vcombine.high %v3658_v47, %v3658_v47  ;;  %v5254_v53 = vmax.f32 %v5252_v1, %v5253_v62 }
 0x244   :  { %14928 = vst [vmem:[#allocation72_spill] sm:$0xff] %v12413_v35  ;;  %v3684_v15 = vcombine.high %v3682_v52, %v3682_v52  ;;  %v3667_v25 = vcombine.high %v3665_v8, %v3665_v8  ;;  %v2945_v34 = vmul.f32 %v11761_v12, %v2742_v56  ;;  %v5260_v21 = vrot.slane %v5259_v4, 1 }
 0x245   :  { %14929 = vst [vmem:[#allocation73_spill] sm:$0xff] %v12415_v39  ;;  %14930 = vst [vmem:[#allocation74_spill] sm:$0xff] %v12417_v54  ;;  %v5339_v20 = vsel %vm4519_vm9, %v3683_v51, -inf  ;;  %v5311_v29 = vsel %vm4519_vm9, %v3666_v33, -inf  ;;  %v3078_v17 = vmax.f32 %v3014_v10, 0.0  ;;  %v5267_v23 = vrot.slane %v5266_v37, 1  ;;  %v10475_v39 = vpop.f32.mrf.mxu0 }
 0x246   :  { %v5273_v43 = vmax.f32 %v5271_v57, %v5272_v28  ;;  %v5334_v41 = vmax.f32 %v5332_v5, %v5333_v11  ;;  %v5346_v0 = vsel %vm4519_vm9, %v3682_v52, -inf  ;;  %v5304_v42 = vsel %vm4519_vm9, %v3658_v47, -inf }
 0x247   :  { %v5318_v31 = vsel %vm4519_vm9, %v3665_v8, -inf  ;;  %v3702_v1 = vcombine.high %v3078_v17, %v3078_v17  ;;  %v3709_v7 = vrot.slane %v3078_v17, %v11775_v36  ;;  %v5340_v44 = vrot.slane %v5339_v20, 4 }
 0x248   :  { %v5312_v9 = vrot.slane %v5311_v29, 4  ;;  %v5325_v62 = vsel %vm4519_vm9, %v3667_v25, -inf  ;;  %v3013_v51 = vadd.f32 %v11765_v58, %v2945_v34  ;;  %v5261_v56 = vmax.f32 %v5259_v4, %v5260_v21 }
 0x249   :  { %v5347_v10 = vrot.slane %v5346_v0, 4  ;;  %v3716_v57 = vrot.slane %v3702_v1, %v11775_v36  ;;  %v3717_v5 = vcombine.high %v3709_v7, %v3709_v7  ;;  %v12431_v52 = vsel %vm4519_vm9, %v3684_v15, -inf }
 0x24a   :  { %14931 = vst [vmem:[#allocation75_spill] sm:$0xff] %v12431_v52  ;;  %v5305_v47 = vrot.slane %v5304_v42, 4  ;;  %v5319_v28 = vrot.slane %v5318_v31, 4  ;;  %v5388_v8 = vsel %vm4519_vm9, %v3709_v7, -inf  ;;  %v5268_v11 = vmax.f32 %v5266_v37, %v5267_v23 }
 0x24b   :  { %v5274_v33 = vrot.slane %v5273_v43, 1  ;;  %v5335_v17 = vrot.slane %v5334_v41, 2  ;;  %v5326_v50 = vrot.slane %v5325_v62, 4  ;;  %v5313_v54 = vmax.f32 %v5311_v29, %v5312_v9 }
 0x24c   :  { %v5395_v25 = vsel %vm4519_vm9, %v3717_v5, -inf  ;;  %v5402_v4 = vsel %vm4519_vm9, %v3716_v57, -inf  ;;  %v3077_v34 = vmax.f32 %v3013_v51, 0.0  ;;  %v7094_v21 = vsel %vm6996_vm11, %v5261_v56, %v5254_v53 }
 0x24d   :  { %v5341_v1 = vmax.f32 %v5339_v20, %v5340_v44  ;;  %v3718_v38 = vcombine.high %v3716_v57, %v3716_v57  ;;  %v5389_v15 = vrot.slane %v5388_v8, 4  ;;  %v5348_v35 = vmax.f32 %v5346_v0, %v5347_v10 }
 0x24e   :  { %v5306_v7 = vmax.f32 %v5304_v42, %v5305_v47  ;;  %v5320_v37 = vmax.f32 %v5318_v31, %v5319_v28  ;;  %v12438_v23 = vmax.f32 %v5273_v43, %v5274_v33  ;;  %v5327_v26 = vmax.f32 %v5325_v62, %v5326_v50 }
 0x24f   :  { %v5396_v29 = vrot.slane %v5395_v25, 4  ;;  %v5403_v9 = vrot.slane %v5402_v4, 4  ;;  %v5336_v5 = vmax.f32 %v5334_v41, %v5335_v17  ;;  %v5314_v59 = vrot.slane %v5313_v54, 2 }
 0x250   :  { %14932 = vst [vmem:[#allocation76_spill] sm:$0xff] %v12438_v23  ;;  %v3685_v18 = vcombine.high %v3077_v34, %v3077_v34  ;;  %v2948_v51 = vmul.f32 %v10475_v39, %v11761_v12  ;;  %v5342_v53 = vrot.slane %v5341_v1, 2  ;;  %v5390_v20 = vmax.f32 %v5388_v8, %v5389_v15 }
 0x251   :  { %v5409_v44 = vsel %vm4519_vm9, %v3718_v38, -inf  ;;  %v3692_v0 = vrot.slane %v3077_v34, %v11775_v36  ;;  %v12444_v56 = vsel %vm6998_vm12, %v5268_v11, %v7094_v21  ;;  %v5307_v42 = vrot.slane %v5306_v7, 2 }
 0x252   :  { %14933 = vst [vmem:[#allocation77_spill] sm:$0xff] %v12444_v56  ;;  %v5321_v43 = vrot.slane %v5320_v37, 2  ;;  %v3699_v50 = vrot.slane %v3685_v18, %v11775_v36  ;;  %v5349_v31 = vrot.slane %v5348_v35, 2  ;;  %v5328_v62 = vrot.slane %v5327_v26, 2 }
 0x253   :  { %v5397_v41 = vmax.f32 %v5395_v25, %v5396_v29  ;;  %v5404_v10 = vmax.f32 %v5402_v4, %v5403_v9  ;;  %v5315_v57 = vmax.f32 %v5313_v54, %v5314_v59  ;;  %v5410_v47 = vrot.slane %v5409_v44, 4 }
 0x254   :  { %v5360_v39 = vsel %vm4519_vm9, %v3692_v0, -inf  ;;  %v3016_v28 = vadd.f32 %v11765_v58, %v2948_v51  ;;  %v5337_v38 = vrot.slane %v5336_v5, 1  ;;  %v12449_v8 = vmax.f32 %v5341_v1, %v5342_v53  ;;  %v2752_v51 = vpop.f32.mrf.mxu0 }
 0x255   :  { %v5391_v33 = vrot.slane %v5390_v20, 2  ;;  %v3700_v11 = vcombine.high %v3692_v0, %v3692_v0  ;;  %v5308_v17 = vmax.f32 %v5306_v7, %v5307_v42  ;;  %v5322_v34 = vmax.f32 %v5320_v37, %v5321_v43 }
 0x256   :  { %14934 = vst [vmem:[#allocation78_spill] sm:$0xff] %v12449_v8  ;;  %v5361_v21 = vrot.slane %v5360_v39, 4  ;;  %v5374_v18 = vsel %vm4519_vm9, %v3699_v50, -inf  ;;  %v5329_v15 = vmax.f32 %v5327_v26, %v5328_v62  ;;  %v5398_v3 = vrot.slane %v5397_v41, 2  ;;  %v10478_v43 = vpop.f32.mrf.mxu0 }
 0x257   :  { %v5405_v25 = vrot.slane %v5404_v10, 2  ;;  %v3701_v4 = vcombine.high %v3699_v50, %v3699_v50  ;;  %v12452_v59 = vmax.f32 %v5348_v35, %v5349_v31  ;;  %v5316_v54 = vrot.slane %v5315_v57, 1 }
 0x258   :  { %v5411_v29 = vmax.f32 %v5409_v44, %v5410_v47  ;;  %v3080_v9 = vmax.f32 %v3016_v28, 0.0  ;;  %v12454_v52 = vmax.f32 %v5336_v5, %v5337_v38  ;;  %v5392_v1 = vmax.f32 %v5390_v20, %v5391_v33 }
 0x259   :  { %14935 = vst [vmem:[#allocation79_spill] sm:$0xff] %v12452_v59  ;;  %v5367_v53 = vsel %vm4519_vm9, %v3700_v11, -inf  ;;  %v5375_v7 = vrot.slane %v5374_v18, 4  ;;  %v5309_v0 = vrot.slane %v5308_v17, 1  ;;  %v5323_v42 = vrot.slane %v5322_v34, 1 }
 0x25a   :  { %14936 = vst [vmem:[#allocation80_spill] sm:$0xff] %v12454_v52  ;;  %v5362_v26 = vmax.f32 %v5360_v39, %v5361_v21  ;;  %v5330_v62 = vrot.slane %v5329_v15, 1  ;;  %v5399_v50 = vmax.f32 %v5397_v41, %v5398_v3  ;;  %v5406_v35 = vmax.f32 %v5404_v10, %v5405_v25 }
 0x25b   :  { %v5381_v31 = vsel %vm4519_vm9, %v3701_v4, -inf  ;;  %v5317_v44 = vmax.f32 %v5315_v57, %v5316_v54  ;;  %v5412_v47 = vrot.slane %v5411_v29, 2  ;;  %v5368_v28 = vrot.slane %v5367_v53, 4 }
 0x25c   :  { %v3736_v5 = vcombine.high %v3080_v9, %v3080_v9  ;;  %v5393_v38 = vrot.slane %v5392_v1, 1  ;;  %v5376_v20 = vmax.f32 %v5374_v18, %v5375_v7  ;;  %v2947_v33 = vmul.f32 %v11761_v12, %v2752_v51 }
 0x25d   :  { %v2950_v11 = vmul.f32 %v10478_v43, %v11761_v12  ;;  %v5310_v37 = vmax.f32 %v5308_v17, %v5309_v0  ;;  %v5363_v52 = vrot.slane %v5362_v26, 2  ;;  %v5382_v59 = vrot.slane %v5381_v31, 4 }
 0x25e   :  { %v3743_v39 = vrot.slane %v3080_v9, %v11775_v36  ;;  %v12462_v21 = vmax.f32 %v5322_v34, %v5323_v42  ;;  %v12464_v3 = vmax.f32 %v5329_v15, %v5330_v62  ;;  %v5400_v41 = vrot.slane %v5399_v50, 1 }
 0x25f   :  { %v5407_v10 = vrot.slane %v5406_v35, 1  ;;  %v12467_v57 = vsel %vm6996_vm11, %v5317_v44, %v5310_v37  ;;  %v12469_v25 = vmax.f32 %v5411_v29, %v5412_v47  ;;  %v5369_v18 = vmax.f32 %v5367_v53, %v5368_v28 }
 0x260   :  { %14937 = vst [vmem:[#allocation81_spill] sm:$0xff] %v12462_v21  ;;  %14938 = vst [vmem:[#allocation82_spill] sm:$0xff] %v12464_v3  ;;  %v3750_v4 = vrot.slane %v3736_v5, %v11775_v36  ;;  %v12472_v54 = vmax.f32 %v5392_v1, %v5393_v38  ;;  %v5377_v17 = vrot.slane %v5376_v20, 2  ;;  %v3015_v51 = vadd.f32 %v11765_v58, %v2947_v33 }
 0x261   :  { %14939 = vst [vmem:[#allocation83_spill] sm:$0xff] %v12467_v57  ;;  %14940 = vst [vmem:[#allocation84_spill] sm:$0xff] %v12469_v25  ;;  %v3018_v34 = vadd.f32 %v11765_v58, %v2950_v11  ;;  %v5364_v9 = vmax.f32 %v5362_v26, %v5363_v52  ;;  %v5383_v15 = vmax.f32 %v5381_v31, %v5382_v59  ;;  %v5444_v0 = vsel %vm4519_vm9, %v3743_v39, -inf  ;;  %v2762_v59 = vpop.f32.mrf.mxu0 }
 0x262   :  { %14941 = vst [vmem:[#allocation85_spill] sm:$0xff] %v12472_v54  ;;  %v3751_v7 = vcombine.high %v3743_v39, %v3743_v39  ;;  %v12477_v42 = vmax.f32 %v5399_v50, %v5400_v41  ;;  %v12479_v37 = vmax.f32 %v5406_v35, %v5407_v10  ;;  %v3079_v29 = vmax.f32 %v3015_v51, 0.0 }
 0x263   :  { %v3082_v53 = vmax.f32 %v3018_v34, 0.0  ;;  %v5370_v1 = vrot.slane %v5369_v18, 2  ;;  %v3752_v62 = vcombine.high %v3750_v4, %v3750_v4  ;;  %v5458_v44 = vsel %vm4519_vm9, %v3750_v4, -inf  ;;  %v10481_v21 = vpop.f32.mrf.mxu0 }
 0x264   :  { %14942 = vst [vmem:[#allocation86_spill] sm:$0xff] %v12477_v42  ;;  %14943 = vst [vmem:[#allocation87_spill] sm:$0xff] %v12479_v37  ;;  %v5378_v47 = vmax.f32 %v5376_v20, %v5377_v17  ;;  %v5445_v28 = vrot.slane %v5444_v0, 4  ;;  %v3719_v5 = vcombine.high %v3079_v29, %v3079_v29  ;;  %v3726_v52 = vrot.slane %v3079_v29, %v11775_v36 }
 0x265   :  { %v5365_v26 = vrot.slane %v5364_v9, 1  ;;  %v5384_v31 = vrot.slane %v5383_v15, 2  ;;  %v5451_v50 = vsel %vm4519_vm9, %v3751_v7, -inf  ;;  %v3777_v35 = vrot.slane %v3082_v53, %v11775_v36 }
 0x266   :  { %v5459_v38 = vrot.slane %v5458_v44, 4  ;;  %v3733_v33 = vrot.slane %v3719_v5, %v11775_v36  ;;  %v3734_v11 = vcombine.high %v3726_v52, %v3726_v52  ;;  %v3770_v39 = vcombine.high %v3082_v53, %v3082_v53 }
 0x267   :  { %v5371_v41 = vmax.f32 %v5369_v18, %v5370_v1  ;;  %v12488_v10 = vsel %vm4519_vm9, %v3752_v62, -inf  ;;  %v5416_v20 = vsel %vm4519_vm9, %v3726_v52, -inf  ;;  %v2949_v4 = vmul.f32 %v11761_v12, %v2762_v59 }
 0x268   :  { %14944 = vst [vmem:[#allocation88_spill] sm:$0xff] %v12488_v10  ;;  %v5379_v17 = vrot.slane %v5378_v47, 1  ;;  %v5446_v51 = vmax.f32 %v5444_v0, %v5445_v28  ;;  %v3735_v34 = vcombine.high %v3733_v33, %v3733_v33  ;;  %v5423_v7 = vsel %vm4519_vm9, %v3734_v11, -inf }
 0x269   :  { %v5385_v29 = vmax.f32 %v5383_v15, %v5384_v31  ;;  %v5452_v43 = vrot.slane %v5451_v50, 4  ;;  %v3785_v37 = vcombine.high %v3777_v35, %v3777_v35  ;;  %v5500_v5 = vsel %vm4519_vm9, %v3777_v35, -inf }
 0x26a   :  { %v5460_v42 = vmax.f32 %v5458_v44, %v5459_v38  ;;  %v5417_v53 = vrot.slane %v5416_v20, 4  ;;  %v5430_v18 = vsel %vm4519_vm9, %v3733_v33, -inf  ;;  %v3784_v1 = vrot.slane %v3770_v39, %v11775_v36 }
 0x26b   :  { %v5372_v62 = vrot.slane %v5371_v41, 1  ;;  %v5424_v52 = vrot.slane %v5423_v7, 4  ;;  %v5437_v59 = vsel %vm4519_vm9, %v3735_v34, -inf  ;;  %v3017_v0 = vadd.f32 %v11765_v58, %v2949_v4 }
 0x26c   :  { %v5366_v28 = vmax.f32 %v5364_v9, %v5365_v26  ;;  %v5447_v54 = vrot.slane %v5446_v51, 2  ;;  %v5501_v31 = vrot.slane %v5500_v5, 4  ;;  %v5386_v11 = vrot.slane %v5385_v29, 1 }
 0x26d   :  { %v5453_v25 = vmax.f32 %v5451_v50, %v5452_v43  ;;  %v5431_v35 = vrot.slane %v5430_v18, 4  ;;  %v5507_v44 = vsel %vm4519_vm9, %v3785_v37, -inf  ;;  %v5461_v38 = vrot.slane %v5460_v42, 2 }
 0x26e   :  { %v5418_v33 = vmax.f32 %v5416_v20, %v5417_v53  ;;  %v5438_v3 = vrot.slane %v5437_v59, 4  ;;  %v5514_v39 = vsel %vm4519_vm9, %v3784_v1, -inf  ;;  %v5373_v57 = vmax.f32 %v5371_v41, %v5372_v62 }
 0x26f   :  { %v5425_v34 = vmax.f32 %v5423_v7, %v5424_v52  ;;  %v3786_v8 = vcombine.high %v3784_v1, %v3784_v1  ;;  %v3081_v4 = vmax.f32 %v3017_v0, 0.0  ;;  %v5380_v9 = vmax.f32 %v5378_v47, %v5379_v17 }
 0x270   :  { %v5448_v26 = vmax.f32 %v5446_v51, %v5447_v54  ;;  %v5502_v23 = vmax.f32 %v5500_v5, %v5501_v31  ;;  %v5508_v15 = vrot.slane %v5507_v44, 4  ;;  %v12501_v10 = vmax.f32 %v5385_v29, %v5386_v11 }
 0x271   :  { %v5432_v43 = vmax.f32 %v5430_v18, %v5431_v35  ;;  %v5515_v50 = vrot.slane %v5514_v39, 4  ;;  %v2952_v37 = vmul.f32 %v10481_v21, %v11761_v12  ;;  %v5454_v56 = vrot.slane %v5453_v25, 2 }
 0x272   :  { %14945 = vst [vmem:[#allocation89_spill] sm:$0xff] %v12501_v10  ;;  %v12504_v20 = vmax.f32 %v5460_v42, %v5461_v38  ;;  %v5419_v53 = vrot.slane %v5418_v33, 2  ;;  %v5439_v45 = vmax.f32 %v5437_v59, %v5438_v3  ;;  %v7108_v41 = vsel %vm6996_vm11, %v5373_v57, %v5366_v28 }
 0x273   :  { %v5426_v7 = vrot.slane %v5425_v34, 2  ;;  %v5521_v1 = vsel %vm4519_vm9, %v3786_v8, -inf  ;;  %v3753_v47 = vcombine.high %v3081_v4, %v3081_v4  ;;  %v5449_v54 = vrot.slane %v5448_v26, 1 }
 0x274   :  { %14946 = vst [vmem:[#allocation90_spill] sm:$0xff] %v12504_v20  ;;  %v5503_v17 = vrot.slane %v5502_v23, 2  ;;  %v5509_v51 = vmax.f32 %v5507_v44, %v5508_v15  ;;  %v3760_v29 = vrot.slane %v3081_v4, %v11775_v36  ;;  %v5433_v5 = vrot.slane %v5432_v43, 2  ;;  %v2772_v44 = vpop.f32.mrf.mxu0 }
 0x275   :  { %v5516_v18 = vmax.f32 %v5514_v39, %v5515_v50  ;;  %v3767_v21 = vrot.slane %v3753_v47, %v11775_v36  ;;  %v3020_v42 = vadd.f32 %v11765_v58, %v2952_v37  ;;  %v5420_v62 = vmax.f32 %v5418_v33, %v5419_v53 }
 0x276   :  { %v5440_v52 = vrot.slane %v5439_v45, 2  ;;  %v5522_v3 = vrot.slane %v5521_v1, 4  ;;  %v3768_v59 = vcombine.high %v3760_v29, %v3760_v29  ;;  %v12512_v57 = vsel %vm6998_vm12, %v5380_v9, %v7108_v41 }
 0x277   :  { %14947 = vst [vmem:[#allocation91_spill] sm:$0xff] %v12512_v57  ;;  %v12514_v8 = vmax.f32 %v5453_v25, %v5454_v56  ;;  %v5427_v0 = vmax.f32 %v5425_v34, %v5426_v7  ;;  %v3769_v28 = vcombine.high %v3767_v21, %v3767_v21  ;;  %v5504_v15 = vmax.f32 %v5502_v23, %v5503_v17 }
 0x278   :  { %v5510_v31 = vrot.slane %v5509_v51, 2  ;;  %v5479_v11 = vsel %vm4519_vm9, %v3768_v59, -inf  ;;  %v3084_v35 = vmax.f32 %v3020_v42, 0.0  ;;  %v12517_v38 = vmax.f32 %v5448_v26, %v5449_v54 }
 0x279   :  { %14948 = vst [vmem:[#allocation92_spill] sm:$0xff] %v12514_v8  ;;  %v5434_v39 = vmax.f32 %v5432_v43, %v5433_v5  ;;  %v5517_v33 = vrot.slane %v5516_v18, 2  ;;  %v5472_v4 = vsel %vm4519_vm9, %v3760_v29, -inf  ;;  %v5421_v50 = vrot.slane %v5420_v62, 1 }
 0x27a   :  { %14949 = vst [vmem:[#allocation93_spill] sm:$0xff] %v12517_v38  ;;  %v5441_v37 = vmax.f32 %v5439_v45, %v5440_v52  ;;  %v5523_v9 = vmax.f32 %v5521_v1, %v5522_v3  ;;  %v5486_v56 = vsel %vm4519_vm9, %v3767_v21, -inf  ;;  %v5428_v25 = vrot.slane %v5427_v0, 1 }
 0x27b   :  { %v5480_v34 = vrot.slane %v5479_v11, 4  ;;  %v5493_v23 = vsel %vm4519_vm9, %v3769_v28, -inf  ;;  %v2951_v53 = vmul.f32 %v11761_v12, %v2772_v44  ;;  %v5505_v41 = vrot.slane %v5504_v15, 1 }
 0x27c   :  { %v5511_v7 = vmax.f32 %v5509_v51, %v5510_v31  ;;  %v5473_v47 = vrot.slane %v5472_v4, 4  ;;  %v3811_v26 = vrot.slane %v3084_v35, %v11775_v36  ;;  %v5435_v54 = vrot.slane %v5434_v39, 1 }
 0x27d   :  { %v5518_v17 = vmax.f32 %v5516_v18, %v5517_v33  ;;  %v5487_v29 = vrot.slane %v5486_v56, 4  ;;  %v5442_v45 = vrot.slane %v5441_v37, 1  ;;  %v5524_v1 = vrot.slane %v5523_v9, 2 }
 0x27e   :  { %v5494_v5 = vrot.slane %v5493_v23, 4  ;;  %v3804_v21 = vcombine.high %v3084_v35, %v3084_v35  ;;  %v5422_v42 = vmax.f32 %v5420_v62, %v5421_v50  ;;  %v5429_v52 = vmax.f32 %v5427_v0, %v5428_v25 }
 0x27f   :  { %v5481_v3 = vmax.f32 %v5479_v11, %v5480_v34  ;;  %v3019_v59 = vadd.f32 %v11765_v58, %v2951_v53  ;;  %v12526_v28 = vmax.f32 %v5504_v15, %v5505_v41  ;;  %v5512_v51 = vrot.slane %v5511_v7, 1  ;;  %v10484_v11 = vpop.f32.mrf.mxu0 }
 0x280   :  { %v5474_v31 = vmax.f32 %v5472_v4, %v5473_v47  ;;  %v5556_v44 = vsel %vm4519_vm9, %v3811_v26, -inf  ;;  %v12529_v38 = vmax.f32 %v5434_v39, %v5435_v54  ;;  %v5519_v43 = vrot.slane %v5518_v17, 1 }
 0x281   :  { %14950 = vst [vmem:[#allocation94_spill] sm:$0xff] %v12526_v28  ;;  %v5488_v18 = vmax.f32 %v5486_v56, %v5487_v29  ;;  %v3819_v33 = vcombine.high %v3811_v26, %v3811_v26  ;;  %v12531_v8 = vmax.f32 %v5441_v37, %v5442_v45  ;;  %v12533_v20 = vmax.f32 %v5523_v9, %v5524_v1  ;;  %v2782_v45 = vpop.f32.mrf.mxu0 }
 0x282   :  { %14951 = vst [vmem:[#allocation95_spill] sm:$0xff] %v12529_v38  ;;  %v5495_v62 = vmax.f32 %v5493_v23, %v5494_v5  ;;  %v3818_v0 = vrot.slane %v3804_v21, %v11775_v36  ;;  %v12537_v15 = vsel %vm6996_vm11, %v5429_v52, %v5422_v42  ;;  %v5482_v35 = vrot.slane %v5481_v3, 2 }
 0x283   :  { %14952 = vst [vmem:[#allocation96_spill] sm:$0xff] %v12531_v8  ;;  %14953 = vst [vmem:[#allocation97_spill] sm:$0xff] %v12533_v20  ;;  %v5557_v4 = vrot.slane %v5556_v44, 4  ;;  %v3083_v50 = vmax.f32 %v3019_v59, 0.0  ;;  %v12539_v25 = vmax.f32 %v5511_v7, %v5512_v51  ;;  %v5475_v39 = vrot.slane %v5474_v31, 2 }
 0x284   :  { %14954 = vst [vmem:[#allocation98_spill] sm:$0xff] %v12537_v15  ;;  %v14956_v56 = vrot.slane %v12102_v19, 7  ;;  %v14957_v37 = vrot.slane %v12040_v63, 7  ;;  %v2954_v34 = vmul.f32 %v10484_v11, %v11761_v12  ;;  %v12550_v23 = vmax.f32 %v5518_v17, %v5519_v43 }
 0x285   :  { %14955 = vst [vmem:[#allocation99_spill] sm:$0xff] %v12539_v25  ;;  %v5489_v53 = vrot.slane %v5488_v18, 2  ;;  %v5563_v41 = vsel %vm4519_vm9, %v3819_v33, -inf  ;;  %v3787_v47 = vcombine.high %v3083_v50, %v3083_v50  ;;  %v5496_v26 = vrot.slane %v5495_v62, 2 }
 0x286   :  { %v12547_v9 = vsel %vm1049_vm1, %v14957_v37, %v14956_v56  ;;  %14958 = vst [vmem:[#allocation100_spill] sm:$0xff] %v12550_v23  ;;  %v3820_v7 = vcombine.high %v3818_v0, %v3818_v0  ;;  %v5570_v54 = vsel %vm4519_vm9, %v3818_v0, -inf  ;;  %v3794_v29 = vrot.slane %v3083_v50, %v11775_v36 }
 0x287   :  { %v5483_v1 = vmax.f32 %v5481_v3, %v5482_v35  ;;  %v5558_v5 = vmax.f32 %v5556_v44, %v5557_v4  ;;  %v3801_v21 = vrot.slane %v3787_v47, %v11775_v36  ;;  %v3022_v42 = vadd.f32 %v11765_v58, %v2954_v34 }
 0x288   :  { %v5476_v17 = vmax.f32 %v5474_v31, %v5475_v39  ;;  %v5564_v52 = vrot.slane %v5563_v41, 4  ;;  %v3802_v59 = vcombine.high %v3794_v29, %v3794_v29  ;;  %v5490_v51 = vmax.f32 %v5488_v18, %v5489_v53 }
 0x289   :  { %v3803_v33 = vcombine.high %v3801_v21, %v3801_v21  ;;  %v3086_v11 = vmax.f32 %v3022_v42, 0.0  ;;  %v2953_v56 = vmul.f32 %v11761_v12, %v2782_v45  ;;  %v5497_v0 = vmax.f32 %v5495_v62, %v5496_v26 }
 0x28a   :  { %v5571_v37 = vrot.slane %v5570_v54, 4  ;;  %v12560_v50 = vsel %vm4519_vm9, %v3820_v7, -inf  ;;  %v5535_v3 = vsel %vm4519_vm9, %v3802_v59, -inf  ;;  %v5484_v44 = vrot.slane %v5483_v1, 1 }
 0x28b   :  { %14959 = vst [vmem:[#allocation101_spill] sm:$0xff] %v12560_v50  ;;  %v5559_v35 = vrot.slane %v5558_v5, 2  ;;  %v5528_v4 = vsel %vm4519_vm9, %v3794_v29, -inf  ;;  %v5542_v31 = vsel %vm4519_vm9, %v3801_v21, -inf  ;;  %v5565_v39 = vmax.f32 %v5563_v41, %v5564_v52 }
 0x28c   :  { %v5536_v34 = vrot.slane %v5535_v3, 4  ;;  %v5549_v18 = vsel %vm4519_vm9, %v3803_v33, -inf  ;;  %v3845_v53 = vrot.slane %v3086_v11, %v11775_v36  ;;  %v5477_v47 = vrot.slane %v5476_v17, 1 }
 0x28d   :  { %v5491_v62 = vrot.slane %v5490_v51, 1  ;;  %v3838_v26 = vcombine.high %v3086_v11, %v3086_v11  ;;  %v3021_v7 = vadd.f32 %v11765_v58, %v2953_v56  ;;  %v5572_v45 = vmax.f32 %v5570_v54, %v5571_v37  ;;  %v10499_v56 = vpop.f32.mrf.mxu1 }
 0x28e   :  { %v5529_v42 = vrot.slane %v5528_v4, 4  ;;  %v5543_v59 = vrot.slane %v5542_v31, 4  ;;  %v5612_v43 = vsel %vm4519_vm9, %v3845_v53, -inf  ;;  %v5485_v23 = vmax.f32 %v5483_v1, %v5484_v44 }
 0x28f   :  { %v5498_v29 = vrot.slane %v5497_v0, 1  ;;  %v5560_v20 = vmax.f32 %v5558_v5, %v5559_v35  ;;  %v5550_v21 = vrot.slane %v5549_v18, 4  ;;  %v5566_v41 = vrot.slane %v5565_v39, 2 }
 0x290   :  { %v5537_v33 = vmax.f32 %v5535_v3, %v5536_v34  ;;  %v3853_v25 = vcombine.high %v3845_v53, %v3845_v53  ;;  %v5478_v28 = vmax.f32 %v5476_v17, %v5477_v47  ;;  %v3852_v8 = vrot.slane %v3838_v26, %v11775_v36 }
 0x291   :  { %v5613_v11 = vrot.slane %v5612_v43, 4  ;;  %v3085_v38 = vmax.f32 %v3021_v7, 0.0  ;;  %v5492_v54 = vmax.f32 %v5490_v51, %v5491_v62  ;;  %v5573_v37 = vrot.slane %v5572_v45, 2 }
 0x292   :  { %v5530_v15 = vmax.f32 %v5528_v4, %v5529_v42  ;;  %v5544_v10 = vmax.f32 %v5542_v31, %v5543_v59  ;;  %v12571_v57 = vmax.f32 %v5497_v0, %v5498_v29  ;;  %v7122_v1 = vsel %vm6996_vm11, %v5485_v23, %v5478_v28 }
 0x293   :  { %v5561_v5 = vrot.slane %v5560_v20, 1  ;;  %v5551_v44 = vmax.f32 %v5549_v18, %v5550_v21  ;;  %v12574_v35 = vmax.f32 %v5565_v39, %v5566_v41  ;;  %v5538_v3 = vrot.slane %v5537_v33, 2  ;;  %v2832_v21 = vpop.f32.mrf.mxu1 }
 0x294   :  { %14960 = vst [vmem:[#allocation102_spill] sm:$0xff] %v12571_v57  ;;  %v5619_v17 = vsel %vm4519_vm9, %v3853_v25, -inf  ;;  %v2964_v34 = vmul.f32 %v10499_v56, %v11761_v12  ;;  %v3854_v53 = vcombine.high %v3852_v8, %v3852_v8  ;;  %v5614_v47 = vmax.f32 %v5612_v43, %v5613_v11 }
 0x295   :  { %14961 = vst [vmem:[#allocation103_spill] sm:$0xff] %v12574_v35  ;;  %v5626_v51 = vsel %vm4519_vm9, %v3852_v8, -inf  ;;  %v3821_v62 = vcombine.high %v3085_v38, %v3085_v38  ;;  %v12579_v4 = vmax.f32 %v5572_v45, %v5573_v37  ;;  %v5531_v0 = vrot.slane %v5530_v15, 2  ;;  %v7614_v37 = vpop.permute.xlu1 %7613 }
 0x296   :  { %v5545_v31 = vrot.slane %v5544_v10, 2  ;;  %v3828_v28 = vrot.slane %v3085_v38, %v11775_v36  ;;  %v12583_v23 = vsel %vm6998_vm12, %v5492_v54, %v7122_v1  ;;  %v5552_v39 = vrot.slane %v5551_v44, 2 }
 0x297   :  { %14962 = vst [vmem:[#allocation104_spill] sm:$0xff] %v12579_v4  ;;  %14963 = vst [vmem:[#allocation105_spill] sm:$0xff] %v12583_v23  ;;  %v5620_v18 = vrot.slane %v5619_v17, 4  ;;  %v3835_v25 = vrot.slane %v3821_v62, %v11775_v36  ;;  %v5627_v26 = vrot.slane %v5626_v51, 4  ;;  %v3032_v8 = vadd.f32 %v11765_v58, %v2964_v34 }
 0x298   :  { %v3836_v7 = vcombine.high %v3828_v28, %v3828_v28  ;;  %v5584_v43 = vsel %vm4519_vm9, %v3828_v28, -inf  ;;  %v5539_v42 = vmax.f32 %v5537_v33, %v5538_v3  ;;  %v5615_v45 = vrot.slane %v5614_v47, 2 }
 0x299   :  { %v5633_v59 = vsel %vm4519_vm9, %v3854_v53, -inf  ;;  %v3837_v29 = vcombine.high %v3835_v25, %v3835_v25  ;;  %v5532_v38 = vmax.f32 %v5530_v15, %v5531_v0  ;;  %v5546_v41 = vmax.f32 %v5544_v10, %v5545_v31 }
 0x29a   :  { %v5585_v11 = vrot.slane %v5584_v43, 4  ;;  %v5591_v56 = vsel %vm4519_vm9, %v3836_v7, -inf  ;;  %v5553_v54 = vmax.f32 %v5551_v44, %v5552_v39  ;;  %v5621_v1 = vmax.f32 %v5619_v17, %v5620_v18 }
 0x29b   :  { %v5592_v62 = vrot.slane %v5591_v56, 4  ;;  %v5598_v52 = vsel %vm4519_vm9, %v3835_v25, -inf  ;;  %v12591_v28 = vmax.f32 %v5560_v20, %v5561_v5  ;;  %v5628_v34 = vmax.f32 %v5626_v51, %v5627_v26 }
 0x29c   :  { %v5634_v33 = vrot.slane %v5633_v59, 4  ;;  %v2963_v3 = vmul.f32 %v11761_v12, %v2832_v21  ;;  %v5540_v53 = vrot.slane %v5539_v42, 1  ;;  %v5616_v4 = vmax.f32 %v5614_v47, %v5615_v45  ;;  %v10502_v21 = vpop.f32.mrf.mxu1 }
 0x29d   :  { %14964 = vst [vmem:[#allocation106_spill] sm:$0xff] %v12591_v28  ;;  %v5605_v15 = vsel %vm4519_vm9, %v3837_v29, -inf  ;;  %v3096_v10 = vmax.f32 %v3032_v8, 0.0  ;;  %v5533_v0 = vrot.slane %v5532_v38, 1  ;;  %v12597_v44 = vsel %vm2268_vm7, %v12547_v9, %v7614_v37 }
 0x29e   :  { %14965 = vst [vmem:[#allocation107_spill] sm:$0xff] %v12597_v44  ;;  %v5586_v17 = vmax.f32 %v5584_v43, %v5585_v11  ;;  %v5599_v31 = vrot.slane %v5598_v52, 4  ;;  %v5547_v39 = vrot.slane %v5546_v41, 1  ;;  %v5554_v18 = vrot.slane %v5553_v54, 1 }
 0x29f   :  { %v5622_v20 = vrot.slane %v5621_v1, 2  ;;  %v5593_v5 = vmax.f32 %v5591_v56, %v5592_v62  ;;  %v5629_v25 = vrot.slane %v5628_v34, 2  ;;  %v5635_v26 = vmax.f32 %v5633_v59, %v5634_v33 }
 0x2a0   :  { %v5606_v7 = vrot.slane %v5605_v15, 4  ;;  %v5541_v47 = vmax.f32 %v5539_v42, %v5540_v53  ;;  %v5617_v45 = vrot.slane %v5616_v4, 1  ;;  %v4008_v29 = vcombine.high %v3096_v10, %v3096_v10 }
 0x2a1   :  { %v3031_v8 = vadd.f32 %v11765_v58, %v2963_v3  ;;  %v5534_v28 = vmax.f32 %v5532_v38, %v5533_v0  ;;  %v5587_v9 = vrot.slane %v5586_v17, 2  ;;  %v5600_v37 = vmax.f32 %v5598_v52, %v5599_v31 }
 0x2a2   :  { %v4015_v43 = vrot.slane %v3096_v10, %v11775_v36  ;;  %v12602_v11 = vmax.f32 %v5546_v41, %v5547_v39  ;;  %v12604_v44 = vmax.f32 %v5553_v54, %v5554_v18  ;;  %v5623_v56 = vmax.f32 %v5621_v1, %v5622_v20 }
 0x2a3   :  { %v5594_v62 = vrot.slane %v5593_v5, 2  ;;  %v5630_v51 = vmax.f32 %v5628_v34, %v5629_v25  ;;  %v5636_v59 = vrot.slane %v5635_v26, 2  ;;  %v5607_v33 = vmax.f32 %v5605_v15, %v5606_v7 }
 0x2a4   :  { %14966 = vst [vmem:[#allocation108_spill] sm:$0xff] %v12602_v11  ;;  %14967 = vst [vmem:[#allocation109_spill] sm:$0xff] %v12604_v44  ;;  %v2966_v42 = vmul.f32 %v10502_v21, %v11761_v12  ;;  %v12608_v53 = vsel %vm6996_vm11, %v5541_v47, %v5534_v28  ;;  %v12610_v3 = vmax.f32 %v5616_v4, %v5617_v45  ;;  %v3095_v38 = vmax.f32 %v3031_v8, 0.0  ;;  %v2842_v8 = vpop.f32.mrf.mxu1 }
 0x2a5   :  { %14968 = vst [vmem:[#allocation110_spill] sm:$0xff] %v12608_v53  ;;  %v4022_v52 = vrot.slane %v4008_v29, %v11775_v36  ;;  %v5588_v10 = vmax.f32 %v5586_v17, %v5587_v9  ;;  %v5601_v41 = vrot.slane %v5600_v37, 2  ;;  %v4023_v0 = vcombine.high %v4015_v43, %v4015_v43 }
 0x2a6   :  { %14969 = vst [vmem:[#allocation111_spill] sm:$0xff] %v12610_v3  ;;  %v5892_v54 = vsel %vm4519_vm9, %v4015_v43, -inf  ;;  %v5624_v1 = vrot.slane %v5623_v56, 1  ;;  %v5595_v31 = vmax.f32 %v5593_v5, %v5594_v62  ;;  %v3991_v34 = vcombine.high %v3095_v38, %v3095_v38 }
 0x2a7   :  { %v3998_v15 = vrot.slane %v3095_v38, %v11775_v36  ;;  %v5631_v39 = vrot.slane %v5630_v51, 1  ;;  %v12615_v18 = vmax.f32 %v5635_v26, %v5636_v59  ;;  %v5608_v28 = vrot.slane %v5607_v33, 2 }
 0x2a8   :  { %v3034_v4 = vadd.f32 %v11765_v58, %v2966_v42  ;;  %v5893_v20 = vrot.slane %v5892_v54, 4  ;;  %v5906_v25 = vsel %vm4519_vm9, %v4022_v52, -inf  ;;  %v4005_v17 = vrot.slane %v3991_v34, %v11775_v36 }
 0x2a9   :  { %14970 = vst [vmem:[#allocation112_spill] sm:$0xff] %v12615_v18  ;;  %v4006_v7 = vcombine.high %v3998_v15, %v3998_v15  ;;  %v5589_v47 = vrot.slane %v5588_v10, 1  ;;  %v5602_v45 = vmax.f32 %v5600_v37, %v5601_v41  ;;  %v4024_v29 = vcombine.high %v4022_v52, %v4022_v52 }
 0x2aa   :  { %v5899_v5 = vsel %vm4519_vm9, %v4023_v0, -inf  ;;  %v5596_v21 = vrot.slane %v5595_v31, 1  ;;  %v4007_v9 = vcombine.high %v4005_v17, %v4005_v17  ;;  %v5864_v26 = vsel %vm4519_vm9, %v3998_v15, -inf }
 0x2ab   :  { %v5871_v43 = vsel %vm4519_vm9, %v4006_v7, -inf  ;;  %v5609_v62 = vmax.f32 %v5607_v33, %v5608_v28  ;;  %v5907_v59 = vrot.slane %v5906_v25, 4  ;;  %v5878_v42 = vsel %vm4519_vm9, %v4005_v17, -inf }
 0x2ac   :  { %v3098_v38 = vmax.f32 %v3034_v4, 0.0  ;;  %v5894_v3 = vmax.f32 %v5892_v54, %v5893_v20  ;;  %v5872_v34 = vrot.slane %v5871_v43, 4  ;;  %v5885_v44 = vsel %vm4519_vm9, %v4007_v9, -inf }
 0x2ad   :  { %v2965_v37 = vmul.f32 %v11761_v12, %v2842_v8  ;;  %v12626_v52 = vmax.f32 %v5623_v56, %v5624_v1  ;;  %v5603_v41 = vrot.slane %v5602_v45, 1  ;;  %v5900_v0 = vrot.slane %v5899_v5, 4 }
 0x2ae   :  { %v5865_v35 = vrot.slane %v5864_v26, 4  ;;  %v12628_v11 = vmax.f32 %v5630_v51, %v5631_v39  ;;  %v5590_v15 = vmax.f32 %v5588_v10, %v5589_v47  ;;  %v5597_v7 = vmax.f32 %v5595_v31, %v5596_v21  ;;  %v10505_v47 = vpop.f32.mrf.mxu1 }
 0x2af   :  { %14971 = vst [vmem:[#allocation113_spill] sm:$0xff] %v12626_v52  ;;  %v5879_v33 = vrot.slane %v5878_v42, 4  ;;  %v5908_v28 = vmax.f32 %v5906_v25, %v5907_v59  ;;  %v5913_v17 = vsel %vm4519_vm9, %v4024_v29, -inf  ;;  %v5886_v4 = vrot.slane %v5885_v44, 4 }
 0x2b0   :  { %14972 = vst [vmem:[#allocation114_spill] sm:$0xff] %v12628_v11  ;;  %v4049_v54 = vrot.slane %v3098_v38, %v11775_v36  ;;  %v5610_v20 = vrot.slane %v5609_v62, 1  ;;  %v5895_v9 = vrot.slane %v5894_v3, 2  ;;  %v5873_v53 = vmax.f32 %v5871_v43, %v5872_v34 }
 0x2b1   :  { %v3033_v56 = vadd.f32 %v11765_v58, %v2965_v37  ;;  %v5604_v8 = vmax.f32 %v5602_v45, %v5603_v41  ;;  %v5901_v52 = vmax.f32 %v5899_v5, %v5900_v0  ;;  %v5866_v51 = vmax.f32 %v5864_v26, %v5865_v35 }
 0x2b2   :  { %v7136_v10 = vsel %vm6996_vm11, %v5597_v7, %v5590_v15  ;;  %v5914_v31 = vrot.slane %v5913_v17, 4  ;;  %v5880_v39 = vmax.f32 %v5878_v42, %v5879_v33  ;;  %v4042_v25 = vcombine.high %v3098_v38, %v3098_v38 }
 0x2b3   :  { %v5909_v29 = vrot.slane %v5908_v28, 2  ;;  %v5887_v21 = vmax.f32 %v5885_v44, %v5886_v4  ;;  %v4057_v59 = vcombine.high %v4049_v54, %v4049_v54  ;;  %v5948_v11 = vsel %vm4519_vm9, %v4049_v54, -inf }
 0x2b4   :  { %v12636_v50 = vmax.f32 %v5609_v62, %v5610_v20  ;;  %v5896_v43 = vmax.f32 %v5894_v3, %v5895_v9  ;;  %v5874_v34 = vrot.slane %v5873_v53, 2  ;;  %v3097_v37 = vmax.f32 %v3033_v56, 0.0 }
 0x2b5   :  { %v12639_v45 = vsel %vm6998_vm12, %v5604_v8, %v7136_v10  ;;  %v5902_v35 = vrot.slane %v5901_v52, 2  ;;  %v5867_v5 = vrot.slane %v5866_v51, 2  ;;  %v2968_v26 = vmul.f32 %v10505_v47, %v11761_v12 }
 0x2b6   :  { %14973 = vst [vmem:[#allocation115_spill] sm:$0xff] %v12636_v50  ;;  %14974 = vst [vmem:[#allocation116_spill] sm:$0xff] %v12639_v45  ;;  %v5881_v42 = vrot.slane %v5880_v39, 2  ;;  %v4056_v38 = vrot.slane %v4042_v25, %v11775_v36  ;;  %v5949_v41 = vrot.slane %v5948_v11, 4  ;;  %v4025_v44 = vcombine.high %v3097_v37, %v3097_v37 }
 0x2b7   :  { %v12643_v0 = vmax.f32 %v5908_v28, %v5909_v29  ;;  %v5888_v15 = vrot.slane %v5887_v21, 2  ;;  %v5955_v62 = vsel %vm4519_vm9, %v4057_v59, -inf  ;;  %v4032_v3 = vrot.slane %v3097_v37, %v11775_v36 }
 0x2b8   :  { %v5897_v7 = vrot.slane %v5896_v43, 1  ;;  %v5875_v33 = vmax.f32 %v5873_v53, %v5874_v34  ;;  %v4039_v4 = vrot.slane %v4025_v44, %v11775_v36  ;;  %v3036_v54 = vadd.f32 %v11765_v58, %v2968_v26 }
 0x2b9   :  { %v5903_v20 = vmax.f32 %v5901_v52, %v5902_v35  ;;  %v5868_v9 = vmax.f32 %v5866_v51, %v5867_v5  ;;  %v4040_v56 = vcombine.high %v4032_v3, %v4032_v3  ;;  %v5920_v8 = vsel %vm4519_vm9, %v4032_v3, -inf }
 0x2ba   :  { %v5882_v10 = vmax.f32 %v5880_v39, %v5881_v42  ;;  %v5950_v25 = vmax.f32 %v5948_v11, %v5949_v41  ;;  %v5956_v28 = vrot.slane %v5955_v62, 4  ;;  %v5962_v47 = vsel %vm4519_vm9, %v4056_v38, -inf }
 0x2bb   :  { %v5889_v29 = vmax.f32 %v5887_v21, %v5888_v15  ;;  %v4058_v59 = vcombine.high %v4056_v38, %v4056_v38  ;;  %v5927_v37 = vsel %vm4519_vm9, %v4040_v56, -inf  ;;  %v3100_v1 = vmax.f32 %v3036_v54, 0.0 }
 0x2bc   :  { %v5876_v53 = vrot.slane %v5875_v33, 1  ;;  %v4041_v34 = vcombine.high %v4039_v4, %v4039_v4  ;;  %v5921_v44 = vrot.slane %v5920_v8, 4  ;;  %v5915_v50 = vmax.f32 %v5913_v17, %v5914_v31 }
 0x2bd   :  { %v5869_v26 = vrot.slane %v5868_v9, 1  ;;  %v5963_v52 = vrot.slane %v5962_v47, 4  ;;  %v5928_v51 = vrot.slane %v5927_v37, 4  ;;  %v5934_v35 = vsel %vm4519_vm9, %v4039_v4, -inf }
 0x2be   :  { %v5883_v5 = vrot.slane %v5882_v10, 1  ;;  %v5951_v39 = vrot.slane %v5950_v25, 2  ;;  %v5957_v11 = vmax.f32 %v5955_v62, %v5956_v28  ;;  %v5916_v42 = vrot.slane %v5915_v50, 2 }
 0x2bf   :  { %v5898_v41 = vmax.f32 %v5896_v43, %v5897_v7  ;;  %v5904_v3 = vrot.slane %v5903_v20, 1  ;;  %v5890_v21 = vrot.slane %v5889_v29, 1  ;;  %v4083_v38 = vrot.slane %v3100_v1, %v11775_v36 }
 0x2c0   :  { %v5877_v15 = vmax.f32 %v5875_v33, %v5876_v53  ;;  %v5922_v54 = vmax.f32 %v5920_v8, %v5921_v44  ;;  %v5935_v56 = vrot.slane %v5934_v35, 4  ;;  %v5941_v45 = vsel %vm4519_vm9, %v4041_v34, -inf  ;;  %v2852_v44 = vpop.f32.mrf.mxu1 }
 0x2c1   :  { %v5870_v17 = vmax.f32 %v5868_v9, %v5869_v26  ;;  %v5964_v31 = vmax.f32 %v5962_v47, %v5963_v52  ;;  %v12656_v18 = vsel %vm4519_vm9, %v4058_v59, -inf  ;;  %v5929_v4 = vmax.f32 %v5927_v37, %v5928_v51 }
 0x2c2   :  { %v5884_v57 = vmax.f32 %v5882_v10, %v5883_v5  ;;  %v5952_v23 = vmax.f32 %v5950_v25, %v5951_v39  ;;  %v5958_v62 = vrot.slane %v5957_v11, 2  ;;  %v5917_v28 = vmax.f32 %v5915_v50, %v5916_v42 }
 0x2c3   :  { %v5891_v43 = vmax.f32 %v5889_v29, %v5890_v21  ;;  %v5942_v7 = vrot.slane %v5941_v45, 4  ;;  %v4076_v55 = vcombine.high %v3100_v1, %v3100_v1  ;;  %v6004_v40 = vsel %vm4519_vm9, %v4083_v38, -inf }
 0x2c4   :  { %v7171_v33 = vsel %vm6996_vm11, %v5877_v15, %v5870_v17  ;;  %v5923_v8 = vrot.slane %v5922_v54, 2  ;;  %v5936_v53 = vmax.f32 %v5934_v35, %v5935_v56  ;;  %v5911_v9 = vrot.slane %v12643_v0, 1  ;;  %v10487_v56 = vpop.f32.mrf.mxu0 }
 0x2c5   :  { %v5965_v47 = vrot.slane %v5964_v31, 2  ;;  %v5970_v59 = vrot.slane %v12656_v18, 4  ;;  %v5930_v34 = vrot.slane %v5929_v4, 2  ;;  %v4091_v37 = vcombine.high %v4083_v38, %v4083_v38 }
 0x2c6   :  { %v5953_v10 = vrot.slane %v5952_v23, 1  ;;  %v12662_v25 = vmax.f32 %v5957_v11, %v5958_v62  ;;  %v6005_v50 = vrot.slane %v6004_v40, 4  ;;  %v5918_v29 = vrot.slane %v5917_v28, 1 }
 0x2c7   :  { %v5943_v1 = vmax.f32 %v5941_v45, %v5942_v7  ;;  %v4090_v26 = vrot.slane %v4076_v55, %v11775_v36  ;;  %v5905_v52 = vmax.f32 %v5903_v20, %v5904_v3  ;;  %v7172_v51 = vsel %vm6998_vm12, %v5884_v57, %v7171_v33 }
 0x2c8   :  { %v5924_v35 = vmax.f32 %v5922_v54, %v5923_v8  ;;  %v5937_v5 = vrot.slane %v5936_v53, 2  ;;  %v5912_v39 = vmax.f32 %v12643_v0, %v5911_v9  ;;  %v7173_v42 = vsel %vm7000_vm13, %v5891_v43, %v7172_v51 }
 0x2c9   :  { %v5931_v21 = vmax.f32 %v5929_v4, %v5930_v34  ;;  %v6011_v38 = vsel %vm4519_vm9, %v4091_v37, -inf  ;;  %v7174_v11 = vsel %vm7002_vm14, %v5898_v41, %v7173_v42  ;;  %v2967_v15 = vmul.f32 %v11761_v12, %v2852_v44 }
 0x2ca   :  { %v6006_v45 = vmax.f32 %v6004_v40, %v6005_v50  ;;  %v5919_v17 = vmax.f32 %v5917_v28, %v5918_v29  ;;  %v7175_v55 = vsel %vm7004_vm15, %v5905_v52, %v7174_v11  ;;  %v2956_v57 = vmul.f32 %v10487_v56, %v11761_v12  ;;  %v10508_v52 = vpop.f32.mrf.mxu1 }
 0x2cb   :  { %v5944_v20 = vrot.slane %v5943_v1, 2  ;;  %v6018_v3 = vsel %vm4519_vm9, %v4090_v26, -inf  ;;  %v7176_v0 = vsel %vm7006_vm2, %v5912_v39, %v7175_v55  ;;  %v3035_v54 = vadd.f32 %v11765_v58, %v2967_v15 }
 0x2cc   :  { %v5938_v4 = vmax.f32 %v5936_v53, %v5937_v5  ;;  %v6012_v62 = vrot.slane %v6011_v38, 4  ;;  %v12677_v41 = vsel %vm7008_vm3, %v5919_v17, %v7176_v0  ;;  %v3024_v43 = vadd.f32 %v11765_v58, %v2956_v57 }
 0x2cd   :  { %14975 = vst [vmem:[#allocation117_spill] sm:$0xff] %v12677_v41  ;;  %v12680_v40 = vmax.f32 %v5952_v23, %v5953_v10  ;;  %v12682_v28 = vmax.f32 %v5964_v31, %v5965_v47  ;;  %v5932_v7 = vrot.slane %v5931_v21, 1  ;;  %7659 = vrot.lane.b32.xlu0 %v12677_v41, %s10611_s24  ;;  %v3099_v33 = vmax.f32 %v3035_v54, 0.0 }
 0x2ce   :  { %v4092_v8 = vcombine.high %v4090_v26, %v4090_v26  ;;  %v6007_v9 = vrot.slane %v6006_v45, 2  ;;  %v6019_v34 = vrot.slane %v6018_v3, 4  ;;  %v3088_v37 = vmax.f32 %v3024_v43, 0.0 }
 0x2cf   :  { %v5925_v53 = vrot.slane %v5924_v35, 1  ;;  %v5945_v50 = vmax.f32 %v5943_v1, %v5944_v20  ;;  %v4059_v29 = vcombine.high %v3099_v33, %v3099_v33  ;;  %v4066_v44 = vrot.slane %v3099_v33, %v11775_v36 }
 0x2d0   :  { %v5939_v51 = vrot.slane %v5938_v4, 1  ;;  %v6013_v23 = vmax.f32 %v6011_v38, %v6012_v62  ;;  %v14976_v31 = vrot.slane %v12102_v19, 1  ;;  %v14977_v47 = vrot.slane %v12040_v63, 1 }
 0x2d1   :  { %v3879_v26 = vrot.slane %v3088_v37, %v11775_v36  ;;  %v5933_v5 = vmax.f32 %v5931_v21, %v5932_v7  ;;  %v4073_v39 = vrot.slane %v4059_v29, %v11775_v36  ;;  %v4074_v42 = vcombine.high %v4066_v44, %v4066_v44 }
 0x2d2   :  { %v7513_v10 = vsel %vm1434_vm0, %v14977_v47, %v14976_v31  ;;  %v5976_v1 = vsel %vm4519_vm9, %v4066_v44, -inf  ;;  %v6008_v11 = vmax.f32 %v6006_v45, %v6007_v9  ;;  %v6020_v38 = vmax.f32 %v6018_v3, %v6019_v34 }
 0x2d3   :  { %7739 = vrot.lane.b32.xlu0 %v7513_v10, %s10613_s6  ;;  %v5668_v15 = vsel %vm4519_vm9, %v3879_v26, -inf  ;;  %v2970_v56 = vmul.f32 %v10508_v52, %v11761_v12  ;;  %v5960_v17 = vrot.slane %v12662_v25, 1  ;;  %v5926_v55 = vmax.f32 %v5924_v35, %v5925_v53 }
 0x2d4   :  { %v5946_v57 = vrot.slane %v5945_v50, 1  ;;  %v3872_v20 = vcombine.high %v3088_v37, %v3088_v37  ;;  %v5940_v21 = vmax.f32 %v5938_v4, %v5939_v51  ;;  %v6014_v0 = vrot.slane %v6013_v23, 2 }
 0x2d5   :  { %v12701_v54 = vsel %vm4519_vm9, %v4092_v8, -inf  ;;  %v5977_v62 = vrot.slane %v5976_v1, 4  ;;  %v7178_v43 = vsel %vm6996_vm11, %v5933_v5, %v5926_v55  ;;  %v4075_v7 = vcombine.high %v4073_v39, %v4073_v39 }
 0x2d6   :  { %v5983_v45 = vsel %vm4519_vm9, %v4074_v42, -inf  ;;  %v5669_v3 = vrot.slane %v5668_v15, 4  ;;  %v6009_v33 = vrot.slane %v6008_v11, 1  ;;  %v6021_v9 = vrot.slane %v6020_v38, 2 }
 0x2d7   :  { %v5990_v34 = vsel %vm4519_vm9, %v4073_v39, -inf  ;;  %v3038_v35 = vadd.f32 %v11765_v58, %v2970_v56  ;;  %v5947_v53 = vmax.f32 %v5945_v50, %v5946_v57  ;;  %v3886_v4 = vrot.slane %v3872_v20, %v11775_v36 }
 0x2d8   :  { %v3887_v37 = vcombine.high %v3879_v26, %v3879_v26  ;;  %v5971_v8 = vmax.f32 %v12656_v18, %v5970_v59  ;;  %v5978_v44 = vmax.f32 %v5976_v1, %v5977_v62  ;;  %v5984_v52 = vrot.slane %v5983_v45, 4 }
 0x2d9   :  { %v7179_v51 = vsel %vm6998_vm12, %v5940_v21, %v7178_v43  ;;  %v12713_v31 = vmax.f32 %v6013_v23, %v6014_v0  ;;  %v5991_v47 = vrot.slane %v5990_v34, 4  ;;  %v5997_v10 = vsel %vm4519_vm9, %v4075_v7, -inf }
 0x2da   :  { %v5670_v5 = vmax.f32 %v5668_v15, %v5669_v3  ;;  %v12716_v50 = vmax.f32 %v6008_v11, %v6009_v33  ;;  %v12718_v39 = vmax.f32 %v6020_v38, %v6021_v9  ;;  %v3102_v26 = vmax.f32 %v3038_v35, 0.0 }
 0x2db   :  { %v5967_v42 = vrot.slane %v12682_v28, 1  ;;  %v5675_v18 = vsel %vm4519_vm9, %v3887_v37, -inf  ;;  %v5682_v59 = vsel %vm4519_vm9, %v3886_v4, -inf  ;;  %v5972_v1 = vrot.slane %v5971_v8, 2 }
 0x2dc   :  { %v7180_v56 = vsel %vm7000_vm13, %v5947_v53, %v7179_v51  ;;  %v5979_v23 = vrot.slane %v5978_v44, 2  ;;  %v5985_v55 = vmax.f32 %v5983_v45, %v5984_v52  ;;  %v5998_v57 = vrot.slane %v5997_v10, 4 }
 0x2dd   :  { %v3888_v20 = vcombine.high %v3886_v4, %v3886_v4  ;;  %v5992_v11 = vmax.f32 %v5990_v34, %v5991_v47  ;;  %v5671_v21 = vrot.slane %v5670_v5, 2  ;;  %v5961_v38 = vmax.f32 %v12662_v25, %v5960_v17  ;;  %v2792_v25 = vpop.f32.mrf.mxu0 }
 0x2de   :  { %v5676_v0 = vrot.slane %v5675_v18, 4  ;;  %v5683_v62 = vrot.slane %v5682_v59, 4  ;;  %v4117_v43 = vrot.slane %v3102_v26, %v11775_v36  ;;  %v7181_v7 = vsel %vm7002_vm14, %v12680_v40, %v7180_v56  ;;  %v2862_v40 = vpop.f32.mrf.mxu1 }
 0x2df   :  { %v14800_v33 = vrot.slane %v12677_v41, 1  ;;  %v5968_v45 = vmax.f32 %v12682_v28, %v5967_v42  ;;  %v5973_v9 = vmax.f32 %v5971_v8, %v5972_v1  ;;  %v5980_v35 = vmax.f32 %v5978_v44, %v5979_v23 }
 0x2e0   :  { %v5986_v53 = vrot.slane %v5985_v55, 2  ;;  %v5999_v34 = vmax.f32 %v5997_v10, %v5998_v57  ;;  %v12733_v4 = vsel %vm4519_vm9, %v3888_v20, -inf  ;;  %v5993_v17 = vrot.slane %v5992_v11, 2 }
 0x2e1   :  { %14978 = vst [vmem:[#allocation118_spill] sm:$0xff] %v12733_v4  ;;  %v5672_v37 = vmax.f32 %v5670_v5, %v5671_v21  ;;  %v5974_v52 = vrot.slane %v5973_v9, 1  ;;  %v7182_v51 = vsel %vm7004_vm15, %v5961_v38, %v7181_v7  ;;  %v5677_v47 = vmax.f32 %v5675_v18, %v5676_v0 }
 0x2e2   :  { %v5684_v56 = vmax.f32 %v5682_v59, %v5683_v62  ;;  %v4110_v3 = vcombine.high %v3102_v26, %v3102_v26  ;;  %v4125_v29 = vcombine.high %v4117_v43, %v4117_v43  ;;  %v6060_v28 = vsel %vm4519_vm9, %v4117_v43, -inf }
 0x2e3   :  { %v5975_v8 = vmax.f32 %v5973_v9, %v5974_v52  ;;  %v7183_v44 = vsel %vm7006_vm2, %v5968_v45, %v7182_v51  ;;  %v2955_v10 = vmul.f32 %v11761_v12, %v2792_v25  ;;  %v5981_v42 = vrot.slane %v5980_v35, 1 }
 0x2e4   :  { %v6000_v1 = vrot.slane %v5999_v34, 2  ;;  %v2969_v5 = vmul.f32 %v11761_v12, %v2862_v40  ;;  %v5987_v57 = vmax.f32 %v5985_v55, %v5986_v53  ;;  %v5994_v20 = vmax.f32 %v5992_v11, %v5993_v17  ;;  %v10490_v11 = vpop.f32.mrf.mxu0 }
 0x2e5   :  { %v12742_v18 = vsel %vm7008_vm3, %v5975_v8, %v7183_v44  ;;  %v3023_v26 = vadd.f32 %v11765_v58, %v2955_v10  ;;  %v5673_v59 = vrot.slane %v5672_v37, 1  ;;  %v5678_v21 = vrot.slane %v5677_v47, 2 }
 0x2e6   :  { %v4124_v38 = vrot.slane %v4110_v3, %v11775_v36  ;;  %v6061_v0 = vrot.slane %v6060_v28, 4  ;;  %7661 = vrot.lane.b32.xlu1 %v12742_v18, %s10611_s24  ;;  %v6067_v62 = vsel %vm4519_vm9, %v4125_v29, -inf  ;;  %v14801_v43 = vrot.slane %v12742_v18, 1 }
 0x2e7   :  { %v3087_v7 = vmax.f32 %v3023_v26, 0.0  ;;  %v3037_v55 = vadd.f32 %v11765_v58, %v2969_v5  ;;  %v5982_v45 = vmax.f32 %v5980_v35, %v5981_v42  ;;  %v6001_v9 = vmax.f32 %v5999_v34, %v6000_v1 }
 0x2e8   :  { %v5685_v53 = vrot.slane %v5684_v56, 2  ;;  %v2958_v25 = vmul.f32 %v10490_v11, %v11761_v12  ;;  %v7489_v29 = vsel %vm1434_vm0, %v14800_v33, %v14801_v43  ;;  %v5988_v51 = vrot.slane %v5987_v57, 1 }
 0x2e9   :  { %v3855_v17 = vcombine.high %v3087_v7, %v3087_v7  ;;  %v3862_v3 = vrot.slane %v3087_v7, %v11775_v36  ;;  %v3101_v52 = vmax.f32 %v3037_v55, 0.0  ;;  %v6062_v40 = vmax.f32 %v6060_v28, %v6061_v0  ;;  %7787 = vrot.lane.b32.xlu0 %v7489_v29, %s10613_s6 }
 0x2ea   :  { %v6068_v8 = vrot.slane %v6067_v62, 4  ;;  %v6074_v35 = vsel %vm4519_vm9, %v4124_v38, -inf  ;;  %v5995_v1 = vrot.slane %v5994_v20, 1  ;;  %v12763_v5 = vmax.f32 %v5672_v37, %v5673_v59 }
 0x2eb   :  { %v3869_v34 = vrot.slane %v3855_v17, %v11775_v36  ;;  %v3870_v44 = vcombine.high %v3862_v3, %v3862_v3  ;;  %v5640_v10 = vsel %vm4519_vm9, %v3862_v3, -inf  ;;  %v4093_v42 = vcombine.high %v3101_v52, %v3101_v52 }
 0x2ec   :  { %14979 = vst [vmem:[#allocation119_spill] sm:$0xff] %v12763_v5  ;;  %v5641_v26 = vrot.slane %v5640_v10, 4  ;;  %v3026_v7 = vadd.f32 %v11765_v58, %v2958_v25  ;;  %v6002_v55 = vrot.slane %v6001_v9, 1  ;;  %v12766_v11 = vmax.f32 %v5677_v47, %v5678_v21 }
 0x2ed   :  { %v4126_v28 = vcombine.high %v4124_v38, %v4124_v38  ;;  %v5647_v0 = vsel %vm4519_vm9, %v3870_v44, -inf  ;;  %v6075_v33 = vrot.slane %v6074_v35, 4  ;;  %v3871_v29 = vcombine.high %v3869_v34, %v3869_v34 }
 0x2ee   :  { %14980 = vst [vmem:[#allocation120_spill] sm:$0xff] %v12766_v11  ;;  %v5654_v17 = vsel %vm4519_vm9, %v3869_v34, -inf  ;;  %v4100_v23 = vrot.slane %v3101_v52, %v11775_v36  ;;  %v12771_v3 = vmax.f32 %v5684_v56, %v5685_v53  ;;  %v6063_v43 = vrot.slane %v6062_v40, 2 }
 0x2ef   :  { %v6069_v37 = vmax.f32 %v6067_v62, %v6068_v8  ;;  %v4107_v59 = vrot.slane %v4093_v42, %v11775_v36  ;;  %v5989_v15 = vmax.f32 %v5987_v57, %v5988_v51  ;;  %v5642_v25 = vmax.f32 %v5640_v10, %v5641_v26 }
 0x2f0   :  { %14981 = vst [vmem:[#allocation121_spill] sm:$0xff] %v12771_v3  ;;  %v5648_v5 = vrot.slane %v5647_v0, 4  ;;  %v3090_v47 = vmax.f32 %v3026_v7, 0.0  ;;  %v12774_v21 = vmax.f32 %v5994_v20, %v5995_v1  ;;  %v12776_v38 = vmax.f32 %v6001_v9, %v6002_v55  ;;  %v2802_v3 = vpop.f32.mrf.mxu0 }
 0x2f1   :  { %v5655_v63 = vrot.slane %v5654_v17, 4  ;;  %v6076_v34 = vmax.f32 %v6074_v35, %v6075_v33  ;;  %v12780_v52 = vsel %vm4519_vm9, %v4126_v28, -inf  ;;  %v5661_v56 = vsel %vm4519_vm9, %v3871_v29, -inf }
 0x2f2   :  { %v4108_v62 = vcombine.high %v4100_v23, %v4100_v23  ;;  %v6064_v53 = vmax.f32 %v6062_v40, %v6063_v43  ;;  %v6070_v8 = vrot.slane %v6069_v37, 2  ;;  %v6032_v57 = vsel %vm4519_vm9, %v4100_v23, -inf }
 0x2f3   :  { %v6046_v51 = vsel %vm4519_vm9, %v4107_v59, -inf  ;;  %v5643_v20 = vrot.slane %v5642_v25, 2  ;;  %v5649_v10 = vmax.f32 %v5647_v0, %v5648_v5  ;;  %v4109_v9 = vcombine.high %v4107_v59, %v4107_v59 }
 0x2f4   :  { %v3906_v42 = vcombine.high %v3090_v47, %v3090_v47  ;;  %v12786_v1 = vsel %vm6996_vm11, %v5989_v15, %v5982_v45  ;;  %v5656_v35 = vmax.f32 %v5654_v17, %v5655_v63  ;;  %v5662_v26 = vrot.slane %v5661_v56, 4 }
 0x2f5   :  { %v6077_v7 = vrot.slane %v6076_v34, 2  ;;  %v6033_v55 = vrot.slane %v6032_v57, 4  ;;  %v6039_v43 = vsel %vm4519_vm9, %v4108_v62, -inf  ;;  %v6047_v40 = vrot.slane %v6046_v51, 4 }
 0x2f6   :  { %v6065_v28 = vrot.slane %v6064_v53, 1  ;;  %v12790_v23 = vmax.f32 %v6069_v37, %v6070_v8  ;;  %v3913_v29 = vrot.slane %v3090_v47, %v11775_v36  ;;  %v7019_v5 = vsel %vm7000_vm13, %v12005_v30, %v12008_v14 }
 0x2f7   :  { %v5644_v15 = vmax.f32 %v5642_v25, %v5643_v20  ;;  %v5650_v45 = vrot.slane %v5649_v10, 2  ;;  %v6053_v0 = vsel %vm4519_vm9, %v4109_v9, -inf  ;;  %v3920_v63 = vrot.slane %v3906_v42, %v11775_v36 }
 0x2f8   :  { %v5657_v17 = vrot.slane %v5656_v35, 2  ;;  %v5663_v59 = vmax.f32 %v5661_v56, %v5662_v26  ;;  %v6040_v44 = vrot.slane %v6039_v43, 4  ;;  %v14982_v62 = vrot.slane %v11986_v32, 1 }
 0x2f9   :  { %v12801_v8 = vmax.f32 %v6076_v34, %v6077_v7  ;;  %v6034_v33 = vmax.f32 %v6032_v57, %v6033_v55  ;;  %v6048_v4 = vmax.f32 %v6046_v51, %v6047_v40  ;;  %v12804_v30 = vmax.f32 %v6064_v53, %v6065_v28 }
 0x2fa   :  { %v4687_v37 = vmax.f32 %v11986_v32, %v14982_v62  ;;  %v6054_v14 = vrot.slane %v6053_v0, 4  ;;  %v3921_v25 = vcombine.high %v3913_v29, %v3913_v29  ;;  %v7020_v20 = vsel %vm7002_vm14, %v11978_v13, %v7019_v5  ;;  %v10493_v5 = vpop.f32.mrf.mxu0 }
 0x2fb   :  { %14983 = vst [vmem:[#allocation122_spill] sm:$0xff] %v12804_v30  ;;  %v5645_v9 = vrot.slane %v5644_v15, 1  ;;  %v5651_v42 = vmax.f32 %v5649_v10, %v5650_v45  ;;  %v3922_v26 = vcombine.high %v3920_v63, %v3920_v63  ;;  %v5658_v32 = vmax.f32 %v5656_v35, %v5657_v17 }
 0x2fc   :  { %v5664_v34 = vrot.slane %v5663_v59, 2  ;;  %v6041_v7 = vmax.f32 %v6039_v43, %v6040_v44  ;;  %v5724_v62 = vsel %vm4519_vm9, %v3913_v29, -inf  ;;  %v6035_v57 = vrot.slane %v6034_v33, 2  ;;  %v2812_v41 = vpop.f32.mrf.mxu0 }
 0x2fd   :  { %v6049_v51 = vrot.slane %v6048_v4, 2  ;;  %v7021_v53 = vsel %vm7004_vm15, %v11990_v22, %v7020_v20  ;;  %v2957_v55 = vmul.f32 %v11761_v12, %v2802_v3  ;;  %v6055_v40 = vmax.f32 %v6053_v0, %v6054_v14 }
 0x2fe   :  { %v5731_v13 = vsel %vm4519_vm9, %v3921_v25, -inf  ;;  %v5738_v28 = vsel %vm4519_vm9, %v3920_v63, -inf  ;;  %v7022_v10 = vsel %vm7006_vm2, %v12001_v46, %v7021_v53  ;;  %v5725_v35 = vrot.slane %v5724_v62, 4 }
 0x2ff   :  { %v5745_v44 = vsel %vm4519_vm9, %v3922_v26, -inf  ;;  %v12819_v43 = vsel %vm7008_vm3, %v4687_v37, %v7022_v10  ;;  %v3025_v29 = vadd.f32 %v11765_v58, %v2957_v55  ;;  %v12822_v22 = vmax.f32 %v5644_v15, %v5645_v9 }
 0x300   :  { %14984 = vst [vmem:[#allocation123_spill] sm:$0xff] %v12819_v43  ;;  %v6042_v3 = vrot.slane %v6041_v7, 2  ;;  %v14812_v45 = vrot.slane %v12819_v43, 1  ;;  %7615 = vrot.lane.b32.xlu0 %v12819_v43, %s10611_s24  ;;  %v2960_v0 = vmul.f32 %v10493_v5, %v11761_v12  ;;  %v5652_v46 = vrot.slane %v5651_v42, 1 }
 0x301   :  { %v5732_v63 = vrot.slane %v5731_v13, 4  ;;  %v5739_v17 = vrot.slane %v5738_v28, 4  ;;  %v3089_v14 = vmax.f32 %v3025_v29, 0.0  ;;  %v5659_v25 = vrot.slane %v5658_v32, 1 }
 0x302   :  { %v5665_v37 = vmax.f32 %v5663_v59, %v5664_v34  ;;  %v5746_v20 = vrot.slane %v5745_v44, 4  ;;  %v14985_v15 = vrot.slane %v12102_v19, 1  ;;  %v5726_v26 = vmax.f32 %v5724_v62, %v5725_v35 }
 0x303   :  { %v3889_v53 = vcombine.high %v3089_v14, %v3089_v14  ;;  %v3896_v55 = vrot.slane %v3089_v14, %v11775_v36  ;;  %v3028_v10 = vadd.f32 %v11765_v58, %v2960_v0  ;;  %v6036_v5 = vmax.f32 %v6034_v33, %v6035_v57 }
 0x304   :  { %v7512_v9 = vsel %vm1434_vm0, %v14985_v15, %v14812_v45  ;;  %v6043_v29 = vmax.f32 %v6041_v7, %v6042_v3  ;;  %v6050_v47 = vmax.f32 %v6048_v4, %v6049_v51  ;;  %v6056_v59 = vrot.slane %v6055_v40, 2 }
 0x305   :  { %7741 = vrot.lane.b32.xlu1 %v7512_v9, %s10613_s6  ;;  %v5733_v34 = vmax.f32 %v5731_v13, %v5732_v63  ;;  %v5740_v56 = vmax.f32 %v5738_v28, %v5739_v17  ;;  %v3903_v11 = vrot.slane %v3889_v53, %v11775_v36  ;;  %v3904_v19 = vcombine.high %v3896_v55, %v3896_v55 }
 0x306   :  { %v5653_v27 = vmax.f32 %v5651_v42, %v5652_v46  ;;  %v5747_v15 = vmax.f32 %v5745_v44, %v5746_v20  ;;  %v5696_v62 = vsel %vm4519_vm9, %v3896_v55, -inf  ;;  %v2959_v35 = vmul.f32 %v11761_v12, %v2812_v41 }
 0x307   :  { %v12840_v9 = vmax.f32 %v5658_v32, %v5659_v25  ;;  %v5727_v14 = vrot.slane %v5726_v26, 2  ;;  %v5703_v33 = vsel %vm4519_vm9, %v3904_v19, -inf  ;;  %v3092_v7 = vmax.f32 %v3028_v10, 0.0 }
 0x308   :  { %v5666_v4 = vrot.slane %v5665_v37, 1  ;;  %v6037_v57 = vrot.slane %v6036_v5, 1  ;;  %v6044_v51 = vrot.slane %v6043_v29, 1  ;;  %v6057_v13 = vmax.f32 %v6055_v40, %v6056_v59 }
 0x309   :  { %14986 = vst [vmem:[#allocation124_spill] sm:$0xff] %v12840_v9  ;;  %v5734_v28 = vrot.slane %v5733_v34, 2  ;;  %v5741_v3 = vrot.slane %v5740_v56, 2  ;;  %v3905_v0 = vcombine.high %v3903_v11, %v3903_v11  ;;  %v5697_v63 = vrot.slane %v5696_v62, 4 }
 0x30a   :  { %v5748_v42 = vrot.slane %v5747_v15, 2  ;;  %v5704_v44 = vrot.slane %v5703_v33, 4  ;;  %v5710_v46 = vsel %vm4519_vm9, %v3903_v11, -inf  ;;  %v3027_v41 = vadd.f32 %v11765_v58, %v2959_v35 }
 0x30b   :  { %v6051_v32 = vrot.slane %v6050_v47, 1  ;;  %v5728_v17 = vmax.f32 %v5726_v26, %v5727_v14  ;;  %v3940_v25 = vcombine.high %v3092_v7, %v3092_v7  ;;  %v3947_v19 = vrot.slane %v3092_v7, %v11775_v36 }
 0x30c   :  { %v12846_v20 = vmax.f32 %v5665_v37, %v5666_v4  ;;  %v6038_v53 = vmax.f32 %v6036_v5, %v6037_v57  ;;  %v6045_v55 = vmax.f32 %v6043_v29, %v6044_v51  ;;  %v6058_v40 = vrot.slane %v6057_v13, 1 }
 0x30d   :  { %v5735_v10 = vmax.f32 %v5733_v34, %v5734_v28  ;;  %v5698_v59 = vmax.f32 %v5696_v62, %v5697_v63  ;;  %v5711_v45 = vrot.slane %v5710_v46, 4  ;;  %v5717_v9 = vsel %vm4519_vm9, %v3905_v0, -inf }
 0x30e   :  { %14987 = vst [vmem:[#allocation125_spill] sm:$0xff] %v12846_v20  ;;  %v5742_v49 = vmax.f32 %v5740_v56, %v5741_v3  ;;  %v12849_v30 = vmax.f32 %v5747_v15, %v5748_v42  ;;  %v5705_v11 = vmax.f32 %v5703_v33, %v5704_v44  ;;  %v3091_v35 = vmax.f32 %v3027_v41, 0.0  ;;  %v10496_v15 = vpop.f32.mrf.mxu0 }
 0x30f   :  { %v12853_v26 = vsel %vm6996_vm11, %v5653_v27, %v12822_v22  ;;  %v5729_v14 = vrot.slane %v5728_v17, 1  ;;  %v3954_v37 = vrot.slane %v3940_v25, %v11775_v36  ;;  %v3955_v5 = vcombine.high %v3947_v19, %v3947_v19 }
 0x310   :  { %14988 = vst [vmem:[#allocation126_spill] sm:$0xff] %v12849_v30  ;;  %14989 = vst [vmem:[#allocation127_spill] sm:$0xff] %v12853_v26  ;;  %v12856_v29 = vmax.f32 %v6050_v47, %v6051_v32  ;;  %v12858_v34 = vmax.f32 %v6057_v13, %v6058_v40  ;;  %v12861_v62 = vsel %vm6996_vm11, %v6045_v55, %v6038_v53  ;;  %v5718_v56 = vrot.slane %v5717_v9, 4 }
 0x311   :  { %14992 = vst [vmem:[#allocation130_spill] sm:$0xff] %v12861_v62  ;;  %v5736_v7 = vrot.slane %v5735_v10, 1  ;;  %v5699_v33 = vrot.slane %v5698_v59, 2  ;;  %v5712_v4 = vmax.f32 %v5710_v46, %v5711_v45  ;;  %v5780_v57 = vsel %vm4519_vm9, %v3947_v19, -inf  ;;  %v2822_v46 = vpop.f32.mrf.mxu0 }
 0x312   :  { %14990 = vst [vmem:[#allocation128_spill] sm:$0xff] %v12856_v29  ;;  %14991 = vst [vmem:[#allocation129_spill] sm:$0xff] %v12858_v34  ;;  %v5743_v27 = vrot.slane %v5742_v49, 1  ;;  %v5706_v51 = vrot.slane %v5705_v11, 2  ;;  %v3923_v28 = vcombine.high %v3091_v35, %v3091_v35  ;;  %v12865_v3 = vmax.f32 %v5728_v17, %v5729_v14 }
 0x313   :  { %v5787_v47 = vsel %vm4519_vm9, %v3955_v5, -inf  ;;  %v5794_v13 = vsel %vm4519_vm9, %v3954_v37, -inf  ;;  %v3930_v0 = vrot.slane %v3091_v35, %v11775_v36  ;;  %v5719_v63 = vmax.f32 %v5717_v9, %v5718_v56 }
 0x314   :  { %14993 = vst [vmem:[#allocation131_spill] sm:$0xff] %v12865_v3  ;;  %v3956_v42 = vcombine.high %v3954_v37, %v3954_v37  ;;  %v5781_v44 = vrot.slane %v5780_v57, 4  ;;  %v3937_v45 = vrot.slane %v3923_v28, %v11775_v36  ;;  %v12871_v41 = vmax.f32 %v5735_v10, %v5736_v7 }
 0x315   :  { %v5700_v32 = vmax.f32 %v5698_v59, %v5699_v33  ;;  %v5713_v25 = vrot.slane %v5712_v4, 2  ;;  %v3938_v19 = vcombine.high %v3930_v0, %v3930_v0  ;;  %v12873_v53 = vmax.f32 %v5742_v49, %v5743_v27 }
 0x316   :  { %14994 = vst [vmem:[#allocation132_spill] sm:$0xff] %v12871_v41  ;;  %v5707_v17 = vmax.f32 %v5705_v11, %v5706_v51  ;;  %v5788_v55 = vrot.slane %v5787_v47, 4  ;;  %v5795_v40 = vrot.slane %v5794_v13, 4  ;;  %v3939_v14 = vcombine.high %v3937_v45, %v3937_v45 }
 0x317   :  { %14995 = vst [vmem:[#allocation133_spill] sm:$0xff] %v12873_v53  ;;  %v5752_v5 = vsel %vm4519_vm9, %v3930_v0, -inf  ;;  %v2962_v9 = vmul.f32 %v10496_v15, %v11761_v12  ;;  %v2961_v35 = vmul.f32 %v11761_v12, %v2822_v46  ;;  %v5720_v37 = vrot.slane %v5719_v63, 2 }
 0x318   :  { %v5782_v56 = vmax.f32 %v5780_v57, %v5781_v44  ;;  %v12879_v10 = vsel %vm4519_vm9, %v3956_v42, -inf  ;;  %v5759_v59 = vsel %vm4519_vm9, %v3938_v19, -inf  ;;  %v5701_v7 = vrot.slane %v5700_v32, 1 }
 0x319   :  { %14996 = vst [vmem:[#allocation134_spill] sm:$0xff] %v12879_v10  ;;  %v5714_v49 = vmax.f32 %v5712_v4, %v5713_v25  ;;  %v3030_v11 = vadd.f32 %v11765_v58, %v2962_v9  ;;  %v3029_v33 = vadd.f32 %v11765_v58, %v2961_v35  ;;  %v5789_v27 = vmax.f32 %v5787_v47, %v5788_v55 }
 0x31a   :  { %v5796_v51 = vmax.f32 %v5794_v13, %v5795_v40  ;;  %v5753_v28 = vrot.slane %v5752_v5, 4  ;;  %v5766_v15 = vsel %vm4519_vm9, %v3937_v45, -inf  ;;  %v5760_v0 = vrot.slane %v5759_v59, 4  ;;  %v10511_v40 = vpop.f32.mrf.mxu1 }
 0x31b   :  { %v5773_v46 = vsel %vm4519_vm9, %v3939_v14, -inf  ;;  %v3094_v57 = vmax.f32 %v3030_v11, 0.0  ;;  %v3093_v44 = vmax.f32 %v3029_v33, 0.0  ;;  %v5708_v42 = vrot.slane %v5707_v17, 1 }
 0x31c   :  { %v5721_v22 = vmax.f32 %v5719_v63, %v5720_v37  ;;  %v5783_v53 = vrot.slane %v5782_v56, 2  ;;  %v5702_v4 = vmax.f32 %v5700_v32, %v5701_v7  ;;  %v5767_v25 = vrot.slane %v5766_v15, 4 }
 0x31d   :  { %v3974_v9 = vcombine.high %v3094_v57, %v3094_v57  ;;  %v3981_v35 = vrot.slane %v3094_v57, %v11775_v36  ;;  %v5715_v47 = vrot.slane %v5714_v49, 1  ;;  %v5754_v13 = vmax.f32 %v5752_v5, %v5753_v28 }
 0x31e   :  { %v5774_v55 = vrot.slane %v5773_v46, 4  ;;  %v3964_v45 = vrot.slane %v3093_v44, %v11775_v36  ;;  %v5790_v41 = vrot.slane %v5789_v27, 2  ;;  %v5797_v14 = vrot.slane %v5796_v51, 2 }
 0x31f   :  { %v5761_v11 = vmax.f32 %v5759_v59, %v5760_v0  ;;  %v3957_v33 = vcombine.high %v3093_v44, %v3093_v44  ;;  %v5709_v3 = vmax.f32 %v5707_v17, %v5708_v42  ;;  %v5722_v63 = vrot.slane %v5721_v22, 1 }
 0x320   :  { %v3989_v37 = vcombine.high %v3981_v35, %v3981_v35  ;;  %v5836_v19 = vsel %vm4519_vm9, %v3981_v35, -inf  ;;  %v5768_v32 = vmax.f32 %v5766_v15, %v5767_v25  ;;  %v3988_v7 = vrot.slane %v3974_v9, %v11775_v36 }
 0x321   :  { %v5837_v10 = vrot.slane %v5836_v19, 4  ;;  %v2972_v57 = vmul.f32 %v10511_v40, %v11761_v12  ;;  %v5784_v5 = vmax.f32 %v5782_v56, %v5783_v53  ;;  %v5755_v28 = vrot.slane %v5754_v13, 2 }
 0x322   :  { %v5775_v30 = vmax.f32 %v5773_v46, %v5774_v55  ;;  %v3972_v20 = vcombine.high %v3964_v45, %v3964_v45  ;;  %v5716_v26 = vmax.f32 %v5714_v49, %v5715_v47  ;;  %v12892_v34 = vmax.f32 %v5789_v27, %v5790_v41 }
 0x323   :  { %v5762_v59 = vrot.slane %v5761_v11, 2  ;;  %v3971_v17 = vrot.slane %v3957_v33, %v11775_v36  ;;  %v12895_v0 = vmax.f32 %v5796_v51, %v5797_v14  ;;  %v5838_v44 = vmax.f32 %v5836_v19, %v5837_v10 }
 0x324   :  { %v5843_v15 = vsel %vm4519_vm9, %v3989_v37, -inf  ;;  %v5808_v42 = vsel %vm4519_vm9, %v3964_v45, -inf  ;;  %v5769_v25 = vrot.slane %v5768_v32, 2  ;;  %v3990_v9 = vcombine.high %v3988_v7, %v3988_v7 }
 0x325   :  { %14997 = vst [vmem:[#allocation135_spill] sm:$0xff] %v12895_v0  ;;  %v5850_v53 = vsel %vm4519_vm9, %v3988_v7, -inf  ;;  %v3040_v56 = vadd.f32 %v11765_v58, %v2972_v57  ;;  %v5756_v46 = vmax.f32 %v5754_v13, %v5755_v28  ;;  %v5776_v49 = vrot.slane %v5775_v30, 2 }
 0x326   :  { %v5809_v41 = vrot.slane %v5808_v42, 4  ;;  %v5815_v27 = vsel %vm4519_vm9, %v3972_v20, -inf  ;;  %v5763_v35 = vmax.f32 %v5761_v11, %v5762_v59  ;;  %v5844_v47 = vrot.slane %v5843_v15, 4 }
 0x327   :  { %v3973_v51 = vcombine.high %v3971_v17, %v3971_v17  ;;  %v5822_v10 = vsel %vm4519_vm9, %v3971_v17, -inf  ;;  %v12903_v19 = vmax.f32 %v5721_v22, %v5722_v63  ;;  %v5839_v55 = vrot.slane %v5838_v44, 2 }
 0x328   :  { %v5851_v45 = vrot.slane %v5850_v53, 4  ;;  %v5816_v40 = vrot.slane %v5815_v27, 4  ;;  %v7150_v14 = vsel %vm6996_vm11, %v5709_v3, %v5702_v4  ;;  %v5785_v33 = vrot.slane %v5784_v5, 1 }
 0x329   :  { %14998 = vst [vmem:[#allocation136_spill] sm:$0xff] %v12903_v19  ;;  %v5770_v37 = vmax.f32 %v5768_v32, %v5769_v25  ;;  %v5857_v13 = vsel %vm4519_vm9, %v3990_v9, -inf  ;;  %v5757_v7 = vrot.slane %v5756_v46, 1  ;;  %v5810_v57 = vmax.f32 %v5808_v42, %v5809_v41 }
 0x32a   :  { %v5823_v28 = vrot.slane %v5822_v10, 4  ;;  %v3104_v20 = vmax.f32 %v3040_v56, 0.0  ;;  %v5764_v11 = vrot.slane %v5763_v35, 1  ;;  %v5777_v59 = vmax.f32 %v5775_v30, %v5776_v49 }
 0x32b   :  { %v5845_v0 = vmax.f32 %v5843_v15, %v5844_v47  ;;  %v5829_v17 = vsel %vm4519_vm9, %v3973_v51, -inf  ;;  %v5840_v22 = vmax.f32 %v5838_v44, %v5839_v55  ;;  %v5852_v63 = vmax.f32 %v5850_v53, %v5851_v45 }
 0x32c   :  { %v5858_v19 = vrot.slane %v5857_v13, 4  ;;  %v5817_v29 = vmax.f32 %v5815_v27, %v5816_v40  ;;  %v12909_v62 = vsel %vm6998_vm12, %v5716_v26, %v7150_v14  ;;  %v12911_v3 = vmax.f32 %v5784_v5, %v5785_v33 }
 0x32d   :  { %v5771_v32 = vrot.slane %v5770_v37, 1  ;;  %v5811_v42 = vrot.slane %v5810_v57, 2  ;;  %v5824_v25 = vmax.f32 %v5822_v10, %v5823_v28  ;;  %v5830_v9 = vrot.slane %v5829_v17, 4 }
 0x32e   :  { %v4144_v56 = vcombine.high %v3104_v20, %v3104_v20  ;;  %v5758_v30 = vmax.f32 %v5756_v46, %v5757_v7  ;;  %v5765_v15 = vmax.f32 %v5763_v35, %v5764_v11  ;;  %v5778_v49 = vrot.slane %v5777_v59, 1 }
 0x32f   :  { %v5846_v41 = vrot.slane %v5845_v0, 2  ;;  %v5841_v44 = vrot.slane %v5840_v22, 1  ;;  %v5853_v53 = vrot.slane %v5852_v63, 2  ;;  %v12914_v47 = vmax.f32 %v5857_v13, %v5858_v19 }
 0x330   :  { %v5818_v27 = vrot.slane %v5817_v29, 2  ;;  %v12916_v26 = vmax.f32 %v5770_v37, %v5771_v32  ;;  %v4151_v5 = vrot.slane %v3104_v20, %v11775_v36  ;;  %v14999_v51 = vrot.slane %v12713_v31, 1  ;;  %v2872_v20 = vpop.f32.mrf.mxu1 }
 0x331   :  { %v6023_v10 = vrot.slane %v12718_v39, 1  ;;  %v5812_v45 = vmax.f32 %v5810_v57, %v5811_v42  ;;  %v5825_v46 = vrot.slane %v5824_v25, 2  ;;  %v5831_v35 = vmax.f32 %v5829_v17, %v5830_v9 }
 0x332   :  { %v6017_v55 = vmax.f32 %v12713_v31, %v14999_v51  ;;  %v4158_v40 = vrot.slane %v4144_v56, %v11775_v36  ;;  %v12924_v14 = vmax.f32 %v5777_v59, %v5778_v49  ;;  %v12927_v19 = vsel %vm6996_vm11, %v5765_v15, %v5758_v30 }
 0x333   :  { %v12929_v33 = vmax.f32 %v5845_v0, %v5846_v41  ;;  %v15000_v37 = vrot.slane %v12701_v54, 4  ;;  %v12934_v7 = vmax.f32 %v5840_v22, %v5841_v44  ;;  %v12936_v31 = vmax.f32 %v5852_v63, %v5853_v53 }
 0x334   :  { %v5860_v57 = vrot.slane %v12914_v47, 2  ;;  %v5819_v28 = vmax.f32 %v5817_v29, %v5818_v27  ;;  %v4159_v11 = vcombine.high %v4151_v5, %v4151_v5  ;;  %v6116_v59 = vsel %vm4519_vm9, %v4151_v5, -inf }
 0x335   :  { %v6027_v13 = vmax.f32 %v12701_v54, %v15000_v37  ;;  %v7186_v0 = vsel %vm6998_vm12, %v12774_v21, %v12786_v1  ;;  %v5813_v32 = vrot.slane %v5812_v45, 1  ;;  %v12943_v42 = vmax.f32 %v5824_v25, %v5825_v46 }
 0x336   :  { %v5832_v54 = vrot.slane %v5831_v35, 2  ;;  %v4160_v22 = vcombine.high %v4158_v40, %v4158_v40  ;;  %v6130_v63 = vsel %vm4519_vm9, %v4158_v40, -inf  ;;  %v7187_v29 = vsel %vm7000_vm13, %v12776_v38, %v7186_v0 }
 0x337   :  { %v6028_v17 = vrot.slane %v6027_v13, 2  ;;  %v2971_v56 = vmul.f32 %v11761_v12, %v2872_v20  ;;  %v5820_v30 = vrot.slane %v5819_v28, 1  ;;  %v6117_v15 = vrot.slane %v6116_v59, 4 }
 0x338   :  { %v6024_v49 = vmax.f32 %v12718_v39, %v6023_v10  ;;  %v7188_v21 = vsel %vm7002_vm14, %v12716_v50, %v7187_v29  ;;  %v6123_v1 = vsel %vm4519_vm9, %v4159_v11, -inf  ;;  %v12955_v53 = vmax.f32 %v5831_v35, %v5832_v54 }
 0x339   :  { %v6029_v9 = vmax.f32 %v6027_v13, %v6028_v17  ;;  %v7189_v41 = vsel %vm7004_vm15, %v6017_v55, %v7188_v21  ;;  %v3039_v44 = vadd.f32 %v11765_v58, %v2971_v56  ;;  %v6131_v27 = vrot.slane %v6130_v63, 4  ;;  %v10514_v13 = vpop.f32.mrf.mxu1 }
 0x33a   :  { %v6137_v38 = vsel %vm4519_vm9, %v4160_v22, -inf  ;;  %v7190_v5 = vsel %vm7006_vm2, %v6024_v49, %v7189_v41  ;;  %v5814_v51 = vmax.f32 %v5812_v45, %v5813_v32  ;;  %v5827_v39 = vrot.slane %v12943_v42, 1 }
 0x33b   :  { %v6030_v25 = vrot.slane %v6029_v9, 1  ;;  %v3103_v46 = vmax.f32 %v3039_v44, 0.0  ;;  %v5821_v50 = vmax.f32 %v5819_v28, %v5820_v30  ;;  %v6118_v40 = vmax.f32 %v6116_v59, %v6117_v15  ;;  %v2882_v56 = vpop.f32.mrf.mxu1 }
 0x33c   :  { %v6124_v37 = vrot.slane %v6123_v1, 4  ;;  %v7026_v55 = vsel %vm7000_vm13, %v12066_v2, %v12088_v24  ;;  %v6138_v35 = vrot.slane %v6137_v38, 4  ;;  %v6132_v45 = vmax.f32 %v6130_v63, %v6131_v27 }
 0x33d   :  { %v6031_v10 = vmax.f32 %v6029_v9, %v6030_v25  ;;  %v4127_v11 = vcombine.high %v3103_v46, %v3103_v46  ;;  %v4134_v17 = vrot.slane %v3103_v46, %v11775_v36  ;;  %v15002_v28 = vrot.slane %v12014_v60, 1 }
 0x33e   :  { %v7027_v2 = vsel %vm7002_vm14, %v12010_v16, %v7026_v55  ;;  %v15003_v9 = vrot.slane %v12742_v18, 1  ;;  %v2974_v16 = vmul.f32 %v10514_v13, %v11761_v12  ;;  %v6119_v30 = vrot.slane %v6118_v40, 2 }
 0x33f   :  { %v12964_v20 = vsel %vm7008_vm3, %v6031_v10, %v7190_v5  ;;  %v4743_v59 = vmax.f32 %v12014_v60, %v15002_v28  ;;  %v4141_v24 = vrot.slane %v4127_v11, %v11775_v36  ;;  %v4142_v32 = vcombine.high %v4134_v17, %v4134_v17 }
 0x340   :  { %15001 = vst [vmem:[#allocation137_spill] sm:$0xff] %v12964_v20  ;;  %v7477_v0 = vrot.slane %v12964_v20, 1  ;;  %7663 = vrot.lane.b32.xlu0 %v12964_v20, %s10611_s24  ;;  %v6088_v54 = vsel %vm4519_vm9, %v4134_v17, -inf  ;;  %v7028_v22 = vsel %vm7004_vm15, %v12044_v61, %v7027_v2  ;;  %v6125_v21 = vmax.f32 %v6123_v1, %v6124_v37  ;;  %v6323_v37 = vld [vmem:[%s14735_s2 + $0x58] sm:$0xff] }
 0x341   :  { %v6089_v63 = vrot.slane %v6088_v54, 4  ;;  %v7029_v60 = vsel %vm7006_vm2, %v12049_v48, %v7028_v22  ;;  %v4143_v15 = vcombine.high %v4141_v24, %v4141_v24  ;;  %v6095_v49 = vsel %vm4519_vm9, %v4142_v32, -inf  ;;  %10521 = vmatprep.subr.mxu1 %v6323_v37 }
 0x342   :  { %v7488_v29 = vsel %vm1434_vm0, %v15003_v9, %v7477_v0  ;;  %v12991_v61 = vsel %vm7008_vm3, %v4743_v59, %v7029_v60  ;;  %v6096_v25 = vrot.slane %v6095_v49, 4  ;;  %v6102_v41 = vsel %vm4519_vm9, %v4141_v24, -inf  ;;  %10522 = vmatpush3.msra.mxu1 %v6323_v37  ;;  %v6321_v9 = vld [vmem:[%s14735_s2 + $0x48] sm:$0xff]  ;;  %v6320_v60 = vld [vmem:[%s14735_s2 + $0x40] sm:$0xff] }
 0x343   :  { %7789 = vrot.lane.b32.xlu1 %v7488_v29, %s10613_s6  ;;  %15004 = vst [vmem:[#allocation138_spill] sm:$0xff] %v12991_v61  ;;  %v7454_v44 = vrot.slane %v12991_v61, 1  ;;  %v6139_v27 = vmax.f32 %v6137_v38, %v6138_v35  ;;  %v6109_v48 = vsel %vm4519_vm9, %v4143_v15, -inf  ;;  %v3042_v5 = vadd.f32 %v11765_v58, %v2974_v16  ;;  %v6322_v38 = vld [vmem:[%s14735_s2 + $0x50] sm:$0xff] }
 0x344   :  { %v2973_v10 = vmul.f32 %v11761_v12, %v2882_v56  ;;  %v5861_v46 = vmax.f32 %v12914_v47, %v5860_v57  ;;  %v5834_v55 = vrot.slane %v12955_v53, 1  ;;  %v6133_v13 = vrot.slane %v6132_v45, 2  ;;  %10523 = vmatprep.subr.mxu1 %v6322_v38 }
 0x345   :  { %v6090_v1 = vmax.f32 %v6088_v54, %v6089_v63  ;;  %v6097_v35 = vmax.f32 %v6095_v49, %v6096_v25  ;;  %v6103_v11 = vrot.slane %v6102_v41, 4  ;;  %v15005_v17 = vrot.slane %v12819_v43, 1  ;;  %10524 = vmatpush3.msra.mxu1 %v6322_v38 }
 0x346   :  { %v3041_v57 = vadd.f32 %v11765_v58, %v2973_v10  ;;  %v5828_v28 = vmax.f32 %v12943_v42, %v5827_v39  ;;  %v6120_v59 = vmax.f32 %v6118_v40, %v6119_v30  ;;  %v6110_v2 = vrot.slane %v6109_v48, 4  ;;  %10525 = vmatprep.subr.mxu1 %v6321_v9 }
 0x347   :  { %v7511_v47 = vsel %vm1434_vm0, %v15005_v17, %v7454_v44  ;;  %7617 = vrot.lane.b32.xlu1 %v12991_v61, %s10611_s24  ;;  %v3106_v24 = vmax.f32 %v3042_v5, 0.0  ;;  %v7164_v32 = vsel %vm6996_vm11, %v5821_v50, %v5814_v51  ;;  %v6126_v54 = vrot.slane %v6125_v21, 2  ;;  %10526 = vmatpush3.msra.mxu1 %v6321_v9 }
 0x348   :  { %7743 = vrot.lane.b32.xlu0 %v7511_v47, %s10613_s6  ;;  %v6140_v22 = vrot.slane %v6139_v27, 2  ;;  %v3105_v63 = vmax.f32 %v3041_v57, 0.0  ;;  %v5848_v29 = vrot.slane %v12929_v33, 1  ;;  %v5855_v42 = vrot.slane %v12936_v31, 1  ;;  %10527 = vmatprep.subr.mxu1 %v6320_v60 }
 0x349   :  { %v5862_v39 = vrot.slane %v5861_v46, 1  ;;  %v6134_v40 = vmax.f32 %v6132_v45, %v6133_v13  ;;  %v5835_v51 = vmax.f32 %v12955_v53, %v5834_v55  ;;  %v6091_v50 = vrot.slane %v6090_v1, 2  ;;  %v6319_v53 = vld [vmem:[%s14735_s2 + $0x38] sm:$0xff]  ;;  %10528 = vmatpush3.msra.mxu1 %v6320_v60 }
 0x34a   :  { %v6098_v16 = vrot.slane %v6097_v35, 2  ;;  %v6104_v56 = vmax.f32 %v6102_v41, %v6103_v11  ;;  %v7165_v30 = vsel %vm6998_vm12, %v5828_v28, %v7164_v32  ;;  %v6121_v15 = vrot.slane %v6120_v59, 1  ;;  %10529 = vmatprep.subr.mxu1 %v6319_v53 }
 0x34b   :  { %v6111_v49 = vmax.f32 %v6109_v48, %v6110_v2  ;;  %v4185_v25 = vrot.slane %v3106_v24, %v11775_v36  ;;  %v6127_v5 = vmax.f32 %v6125_v21, %v6126_v54  ;;  %v13031_v45 = vmax.f32 %v6139_v27, %v6140_v22  ;;  %v6318_v21 = vld [vmem:[%s14735_s2 + $0x30] sm:$0xff]  ;;  %10530 = vmatpush3.msra.mxu1 %v6319_v53  ;;  %v6316_v22 = vld [vmem:[%s14735_s2 + $0x20] sm:$0xff] }
 0x34c   :  { %v4178_v10 = vcombine.high %v3106_v24, %v3106_v24  ;;  %v4161_v13 = vcombine.high %v3105_v63, %v3105_v63  ;;  %v13037_v41 = vmax.f32 %v12929_v33, %v5848_v29  ;;  %v13040_v55 = vmax.f32 %v12936_v31, %v5855_v42  ;;  %10531 = vmatprep.subr.mxu1 %v6318_v21 }
 0x34d   :  { %v13042_v48 = vmax.f32 %v5861_v46, %v5862_v39  ;;  %v6135_v37 = vrot.slane %v6134_v40, 1  ;;  %v6092_v27 = vmax.f32 %v6090_v1, %v6091_v50  ;;  %v6099_v38 = vmax.f32 %v6097_v35, %v6098_v16  ;;  %v6317_v35 = vld [vmem:[%s14735_s2 + $0x28] sm:$0xff]  ;;  %10532 = vmatpush3.msra.mxu1 %v6318_v21 }
 0x34e   :  { %v6105_v11 = vrot.slane %v6104_v56, 2  ;;  %v4168_v17 = vrot.slane %v3105_v63, %v11775_v36  ;;  %v13049_v33 = vsel %vm7000_vm13, %v5835_v51, %v7165_v30  ;;  %v13051_v47 = vmax.f32 %v6120_v59, %v6121_v15  ;;  %10533 = vmatprep.subr.mxu1 %v6317_v35 }
 0x34f   :  { %v6112_v31 = vrot.slane %v6111_v49, 2  ;;  %v4193_v46 = vcombine.high %v4185_v25, %v4185_v25  ;;  %v6128_v57 = vrot.slane %v6127_v5, 1  ;;  %v4192_v2 = vrot.slane %v4178_v10, %v11775_v36  ;;  %10534 = vmatpush3.msra.mxu1 %v6317_v35 }
 0x350   :  { %v4175_v1 = vrot.slane %v4161_v13, %v11775_v36  ;;  %v13059_v24 = vmax.f32 %v6134_v40, %v6135_v37  ;;  %v6172_v59 = vsel %vm4519_vm9, %v4185_v25, -inf  ;;  %v4176_v32 = vcombine.high %v4168_v17, %v4168_v17  ;;  %10535 = vmatprep.subr.mxu1 %v6316_v22 }
 0x351   :  { %v6079_v54 = vrot.slane %v12801_v8, 1  ;;  %v6093_v63 = vrot.slane %v6092_v27, 1  ;;  %v6100_v9 = vrot.slane %v6099_v38, 1  ;;  %v6106_v29 = vmax.f32 %v6104_v56, %v6105_v11  ;;  %v6315_v56 = vld [vmem:[%s14735_s2 + $0x18] sm:$0xff]  ;;  %10536 = vmatpush3.msra.mxu1 %v6316_v22 }
 0x352   :  { %v6144_v42 = vsel %vm4519_vm9, %v4168_v17, -inf  ;;  %v6113_v39 = vmax.f32 %v6111_v49, %v6112_v31  ;;  %v6179_v40 = vsel %vm4519_vm9, %v4193_v46, -inf  ;;  %v6151_v60 = vsel %vm4519_vm9, %v4176_v32, -inf  ;;  %10537 = vmatprep.subr.mxu1 %v6315_v56 }
 0x353   :  { %v6158_v51 = vsel %vm4519_vm9, %v4175_v1, -inf  ;;  %v13070_v50 = vmax.f32 %v6127_v5, %v6128_v57  ;;  %v4194_v16 = vcombine.high %v4192_v2, %v4192_v2  ;;  %v6173_v30 = vrot.slane %v6172_v59, 4  ;;  %v6314_v5 = vld [vmem:[%s14735_s2 + $0x10] sm:$0xff]  ;;  %10538 = vmatpush3.msra.mxu1 %v6315_v56 }
 0x354   :  { %v4177_v15 = vcombine.high %v4175_v1, %v4175_v1  ;;  %v6145_v49 = vrot.slane %v6144_v42, 4  ;;  %v6152_v10 = vrot.slane %v6151_v60, 4  ;;  %v15006_v13 = vrot.slane %v12790_v23, 1  ;;  %10539 = vmatprep.subr.mxu1 %v6314_v5 }
 0x355   :  { %v6180_v37 = vrot.slane %v6179_v40, 4  ;;  %v6186_v21 = vsel %vm4519_vm9, %v4192_v2, -inf  ;;  %v6159_v11 = vrot.slane %v6158_v51, 4  ;;  %v6080_v17 = vmax.f32 %v12801_v8, %v6079_v54  ;;  %v6313_v8 = vld [vmem:[%s14735_s2 + $0x8] sm:$0xff]  ;;  %v15008_v54 = vld [vmem:[#allocation130_spill] sm:$0xff]  ;;  %10540 = vmatpush3.msra.mxu1 %v6314_v5 }
 0x356   :  { %v6073_v53 = vmax.f32 %v12790_v23, %v15006_v13  ;;  %v6094_v31 = vmax.f32 %v6092_v27, %v6093_v63  ;;  %v6101_v46 = vmax.f32 %v6099_v38, %v6100_v9  ;;  %v6107_v57 = vrot.slane %v6106_v29, 1  ;;  %v15009_v63 = vld [vmem:[#allocation128_spill] sm:$0xff]  ;;  %v6312_v9 = vld [vmem:[%s14735_s2] sm:$0xff]  ;;  %10541 = vmatprep.subr.mxu1 %v6313_v8 }
 0x357   :  { %v6114_v1 = vrot.slane %v6113_v39, 1  ;;  %v6174_v35 = vmax.f32 %v6172_v59, %v6173_v30  ;;  %v6193_v23 = vsel %vm4519_vm9, %v4194_v16, -inf  ;;  %v6165_v32 = vsel %vm4519_vm9, %v4177_v15, -inf  ;;  %v15010_v15 = vld [vmem:[#allocation129_spill] sm:$0xff]  ;;  %10542 = vmatpush3.msra.mxu1 %v6313_v8 }
 0x358   :  { %v15007_v22 = vrot.slane %v12780_v52, 4  ;;  %v6187_v2 = vrot.slane %v6186_v21, 4  ;;  %v6146_v27 = vmax.f32 %v6144_v42, %v6145_v49  ;;  %v6153_v38 = vmax.f32 %v6151_v60, %v6152_v10  ;;  %v15011_v60 = vld [vmem:[#allocation122_spill] sm:$0xff]  ;;  %10543 = vmatprep.subr.mxu1 %v6312_v9 }
 0x359   :  { %v7193_v59 = vsel %vm6998_vm12, %v15009_v63, %v15008_v54  ;;  %v6181_v16 = vmax.f32 %v6179_v40, %v6180_v37  ;;  %v6160_v30 = vmax.f32 %v6158_v51, %v6159_v11  ;;  %v6194_v25 = vrot.slane %v6193_v23, 4  ;;  %10544 = vmatpush3.msra.mxu1 %v6312_v9 }
 0x35a   :  { %v6083_v13 = vmax.f32 %v12780_v52, %v15007_v22  ;;  %v7194_v56 = vsel %vm7000_vm13, %v15010_v15, %v7193_v59  ;;  %v10517_v22 = vpop.f32.mrf.mxu1  ;;  %v6166_v42 = vrot.slane %v6165_v32, 4  ;;  %v6108_v5 = vmax.f32 %v6106_v29, %v6107_v57 }
 0x35b   :  { %v7195_v49 = vsel %vm7002_vm14, %v15011_v60, %v7194_v56  ;;  %v2976_v10 = vmul.f32 %v10517_v22, %v11761_v12  ;;  %v6175_v54 = vrot.slane %v6174_v35, 2  ;;  %v13104_v51 = vmax.f32 %v6113_v39, %v6114_v1  ;;  %v15012_v1 = vld [vmem:[#allocation20_spill] sm:$0xff] }
 0x35c   :  { %v6084_v52 = vrot.slane %v6083_v13, 2  ;;  %v7196_v40 = vsel %vm7004_vm15, %v6073_v53, %v7195_v49  ;;  %v6188_v37 = vmax.f32 %v6186_v21, %v6187_v2  ;;  %v6147_v11 = vrot.slane %v6146_v27, 2  ;;  %v15013_v21 = vld [vmem:[#allocation18_spill] sm:$0xff] }
 0x35d   :  { %v6154_v59 = vrot.slane %v6153_v38, 2  ;;  %v7199_v15 = vsel %vm6996_vm11, %v6101_v46, %v6094_v31  ;;  %v6182_v4 = vrot.slane %v6181_v16, 2  ;;  %v6161_v28 = vrot.slane %v6160_v30, 2 }
 0x35e   :  { %v6085_v63 = vmax.f32 %v6083_v13, %v6084_v52  ;;  %v6195_v60 = vmax.f32 %v6193_v23, %v6194_v25  ;;  %v6167_v22 = vmax.f32 %v6165_v32, %v6166_v42  ;;  %v7197_v29 = vsel %vm7006_vm2, %v6080_v17, %v7196_v40  ;;  %v15014_v32 = vld [vmem:[#allocation12_spill] sm:$0xff]  ;;  %v15017_v40 = vld [vmem:[#allocation11_spill] sm:$0xff] }
 0x35f   :  { %v3044_v57 = vadd.f32 %v11765_v58, %v2976_v10  ;;  %v6176_v13 = vmax.f32 %v6174_v35, %v6175_v54  ;;  %v92_v39 = vadd.s32 24, %v10658_v6  ;;  %v7033_v8 = vsel %vm7000_vm13, %v15013_v21, %v15012_v1 }
 0x360   :  { %v6086_v56 = vrot.slane %v6085_v63, 1  ;;  %v13114_v2 = vsel %vm6998_vm12, %v6108_v5, %v7199_v15  ;;  %v6189_v31 = vrot.slane %v6188_v37, 2  ;;  %v6148_v46 = vmax.f32 %v6146_v27, %v6147_v11  ;;  %v2892_v5 = vpop.f32.mrf.mxu1 }
 0x361   :  { %v6155_v9 = vmax.f32 %v6153_v38, %v6154_v59  ;;  %v6183_v25 = vmax.f32 %v6181_v16, %v6182_v4  ;;  %v6162_v23 = vmax.f32 %v6160_v30, %v6161_v28  ;;  %v7034_v35 = vsel %vm7002_vm14, %v15014_v32, %v7033_v8  ;;  %v15015_v38 = vld [vmem:[#allocation13_spill] sm:$0xff] }
 0x362   :  { %v6087_v53 = vmax.f32 %v6085_v63, %v6086_v56  ;;  %v6196_v52 = vrot.slane %v6195_v60, 2  ;;  %v6168_v42 = vrot.slane %v6167_v22, 2  ;;  %v3108_v10 = vmax.f32 %v3044_v57, 0.0  ;;  %v10520_v8 = vpop.f32.mrf.mxu1 }
 0x363   :  { %v6177_v54 = vrot.slane %v6176_v13, 1  ;;  %v6349_v27 = vand.u32 31, %v92_v39  ;;  %v7035_v4 = vsel %vm7004_vm15, %v15015_v38, %v7034_v35  ;;  %v2975_v28 = vmul.f32 %v11761_v12, %v2892_v5 }
 0x364   :  { %v13117_v17 = vsel %vm7008_vm3, %v6087_v53, %v7197_v29  ;;  %v13127_v16 = vmax.f32 %v6188_v37, %v6189_v31  ;;  %v6149_v30 = vrot.slane %v6148_v46, 1  ;;  %v6156_v63 = vrot.slane %v6155_v9, 1  ;;  %v15019_v29 = vld [vmem:[#allocation15_spill] sm:$0xff] }
 0x365   :  { %v14818_v49 = vrot.slane %v13117_v17, 1  ;;  %7665 = vrot.lane.b32.xlu1 %v13117_v17, %s10611_s24  ;;  %v15018_v11 = vrot.slane %v15017_v40, 1  ;;  %v6163_v15 = vrot.slane %v6162_v23, 1  ;;  %v7036_v57 = vsel %vm7006_vm2, %v15019_v29, %v7035_v4 }
 0x366   :  { %15016 = vst [vmem:[#allocation130_spill] sm:$0xff] %v13127_v16  ;;  %v3043_v37 = vadd.f32 %v11765_v58, %v2975_v28  ;;  %v6169_v53 = vmax.f32 %v6167_v22, %v6168_v42  ;;  %v4212_v39 = vcombine.high %v3108_v10, %v3108_v10  ;;  %v4219_v1 = vrot.slane %v3108_v10, %v11775_v36 }
 0x367   :  { %v4799_v59 = vmax.f32 %v15017_v40, %v15018_v11  ;;  %v7487_v56 = vsel %vm1434_vm0, %v7477_v0, %v14818_v49  ;;  %vm13146_vm6 = vcmp.eq.s32.totalorder %v6349_v27, 31  ;;  %v2978_v35 = vmul.f32 %v10520_v8, %v11761_v12 }
 0x368   :  { %7791 = vrot.lane.b32.xlu0 %v7487_v56, %s10613_s6  ;;  %v3107_v32 = vmax.f32 %v3043_v37, 0.0  ;;  %v6184_v5 = vrot.slane %v6183_v25, 1  ;;  %v13152_v22 = vmax.f32 %v6195_v60, %v6196_v52  ;;  %v6150_v42 = vmax.f32 %v6148_v46, %v6149_v30 }
 0x369   :  { %v13144_v21 = vsel %vm7008_vm3, %v4799_v59, %v7036_v57  ;;  %v6157_v10 = vmax.f32 %v6155_v9, %v6156_v63  ;;  %v3046_v28 = vadd.f32 %v11765_v58, %v2978_v35  ;;  %v6164_v40 = vmax.f32 %v6162_v23, %v6163_v15 }
 0x36a   :  { %15020 = vst [vmem:[#allocation128_spill] sm:$0xff] %v13144_v21  ;;  %v14819_v0 = vrot.slane %v13144_v21, 1  ;;  %15023 = vst [vmem:[#allocation129_spill] sm:$0xff] %v13152_v22  ;;  %v4195_v38 = vcombine.high %v3107_v32, %v3107_v32  ;;  %v4202_v4 = vrot.slane %v3107_v32, %v11775_v36  ;;  %v6170_v11 = vrot.slane %v6169_v53, 1  ;;  %v15030_v22 = vld [vmem:[#allocation25_spill] sm:$0xff] }
 0x36b   :  { %v4226_v59 = vrot.slane %v4212_v39, %v11775_v36  ;;  %v4227_v46 = vcombine.high %v4219_v1, %v4219_v1  ;;  %v6228_v9 = vsel %vm4519_vm9, %v4219_v1, -inf  ;;  %v3110_v52 = vmax.f32 %v3046_v28, 0.0 }
 0x36c   :  { %v7510_v27 = vsel %vm1434_vm0, %v7454_v44, %v14819_v0  ;;  %7619 = vrot.lane.b32.xlu0 %v13144_v21, %s10611_s24  ;;  %v6200_v44 = vsel %vm4519_vm9, %v4202_v4, -inf  ;;  %v7206_v30 = vsel %vm6996_vm11, %v6157_v10, %v6150_v42  ;;  %v4209_v23 = vrot.slane %v4195_v38, %v11775_v36 }
 0x36d   :  { %v7582_v60 = vsel %vm13146_vm6, 0.0, %v7510_v27  ;;  %v4210_v63 = vcombine.high %v4202_v4, %v4202_v4  ;;  %v6201_v15 = vrot.slane %v6200_v44, 4  ;;  %v13172_v56 = vmax.f32 %v6176_v13, %v6177_v54 }
 0x36e   :  { %7745 = vrot.lane.b32.xlu1 %v7582_v60, %s10613_s6  ;;  %v13174_v29 = vmax.f32 %v6183_v25, %v6184_v5  ;;  %v4246_v37 = vcombine.high %v3110_v52, %v3110_v52  ;;  %v13178_v1 = vmax.f32 %v6169_v53, %v6170_v11  ;;  %v6229_v8 = vrot.slane %v6228_v9, 4 }
 0x36f   :  { %15024 = vst [vmem:[#allocation122_spill] sm:$0xff] %v13172_v56  ;;  %v4253_v31 = vrot.slane %v3110_v52, %v11775_v36  ;;  %v13182_v32 = vsel %vm6998_vm12, %v6164_v40, %v7206_v30  ;;  %v6235_v35 = vsel %vm4519_vm9, %v4227_v46, -inf  ;;  %v6242_v13 = vsel %vm4519_vm9, %v4226_v59, -inf }
 0x370   :  { %15025 = vst [vmem:[#allocation20_spill] sm:$0xff] %v13174_v29  ;;  %15026 = vst [vmem:[#allocation18_spill] sm:$0xff] %v13178_v1  ;;  %v4260_v25 = vrot.slane %v4246_v37, %v11775_v36  ;;  %v4228_v54 = vcombine.high %v4226_v59, %v4226_v59  ;;  %v6202_v5 = vmax.f32 %v6200_v44, %v6201_v15  ;;  %v6207_v42 = vsel %vm4519_vm9, %v4210_v63, -inf  ;;  %v15027_v37 = vld [vmem:[#allocation16_spill] sm:$0xff]  ;;  %v15031_v29 = vld [vmem:[#allocation23_spill] sm:$0xff] }
 0x371   :  { %v6214_v10 = vsel %vm4519_vm9, %v4209_v23, -inf  ;;  %v4261_v53 = vcombine.high %v4253_v31, %v4253_v31  ;;  %v6284_v38 = vsel %vm4519_vm9, %v4253_v31, -inf  ;;  %v6230_v28 = vmax.f32 %v6228_v9, %v6229_v8 }
 0x372   :  { %v4262_v27 = vcombine.high %v4260_v25, %v4260_v25  ;;  %v6298_v4 = vsel %vm4519_vm9, %v4260_v25, -inf  ;;  %v6236_v40 = vrot.slane %v6235_v35, 4  ;;  %v6243_v11 = vrot.slane %v6242_v13, 4 }
 0x373   :  { %v4211_v60 = vcombine.high %v4209_v23, %v4209_v23  ;;  %v6285_v46 = vrot.slane %v6284_v38, 4  ;;  %v6291_v52 = vsel %vm4519_vm9, %v4261_v53, -inf  ;;  %v6299_v30 = vrot.slane %v6298_v4, 4 }
 0x374   :  { %v6305_v59 = vsel %vm4519_vm9, %v4262_v27, -inf  ;;  %v13194_v44 = vsel %vm4519_vm9, %v4228_v54, -inf  ;;  %v6208_v63 = vrot.slane %v6207_v42, 4  ;;  %v6215_v15 = vrot.slane %v6214_v10, 4  ;;  %v15029_v54 = vld [vmem:[#allocation17_spill] sm:$0xff] }
 0x375   :  { %v15028_v39 = vrot.slane %v15027_v37, 4  ;;  %v6203_v25 = vrot.slane %v6202_v5, 2  ;;  %v6286_v9 = vmax.f32 %v6284_v38, %v6285_v46  ;;  %v6292_v8 = vrot.slane %v6291_v52, 4  ;;  %v15032_v38 = vld [vmem:[#allocation19_spill] sm:$0xff] }
 0x376   :  { %v6300_v57 = vmax.f32 %v6298_v4, %v6299_v30  ;;  %v6231_v23 = vrot.slane %v6230_v28, 2  ;;  %v13199_v49 = vmax.f32 %v6235_v35, %v6236_v40  ;;  %v6221_v53 = vsel %vm4519_vm9, %v4211_v60, -inf }
 0x377   :  { %v4851_v31 = vmax.f32 %v15027_v37, %v15028_v39  ;;  %v6306_v0 = vrot.slane %v6305_v59, 4  ;;  %v6287_v27 = vrot.slane %v6286_v9, 2  ;;  %v6293_v61 = vmax.f32 %v6291_v52, %v6292_v8  ;;  %v2902_v37 = vpop.f32.mrf.mxu1 }
 0x378   :  { %v4847_v20 = vrot.slane %v15029_v54, 1  ;;  %v7039_v16 = vsel %vm6998_vm12, %v15031_v29, %v15030_v22  ;;  %v13206_v43 = vmax.f32 %v6242_v13, %v6243_v11  ;;  %v6301_v39 = vrot.slane %v6300_v57, 2  ;;  %v15034_v29 = vld [vmem:[#allocation24_spill] sm:$0xff] }
 0x379   :  { %v15033_v46 = vrot.slane %v15032_v38, 1  ;;  %v4852_v35 = vrot.slane %v4851_v31, 2  ;;  %v13211_v40 = vmax.f32 %v6202_v5, %v6203_v25  ;;  %v13213_v60 = vmax.f32 %v6207_v42, %v6208_v63  ;;  %v15035_v63 = vld [vmem:[#allocation21_spill] sm:$0xff] }
 0x37a   :  { %v13215_v30 = vmax.f32 %v6214_v10, %v6215_v15  ;;  %v6222_v52 = vrot.slane %v6221_v53, 4  ;;  %v13217_v8 = vmax.f32 %v6230_v28, %v6231_v23  ;;  %v6307_v56 = vmax.f32 %v6305_v59, %v6306_v0 }
 0x37b   :  { %v4841_v4 = vmax.f32 %v15032_v38, %v15033_v46  ;;  %v4853_v22 = vmax.f32 %v4851_v31, %v4852_v35  ;;  %v7040_v13 = vsel %vm7000_vm13, %v15034_v29, %v7039_v16  ;;  %v13222_v1 = vmax.f32 %v6286_v9, %v6287_v27 }
 0x37c   :  { %v6294_v38 = vrot.slane %v6293_v61, 2  ;;  %v4848_v5 = vmax.f32 %v15029_v54, %v4847_v20  ;;  %v13225_v42 = vmax.f32 %v6300_v57, %v6301_v39  ;;  %v7041_v15 = vsel %vm7002_vm14, %v15035_v63, %v7040_v13 }
 0x37d   :  { %v4854_v10 = vrot.slane %v4853_v22, 1  ;;  %v2977_v28 = vmul.f32 %v11761_v12, %v2902_v37  ;;  %v6210_v59 = vrot.slane %v13213_v60, 2  ;;  %v6217_v16 = vrot.slane %v13215_v30, 2  ;;  %v15036_v12 = vld [vmem:[#allocation22_spill] sm:$0xff]  ;;  %v15038_v37 = vld [vmem:[#allocation31_spill] sm:$0xff] }
 0x37e   :  { %v13233_v31 = vmax.f32 %v6221_v53, %v6222_v52  ;;  %v6308_v25 = vrot.slane %v6307_v56, 2  ;;  %v7042_v20 = vsel %vm7004_vm15, %v4841_v4, %v7041_v15  ;;  %v6289_v23 = vrot.slane %v13222_v1, 1  ;;  %v15042_v15 = vld [vmem:[#allocation27_spill] sm:$0xff] }
 0x37f   :  { %v4855_v9 = vmax.f32 %v4853_v22, %v4854_v10  ;;  %v3045_v57 = vadd.f32 %v11765_v58, %v2977_v28  ;;  %v6295_v27 = vmax.f32 %v6293_v61, %v6294_v38  ;;  %v7043_v54 = vsel %vm7006_vm2, %v4848_v5, %v7042_v20  ;;  %v15039_v22 = vld [vmem:[#allocation29_spill] sm:$0xff]  ;;  %v15040_v61 = vld [vmem:[#allocation28_spill] sm:$0xff]  ;;  %v15041_v38 = vld [vmem:[#allocation30_spill] sm:$0xff] }
 0x380   :  { %v15037_v39 = vrot.slane %v15036_v12, 4  ;;  %v6303_v35 = vrot.slane %v13225_v42, 1  ;;  %v7046_v4 = vsel %vm6998_vm12, %v15039_v22, %v15038_v37  ;;  %v4903_v29 = vrot.slane %v15040_v61, 1  ;;  %v15044_v20 = vld [vmem:[#allocation26_spill] sm:$0xff] }
 0x381   :  { %v13244_v53 = vsel %vm7008_vm3, %v4855_v9, %v7043_v54  ;;  %v3109_v52 = vmax.f32 %v3045_v57, 0.0  ;;  %v7047_v5 = vsel %vm7000_vm13, %v15041_v38, %v7046_v4  ;;  %v15043_v28 = vrot.slane %v15042_v15, 1  ;;  %v15046_v22 = vld [vmem:[#allocation38_spill] sm:$0xff]  ;;  %v15047_v4 = vld [vmem:[#allocation37_spill] sm:$0xff] }
 0x382   :  { %v4907_v46 = vmax.f32 %v15036_v12, %v15037_v39  ;;  %7621 = vrot.lane.b32.xlu1 %v13244_v53, %s10611_s24  ;;  %v14829_v58 = vrot.slane %v13244_v53, 1  ;;  %v7048_v57 = vsel %vm7002_vm14, %v15044_v20, %v7047_v5  ;;  %v6309_v54 = vmax.f32 %v6307_v56, %v6308_v25  ;;  %v15048_v20 = vld [vmem:[#allocation32_spill] sm:$0xff] }
 0x383   :  { %v4229_v10 = vcombine.high %v3109_v52, %v3109_v52  ;;  %v4236_v63 = vrot.slane %v3109_v52, %v11775_v36  ;;  %v4897_v9 = vmax.f32 %v15042_v15, %v15043_v28  ;;  %v15045_v12 = vrot.slane %v13144_v21, 1 }
 0x384   :  { %v4908_v13 = vrot.slane %v4907_v46, 2  ;;  %v7054_v52 = vsel %vm7000_vm13, %v15047_v4, %v15046_v22  ;;  %v4904_v5 = vmax.f32 %v15040_v61, %v4903_v29  ;;  %v15050_v29 = vld [vmem:[#allocation34_spill] sm:$0xff]  ;;  %vm7867_vm6 = vcmask 523264  }
 0x385   :  { %v7509_v39 = vsel %vm1434_vm0, %v15045_v12, %v14829_v58  ;;  %v4243_v38 = vrot.slane %v4229_v10, %v11775_v36  ;;  %v4244_v11 = vcombine.high %v4236_v63, %v4236_v63  ;;  %v6256_v15 = vsel %vm4519_vm9, %v4236_v63, -inf  ;;  %v15049_v10 = vld [vmem:[#allocation33_spill] sm:$0xff] }
 0x386   :  { %v4909_v37 = vmax.f32 %v4907_v46, %v4908_v13  ;;  %7747 = vrot.lane.b32.xlu0 %v7509_v39, %s10613_s6  ;;  %v7049_v56 = vsel %vm7004_vm15, %v4897_v9, %v7048_v57  ;;  %v6257_v25 = vrot.slane %v6256_v15, 4  ;;  %v7055_v46 = vsel %vm7002_vm14, %v15048_v20, %v7054_v52  ;;  %v15052_v20 = vld [vmem:[#allocation35_spill] sm:$0xff] }
 0x387   :  { %v4245_v13 = vcombine.high %v4243_v38, %v4243_v38  ;;  %v6263_v12 = vsel %vm4519_vm9, %v4244_v11, -inf  ;;  %v6270_v22 = vsel %vm4519_vm9, %v4243_v38, -inf  ;;  %v7056_v4 = vsel %vm7004_vm15, %v15049_v10, %v7055_v46 }
 0x388   :  { %v4910_v28 = vrot.slane %v4909_v37, 1  ;;  %v6258_v63 = vmax.f32 %v6256_v15, %v6257_v25  ;;  %v6264_v0 = vrot.slane %v6263_v12, 4  ;;  %v6271_v39 = vrot.slane %v6270_v22, 4 }
 0x389   :  { %v7050_v9 = vsel %vm7006_vm2, %v4904_v5, %v7049_v56  ;;  %v6277_v57 = vsel %vm4519_vm9, %v4245_v13, -inf  ;;  %v15051_v58 = vrot.slane %v15050_v29, 1  ;;  %v7057_v11 = vsel %vm7006_vm2, %v15052_v20, %v7056_v4 }
 0x38a   :  { %v4911_v61 = vmax.f32 %v4909_v37, %v4910_v28  ;;  %v6259_v36 = vrot.slane %v6258_v63, 2  ;;  %v6265_v38 = vmax.f32 %v6263_v12, %v6264_v0  ;;  %v6272_v21 = vmax.f32 %v6270_v22, %v6271_v39 }
 0x38b   :  { %v4967_v52 = vmax.f32 %v15050_v29, %v15051_v58  ;;  %v116_v46 = vadd.s32 216, %v10658_v6  ;;  %v6296_v15 = vrot.slane %v6295_v27, 1  ;;  %v7201_v37 = vsel %vm7000_vm13, %v13104_v51, %v13114_v2 }
 0x38c   :  { %v13290_v25 = vsel %vm7008_vm3, %v4911_v61, %v7050_v9  ;;  %v13299_v58 = vmax.f32 %v13213_v60, %v6210_v59  ;;  %v6260_v5 = vmax.f32 %v6258_v63, %v6259_v36  ;;  %v6266_v28 = vrot.slane %v6265_v38, 2  ;;  %v15055_v9 = vld [vmem:[#allocation36_spill] sm:$0xff] }
 0x38d   :  { %v13293_v56 = vsel %vm7008_vm3, %v4967_v52, %v7057_v11  ;;  %v6278_v0 = vrot.slane %v6277_v57, 4  ;;  %7623 = vrot.lane.b32.xlu0 %v13290_v25, %s10611_s24  ;;  %v13304_v13 = vmax.f32 %v13215_v30, %v6217_v16  ;;  %v7457_v12 = vrot.slane %v13290_v25, 1  ;;  %v15058_v52 = vld [vmem:[#allocation42_spill] sm:$0xff] }
 0x38e   :  { %v7458_v22 = vrot.slane %v13293_v56, 1  ;;  %v7202_v10 = vsel %vm7002_vm14, %v13051_v47, %v7201_v37  ;;  %v13311_v51 = vmax.f32 %v13222_v1, %v6289_v23  ;;  %v6310_v2 = vrot.slane %v6309_v54, 1 }
 0x38f   :  { %v6273_v36 = vrot.slane %v6272_v21, 2  ;;  %v6517_v60 = vand.u32 31, %v116_v46  ;;  %v13313_v59 = vmax.f32 %v6295_v27, %v6296_v15  ;;  %v13316_v4 = vmax.f32 %v13225_v42, %v6303_v35  ;;  %v15054_v35 = vld [vmem:[#allocation39_spill] sm:$0xff]  ;;  %v15061_v46 = vld [vmem:[#allocation40_spill] sm:$0xff] }
 0x390   :  { %v7507_v30 = vsel %vm1434_vm0, %v7457_v12, %v7458_v22  ;;  %v7203_v16 = vsel %vm7004_vm15, %v13070_v50, %v7202_v10  ;;  %v6261_v47 = vrot.slane %v6260_v5, 1  ;;  %v13324_v63 = vmax.f32 %v6265_v38, %v6266_v28  ;;  %v15057_v50 = vld [vmem:[#allocation45_spill] sm:$0xff] }
 0x391   :  { %v6279_v1 = vmax.f32 %v6277_v57, %v6278_v0  ;;  %7751 = vrot.lane.b32.xlu0 %v7507_v30, %s10613_s6  ;;  %v15053_v23 = vrot.slane %v13031_v45, 1  ;;  %v7204_v42 = vsel %vm7006_vm2, %v13059_v24, %v7203_v16  ;;  %v5015_v39 = vrot.slane %v15054_v35, 1  ;;  %v15063_v0 = vld [vmem:[#allocation43_spill] sm:$0xff] }
 0x392   :  { %v15056_v61 = vrot.slane %v15055_v9, 4  ;;  %v7060_v20 = vsel %vm6998_vm12, %v15058_v52, %v15057_v50  ;;  %v13339_v57 = vmax.f32 %v6309_v54, %v6310_v2  ;;  %v13341_v11 = vmax.f32 %v6272_v21, %v6273_v36  ;;  %v15064_v36 = vld [vmem:[#allocation41_spill] sm:$0xff]  ;;  %v15068_v52 = vld [vmem:[#allocation51_spill] sm:$0xff] }
 0x393   :  { %v6143_v27 = vmax.f32 %v13031_v45, %v15053_v23  ;;  %vm13346_vm8 = vcmp.eq.s32.totalorder %v6517_v60, 31  ;;  %v15062_v15 = vrot.slane %v15061_v46, 1  ;;  %v7061_v54 = vsel %vm7000_vm13, %v15063_v0, %v7060_v20  ;;  %v15069_v20 = vld [vmem:[#allocation50_spill] sm:$0xff]  ;;  %v15072_v45 = vld [vmem:[#allocation47_spill] sm:$0xff] }
 0x394   :  { %v5019_v29 = vmax.f32 %v15055_v9, %v15056_v61  ;;  %v13356_v10 = vmax.f32 %v6260_v5, %v6261_v47  ;;  %v6268_v21 = vrot.slane %v13324_v63, 1  ;;  %v6280_v2 = vrot.slane %v6279_v1, 2  ;;  %v15066_v9 = vld [vmem:[#allocation44_spill] sm:$0xff] }
 0x395   :  { %v13344_v38 = vsel %vm7008_vm3, %v6143_v27, %v7204_v42  ;;  %v5009_v37 = vmax.f32 %v15061_v46, %v15062_v15  ;;  %v7062_v60 = vsel %vm7002_vm14, %v15064_v36, %v7061_v54  ;;  %v15065_v30 = vrot.slane %v13117_v17, 1  ;;  %v15073_v54 = vld [vmem:[#allocation49_spill] sm:$0xff] }
 0x396   :  { %v14833_v24 = vrot.slane %v13344_v38, 1  ;;  %v5020_v28 = vrot.slane %v5019_v29, 2  ;;  %v5016_v23 = vmax.f32 %v15054_v35, %v5015_v39  ;;  %v6275_v5 = vrot.slane %v13341_v11, 1  ;;  %v15070_v39 = vld [vmem:[#allocation46_spill] sm:$0xff] }
 0x397   :  { %v7063_v42 = vsel %vm7004_vm15, %v5009_v37, %v7062_v60  ;;  %v15067_v61 = vrot.slane %v15066_v9, 1  ;;  %v7068_v46 = vsel %vm7000_vm13, %v15069_v20, %v15068_v52  ;;  %v15071_v37 = vld [vmem:[#allocation53_spill] sm:$0xff]  ;;  %v15074_v36 = vrot.slane %v15073_v54, 4  ;;  %v15079_v20 = vld [vmem:[#allocation52_spill] sm:$0xff] }
 0x398   :  { %v7486_v16 = vsel %vm1434_vm0, %v15065_v30, %v14833_v24  ;;  %v5021_v27 = vmax.f32 %v5019_v29, %v5020_v28  ;;  %v7064_v35 = vsel %vm7006_vm2, %v5016_v23, %v7063_v42  ;;  %v7069_v29 = vsel %vm7002_vm14, %v15070_v39, %v7068_v46  ;;  %v15075_v30 = vld [vmem:[#allocation57_spill] sm:$0xff]  ;;  %v15078_v23 = vld [vmem:[#allocation48_spill] sm:$0xff] }
 0x399   :  { %v7606_v47 = vsel %vm13346_vm8, 0.0, %v7486_v16  ;;  %v5079_v50 = vmax.f32 %v15066_v9, %v15067_v61  ;;  %v5127_v28 = vrot.slane %v15071_v37, 1  ;;  %v7070_v0 = vsel %vm7004_vm15, %v15072_v45, %v7069_v29  ;;  %v15076_v16 = vld [vmem:[#allocation55_spill] sm:$0xff]  ;;  %v15081_v24 = vld [vmem:[#allocation56_spill] sm:$0xff] }
 0x39a   :  { %7793 = vrot.lane.b32.xlu1 %v7606_v47, %s10613_s6  ;;  %v5022_v15 = vrot.slane %v5021_v27, 1  ;;  %v5131_v60 = vmax.f32 %v15073_v54, %v15074_v36  ;;  %v7074_v9 = vsel %vm6998_vm12, %v15076_v16, %v15075_v30  ;;  %v15077_v47 = vld [vmem:[#allocation2_spill] sm:$0xff]  ;;  %v7071_v42 = vsel %vm7006_vm2, %v15078_v23, %v7070_v0 }
 0x39b   :  { %v6377_v61 = vand.u32 31, %v15077_v47  ;;  %v15080_v46 = vrot.slane %v15079_v20, 1  ;;  %v7075_v29 = vsel %vm7000_vm13, %v15081_v24, %v7074_v9  ;;  %v15082_v45 = vrot.slane %v13244_v53, 1 }
 0x39c   :  { %v5023_v52 = vmax.f32 %v5021_v27, %v5022_v15  ;;  %v13404_v36 = vsel %vm7008_vm3, %v5079_v50, %v7071_v42  ;;  %v5132_v30 = vrot.slane %v5131_v60, 2  ;;  %v15084_v27 = vld [vmem:[#allocation54_spill] sm:$0xff]  ;;  %v5128_v24 = vmax.f32 %v15071_v37, %v5127_v28  ;;  %v15089_v37 = vld [vmem:[#allocation64_spill] sm:$0xff]  ;;  %v15090_v28 = vld [vmem:[#allocation63_spill] sm:$0xff] }
 0x39d   :  { %v5121_v39 = vmax.f32 %v15079_v20, %v15080_v46  ;;  %v7508_v54 = vsel %vm1434_vm0, %v15082_v45, %v7457_v12  ;;  %15083 = vst [vmem:[#allocation12_spill] sm:$0xff] %v13404_v36  ;;  %v7076_v15 = vsel %vm7002_vm14, %v15084_v27, %v7075_v29  ;;  %v14834_v16 = vrot.slane %v13404_v36, 1 }
 0x39e   :  { %v13409_v0 = vsel %vm7008_vm3, %v5023_v52, %v7064_v35  ;;  %7749 = vrot.lane.b32.xlu1 %v7508_v54, %s10613_s6  ;;  %v6281_v47 = vmax.f32 %v6279_v1, %v6280_v2  ;;  %v5133_v50 = vmax.f32 %v5131_v60, %v5132_v30  ;;  %vm13418_vm4 = vcmp.eq.s32.totalorder %v6377_v61, 31  ;;  %v15087_v52 = vld [vmem:[#allocation59_spill] sm:$0xff]  ;;  %v15091_v2 = vld [vmem:[#allocation62_spill] sm:$0xff] }
 0x39f   :  { %v7077_v9 = vsel %vm7004_vm15, %v5121_v39, %v7076_v15  ;;  %7627 = vrot.lane.b32.xlu0 %v13409_v0, %s10611_s24  ;;  %v7459_v12 = vrot.slane %v13409_v0, 1  ;;  %v15088_v42 = vrot.slane %v15087_v52, 1  ;;  %v7082_v1 = vsel %vm7000_vm13, %v15090_v28, %v15089_v37  ;;  %v15093_v61 = vld [vmem:[#allocation58_spill] sm:$0xff]  ;;  %v15095_v15 = vld [vmem:[#allocation60_spill] sm:$0xff] }
 0x3a0   :  { %v7078_v35 = vsel %vm7006_vm2, %v5128_v24, %v7077_v9  ;;  %v15092_v46 = vrot.slane %v15091_v2, 4  ;;  %v5134_v29 = vrot.slane %v5133_v50, 1  ;;  %v7083_v45 = vsel %vm7002_vm14, %v15093_v61, %v7082_v1  ;;  %v15094_v54 = vld [vmem:[#allocation66_spill] sm:$0xff]  ;;  %v15096_v9 = vld [vmem:[#allocation65_spill] sm:$0xff] }
 0x3a1   :  { %v5191_v20 = vmax.f32 %v15087_v52, %v15088_v42  ;;  %v7506_v60 = vsel %vm1434_vm0, %v7458_v22, %v7459_v12  ;;  %v5239_v30 = vrot.slane %v15094_v54, 1  ;;  %v7505_v27 = vsel %vm1434_vm0, %v7459_v12, %v14834_v16  ;;  %v15098_v1 = vld [vmem:[#allocation61_spill] sm:$0xff] }
 0x3a2   :  { %v5243_v39 = vmax.f32 %v15091_v2, %v15092_v46  ;;  %7625 = vrot.lane.b32.xlu1 %v13293_v56, %s10611_s24  ;;  %v7084_v24 = vsel %vm7004_vm15, %v15095_v15, %v7083_v45  ;;  %v15097_v52 = vrot.slane %v15096_v9, 1  ;;  %v5135_v37 = vmax.f32 %v5133_v50, %v5134_v29  ;;  %v15099_v2 = vld [vmem:[#allocation71_spill] sm:$0xff]  ;;  %v15100_v46 = vld [vmem:[#allocation68_spill] sm:$0xff]  ;;  %v15101_v16 = vld [vmem:[#allocation69_spill] sm:$0xff] }
 0x3a3   :  { %7755 = vrot.lane.b32.xlu0 %v7505_v27, %s10613_s6  ;;  %v7586_v28 = vsel %vm13418_vm4, 0.0, %v7506_v60  ;;  %v7085_v12 = vsel %vm7006_vm2, %v15098_v1, %v7084_v24  ;;  %v7088_v61 = vsel %vm6998_vm12, %v15100_v46, %v15099_v2  ;;  %v15103_v27 = vld [vmem:[#allocation76_spill] sm:$0xff]  ;;  %v5240_v29 = vmax.f32 %v15094_v54, %v5239_v30  ;;  %v15104_v60 = vld [vmem:[#allocation67_spill] sm:$0xff]  ;;  %v15107_v2 = vld [vmem:[#allocation70_spill] sm:$0xff] }
 0x3a4   :  { %v5233_v22 = vmax.f32 %v15096_v9, %v15097_v52  ;;  %v5244_v42 = vrot.slane %v5243_v39, 2  ;;  %v13459_v45 = vsel %vm7008_vm3, %v5191_v20, %v7085_v12  ;;  %v7089_v9 = vsel %vm7000_vm13, %v15101_v16, %v7088_v61  ;;  %v15102_v52 = vld [vmem:[#allocation77_spill] sm:$0xff]  ;;  %v15105_v1 = vld [vmem:[#allocation72_spill] sm:$0xff]  ;;  %v15109_v61 = vld [vmem:[#allocation74_spill] sm:$0xff] }
 0x3a5   :  { %v7096_v50 = vsel %vm7000_vm13, %v15103_v27, %v15102_v52  ;;  %v13467_v23 = vsel %vm7008_vm3, %v5135_v37, %v7078_v35  ;;  %v7090_v24 = vsel %vm7002_vm14, %v15104_v60, %v7089_v9  ;;  %v7462_v16 = vrot.slane %v13459_v45, 1  ;;  %v15106_v12 = vld [vmem:[#allocation73_spill] sm:$0xff]  ;;  %v15112_v27 = vld [vmem:[#allocation79_spill] sm:$0xff] }
 0x3a6   :  { %v5245_v15 = vmax.f32 %v5243_v39, %v5244_v42  ;;  %v7097_v20 = vsel %vm7002_vm14, %v15105_v1, %v7096_v50  ;;  %v6269_v39 = vmax.f32 %v13324_v63, %v6268_v21  ;;  %7753 = vrot.lane.b32.xlu1 %v7586_v28, %s10613_s6  ;;  %v7091_v35 = vsel %vm7004_vm15, %v5233_v22, %v7090_v24  ;;  %v15115_v1 = vld [vmem:[#allocation83_spill] sm:$0xff] }
 0x3a7   :  { %v6276_v54 = vmax.f32 %v13341_v11, %v6275_v5  ;;  %v6282_v30 = vrot.slane %v6281_v47, 1  ;;  %7631 = vrot.lane.b32.xlu0 %v13467_v23, %s10611_s24  ;;  %v7092_v37 = vsel %vm7006_vm2, %v5240_v29, %v7091_v35  ;;  %v7098_v63 = vsel %vm7004_vm15, %v15106_v12, %v7097_v20  ;;  %v15110_v11 = vld [vmem:[#allocation78_spill] sm:$0xff]  ;;  %v15113_v29 = vld [vmem:[#allocation75_spill] sm:$0xff]  ;;  %v15116_v20 = vld [vmem:[#allocation81_spill] sm:$0xff] }
 0x3a8   :  { %v5246_v42 = vrot.slane %v5245_v15, 1  ;;  %v7461_v21 = vrot.slane %v13467_v23, 1  ;;  %v15108_v46 = vrot.slane %v15107_v2, 1  ;;  %v7099_v9 = vsel %vm7006_vm2, %v15109_v61, %v7098_v63  ;;  %v15117_v12 = vld [vmem:[#allocation82_spill] sm:$0xff] }
 0x3a9   :  { %v15111_v5 = vrot.slane %v15110_v11, 1  ;;  %v5351_v50 = vrot.slane %v15112_v27, 1  ;;  %v15114_v60 = vrot.slane %v15113_v29, 4  ;;  %vm7900_vm8 = vcmask 785408  }
 0x3aa   :  { %v5247_v28 = vmax.f32 %v5245_v15, %v5246_v42  ;;  %v5303_v22 = vmax.f32 %v15107_v2, %v15108_v46  ;;  %v7102_v15 = vsel %vm6998_vm12, %v15116_v20, %v15115_v1  ;;  %v7503_v42 = vsel %vm1434_vm0, %v7461_v21, %v7462_v16  ;;  %7629 = vrot.lane.b32.xlu1 %v13404_v36, %s10611_s24  ;;  %v15119_v1 = vld [vmem:[#allocation91_spill] sm:$0xff]  ;;  %v15120_v20 = vld [vmem:[#allocation89_spill] sm:$0xff] }
 0x3ab   :  { %v5345_v52 = vmax.f32 %v15110_v11, %v15111_v5  ;;  %v5355_v24 = vmax.f32 %v15113_v29, %v15114_v60  ;;  %v7103_v63 = vsel %vm7000_vm13, %v15117_v12, %v7102_v15  ;;  %v100_v2 = vadd.s32 88, %v10658_v6  ;;  %7759 = vrot.lane.b32.xlu0 %v7503_v42, %s10613_s6  ;;  %v15118_v5 = vld [vmem:[#allocation80_spill] sm:$0xff] }
 0x3ac   :  { %v13509_v35 = vsel %vm7008_vm3, %v5247_v28, %v7092_v37  ;;  %v7220_v46 = vsel %vm6996_vm11, %v6269_v39, %v13356_v10  ;;  %v13518_v61 = vsel %vm7008_vm3, %v5303_v22, %v7099_v9  ;;  %v7104_v29 = vsel %vm7002_vm14, %v15118_v5, %v7103_v63  ;;  %v15124_v5 = vld [vmem:[#allocation85_spill] sm:$0xff] }
 0x3ad   :  { %v5356_v11 = vrot.slane %v5355_v24, 2  ;;  %v13522_v60 = vmax.f32 %v6281_v47, %v6282_v30  ;;  %v7463_v37 = vrot.slane %v13509_v35, 1  ;;  %v7105_v28 = vsel %vm7004_vm15, %v5345_v52, %v7104_v29  ;;  %v15122_v52 = vld [vmem:[#allocation84_spill] sm:$0xff] }
 0x3ae   :  { %v7110_v15 = vsel %vm7000_vm13, %v15120_v20, %v15119_v1  ;;  %v15121_v10 = vrot.slane %v13404_v36, 1  ;;  %v5352_v22 = vmax.f32 %v15112_v27, %v5351_v50  ;;  %v6405_v42 = vand.u32 31, %v100_v2  ;;  %v15125_v50 = vld [vmem:[#allocation86_spill] sm:$0xff]  ;;  %v15128_v1 = vld [vmem:[#allocation87_spill] sm:$0xff] }
 0x3af   :  { %v5357_v9 = vmax.f32 %v5355_v24, %v5356_v11  ;;  %v7221_v47 = vsel %vm6998_vm12, %v6276_v54, %v7220_v46  ;;  %v7464_v30 = vrot.slane %v13518_v61, 1  ;;  %v15123_v12 = vrot.slane %v15122_v52, 1  ;;  %7635 = vrot.lane.b32.xlu0 %v13509_v35, %s10611_s24  ;;  %v15126_v24 = vld [vmem:[#allocation88_spill] sm:$0xff] }
 0x3b0   :  { %v7504_v39 = vsel %vm1434_vm0, %v15121_v10, %v7461_v21  ;;  %v7111_v29 = vsel %vm7002_vm14, %v15124_v5, %v7110_v15  ;;  %v7106_v27 = vsel %vm7006_vm2, %v5352_v22, %v7105_v28  ;;  %v15127_v2 = vrot.slane %v15126_v24, 4  ;;  %v15129_v15 = vld [vmem:[#allocation90_spill] sm:$0xff]  ;;  %v15134_v22 = vld [vmem:[#allocation92_spill] sm:$0xff] }
 0x3b1   :  { %7757 = vrot.lane.b32.xlu1 %v7504_v39, %s10613_s6  ;;  %v5415_v63 = vmax.f32 %v15122_v52, %v15123_v12  ;;  %v5358_v21 = vrot.slane %v5357_v9, 1  ;;  %v7112_v54 = vsel %vm7004_vm15, %v15125_v50, %v7111_v29  ;;  %v7502_v11 = vsel %vm1434_vm0, %v7462_v16, %v7463_v37  ;;  %v15130_v39 = vld [vmem:[#allocation98_spill] sm:$0xff]  ;;  %v15131_v52 = vld [vmem:[#allocation95_spill] sm:$0xff] }
 0x3b2   :  { %v5467_v46 = vmax.f32 %v15126_v24, %v15127_v2  ;;  %v7113_v20 = vsel %vm7006_vm2, %v15128_v1, %v7112_v54  ;;  %v5463_v10 = vrot.slane %v15129_v15, 1  ;;  %v7116_v12 = vsel %vm6998_vm12, %v15131_v52, %v15130_v39  ;;  %v15136_v24 = vld [vmem:[#allocation96_spill] sm:$0xff]  ;;  %v15137_v1 = vld [vmem:[#allocation93_spill] sm:$0xff]  ;;  %v15139_v52 = vld [vmem:[#allocation102_spill] sm:$0xff] }
 0x3b3   :  { %vm13558_vm5 = vcmp.eq.s32.totalorder %v6405_v42, 31  ;;  %v15135_v5 = vrot.slane %v15134_v22, 1  ;;  %v7117_v16 = vsel %vm7000_vm13, %v15136_v24, %v7116_v12  ;;  %v7501_v54 = vsel %vm1434_vm0, %v7463_v37, %v7464_v30  ;;  %v15138_v39 = vld [vmem:[#allocation105_spill] sm:$0xff]  ;;  %v15140_v37 = vld [vmem:[#allocation94_spill] sm:$0xff] }
 0x3b4   :  { %v5468_v50 = vrot.slane %v5467_v46, 2  ;;  %v5359_v2 = vmax.f32 %v5357_v9, %v5358_v21  ;;  %v7118_v42 = vsel %vm7002_vm14, %v15137_v1, %v7117_v16  ;;  %v7124_v36 = vsel %vm7000_vm13, %v15139_v52, %v15138_v39  ;;  %7763 = vrot.lane.b32.xlu0 %v7501_v54, %s10613_s6  ;;  %v15141_v1 = vld [vmem:[#allocation99_spill] sm:$0xff]  ;;  %v15149_v52 = vld [vmem:[#allocation108_spill] sm:$0xff] }
 0x3b5   :  { %v5457_v29 = vmax.f32 %v15134_v22, %v15135_v5  ;;  %7633 = vrot.lane.b32.xlu1 %v13459_v45, %s10611_s24  ;;  %v13578_v22 = vsel %vm7008_vm3, %v5415_v63, %v7113_v20  ;;  %v7125_v24 = vsel %vm7002_vm14, %v15140_v37, %v7124_v36  ;;  %v7590_v21 = vsel %vm13558_vm5, 0.0, %v7502_v11  ;;  %v15142_v63 = vld [vmem:[#allocation97_spill] sm:$0xff] }
 0x3b6   :  { %v5469_v12 = vmax.f32 %v5467_v46, %v5468_v50  ;;  %v13584_v9 = vsel %vm7008_vm3, %v5359_v2, %v7106_v27  ;;  %v5464_v16 = vmax.f32 %v15129_v15, %v5463_v10  ;;  %v7126_v54 = vsel %vm7004_vm15, %v15141_v1, %v7125_v24  ;;  %v15145_v36 = vld [vmem:[#allocation101_spill] sm:$0xff]  ;;  %v15147_v10 = vld [vmem:[#allocation104_spill] sm:$0xff]  ;;  %v15148_v2 = vld [vmem:[#allocation110_spill] sm:$0xff] }
 0x3b7   :  { %v7119_v5 = vsel %vm7004_vm15, %v5457_v29, %v7118_v42  ;;  %v15143_v20 = vrot.slane %v15142_v63, 1  ;;  %v15144_v29 = vld [vmem:[#allocation100_spill] sm:$0xff]  ;;  %v15146_v42 = vrot.slane %v15145_v36, 4  ;;  %v7466_v11 = vrot.slane %v13578_v22, 1 }
 0x3b8   :  { %v5470_v39 = vrot.slane %v5469_v12, 1  ;;  %v7127_v50 = vsel %vm7006_vm2, %v15144_v29, %v7126_v54  ;;  %v7120_v15 = vsel %vm7006_vm2, %v5464_v16, %v7119_v5  ;;  %v5575_v28 = vrot.slane %v15147_v10, 1  ;;  %7639 = vrot.lane.b32.xlu0 %v13584_v9, %s10611_s24  ;;  %v15150_v54 = vld [vmem:[#allocation103_spill] sm:$0xff]  ;;  %v13612_v29 = vpop.permute.xlu0 %7611  ;;  %v15152_v16 = vld [vmem:[#allocation109_spill] sm:$0xff] }
 0x3b9   :  { %v5527_v46 = vmax.f32 %v15142_v63, %v15143_v20  ;;  %v5579_v27 = vmax.f32 %v15145_v36, %v15146_v42  ;;  %7761 = vrot.lane.b32.xlu1 %v7590_v21, %s10613_s6  ;;  %v7130_v37 = vsel %vm6998_vm12, %v15149_v52, %v15148_v2  ;;  %v7465_v24 = vrot.slane %v13584_v9, 1  ;;  %v15153_v42 = vld [vmem:[#allocation3_spill] sm:$0xff] }
 0x3ba   :  { %v5471_v1 = vmax.f32 %v5469_v12, %v5470_v39  ;;  %v15151_v63 = vrot.slane %v15150_v54, 1  ;;  %v7131_v36 = vsel %vm7000_vm13, %v15152_v16, %v7130_v37  ;;  %v6433_v2 = vand.u32 31, %v15153_v42  ;;  %v15161_v42 = vld [vmem:[#allocation115_spill] sm:$0xff] }
 0x3bb   :  { %v5580_v20 = vrot.slane %v5579_v27, 2  ;;  %v13615_v5 = vsel %vm7008_vm3, %v5527_v46, %v7127_v50  ;;  %v7167_v52 = vsel %vm7002_vm14, %v12934_v7, %v13049_v33  ;;  %v7499_v50 = vsel %vm1434_vm0, %v7465_v24, %v7466_v11 }
 0x3bc   :  { %v5569_v21 = vmax.f32 %v15150_v54, %v15151_v63  ;;  %v13624_v12 = vsel %vm7008_vm3, %v5471_v1, %v7120_v15  ;;  %v15154_v54 = vld [vmem:[#allocation106_spill] sm:$0xff]  ;;  %v7168_v46 = vsel %vm7004_vm15, %v13037_v41, %v7167_v52  ;;  %v5576_v7 = vmax.f32 %v15147_v10, %v5575_v28  ;;  %7767 = vrot.lane.b32.xlu0 %v7499_v50, %s10613_s6  ;;  %v13650_v28 = vpop.permute.xlu0 %7659  ;;  %v15163_v50 = vld [vmem:[#allocation117_spill] sm:$0xff] }
 0x3bd   :  { %v5581_v39 = vmax.f32 %v5579_v27, %v5580_v20  ;;  %v7132_v63 = vsel %vm7002_vm14, %v15154_v54, %v7131_v36  ;;  %7637 = vrot.lane.b32.xlu1 %v13518_v61, %s10611_s24  ;;  %v7467_v37 = vrot.slane %v13624_v12, 1  ;;  %v7222_v27 = vsel %vm7000_vm13, %v13522_v60, %v7221_v47  ;;  %15157 = vst [vmem:[#allocation13_spill] sm:$0xff] %v13650_v28  ;;  %v15160_v36 = vld [vmem:[#allocation116_spill] sm:$0xff]  ;;  %v15162_v54 = vld [vmem:[#allocation111_spill] sm:$0xff] }
 0x3be   :  { %v7133_v33 = vsel %vm7004_vm15, %v5569_v21, %v7132_v63  ;;  %v7500_v41 = vsel %vm1434_vm0, %v7464_v30, %v7465_v24  ;;  %v7169_v1 = vsel %vm7006_vm2, %v13040_v55, %v7168_v46  ;;  %v14838_v20 = vrot.slane %v13615_v5, 1  ;;  %v15158_v24 = vld [vmem:[#allocation112_spill] sm:$0xff] }
 0x3bf   :  { %v5582_v15 = vrot.slane %v5581_v39, 1  ;;  %v7134_v16 = vsel %vm7006_vm2, %v5576_v7, %v7133_v33  ;;  %vm13646_vm9 = vcmp.eq.s32.totalorder %v6433_v2, 31  ;;  %v13654_v60 = vsel %vm7008_vm3, %v13042_v48, %v7169_v1  ;;  %v15165_v33 = vld [vmem:[#allocation113_spill] sm:$0xff] }
 0x3c0   :  { %v14836_v30 = vrot.slane %v13654_v60, 7  ;;  %v15159_v21 = vrot.slane %v15158_v24, 1  ;;  %v7138_v2 = vsel %vm7000_vm13, %v15161_v42, %v15160_v36  ;;  %v7498_v52 = vsel %vm1434_vm0, %v7466_v11, %v7467_v37  ;;  %7643 = vrot.lane.b32.xlu0 %v13624_v12, %s10611_s24 }
 0x3c1   :  { %v5583_v47 = vmax.f32 %v5581_v39, %v5582_v15  ;;  %7765 = vrot.lane.b32.xlu1 %v7500_v41, %s10613_s6  ;;  %v7139_v48 = vsel %vm7002_vm14, %v15162_v54, %v7138_v2  ;;  %v6328_v39 = vand.u32 31, %v10658_v6  ;;  %v7223_v63 = vsel %vm7002_vm14, %v13311_v51, %v7222_v27  ;;  %v7740_v2 = vpop.permute.xlu0 %7739  ;;  %v15167_v54 = vld [vmem:[#allocation120_spill] sm:$0xff] }
 0x3c2   :  { %v5639_v55 = vmax.f32 %v15158_v24, %v15159_v21  ;;  %v15164_v7 = vrot.slane %v15163_v50, 7  ;;  %v7140_v41 = vsel %vm7004_vm15, %v15165_v33, %v7139_v48  ;;  %v7224_v51 = vsel %vm7004_vm15, %v13313_v59, %v7223_v63 }
 0x3c3   :  { %v13674_v46 = vsel %vm7008_vm3, %v5583_v47, %v7134_v16  ;;  %v6212_v27 = vrot.slane %v13299_v58, 1  ;;  %v6224_v15 = vrot.slane %v13233_v31, 2  ;;  %v7497_v1 = vsel %vm1434_vm0, %v7467_v37, %v14838_v20  ;;  %v15166_v16 = vld [vmem:[#allocation114_spill] sm:$0xff]  ;;  %v15182_v20 = vld [vmem:[#allocation136_spill] sm:$0xff] }
 0x3c4   :  { %v13682_v11 = vsel %vm1049_vm1, %v14836_v30, %v15164_v7  ;;  %v7141_v47 = vsel %vm7006_vm2, %v15166_v16, %v7140_v41  ;;  %v7469_v24 = vrot.slane %v13674_v46, 1  ;;  %v7594_v21 = vsel %vm13646_vm9, 0.0, %v7498_v52  ;;  %v15169_v52 = vld [vmem:[#allocation121_spill] sm:$0xff]  ;;  %7771 = vrot.lane.b32.xlu0 %v7497_v1, %s10613_s6  ;;  %v15172_v7 = vld [vmem:[#allocation118_spill] sm:$0xff]  ;;  %v15174_v41 = vld [vmem:[#allocation127_spill] sm:$0xff] }
 0x3c5   :  { %v13700_v36 = vsel %vm7008_vm3, %v5639_v55, %v7141_v47  ;;  %v7225_v59 = vsel %vm7006_vm2, %v13316_v4, %v7224_v51  ;;  %7641 = vrot.lane.b32.xlu1 %v13578_v22, %s10611_s24  ;;  %v15168_v48 = vrot.slane %v15167_v54, 1  ;;  %v5687_v55 = vrot.slane %v15169_v52, 1  ;;  %v15175_v51 = vld [vmem:[#allocation124_spill] sm:$0xff] }
 0x3c6   :  { %v14837_v42 = vrot.slane %v13700_v36, 1  ;;  %v13709_v37 = vsel %vm7008_vm3, %v13339_v57, %v7225_v59  ;;  %vm13716_vm10 = vcmp.eq.s32.totalorder %v6328_v39, 0  ;;  %v15173_v33 = vrot.slane %v15172_v7, 4  ;;  %v15176_v59 = vld [vmem:[#allocation125_spill] sm:$0xff]  ;;  %v13730_v39 = vpop.permute.xlu1 %7661 }
 0x3c7   :  { %v5681_v10 = vmax.f32 %v15167_v54, %v15168_v48  ;;  %v14839_v63 = vrot.slane %v13709_v37, 7  ;;  %v7144_v16 = vsel %vm6998_vm12, %v15175_v51, %v15174_v41  ;;  %v5688_v47 = vmax.f32 %v15169_v52, %v5687_v55  ;;  %v15177_v48 = vld [vmem:[#allocation10_spill] sm:$0xff]  ;;  %v15179_v52 = vld [vmem:[#allocation119_spill] sm:$0xff] }
 0x3c8   :  { %v5691_v57 = vmax.f32 %v15172_v7, %v15173_v33  ;;  %v7145_v1 = vsel %vm7000_vm13, %v15176_v59, %v7144_v16  ;;  %v7495_v54 = vsel %vm1434_vm0, %v7469_v24, %v14837_v42  ;;  %v15178_v7 = vrot.slane %v15177_v48, 7  ;;  %v15180_v59 = vld [vmem:[#allocation126_spill] sm:$0xff]  ;;  %7647 = vrot.lane.b32.xlu0 %v13674_v46, %s10611_s24 }
 0x3c9   :  { %v7146_v55 = vsel %vm7002_vm14, %v15179_v52, %v7145_v1  ;;  %7769 = vrot.lane.b32.xlu1 %v7594_v21, %s10613_s6  ;;  %v15181_v30 = vrot.slane %v15180_v59, 1  ;;  %v7152_v28 = vsel %vm7000_vm13, %v15182_v20, %v12909_v62  ;;  %v15184_v1 = vld [vmem:[#allocation131_spill] sm:$0xff]  ;;  %v15186_v20 = vld [vmem:[#allocation132_spill] sm:$0xff] }
 0x3ca   :  { %v7322_v33 = vsel %vm1049_vm1, %v14839_v63, %v15178_v7  ;;  %v5692_v41 = vrot.slane %v5691_v57, 2  ;;  %v7147_v16 = vsel %vm7004_vm15, %v5681_v10, %v7146_v55  ;;  %v13754_v7 = vpop.permute.xlu0 %7787  ;;  %v7153_v10 = vsel %vm7002_vm14, %v15184_v1, %v7152_v28 }
 0x3cb   :  { %v7387_v51 = vsel %vm13716_vm10, 0.0, %v7322_v33  ;;  %v5751_v42 = vmax.f32 %v15180_v59, %v15181_v30  ;;  %15183 = vst [vmem:[#allocation11_spill] sm:$0xff] %v13754_v7  ;;  %v15185_v33 = vrot.slane %v12892_v34, 1  ;;  %v7148_v62 = vsel %vm7006_vm2, %v5688_v47, %v7147_v16  ;;  %v15187_v59 = vld [vmem:[#allocation134_spill] sm:$0xff] }
 0x3cc   :  { %v7835_v21 = vsel %vm2268_vm7, %v7387_v51, %v13612_v29  ;;  %v5693_v4 = vmax.f32 %v5691_v57, %v5692_v41  ;;  %v7154_v55 = vsel %vm7004_vm15, %v15186_v20, %v7153_v10  ;;  %v15188_v63 = vrot.slane %v15187_v59, 4  ;;  %v15189_v57 = vld [vmem:[#allocation133_spill] sm:$0xff]  ;;  %v15190_v41 = vld [vmem:[#allocation135_spill] sm:$0xff]  ;;  %7775 = vrot.lane.b32.xlu0 %v7495_v54, %s10613_s6 }
 0x3cd   :  { %v5793_v30 = vmax.f32 %v12892_v34, %v15185_v33  ;;  %v7868_v52 = vsel %vm7867_vm6, %v7835_v21, %v7740_v2  ;;  %v7155_v28 = vsel %vm7006_vm2, %v15189_v57, %v7154_v55  ;;  %v5799_v51 = vrot.slane %v15190_v41, 1  ;;  %7645 = vrot.lane.b32.xlu1 %v13615_v5, %s10611_s24  ;;  %v7742_v21 = vpop.permute.xlu1 %7741 }
 0x3ce   :  { %v5803_v7 = vmax.f32 %v15187_v59, %v15188_v63  ;;  %v5694_v29 = vrot.slane %v5693_v4, 1  ;;  %10545 = vmatprep.mubr.msk.f32.mxu1 %vm7900_vm8, %v7868_v52  ;;  %v7158_v34 = vsel %vm6998_vm12, %v12916_v26, %v12927_v19  ;;  %v13782_v2 = vsel %vm7008_vm3, %v5751_v42, %v7155_v28  ;;  %v7616_v59 = vpop.permute.xlu0 %7615 }
 0x3cf   :  { %v7159_v63 = vsel %vm7000_vm13, %v12924_v14, %v7158_v34  ;;  %v108_v16 = vadd.s32 152, %v10658_v6  ;;  %v15191_v1 = vrot.slane %v13211_v40, 1  ;;  %v6219_v33 = vrot.slane %v13304_v13, 1 }
 0x3d0   :  { %v5804_v47 = vrot.slane %v5803_v7, 2  ;;  %v5695_v26 = vmax.f32 %v5693_v4, %v5694_v29  ;;  %v7160_v19 = vsel %vm7002_vm14, %v12911_v3, %v7159_v63  ;;  %v6213_v42 = vmax.f32 %v13299_v58, %v6212_v27 }
 0x3d1   :  { %v6206_v10 = vmax.f32 %v13211_v40, %v15191_v1  ;;  %v6225_v52 = vmax.f32 %v13233_v31, %v6224_v15  ;;  %v15192_v20 = vrot.slane %v12742_v18, 7  ;;  %v15193_v55 = vrot.slane %v15163_v50, 7  ;;  %v7790_v29 = vpop.permute.xlu1 %7789 }
 0x3d2   :  { %v5805_v14 = vmax.f32 %v5803_v7, %v5804_v47  ;;  %v13803_v57 = vsel %vm7008_vm3, %v5695_v26, %v7148_v62  ;;  %v15194_v54 = vrot.slane %v13615_v5, 1  ;;  %v7472_v58 = vrot.slane %v13782_v2, 1  ;;  %v7664_v26 = vpop.permute.xlu0 %7663 }
 0x3d3   :  { %v7297_v40 = vsel %vm1049_vm1, %v15193_v55, %v15192_v20  ;;  %v5800_v31 = vmax.f32 %v15190_v41, %v5799_v51  ;;  %v7471_v27 = vrot.slane %v13803_v57, 1  ;;  %v7161_v7 = vsel %vm7004_vm15, %v5793_v30, %v7160_v19  ;;  %7651 = vrot.lane.b32.xlu0 %v13803_v57, %s10611_s24  ;;  %v15196_v41 = vld [vmem:[#allocation18_spill] sm:$0xff] }
 0x3d4   :  { %v7496_v3 = vsel %vm1434_vm0, %v15194_v54, %v7469_v24  ;;  %v5806_v15 = vrot.slane %v5805_v14, 1  ;;  %v6461_v4 = vand.u32 31, %v108_v16  ;;  %v6245_v62 = vrot.slane %v13206_v43, 2  ;;  %v15195_v24 = vld [vmem:[#allocation107_spill] sm:$0xff]  ;;  %v15198_v55 = vld [vmem:[#allocation122_spill] sm:$0xff] }
 0x3d5   :  { %7773 = vrot.lane.b32.xlu1 %v7496_v3, %s10613_s6  ;;  %v6250_v28 = vrot.slane %v13194_v44, 4  ;;  %v7869_v34 = vsel %vm7867_vm6, %v15195_v24, %v7742_v21  ;;  %v7208_v51 = vsel %vm7000_vm13, %v15196_v41, %v13182_v32  ;;  %v6233_v47 = vrot.slane %v13217_v8, 1 }
 0x3d6   :  { %v15197_v30 = vrot.slane %v13199_v49, 2  ;;  %v6226_v16 = vrot.slane %v6225_v52, 1  ;;  %v5807_v1 = vmax.f32 %v5805_v14, %v5806_v15  ;;  %10546 = vmatmul.mubr.msk.f32.vlgmr.msra.gmra.mxu1 %vm7900_vm8, %v7869_v34  ;;  %v6220_v19 = vmax.f32 %v13304_v13, %v6219_v33  ;;  %v15202_v33 = vld [vmem:[#allocation123_spill] sm:$0xff]  ;;  %v15203_v14 = vld [vmem:[#allocation130_spill] sm:$0xff] }
 0x3d7   :  { %v7213_v20 = vsel %vm6996_vm11, %v6213_v42, %v6206_v10  ;;  %v7162_v21 = vsel %vm7006_vm2, %v5800_v31, %v7161_v7  ;;  %v7209_v32 = vsel %vm7002_vm14, %v15198_v55, %v7208_v51  ;;  %v7493_v54 = vsel %vm1434_vm0, %v7471_v27, %v7472_v58 }
 0x3d8   :  { %v6239_v63 = vmax.f32 %v13199_v49, %v15197_v30  ;;  %vm13839_vm4 = vcmp.eq.s32.totalorder %v6461_v4, 31  ;;  %v15201_v13 = vrot.slane %v13700_v36, 1  ;;  %v7261_v42 = vrot.slane %v15202_v33, 7  ;;  %7779 = vrot.lane.b32.xlu0 %v7493_v54, %s10613_s6  ;;  %v7618_v30 = vpop.permute.xlu1 %7617 }
 0x3d9   :  { %7649 = vrot.lane.b32.xlu1 %v13700_v36, %s10611_s24  ;;  %v15204_v3 = vrot.slane %v15203_v14, 1  ;;  %v7286_v15 = vrot.slane %v13117_v17, 7  ;;  %v6246_v7 = vmax.f32 %v13206_v43, %v6245_v62  ;;  %v6251_v4 = vmax.f32 %v13194_v44, %v6250_v28 }
 0x3da   :  { %v7494_v10 = vsel %vm1434_vm0, %v15201_v13, %v7471_v27  ;;  %v6234_v24 = vmax.f32 %v13217_v8, %v6233_v47  ;;  %v6227_v34 = vmax.f32 %v6225_v52, %v6226_v16  ;;  %v13857_v41 = vsel %vm7008_vm3, %v5807_v1, %v7162_v21  ;;  %v15205_v27 = vld [vmem:[#allocation20_spill] sm:$0xff]  ;;  %v15206_v52 = vld [vmem:[#allocation14_spill] sm:$0xff]  ;;  %v15208_v47 = vld [vmem:[#allocation129_spill] sm:$0xff]  ;;  %v7744_v21 = vpop.permute.xlu0 %7743 }
 0x3db   :  { %v6192_v31 = vmax.f32 %v15203_v14, %v15204_v3  ;;  %v7210_v51 = vsel %vm7004_vm15, %v15205_v27, %v7209_v32  ;;  %v6240_v55 = vrot.slane %v6239_v63, 1  ;;  %v7598_v13 = vsel %vm13839_vm4, 0.0, %v7494_v10 }
 0x3dc   :  { %v6252_v33 = vrot.slane %v6251_v4, 2  ;;  %v7214_v43 = vsel %vm6998_vm12, %v6220_v19, %v7213_v20  ;;  %v7860_v44 = vsel %vm2268_vm7, %v7297_v40, %v13730_v39  ;;  %v7474_v8 = vrot.slane %v13654_v60, 1  ;;  %7655 = vrot.lane.b32.xlu0 %v13857_v41, %s10611_s24  ;;  %v15210_v40 = vld [vmem:[#allocation137_spill] sm:$0xff] }
 0x3dd   :  { %7777 = vrot.lane.b32.xlu1 %v7598_v13, %s10613_s6  ;;  %v15207_v62 = vrot.slane %v15206_v52, 7  ;;  %v15209_v16 = vrot.slane %v15208_v47, 1  ;;  %v7473_v19 = vrot.slane %v13857_v41, 1  ;;  %v7211_v39 = vsel %vm7006_vm2, %v6192_v31, %v7210_v51  ;;  %v7666_v13 = vpop.permute.xlu1 %7665 }
 0x3de   :  { %v15211_v32 = vrot.slane %v15210_v40, 7  ;;  %v15212_v54 = vrot.slane %v12742_v18, 7  ;;  %v6253_v10 = vmax.f32 %v6251_v4, %v6252_v33  ;;  %v7215_v14 = vsel %vm7000_vm13, %v6227_v34, %v7214_v43  ;;  %v15214_v43 = vld [vmem:[#allocation138_spill] sm:$0xff] }
 0x3df   :  { %v7320_v28 = vsel %vm1049_vm1, %v15207_v62, %v7261_v42  ;;  %v6199_v1 = vmax.f32 %v15208_v47, %v15209_v16  ;;  %v13889_v27 = vsel %vm7867_vm6, %v7860_v44, %v7790_v29  ;;  %v6247_v52 = vrot.slane %v6246_v7, 1  ;;  %v7792_v62 = vpop.permute.xlu0 %7791 }
 0x3e0   :  { %v7837_v20 = vsel %vm2268_vm7, %v7320_v28, %v7616_v59  ;;  %v7296_v49 = vsel %vm1049_vm1, %v15212_v54, %v15211_v32  ;;  %v7265_v59 = vrot.slane %v13290_v25, 7  ;;  %v7491_v18 = vsel %vm1434_vm0, %v7473_v19, %v7474_v8 }
 0x3e1   :  { %v7861_v3 = vsel %vm2268_vm7, %v7296_v49, %v7664_v26  ;;  %v7870_v31 = vsel %vm7867_vm6, %v7837_v20, %v7744_v21  ;;  %7653 = vrot.lane.b32.xlu1 %v13782_v2, %s10611_s24  ;;  %v6241_v4 = vmax.f32 %v6239_v63, %v6240_v55  ;;  %v15213_v29 = vmov %v15211_v32  ;;  %v15215_v20 = vld [vmem:[#allocation4_spill] sm:$0xff] }
 0x3e2   :  { %10548 = vmatprep.mubr.msk.f32.mxu1 %vm7900_vm8, %v7870_v31  ;;  %v7295_v26 = vsel %vm1049_vm1, %v15213_v29, %v7286_v15  ;;  %v7264_v34 = vrot.slane %v13244_v53, 7  ;;  %7783 = vrot.lane.b32.xlu0 %v7491_v18, %s10613_s6  ;;  %v13907_v51 = vsel %vm7008_vm3, %v6199_v1, %v7211_v39  ;;  %v7216_v33 = vsel %vm7002_vm14, %v6234_v24, %v7215_v14 }
 0x3e3   :  { %v13911_v63 = vsel %vm2268_vm7, %v7295_v26, %v7666_v13  ;;  %v6254_v55 = vrot.slane %v6253_v10, 1  ;;  %v7262_v44 = vrot.slane %v15214_v43, 7  ;;  %v7492_v28 = vsel %vm1434_vm0, %v7472_v58, %v7473_v19  ;;  %v7746_v13 = vpop.permute.xlu1 %7745 }
 0x3e4   :  { %v6248_v47 = vmax.f32 %v6246_v7, %v6247_v52  ;;  %v13919_v16 = vsel %vm7867_vm6, %v7861_v3, %v7792_v62  ;;  %v13927_v24 = vsel %vm1049_vm1, %v7264_v34, %v7265_v59  ;;  %v7480_v1 = vrot.slane %v13907_v51, 1 }
 0x3e5   :  { %7781 = vrot.lane.b32.xlu1 %v7492_v28, %s10613_s6  ;;  %v7217_v21 = vsel %vm7004_vm15, %v6241_v4, %v7216_v33  ;;  %v6489_v58 = vand.u32 31, %v15215_v20  ;;  %v7269_v7 = vrot.slane %v13467_v23, 7  ;;  %v7271_v19 = vrot.slane %v13509_v35, 7 }
 0x3e6   :  { %7667 = vrot.lane.b32.xlu0 %v13344_v38, %s10611_s24  ;;  %v7273_v39 = vrot.slane %v13584_v9, 7  ;;  %v6255_v40 = vmax.f32 %v6253_v10, %v6254_v55  ;;  %v7319_v32 = vsel %vm1049_vm1, %v7261_v42, %v7262_v44  ;;  %v7270_v54 = vrot.slane %v13459_v45, 7 }
 0x3e7   :  { %v7275_v49 = vrot.slane %v13624_v12, 7  ;;  %v7277_v14 = vrot.slane %v13674_v46, 7  ;;  %v7218_v3 = vsel %vm7006_vm2, %v6248_v47, %v7217_v21  ;;  %v7838_v35 = vsel %vm2268_vm7, %v7319_v32, %v7618_v30 }
 0x3e8   :  { %v15216_v52 = vrot.slane %v13344_v38, 1  ;;  %vm13953_vm5 = vcmp.eq.s32.totalorder %v6489_v58, 31  ;;  %v15219_v45 = vrot.slane %v15163_v50, 1  ;;  %v7871_v46 = vsel %vm7867_vm6, %v7838_v35, %v7746_v13 }
 0x3e9   :  { %7657 = vrot.lane.b32.xlu1 %v13654_v60, %s10611_s24  ;;  %10549 = vmatmul.mubr.msk.f32.gmra.mxu1 %vm7900_vm8, %v7871_v46  ;;  %v13966_v30 = vsel %vm1049_vm1, %v7270_v54, %v7271_v19  ;;  %v13972_v10 = vsel %vm1049_vm1, %v7269_v7, %v7270_v54  ;;  %v7272_v50 = vrot.slane %v13518_v61, 7  ;;  %v7219_v31 = vsel %vm7008_vm3, %v6255_v40, %v7218_v3  ;;  %v15222_v3 = vld [vmem:[#allocation5_spill] sm:$0xff]  ;;  %v7620_v46 = vpop.permute.xlu0 %7619 }
 0x3ea   :  { %v7485_v9 = vsel %vm1434_vm0, %v15216_v52, %v7480_v1  ;;  %v7490_v12 = vsel %vm1434_vm0, %v7474_v8, %v15219_v45  ;;  %v7279_v8 = vrot.slane %v13803_v57, 7  ;;  %v7274_v18 = vrot.slane %v13578_v22, 7  ;;  %v15224_v45 = vld [vmem:[#allocation128_spill] sm:$0xff] }
 0x3eb   :  { %7795 = vrot.lane.b32.xlu0 %v7485_v9, %s10613_s6  ;;  %v7276_v4 = vrot.slane %v13615_v5, 7  ;;  %v7281_v29 = vrot.slane %v13857_v41, 7  ;;  %v7602_v26 = vsel %vm13953_vm5, 0.0, %v7490_v12  ;;  %v13984_v33 = vsel %vm1049_vm1, %v7272_v50, %v7273_v39 }
 0x3ec   :  { %v13988_v61 = vsel %vm1049_vm1, %v7271_v19, %v7272_v50  ;;  %v13993_v22 = vsel %vm1049_vm1, %v7274_v18, %v7275_v49  ;;  %v13997_v5 = vsel %vm1049_vm1, %v7273_v39, %v7274_v18  ;;  %v7289_v55 = vrot.slane %v7219_v31, 7 }
 0x3ed   :  { %7785 = vrot.lane.b32.xlu1 %v7602_v26, %s10613_s6  ;;  %v14001_v57 = vsel %vm1049_vm1, %v7276_v4, %v7277_v14  ;;  %v14005_v41 = vsel %vm1049_vm1, %v7275_v49, %v7276_v4  ;;  %v7278_v62 = vrot.slane %v13700_v36, 7  ;;  %v7280_v28 = vrot.slane %v13782_v2, 7 }
 0x3ee   :  { %v7481_v47 = vrot.slane %v7219_v31, 1  ;;  %v7482_v21 = vrot.slane %v13709_v37, 1  ;;  %v15220_v20 = vrot.slane %v13654_v60, 7  ;;  %v7288_v2 = vrot.slane %v13907_v51, 7 }
 0x3ef   :  { %7671 = vrot.lane.b32.xlu0 %v7219_v31, %s10611_s24  ;;  %v14019_v19 = vsel %vm1049_vm1, %v7278_v62, %v7279_v8  ;;  %v14023_v39 = vsel %vm1049_vm1, %v7277_v14, %v7278_v62  ;;  %v14027_v36 = vsel %vm1049_vm1, %v7280_v28, %v7281_v29  ;;  %v14036_v40 = vsel %vm1049_vm1, %v7279_v8, %v7280_v28 }
 0x3f0   :  { %v14015_v58 = vsel %vm1049_vm1, %v7281_v29, %v15220_v20  ;;  %v7483_v60 = vsel %vm1434_vm0, %v7481_v47, %v7482_v21  ;;  %v14043_v32 = vsel %vm1049_vm1, %v7288_v2, %v7289_v55  ;;  %v15221_v54 = vrot.slane %v13709_v37, 7 }
 0x3f1   :  { %7669 = vrot.lane.b32.xlu1 %v13907_v51, %s10611_s24  ;;  %v7484_v14 = vsel %vm1434_vm0, %v7480_v1, %v7481_v47  ;;  %v6545_v35 = vand.u32 31, %v15222_v3  ;;  %v93_v13 = vadd.s32 32, %v10658_v6  ;;  %v15223_v52 = vrot.slane %v15177_v48, 1 }
 0x3f2   :  { %v14049_v49 = vsel %vm1049_vm1, %v7289_v55, %v15221_v54  ;;  %v7263_v12 = vrot.slane %v15224_v45, 7  ;;  %v7267_v28 = vrot.slane %v13409_v0, 7  ;;  %v7266_v53 = vrot.slane %v13293_v56, 7  ;;  %v15226_v45 = vld [vmem:[#allocation12_spill] sm:$0xff] }
 0x3f3   :  { %7799 = vrot.lane.b32.xlu0 %v7483_v60, %s10613_s6  ;;  %vm7450_vm9 = vcmp.eq.s32.totalorder %v6545_v35, 31  ;;  %v7514_v9 = vsel %vm1434_vm0, %v7482_v21, %v15223_v52  ;;  %v6356_v42 = vand.u32 31, %v93_v13  ;;  %v15225_v21 = vld [vmem:[#allocation6_spill] sm:$0xff] }
 0x3f4   :  { %v7610_v1 = vsel %vm7450_vm9, 0.0, %v7514_v9  ;;  %v7318_v50 = vsel %vm1049_vm1, %v7262_v44, %v7263_v12  ;;  %v7622_v4 = vpop.permute.xlu1 %7621  ;;  %v7317_v43 = vsel %vm1049_vm1, %v7263_v12, %v7264_v34  ;;  %v6384_v20 = vand.u32 31, %v15225_v21 }
 0x3f5   :  { %7797 = vrot.lane.b32.xlu1 %v7484_v14, %s10613_s6  ;;  %vm6712_vm10 = vcmp.eq.s32.totalorder %v6356_v42, 0  ;;  %v7840_v44 = vsel %vm2268_vm7, %v7317_v43, %v7622_v4  ;;  %v7314_v0 = vsel %vm1049_vm1, %v7266_v53, %v7267_v28  ;;  %v7268_v12 = vrot.slane %v15226_v45, 7 }
 0x3f6   :  { %vm6716_vm0 = vcmp.eq.s32.totalorder %v6384_v20, 0 }
 0x3f7   :  { %v7395_v3 = vsel %vm6716_vm0, 0.0, %v7314_v0 }
 0x3f8   :  { %v7748_v48 = vpop.permute.xlu0 %7747 }
 0x3f9   :  { %7673 = vrot.lane.b32.xlu1 %v13709_v37, %s10611_s24  ;;  %v7391_v37 = vsel %vm6712_vm10, 0.0, %v7318_v50  ;;  %v7312_v50 = vsel %vm1049_vm1, %v7268_v12, %v7269_v7 }
 0x3fa   :  { %v7839_v8 = vsel %vm2268_vm7, %v7391_v37, %v7620_v46 }
 0x3fb   :  { %v7872_v31 = vsel %vm7867_vm6, %v7839_v8, %v7748_v48 }
 0x3fc   :  { %10551 = vmatprep.mubr.msk.f32.mxu1 %vm7900_vm8, %v7872_v31 }
 0x3fd   :  { %7801 = vrot.lane.b32.xlu1 %v7610_v1, %s10613_s6  ;;  %v7313_v1 = vsel %vm1049_vm1, %v7267_v28, %v7268_v12  ;;  %v109_v12 = vadd.s32 160, %v10658_v6 }
 0x3ff   :  { %v7624_v18 = vpop.permute.xlu0 %7623 }
 0x400   :  { %v7841_v47 = vsel %vm2268_vm7, %v13927_v24, %v7624_v18  ;;  %v7315_v24 = vsel %vm1049_vm1, %v7265_v59, %v7266_v53  ;;  %v101_v59 = vadd.s32 96, %v10658_v6 }
 0x402   :  { %v6412_v31 = vand.u32 31, %v101_v59 }
 0x403   :  { %v7752_v29 = vpop.permute.xlu0 %7751 }
 0x404   :  { %vm6720_vm4 = vcmp.eq.s32.totalorder %v6412_v31, 0 }
 0x405   :  { %v7399_v7 = vsel %vm6720_vm4, 0.0, %v13966_v30 }
 0x40c   :  { %v7794_v26 = vpop.permute.xlu1 %7793 }
 0x40d   :  { %v14073_v55 = vsel %vm7867_vm6, %v13911_v63, %v7794_v26  ;;  %v7874_v63 = vsel %vm7867_vm6, %v7841_v47, %v7752_v29 }
 0x410   :  { %v7750_v62 = vpop.permute.xlu1 %7749 }
 0x411   :  { %v7628_v60 = vpop.permute.xlu0 %7627  ;;  %v7873_v54 = vsel %vm7867_vm6, %v7840_v44, %v7750_v62 }
 0x412   :  { %10552 = vmatmul.mubr.msk.f32.gmra.mxu1 %vm7900_vm8, %v7873_v54  ;;  %v7843_v52 = vsel %vm2268_vm7, %v7395_v3, %v7628_v60 }
 0x413   :  { %10554 = vmatprep.mubr.msk.f32.mxu1 %vm7900_vm8, %v7874_v63  ;;  %v15227_v63 = vld [vmem:[#allocation7_spill] sm:$0xff] }
 0x414   :  { %v7626_v34 = vpop.permute.xlu1 %7625  ;;  %v6440_v53 = vand.u32 31, %v15227_v63 }
 0x415   :  { %v7756_v14 = vpop.permute.xlu0 %7755  ;;  %v7842_v35 = vsel %vm2268_vm7, %v7315_v24, %v7626_v34 }
 0x416   :  { %v7876_v42 = vsel %vm7867_vm6, %v7843_v52, %v7756_v14  ;;  %vm6724_vm5 = vcmp.eq.s32.totalorder %v6440_v53, 0  ;;  %v7287_v53 = vrot.slane %v13344_v38, 7 }
 0x418   :  { %v7754_v13 = vpop.permute.xlu1 %7753 }
 0x419   :  { %v7632_v56 = vpop.permute.xlu0 %7631  ;;  %v7875_v9 = vsel %vm7867_vm6, %v7842_v35, %v7754_v13 }
 0x41a   :  { %10555 = vmatmul.mubr.msk.f32.gmra.mxu1 %vm7900_vm8, %v7875_v9  ;;  %v7845_v48 = vsel %vm2268_vm7, %v7312_v50, %v7632_v56 }
 0x41b   :  { %10557 = vmatprep.mubr.msk.f32.mxu1 %vm7900_vm8, %v7876_v42 }
 0x41c   :  { %v7630_v25 = vpop.permute.xlu1 %7629 }
 0x41d   :  { %v7760_v46 = vpop.permute.xlu0 %7759  ;;  %v7844_v37 = vsel %vm2268_vm7, %v7313_v1, %v7630_v25 }
 0x41e   :  { %v7878_v29 = vsel %vm7867_vm6, %v7845_v48, %v7760_v46  ;;  %v6468_v46 = vand.u32 31, %v109_v12 }
 0x420   :  { %vm6728_vm9 = vcmp.eq.s32.totalorder %v6468_v46, 0 }
 0x421   :  { %v7636_v18 = vpop.permute.xlu0 %7635  ;;  %v7407_v48 = vsel %vm6728_vm9, 0.0, %v14019_v19 }
 0x422   :  { %v7847_v62 = vsel %vm2268_vm7, %v7399_v7, %v7636_v18 }
 0x423   :  { %v7758_v8 = vpop.permute.xlu1 %7757 }
 0x424   :  { %v7877_v4 = vsel %vm7867_vm6, %v7844_v37, %v7758_v8 }
 0x425   :  { %10558 = vmatmul.mubr.msk.f32.gmra.mxu1 %vm7900_vm8, %v7877_v4 }
 0x426   :  { %10560 = vmatprep.mubr.msk.f32.mxu1 %vm7900_vm8, %v7878_v29  ;;  %v7764_v23 = vpop.permute.xlu0 %7763 }
 0x427   :  { %v7634_v26 = vpop.permute.xlu1 %7633  ;;  %v7880_v21 = vsel %vm7867_vm6, %v7847_v62, %v7764_v23 }
 0x428   :  { %v7846_v43 = vsel %vm2268_vm7, %v13972_v10, %v7634_v26 }
 0x42a   :  { %v7640_v28 = vpop.permute.xlu0 %7639 }
 0x42b   :  { %v7762_v44 = vpop.permute.xlu1 %7761  ;;  %v7849_v10 = vsel %vm2268_vm7, %v13984_v33, %v7640_v28 }
 0x42c   :  { %v7879_v47 = vsel %vm7867_vm6, %v7846_v43, %v7762_v44  ;;  %v15228_v43 = vld [vmem:[#allocation8_spill] sm:$0xff] }
 0x42d   :  { %10561 = vmatmul.mubr.msk.f32.gmra.mxu1 %vm7900_vm8, %v7879_v47 }
 0x42e   :  { %10563 = vmatprep.mubr.msk.f32.mxu1 %vm7900_vm8, %v7880_v21  ;;  %v7768_v60 = vpop.permute.xlu0 %7767 }
 0x42f   :  { %v7638_v20 = vpop.permute.xlu1 %7637  ;;  %v7882_v14 = vsel %vm7867_vm6, %v7849_v10, %v7768_v60 }
 0x430   :  { %v7848_v30 = vsel %vm2268_vm7, %v13988_v61, %v7638_v20  ;;  %v7403_v61 = vsel %vm6724_vm5, 0.0, %v13993_v22  ;;  %v117_v20 = vadd.s32 224, %v10658_v6 }
 0x432   :  { %v7644_v34 = vpop.permute.xlu0 %7643  ;;  %v6524_v63 = vand.u32 31, %v117_v20 }
 0x433   :  { %v7766_v54 = vpop.permute.xlu1 %7765  ;;  %v7851_v13 = vsel %vm2268_vm7, %v7403_v61, %v7644_v34 }
 0x434   :  { %v7881_v0 = vsel %vm7867_vm6, %v7848_v30, %v7766_v54  ;;  %v15229_v54 = vld [vmem:[#allocation13_spill] sm:$0xff]  ;;  %vm6736_vm0 = vcmp.eq.s32.totalorder %v6524_v63, 0 }
 0x435   :  { %10564 = vmatmul.mubr.msk.f32.gmra.mxu1 %vm7900_vm8, %v7881_v0  ;;  %v15230_v0 = vld [vmem:[#allocation11_spill] sm:$0xff] }
 0x436   :  { %10566 = vmatprep.mubr.msk.f32.mxu1 %vm7900_vm8, %v7882_v14  ;;  %v7772_v3 = vpop.permute.xlu0 %7771 }
 0x437   :  { %v7642_v24 = vpop.permute.xlu1 %7641  ;;  %v7884_v9 = vsel %vm7867_vm6, %v7851_v13, %v7772_v3 }
 0x438   :  { %v7850_v35 = vsel %vm2268_vm7, %v13997_v5, %v7642_v24 }
 0x43a   :  { %v7648_v52 = vpop.permute.xlu0 %7647 }
 0x43b   :  { %v7770_v33 = vpop.permute.xlu1 %7769  ;;  %v7853_v25 = vsel %vm2268_vm7, %v14001_v57, %v7648_v52 }
 0x43c   :  { %v7883_v56 = vsel %vm7867_vm6, %v7850_v35, %v7770_v33 }
 0x43d   :  { %10567 = vmatmul.mubr.msk.f32.gmra.mxu1 %vm7900_vm8, %v7883_v56  ;;  %v8224_v56 = vsub.s32 2, %v10658_v6 }
 0x43e   :  { %10569 = vmatprep.mubr.msk.f32.mxu1 %vm7900_vm8, %v7884_v9  ;;  %v7776_v45 = vpop.permute.xlu0 %7775  ;;  %v10609_v9 = vld [vmem:[%s14734_s3] sm:$0xf] }
 0x43f   :  { %v7646_v42 = vpop.permute.xlu1 %7645  ;;  %v7886_v50 = vsel %vm7867_vm6, %v7853_v25, %v7776_v45 }
 0x440   :  { %v7852_v22 = vsel %vm2268_vm7, %v14005_v41, %v7646_v42  ;;  %v14211_v42 = vrot.slane %v10609_v9, %v8224_v56 }
 0x445   :  { %v7652_v59 = vpop.permute.xlu0 %7651 }
 0x446   :  { %v7855_v57 = vsel %vm2268_vm7, %v7407_v48, %v7652_v59 }
 0x447   :  { %v7774_v5 = vpop.permute.xlu1 %7773 }
 0x448   :  { %v7885_v1 = vsel %vm7867_vm6, %v7852_v22, %v7774_v5 }
 0x449   :  { %10570 = vmatmul.mubr.msk.f32.gmra.mxu1 %vm7900_vm8, %v7885_v1  ;;  %v15231_v1 = vld [vmem:[#allocation9_spill] sm:$0xff] }
 0x44a   :  { %10572 = vmatprep.mubr.msk.f32.mxu1 %vm7900_vm8, %v7886_v50  ;;  %v7780_v8 = vpop.permute.xlu0 %7779 }
 0x44b   :  { %v7650_v37 = vpop.permute.xlu1 %7649  ;;  %v7888_v29 = vsel %vm7867_vm6, %v7855_v57, %v7780_v8 }
 0x44c   :  { %v7854_v41 = vsel %vm2268_vm7, %v14023_v39, %v7650_v37  ;;  %v6496_v39 = vand.u32 31, %v15228_v43 }
 0x44e   :  { %v7656_v18 = vpop.permute.xlu0 %7655  ;;  %vm6732_vm10 = vcmp.eq.s32.totalorder %v6496_v39, 0 }
 0x44f   :  { %v7778_v31 = vpop.permute.xlu1 %7777  ;;  %v7857_v44 = vsel %vm2268_vm7, %v14027_v36, %v7656_v18  ;;  %v7411_v60 = vsel %vm6732_vm10, 0.0, %v13682_v11 }
 0x450   :  { %v7887_v4 = vsel %vm7867_vm6, %v7854_v41, %v7778_v31  ;;  %v7859_v10 = vsel %vm2268_vm7, %v7411_v60, %v15229_v54 }
 0x451   :  { %10573 = vmatmul.mubr.msk.f32.gmra.mxu1 %vm7900_vm8, %v7887_v4  ;;  %v7892_v14 = vsel %vm7867_vm6, %v7859_v10, %v15230_v0 }
 0x452   :  { %10575 = vmatprep.mubr.msk.f32.mxu1 %vm7900_vm8, %v7888_v29 }
 0x453   :  { %v7654_v26 = vpop.permute.xlu1 %7653 }
 0x454   :  { %v7784_v23 = vpop.permute.xlu0 %7783  ;;  %v7856_v19 = vsel %vm2268_vm7, %v14036_v40, %v7654_v26 }
 0x455   :  { %v7890_v47 = vsel %vm7867_vm6, %v7857_v44, %v7784_v23 }
 0x457   :  { %v7782_v7 = vpop.permute.xlu1 %7781 }
 0x458   :  { %v7668_v62 = vpop.permute.xlu0 %7667  ;;  %v7889_v28 = vsel %vm7867_vm6, %v7856_v19, %v7782_v7 }
 0x459   :  { %10576 = vmatmul.mubr.msk.f32.gmra.mxu1 %vm7900_vm8, %v7889_v28 }
 0x45a   :  { %10578 = vmatprep.mubr.msk.f32.mxu1 %vm7900_vm8, %v7890_v47 }
 0x45b   :  { %v7658_v21 = vpop.permute.xlu1 %7657 }
 0x45c   :  { %v7858_v30 = vsel %vm2268_vm7, %v14015_v58, %v7658_v21  ;;  %v7294_v58 = vsel %vm1049_vm1, %v7286_v15, %v7287_v53  ;;  %v7293_v15 = vsel %vm1049_vm1, %v7287_v53, %v7288_v2  ;;  %vm9030_vm1 = vcmask 517120  }
 0x45d   :  { %v7796_v40 = vpop.permute.xlu0 %7795  ;;  %v7415_v38 = vsel %vm6736_vm0, 0.0, %v7294_v58 }
 0x45e   :  { %v7863_v61 = vsel %vm2268_vm7, %v7415_v38, %v7668_v62 }
 0x45f   :  { %v7786_v36 = vpop.permute.xlu1 %7785  ;;  %v7896_v35 = vsel %vm7867_vm6, %v7863_v61, %v7796_v40 }
 0x460   :  { %v7891_v34 = vsel %vm7867_vm6, %v7858_v30, %v7786_v36 }
 0x461   :  { %10579 = vmatmul.mubr.msk.f32.gmra.mxu1 %vm7900_vm8, %v7891_v34  ;;  %v7672_v24 = vpop.permute.xlu0 %7671 }
 0x462   :  { %10581 = vmatprep.mubr.msk.f32.mxu1 %vm7900_vm8, %v7892_v14  ;;  %v7865_v33 = vsel %vm2268_vm7, %v14043_v32, %v7672_v24  ;;  %v8260_v32 = vsub.s32 3, %v10658_v6 }
 0x463   :  { %v7670_v11 = vpop.permute.xlu1 %7669 }
 0x464   :  { %v14213_v45 = vrot.slane %v10609_v9, %v8260_v32 }
 0x465   :  { %10582 = vmatmul.mubr.msk.f32.gmra.mxu1 %vm7900_vm8, %v13889_v27  ;;  %v7800_v17 = vpop.permute.xlu0 %7799  ;;  %v7864_v27 = vsel %vm2268_vm7, %v7293_v15, %v7670_v11 }
 0x466   :  { %10584 = vmatprep.mubr.msk.f32.mxu1 %vm7900_vm8, %v13919_v16  ;;  %v7898_v52 = vsel %vm7867_vm6, %v7865_v33, %v7800_v17 }
 0x467   :  { %v7798_v3 = vpop.permute.xlu1 %7797 }
 0x468   :  { %v7897_v13 = vsel %vm7867_vm6, %v7864_v27, %v7798_v3 }
 0x469   :  { %10585 = vmatmul.mubr.msk.f32.gmra.mxu1 %vm7900_vm8, %v14073_v55 }
 0x46a   :  { %10587 = vmatprep.mubr.msk.f32.mxu1 %vm7900_vm8, %v7896_v35 }
 0x46b   :  { %v7674_v16 = vpop.permute.xlu1 %7673 }
 0x46c   :  { %v7866_v51 = vsel %vm2268_vm7, %v14049_v49, %v7674_v16 }
 0x46d   :  { %10588 = vmatmul.mubr.msk.f32.gmra.mxu1 %vm7900_vm8, %v7897_v13 }
 0x46e   :  { %10590 = vmatprep.mubr.msk.f32.mxu1 %vm7900_vm8, %v7898_v52 }
 0x46f   :  { %v7802_v2 = vpop.permute.xlu1 %7801 }
 0x470   :  { %v7899_v55 = vsel %vm7867_vm6, %v7866_v51, %v7802_v2 }
 0x471   :  { %10591 = vmatmul.mubr.msk.f32.gmra.mxu1 %vm7900_vm8, %v7899_v55 }
 0x496   :  { %v10547_v12 = vpop.f32.mrf.mxu1 }
 0x497   :  { %v8227_v49 = vmul.f32 %v10547_v12, %v14211_v42 }
 0x498   :  { %v8063_v22 = vpop.f32.mrf.mxu1 }
 0x499   :  { %v8263_v5 = vadd.f32 %v14213_v45, %v8227_v49  ;;  %v8226_v25 = vmul.f32 %v14211_v42, %v8063_v22 }
 0x49b   :  { %v8295_v46 = vmax.f32 %v8263_v5, 0.0  ;;  %v8262_v59 = vadd.f32 %v14213_v45, %v8226_v25 }
 0x49d   :  { %v8375_v6 = vcombine.high %v8295_v46, %v8295_v46  ;;  %v8382_v50 = vrot.slane %v8295_v46, %v15231_v1  ;;  %v8294_v37 = vmax.f32 %v8262_v59, 0.0 }
 0x49f   :  { %v8389_v8 = vrot.slane %v8375_v6, %v15231_v1  ;;  %v8390_v48 = vcombine.high %v8382_v50, %v8382_v50  ;;  %v9059_v41 = vsel %vm9030_vm1, %v8382_v50, -inf  ;;  %v8358_v31 = vcombine.high %v8294_v37, %v8294_v37 }
 0x4a0   :  { %v9060_v57 = vrot.slane %v9059_v41, 4  ;;  %v8365_v18 = vrot.slane %v8294_v37, %v15231_v1 }
 0x4a1   :  { %v8391_v4 = vcombine.high %v8389_v8, %v8389_v8  ;;  %v9066_v29 = vsel %vm9030_vm1, %v8390_v48, -inf  ;;  %v9073_v26 = vsel %vm9030_vm1, %v8389_v8, -inf  ;;  %v8372_v23 = vrot.slane %v8358_v31, %v15231_v1 }
 0x4a2   :  { %v9061_v19 = vmax.f32 %v9059_v41, %v9060_v57  ;;  %v9067_v7 = vrot.slane %v9066_v29, 4  ;;  %v9074_v43 = vrot.slane %v9073_v26, 4  ;;  %v8373_v39 = vcombine.high %v8365_v18, %v8365_v18 }
 0x4a3   :  { %v9080_v44 = vsel %vm9030_vm1, %v8391_v4, -inf  ;;  %v8374_v62 = vcombine.high %v8372_v23, %v8372_v23  ;;  %v9031_v28 = vsel %vm9030_vm1, %v8365_v18, -inf  ;;  %v9045_v47 = vsel %vm9030_vm1, %v8372_v23, -inf }
 0x4a4   :  { %v9068_v21 = vmax.f32 %v9066_v29, %v9067_v7  ;;  %v9075_v20 = vmax.f32 %v9073_v26, %v9074_v43  ;;  %v9081_v40 = vrot.slane %v9080_v44, 4  ;;  %v9032_v60 = vrot.slane %v9031_v28, 4 }
 0x4a5   :  { %v9038_v30 = vsel %vm9030_vm1, %v8373_v39, -inf  ;;  %v9046_v36 = vrot.slane %v9045_v47, 4  ;;  %v9052_v54 = vsel %vm9030_vm1, %v8374_v62, -inf  ;;  %v9062_v10 = vrot.slane %v9061_v19, 2 }
 0x4a6   :  { %v9069_v63 = vrot.slane %v9068_v21, 2  ;;  %v9076_v53 = vrot.slane %v9075_v20, 2  ;;  %v9082_v34 = vmax.f32 %v9080_v44, %v9081_v40  ;;  %v9033_v0 = vmax.f32 %v9031_v28, %v9032_v60 }
 0x4a7   :  { %v9039_v14 = vrot.slane %v9038_v30, 4  ;;  %v9047_v11 = vmax.f32 %v9045_v47, %v9046_v36  ;;  %v9053_v58 = vrot.slane %v9052_v54, 4  ;;  %v9063_v17 = vmax.f32 %v9061_v19, %v9062_v10 }
 0x4a8   :  { %v9034_v24 = vrot.slane %v9033_v0, 2  ;;  %v9070_v15 = vmax.f32 %v9068_v21, %v9069_v63  ;;  %v9077_v27 = vmax.f32 %v9075_v20, %v9076_v53  ;;  %v9083_v16 = vrot.slane %v9082_v34, 2 }
 0x4a9   :  { %v9040_v38 = vmax.f32 %v9038_v30, %v9039_v14  ;;  %v9048_v3 = vrot.slane %v9047_v11, 2  ;;  %v9054_v61 = vmax.f32 %v9052_v54, %v9053_v58  ;;  %v10550_v35 = vpop.f32.mrf.mxu1  ;;  %v9064_v49 = vrot.slane %v9063_v17, 1 }
 0x4aa   :  { %v9035_v33 = vmax.f32 %v9033_v0, %v9034_v24  ;;  %v8229_v55 = vmul.f32 %v10550_v35, %v14211_v42  ;;  %v9071_v22 = vrot.slane %v9070_v15, 1  ;;  %v9078_v46 = vrot.slane %v9077_v27, 1 }
 0x4ab   :  { %v9041_v13 = vrot.slane %v9040_v38, 2  ;;  %v9049_v52 = vmax.f32 %v9047_v11, %v9048_v3  ;;  %v9055_v51 = vrot.slane %v9054_v61, 2  ;;  %v8073_v2 = vpop.f32.mrf.mxu1  ;;  %v9084_v59 = vmax.f32 %v9082_v34, %v9083_v16 }
 0x4ac   :  { %v9036_v56 = vrot.slane %v9035_v33, 1  ;;  %v8265_v5 = vadd.f32 %v14213_v45, %v8229_v55  ;;  %v8228_v25 = vmul.f32 %v14211_v42, %v8073_v2  ;;  %v9065_v18 = vmax.f32 %v9063_v17, %v9064_v49 }
 0x4ad   :  { %v9042_v32 = vmax.f32 %v9040_v38, %v9041_v13  ;;  %v9050_v9 = vrot.slane %v9049_v52, 1  ;;  %v9056_v12 = vmax.f32 %v9054_v61, %v9055_v51  ;;  %v9072_v23 = vmax.f32 %v9070_v15, %v9071_v22 }
 0x4ae   :  { %v8297_v8 = vmax.f32 %v8265_v5, 0.0  ;;  %v8264_v48 = vadd.f32 %v14213_v45, %v8228_v25  ;;  %v9037_v41 = vmax.f32 %v9035_v33, %v9036_v56  ;;  %v9079_v19 = vmax.f32 %v9077_v27, %v9078_v46 }
 0x4af   :  { %v9043_v6 = vrot.slane %v9042_v32, 1  ;;  %v9057_v50 = vrot.slane %v9056_v12, 1  ;;  %v9051_v37 = vmax.f32 %v9049_v52, %v9050_v9  ;;  %v9085_v7 = vrot.slane %v9084_v59, 1 }
 0x4b0   :  { %v8409_v4 = vcombine.high %v8297_v8, %v8297_v8  ;;  %v8416_v29 = vrot.slane %v8297_v8, %v15231_v1  ;;  %v8296_v26 = vmax.f32 %v8264_v48, 0.0 }
 0x4b1   :  { %v9044_v31 = vmax.f32 %v9042_v32, %v9043_v6  ;;  %v9058_v57 = vmax.f32 %v9056_v12, %v9057_v50  ;;  %v9086_v10 = vmax.f32 %v9084_v59, %v9085_v7 }
 0x4b2   :  { %v8423_v44 = vrot.slane %v8409_v4, %v15231_v1  ;;  %v8424_v62 = vcombine.high %v8416_v29, %v8416_v29  ;;  %v9115_v28 = vsel %vm9030_vm1, %v8416_v29, -inf  ;;  %v8392_v20 = vcombine.high %v8296_v26, %v8296_v26 }
 0x4b3   :  { %v10055_v43 = vsel %vm6996_vm11, %v9044_v31, %v9037_v41  ;;  %v9116_v21 = vrot.slane %v9115_v28, 4  ;;  %v8399_v40 = vrot.slane %v8296_v26, %v15231_v1 }
 0x4b4   :  { %v10056_v39 = vsel %vm6998_vm12, %v9051_v37, %v10055_v43  ;;  %v8425_v30 = vcombine.high %v8423_v44, %v8423_v44  ;;  %v9122_v36 = vsel %vm9030_vm1, %v8424_v62, -inf  ;;  %v9129_v54 = vsel %vm9030_vm1, %v8423_v44, -inf }
 0x4b5   :  { %v10057_v47 = vsel %vm7000_vm13, %v9058_v57, %v10056_v39  ;;  %v9123_v53 = vrot.slane %v9122_v36, 4  ;;  %v9130_v34 = vrot.slane %v9129_v54, 4  ;;  %v8406_v11 = vrot.slane %v8392_v20, %v15231_v1 }
 0x4b6   :  { %v10058_v60 = vsel %vm7002_vm14, %v9065_v18, %v10057_v47  ;;  %v9136_v14 = vsel %vm9030_vm1, %v8425_v30, -inf  ;;  %v8407_v58 = vcombine.high %v8399_v40, %v8399_v40  ;;  %v9117_v38 = vmax.f32 %v9115_v28, %v9116_v21 }
 0x4b7   :  { %v10059_v63 = vsel %vm7004_vm15, %v9072_v23, %v10058_v60  ;;  %v9137_v3 = vrot.slane %v9136_v14, 4  ;;  %v8408_v61 = vcombine.high %v8406_v11, %v8406_v11  ;;  %v9087_v35 = vsel %vm9030_vm1, %v8399_v40, -inf }
 0x4b8   :  { %v10060_v0 = vsel %vm7006_vm2, %v9079_v19, %v10059_v63  ;;  %v9094_v17 = vsel %vm9030_vm1, %v8407_v58, -inf  ;;  %v9124_v15 = vmax.f32 %v9122_v36, %v9123_v53  ;;  %v9088_v27 = vrot.slane %v9087_v35, 4 }
 0x4b9   :  { %v10061_v24 = vsel %vm7008_vm3, %v9086_v10, %v10060_v0  ;;  %v9131_v16 = vmax.f32 %v9129_v54, %v9130_v34  ;;  %v9095_v33 = vrot.slane %v9094_v17, 4  ;;  %v9101_v13 = vsel %vm9030_vm1, %v8406_v11, -inf }
 0x4ba   :  { %10183 = vst.msk [vmem:[%s14736_s4] sm:$0xff] %vm7867_vm6, %v10061_v24  ;;  %v9108_v52 = vsel %vm9030_vm1, %v8408_v61, -inf  ;;  %v9118_v51 = vrot.slane %v9117_v38, 2  ;;  %v9138_v2 = vmax.f32 %v9136_v14, %v9137_v3  ;;  %v9089_v55 = vmax.f32 %v9087_v35, %v9088_v27 }
 0x4bb   :  { %v9096_v56 = vmax.f32 %v9094_v17, %v9095_v33  ;;  %v9102_v32 = vrot.slane %v9101_v13, 4  ;;  %v9109_v9 = vrot.slane %v9108_v52, 4  ;;  %v9125_v12 = vrot.slane %v9124_v15, 2 }
 0x4bc   :  { %v9090_v49 = vrot.slane %v9089_v55, 2  ;;  %v9132_v22 = vrot.slane %v9131_v16, 2  ;;  %v9119_v59 = vmax.f32 %v9117_v38, %v9118_v51  ;;  %v9139_v6 = vrot.slane %v9138_v2, 2 }
 0x4bd   :  { %v9097_v5 = vrot.slane %v9096_v56, 2  ;;  %v9103_v25 = vmax.f32 %v9101_v13, %v9102_v32  ;;  %v9110_v46 = vmax.f32 %v9108_v52, %v9109_v9  ;;  %v9126_v41 = vmax.f32 %v9124_v15, %v9125_v12 }
 0x4be   :  { %v9091_v50 = vmax.f32 %v9089_v55, %v9090_v49  ;;  %v9133_v57 = vmax.f32 %v9131_v16, %v9132_v22  ;;  %v9120_v26 = vrot.slane %v9119_v59, 1  ;;  %v9140_v23 = vmax.f32 %v9138_v2, %v9139_v6 }
 0x4bf   :  { %v9098_v37 = vmax.f32 %v9096_v56, %v9097_v5  ;;  %v9104_v8 = vrot.slane %v9103_v25, 2  ;;  %v9111_v48 = vrot.slane %v9110_v46, 2  ;;  %v9127_v44 = vrot.slane %v9126_v41, 1 }
 0x4c0   :  { %v9092_v31 = vrot.slane %v9091_v50, 1  ;;  %v9134_v62 = vrot.slane %v9133_v57, 1  ;;  %v9141_v20 = vrot.slane %v9140_v23, 1  ;;  %v9121_v40 = vmax.f32 %v9119_v59, %v9120_v26 }
 0x4c1   :  { %v9099_v18 = vrot.slane %v9098_v37, 1  ;;  %v9105_v4 = vmax.f32 %v9103_v25, %v9104_v8  ;;  %v9112_v29 = vmax.f32 %v9110_v46, %v9111_v48  ;;  %v9128_v30 = vmax.f32 %v9126_v41, %v9127_v44 }
 0x4c2   :  { %v9093_v19 = vmax.f32 %v9091_v50, %v9092_v31  ;;  %v9135_v54 = vmax.f32 %v9133_v57, %v9134_v62  ;;  %v9142_v63 = vmax.f32 %v9140_v23, %v9141_v20 }
 0x4c3   :  { %v9100_v7 = vmax.f32 %v9098_v37, %v9099_v18  ;;  %v9106_v43 = vrot.slane %v9105_v4, 1  ;;  %v9113_v39 = vrot.slane %v9112_v29, 1 }
 0x4c5   :  { %v9107_v28 = vmax.f32 %v9105_v4, %v9106_v43  ;;  %v9114_v47 = vmax.f32 %v9112_v29, %v9113_v39  ;;  %v10062_v21 = vsel %vm6996_vm11, %v9100_v7, %v9093_v19 }
 0x4c7   :  { %v10063_v60 = vsel %vm6998_vm12, %v9107_v28, %v10062_v21 }
 0x4c8   :  { %v10064_v36 = vsel %vm7000_vm13, %v9114_v47, %v10063_v60 }
 0x4c9   :  { %v10065_v10 = vsel %vm7002_vm14, %v9121_v40, %v10064_v36 }
 0x4ca   :  { %v10066_v53 = vsel %vm7004_vm15, %v9128_v30, %v10065_v10 }
 0x4cb   :  { %v10067_v34 = vsel %vm7006_vm2, %v9135_v54, %v10066_v53 }
 0x4cc   :  { %v10068_v0 = vsel %vm7008_vm3, %v9142_v63, %v10067_v34 }
 0x4cd   :  { %10184 = vst.msk [vmem:[%s14736_s4 + $0x8] sm:$0xff] %vm7867_vm6, %v10068_v0 }
 0x4d2   :  { %v10553_v14 = vpop.f32.mrf.mxu1 }
 0x4d3   :  { %v8231_v11 = vmul.f32 %v10553_v14, %v14211_v42 }
 0x4d4   :  { %v8083_v58 = vpop.f32.mrf.mxu1 }
 0x4d5   :  { %v8267_v24 = vadd.f32 %v14213_v45, %v8231_v11  ;;  %v8230_v38 = vmul.f32 %v14211_v42, %v8083_v58 }
 0x4d7   :  { %v8299_v3 = vmax.f32 %v8267_v24, 0.0  ;;  %v8266_v61 = vadd.f32 %v14213_v45, %v8230_v38 }
 0x4d9   :  { %v8443_v35 = vcombine.high %v8299_v3, %v8299_v3  ;;  %v8450_v17 = vrot.slane %v8299_v3, %v15231_v1  ;;  %v8298_v15 = vmax.f32 %v8266_v61, 0.0 }
 0x4da   :  { %v10556_v27 = vpop.f32.mrf.mxu1 }
 0x4db   :  { %v8457_v16 = vrot.slane %v8443_v35, %v15231_v1  ;;  %v8458_v33 = vcombine.high %v8450_v17, %v8450_v17  ;;  %v9171_v13 = vsel %vm9030_vm1, %v8450_v17, -inf  ;;  %v8426_v52 = vcombine.high %v8298_v15, %v8298_v15 }
 0x4dc   :  { %v9172_v51 = vrot.slane %v9171_v13, 4  ;;  %v8433_v2 = vrot.slane %v8298_v15, %v15231_v1  ;;  %v8233_v55 = vmul.f32 %v10556_v27, %v14211_v42  ;;  %v8093_v7 = vpop.f32.mrf.mxu1 }
 0x4dd   :  { %v8459_v56 = vcombine.high %v8457_v16, %v8457_v16  ;;  %v9178_v32 = vsel %vm9030_vm1, %v8458_v33, -inf  ;;  %v9185_v9 = vsel %vm9030_vm1, %v8457_v16, -inf  ;;  %v8440_v12 = vrot.slane %v8426_v52, %v15231_v1 }
 0x4de   :  { %v9173_v49 = vmax.f32 %v9171_v13, %v9172_v51  ;;  %v9179_v22 = vrot.slane %v9178_v32, 4  ;;  %v9186_v5 = vrot.slane %v9185_v9, 4  ;;  %v8441_v25 = vcombine.high %v8433_v2, %v8433_v2 }
 0x4df   :  { %v9192_v46 = vsel %vm9030_vm1, %v8459_v56, -inf  ;;  %v8442_v59 = vcombine.high %v8440_v12, %v8440_v12  ;;  %v9143_v6 = vsel %vm9030_vm1, %v8433_v2, -inf  ;;  %v9157_v50 = vsel %vm9030_vm1, %v8440_v12, -inf }
 0x4e0   :  { %v9174_v37 = vrot.slane %v9173_v49, 2  ;;  %v9180_v8 = vmax.f32 %v9178_v32, %v9179_v22  ;;  %v9187_v48 = vmax.f32 %v9185_v9, %v9186_v5  ;;  %v9193_v41 = vrot.slane %v9192_v46, 4 }
 0x4e1   :  { %v9144_v31 = vrot.slane %v9143_v6, 4  ;;  %v9150_v57 = vsel %vm9030_vm1, %v8441_v25, -inf  ;;  %v9158_v18 = vrot.slane %v9157_v50, 4  ;;  %v9164_v4 = vsel %vm9030_vm1, %v8442_v59, -inf }
 0x4e2   :  { %v9175_v29 = vmax.f32 %v9173_v49, %v9174_v37  ;;  %v9181_v26 = vrot.slane %v9180_v8, 2  ;;  %v9188_v23 = vrot.slane %v9187_v48, 2  ;;  %v9194_v19 = vmax.f32 %v9192_v46, %v9193_v41 }
 0x4e3   :  { %v9145_v43 = vmax.f32 %v9143_v6, %v9144_v31  ;;  %v9151_v39 = vrot.slane %v9150_v57, 4  ;;  %v9159_v44 = vmax.f32 %v9157_v50, %v9158_v18  ;;  %v9165_v62 = vrot.slane %v9164_v4, 4 }
 0x4e4   :  { %v9176_v28 = vrot.slane %v9175_v29, 1  ;;  %v9182_v47 = vmax.f32 %v9180_v8, %v9181_v26  ;;  %v9189_v21 = vmax.f32 %v9187_v48, %v9188_v23  ;;  %v9195_v20 = vrot.slane %v9194_v19, 2 }
 0x4e5   :  { %v10559_v40 = vpop.f32.mrf.mxu1  ;;  %v9146_v60 = vrot.slane %v9145_v43, 2  ;;  %v9152_v30 = vmax.f32 %v9150_v57, %v9151_v39  ;;  %v9160_v36 = vrot.slane %v9159_v44, 2  ;;  %v9166_v54 = vmax.f32 %v9164_v4, %v9165_v62 }
 0x4e6   :  { %v9177_v10 = vmax.f32 %v9175_v29, %v9176_v28  ;;  %v9183_v63 = vrot.slane %v9182_v47, 1  ;;  %v9190_v53 = vrot.slane %v9189_v21, 1  ;;  %v9196_v34 = vmax.f32 %v9194_v19, %v9195_v20 }
 0x4e7   :  { %v9147_v0 = vmax.f32 %v9145_v43, %v9146_v60  ;;  %v9153_v14 = vrot.slane %v9152_v30, 2  ;;  %v9161_v11 = vmax.f32 %v9159_v44, %v9160_v36  ;;  %v9167_v58 = vrot.slane %v9166_v54, 2  ;;  %v8103_v35 = vpop.f32.mrf.mxu1 }
 0x4e8   :  { %v9184_v24 = vmax.f32 %v9182_v47, %v9183_v63  ;;  %v9191_v38 = vmax.f32 %v9189_v21, %v9190_v53  ;;  %v9197_v3 = vrot.slane %v9196_v34, 1  ;;  %v8269_v61 = vadd.f32 %v14213_v45, %v8233_v55 }
 0x4e9   :  { %v9148_v17 = vrot.slane %v9147_v0, 1  ;;  %v9154_v15 = vmax.f32 %v9152_v30, %v9153_v14  ;;  %v9162_v27 = vrot.slane %v9161_v11, 1  ;;  %v9168_v16 = vmax.f32 %v9166_v54, %v9167_v58 }
 0x4ea   :  { %v9198_v33 = vmax.f32 %v9196_v34, %v9197_v3  ;;  %v8301_v13 = vmax.f32 %v8269_v61, 0.0  ;;  %v8232_v52 = vmul.f32 %v14211_v42, %v8093_v7  ;;  %v8235_v51 = vmul.f32 %v10559_v40, %v14211_v42 }
 0x4eb   :  { %v9149_v56 = vmax.f32 %v9147_v0, %v9148_v17  ;;  %v9155_v32 = vrot.slane %v9154_v15, 1  ;;  %v9163_v9 = vmax.f32 %v9161_v11, %v9162_v27  ;;  %v9169_v12 = vrot.slane %v9168_v16, 1 }
 0x4ec   :  { %v8477_v49 = vcombine.high %v8301_v13, %v8301_v13  ;;  %v8484_v22 = vrot.slane %v8301_v13, %v15231_v1  ;;  %v8268_v55 = vadd.f32 %v14213_v45, %v8232_v52  ;;  %v8271_v5 = vadd.f32 %v14213_v45, %v8235_v51 }
 0x4ed   :  { %v10562_v2 = vpop.f32.mrf.mxu1  ;;  %v9156_v25 = vmax.f32 %v9154_v15, %v9155_v32  ;;  %v9170_v46 = vmax.f32 %v9168_v16, %v9169_v12  ;;  %v8234_v59 = vmul.f32 %v14211_v42, %v8103_v35 }
 0x4ee   :  { %v14294_v6 = vmul.f32 %v10562_v2, %v14211_v42  ;;  %v8491_v50 = vrot.slane %v8477_v49, %v15231_v1  ;;  %v8492_v37 = vcombine.high %v8484_v22, %v8484_v22  ;;  %v9227_v8 = vsel %vm9030_vm1, %v8484_v22, -inf }
 0x4ef   :  { %v8300_v48 = vmax.f32 %v8268_v55, 0.0  ;;  %v10069_v41 = vsel %vm6996_vm11, %v9156_v25, %v9149_v56  ;;  %v9228_v31 = vrot.slane %v9227_v8, 4  ;;  %v8303_v57 = vmax.f32 %v8271_v5, 0.0 }
 0x4f0   :  { %v8270_v18 = vadd.f32 %v14213_v45, %v8234_v59  ;;  %v10070_v4 = vsel %vm6998_vm12, %v9163_v9, %v10069_v41  ;;  %v8493_v29 = vcombine.high %v8491_v50, %v8491_v50  ;;  %v9234_v26 = vsel %vm9030_vm1, %v8492_v37, -inf }
 0x4f1   :  { %v9241_v23 = vsel %vm9030_vm1, %v8491_v50, -inf  ;;  %v10071_v19 = vsel %vm7000_vm13, %v9170_v46, %v10070_v4  ;;  %v9229_v7 = vmax.f32 %v9227_v8, %v9228_v31  ;;  %v9235_v43 = vrot.slane %v9234_v26, 4 }
 0x4f2   :  { %v9242_v39 = vrot.slane %v9241_v23, 4  ;;  %v10072_v44 = vsel %vm7002_vm14, %v9177_v10, %v10071_v19  ;;  %v9248_v62 = vsel %vm9030_vm1, %v8493_v29, -inf  ;;  %v8460_v28 = vcombine.high %v8300_v48, %v8300_v48 }
 0x4f3   :  { %v8467_v47 = vrot.slane %v8300_v48, %v15231_v1  ;;  %v10073_v21 = vsel %vm7004_vm15, %v9184_v24, %v10072_v44  ;;  %v9230_v20 = vrot.slane %v9229_v7, 2  ;;  %v9236_v40 = vmax.f32 %v9234_v26, %v9235_v43 }
 0x4f4   :  { %v9243_v60 = vmax.f32 %v9241_v23, %v9242_v39  ;;  %v10074_v30 = vsel %vm7006_vm2, %v9191_v38, %v10073_v21  ;;  %v9249_v36 = vrot.slane %v9248_v62, 4  ;;  %v8474_v54 = vrot.slane %v8460_v28, %v15231_v1 }
 0x4f5   :  { %v8475_v63 = vcombine.high %v8467_v47, %v8467_v47  ;;  %v10075_v53 = vsel %vm7008_vm3, %v9198_v33, %v10074_v30  ;;  %v9231_v34 = vmax.f32 %v9229_v7, %v9230_v20  ;;  %v9237_v10 = vrot.slane %v9236_v40, 2 }
 0x4f6   :  { %v9244_v0 = vrot.slane %v9243_v60, 2  ;;  %10185 = vst.msk [vmem:[%s14736_s4 + $0x10] sm:$0xff] %vm7867_vm6, %v10075_v53  ;;  %v9250_v14 = vmax.f32 %v9248_v62, %v9249_v36  ;;  %v8476_v11 = vcombine.high %v8474_v54, %v8474_v54  ;;  %v9199_v58 = vsel %vm9030_vm1, %v8467_v47, -inf }
 0x4f7   :  { %v9206_v24 = vsel %vm9030_vm1, %v8475_v63, -inf  ;;  %v9232_v38 = vrot.slane %v9231_v34, 1  ;;  %v9238_v3 = vmax.f32 %v9236_v40, %v9237_v10  ;;  %v9200_v35 = vrot.slane %v9199_v58, 4 }
 0x4f8   :  { %v9245_v61 = vmax.f32 %v9243_v60, %v9244_v0  ;;  %v9251_v17 = vrot.slane %v9250_v14, 2  ;;  %v9207_v15 = vrot.slane %v9206_v24, 4  ;;  %v9213_v27 = vsel %vm9030_vm1, %v8474_v54, -inf }
 0x4f9   :  { %v9220_v16 = vsel %vm9030_vm1, %v8476_v11, -inf  ;;  %v9233_v33 = vmax.f32 %v9231_v34, %v9232_v38  ;;  %v9239_v13 = vrot.slane %v9238_v3, 1  ;;  %v9201_v51 = vmax.f32 %v9199_v58, %v9200_v35 }
 0x4fa   :  { %v9246_v52 = vrot.slane %v9245_v61, 1  ;;  %v9252_v2 = vmax.f32 %v9250_v14, %v9251_v17  ;;  %v9208_v56 = vmax.f32 %v9206_v24, %v9207_v15  ;;  %v9214_v32 = vrot.slane %v9213_v27, 4  ;;  %v8113_v17 = vpop.f32.mrf.mxu1 }
 0x4fb   :  { %v9221_v9 = vrot.slane %v9220_v16, 4  ;;  %v9240_v12 = vmax.f32 %v9238_v3, %v9239_v13  ;;  %v9202_v22 = vrot.slane %v9201_v51, 2  ;;  %v8511_v55 = vcombine.high %v8303_v57, %v8303_v57 }
 0x4fc   :  { %v9247_v49 = vmax.f32 %v9245_v61, %v9246_v52  ;;  %v9253_v5 = vrot.slane %v9252_v2, 1  ;;  %v9209_v25 = vrot.slane %v9208_v56, 2  ;;  %v9215_v46 = vmax.f32 %v9213_v27, %v9214_v32  ;;  %v10565_v32 = vpop.f32.mrf.mxu1 }
 0x4fd   :  { %v9222_v59 = vmax.f32 %v9220_v16, %v9221_v9  ;;  %v9203_v50 = vmax.f32 %v9201_v51, %v9202_v22  ;;  %v8518_v37 = vrot.slane %v8303_v57, %v15231_v1  ;;  %v8525_v8 = vrot.slane %v8511_v55, %v15231_v1 }
 0x4fe   :  { %v8302_v48 = vmax.f32 %v8270_v18, 0.0  ;;  %v9254_v41 = vmax.f32 %v9252_v2, %v9253_v5  ;;  %v9210_v31 = vmax.f32 %v9208_v56, %v9209_v25  ;;  %v9216_v4 = vrot.slane %v9215_v46, 2 }
 0x4ff   :  { %v9223_v29 = vrot.slane %v9222_v59, 2  ;;  %v9204_v26 = vrot.slane %v9203_v50, 1  ;;  %v8526_v23 = vcombine.high %v8518_v37, %v8518_v37  ;;  %v8527_v19 = vcombine.high %v8525_v8, %v8525_v8 }
 0x500   :  { %v9283_v7 = vsel %vm9030_vm1, %v8518_v37, -inf  ;;  %v9211_v43 = vrot.slane %v9210_v31, 1  ;;  %v9217_v39 = vmax.f32 %v9215_v46, %v9216_v4  ;;  %v9297_v57 = vsel %vm9030_vm1, %v8525_v8, -inf  ;;  %v8123_v4 = vpop.f32.mrf.mxu1 }
 0x501   :  { %v9224_v44 = vmax.f32 %v9222_v59, %v9223_v29  ;;  %v9284_v62 = vrot.slane %v9283_v7, 4  ;;  %v9205_v28 = vmax.f32 %v9203_v50, %v9204_v26  ;;  %v9290_v47 = vsel %vm9030_vm1, %v8526_v23, -inf }
 0x502   :  { %v9304_v18 = vsel %vm9030_vm1, %v8527_v19, -inf  ;;  %v9212_v21 = vmax.f32 %v9210_v31, %v9211_v43  ;;  %v9218_v20 = vrot.slane %v9217_v39, 1  ;;  %v9291_v30 = vrot.slane %v9290_v47, 4 }
 0x503   :  { %v9225_v40 = vrot.slane %v9224_v44, 1  ;;  %v9285_v60 = vmax.f32 %v9283_v7, %v9284_v62  ;;  %v9298_v36 = vrot.slane %v9297_v57, 4  ;;  %v9305_v54 = vrot.slane %v9304_v18, 4 }
 0x504   :  { %v8494_v63 = vcombine.high %v8302_v48, %v8302_v48  ;;  %v9219_v53 = vmax.f32 %v9217_v39, %v9218_v20  ;;  %v10076_v10 = vsel %vm6996_vm11, %v9212_v21, %v9205_v28  ;;  %v9292_v14 = vmax.f32 %v9290_v47, %v9291_v30 }
 0x505   :  { %v9226_v34 = vmax.f32 %v9224_v44, %v9225_v40  ;;  %v9286_v0 = vrot.slane %v9285_v60, 2  ;;  %v9299_v11 = vmax.f32 %v9297_v57, %v9298_v36  ;;  %v9306_v58 = vmax.f32 %v9304_v18, %v9305_v54 }
 0x506   :  { %v8501_v24 = vrot.slane %v8302_v48, %v15231_v1  ;;  %v10077_v38 = vsel %vm6998_vm12, %v9219_v53, %v10076_v10  ;;  %v8508_v61 = vrot.slane %v8494_v63, %v15231_v1  ;;  %v8273_v35 = vadd.f32 %v14213_v45, %v14294_v6 }
 0x507   :  { %v9287_v3 = vmax.f32 %v9285_v60, %v9286_v0  ;;  %v10078_v15 = vsel %vm7000_vm13, %v9226_v34, %v10077_v38  ;;  %v9293_v27 = vrot.slane %v9292_v14, 2  ;;  %v9300_v16 = vrot.slane %v9299_v11, 2 }
 0x508   :  { %v9307_v13 = vrot.slane %v9306_v58, 2  ;;  %v10079_v52 = vsel %vm7002_vm14, %v9233_v33, %v10078_v15  ;;  %v8509_v2 = vcombine.high %v8501_v24, %v8501_v24  ;;  %v8510_v56 = vcombine.high %v8508_v61, %v8508_v61 }
 0x509   :  { %v9288_v51 = vrot.slane %v9287_v3, 1  ;;  %v10080_v9 = vsel %vm7004_vm15, %v9240_v12, %v10079_v52  ;;  %v9294_v22 = vmax.f32 %v9292_v14, %v9293_v27  ;;  %v9301_v55 = vmax.f32 %v9299_v11, %v9300_v16 }
 0x50a   :  { %v9308_v5 = vmax.f32 %v9306_v58, %v9307_v13  ;;  %v10081_v25 = vsel %vm7006_vm2, %v9247_v49, %v10080_v9  ;;  %v9255_v46 = vsel %vm9030_vm1, %v8501_v24, -inf  ;;  %v9262_v59 = vsel %vm9030_vm1, %v8509_v2, -inf }
 0x50b   :  { %v14335_v6 = vmax.f32 %v9287_v3, %v9288_v51  ;;  %v10082_v50 = vsel %vm7008_vm3, %v9254_v41, %v10081_v25  ;;  %v9295_v33 = vrot.slane %v9294_v22, 1  ;;  %v9302_v37 = vrot.slane %v9301_v55, 1 }
 0x50c   :  { %v9309_v8 = vrot.slane %v9308_v5, 1  ;;  %10186 = vst.msk [vmem:[%s14736_s4 + $0x18] sm:$0xff] %vm7867_vm6, %v10082_v50  ;;  %v9256_v12 = vrot.slane %v9255_v46, 4  ;;  %v9263_v48 = vrot.slane %v9262_v59, 4  ;;  %v9269_v49 = vsel %vm9030_vm1, %v8508_v61, -inf }
 0x50d   :  { %v9276_v31 = vsel %vm9030_vm1, %v8510_v56, -inf  ;;  %v9296_v29 = vmax.f32 %v9294_v22, %v9295_v33  ;;  %v14346_v26 = vmax.f32 %v9301_v55, %v9302_v37  ;;  %v9270_v41 = vrot.slane %v9269_v49, 4 }
 0x50e   :  { %v14348_v23 = vmax.f32 %v9308_v5, %v9309_v8  ;;  %v9257_v19 = vmax.f32 %v9255_v46, %v9256_v12  ;;  %v9264_v7 = vmax.f32 %v9262_v59, %v9263_v48  ;;  %v9277_v43 = vrot.slane %v9276_v31, 4 }
 0x50f   :  { %v8305_v39 = vmax.f32 %v8273_v35, 0.0  ;;  %v9271_v44 = vmax.f32 %v9269_v49, %v9270_v41  ;;  %v8236_v62 = vmul.f32 %v14211_v42, %v8113_v17  ;;  %v8239_v28 = vmul.f32 %v10565_v32, %v14211_v42 }
 0x510   :  { %v14353_v47 = vmul.f32 %v14211_v42, %v8123_v4  ;;  %v9258_v57 = vrot.slane %v9257_v19, 2  ;;  %v9265_v18 = vrot.slane %v9264_v7, 2  ;;  %v9278_v21 = vmax.f32 %v9276_v31, %v9277_v43 }
 0x511   :  { %v8545_v20 = vcombine.high %v8305_v39, %v8305_v39  ;;  %v9272_v40 = vrot.slane %v9271_v44, 2  ;;  %v8552_v60 = vrot.slane %v8305_v39, %v15231_v1  ;;  %v8272_v30 = vadd.f32 %v14213_v45, %v8236_v62 }
 0x512   :  { %v14358_v36 = vadd.f32 %v14213_v45, %v8239_v28  ;;  %v9259_v54 = vmax.f32 %v9257_v19, %v9258_v57  ;;  %v9266_v63 = vmax.f32 %v9264_v7, %v9265_v18  ;;  %v9279_v53 = vrot.slane %v9278_v21, 2 }
 0x513   :  { %v8559_v34 = vrot.slane %v8545_v20, %v15231_v1  ;;  %v9273_v10 = vmax.f32 %v9271_v44, %v9272_v40  ;;  %v8560_v0 = vcombine.high %v8552_v60, %v8552_v60  ;;  %v9339_v14 = vsel %vm9030_vm1, %v8552_v60, -inf }
 0x514   :  { %v8304_v11 = vmax.f32 %v8272_v30, 0.0  ;;  %v9260_v58 = vrot.slane %v9259_v54, 1  ;;  %v9267_v24 = vrot.slane %v9266_v63, 1  ;;  %v9280_v38 = vmax.f32 %v9278_v21, %v9279_v53 }
 0x515   :  { %v8561_v3 = vcombine.high %v8559_v34, %v8559_v34  ;;  %v9274_v61 = vrot.slane %v9273_v10, 1  ;;  %v9340_v35 = vrot.slane %v9339_v14, 4  ;;  %v9346_v17 = vsel %vm9030_vm1, %v8560_v0, -inf }
 0x516   :  { %v9353_v15 = vsel %vm9030_vm1, %v8559_v34, -inf  ;;  %v9261_v27 = vmax.f32 %v9259_v54, %v9260_v58  ;;  %v9268_v16 = vmax.f32 %v9266_v63, %v9267_v24  ;;  %v9281_v13 = vrot.slane %v9280_v38, 1  ;;  %v10568_v63 = vpop.f32.mrf.mxu1 }
 0x517   :  { %v9347_v52 = vrot.slane %v9346_v17, 4  ;;  %v9275_v51 = vmax.f32 %v9273_v10, %v9274_v61  ;;  %v9341_v2 = vmax.f32 %v9339_v14, %v9340_v35  ;;  %v9354_v56 = vrot.slane %v9353_v15, 4 }
 0x518   :  { %v9360_v32 = vsel %vm9030_vm1, %v8561_v3, -inf  ;;  %v9282_v9 = vmax.f32 %v9280_v38, %v9281_v13  ;;  %v10083_v22 = vsel %vm6996_vm11, %v9268_v16, %v9261_v27  ;;  %v8528_v50 = vcombine.high %v8304_v11, %v8304_v11 }
 0x519   :  { %v9348_v55 = vmax.f32 %v9346_v17, %v9347_v52  ;;  %v9361_v5 = vrot.slane %v9360_v32, 4  ;;  %v10084_v25 = vsel %vm6998_vm12, %v9275_v51, %v10083_v22  ;;  %v9342_v46 = vrot.slane %v9341_v2, 2 }
 0x51a   :  { %v9355_v59 = vmax.f32 %v9353_v15, %v9354_v56  ;;  %v10085_v33 = vsel %vm7000_vm13, %v9282_v9, %v10084_v25  ;;  %v8535_v12 = vrot.slane %v8304_v11, %v15231_v1  ;;  %v8542_v4 = vrot.slane %v8528_v50, %v15231_v1 }
 0x51b   :  { %v9349_v37 = vrot.slane %v9348_v55, 2  ;;  %v9362_v8 = vmax.f32 %v9360_v32, %v9361_v5  ;;  %v10086_v48 = vsel %vm7002_vm14, %v14335_v6, %v10085_v33  ;;  %v9343_v49 = vmax.f32 %v9341_v2, %v9342_v46 }
 0x51c   :  { %v9356_v31 = vrot.slane %v9355_v59, 2  ;;  %v10087_v41 = vsel %vm7004_vm15, %v9296_v29, %v10086_v48  ;;  %v8543_v43 = vcombine.high %v8535_v12, %v8535_v12  ;;  %v8544_v28 = vcombine.high %v8542_v4, %v8542_v4 }
 0x51d   :  { %v9350_v19 = vmax.f32 %v9348_v55, %v9349_v37  ;;  %v9363_v7 = vrot.slane %v9362_v8, 2  ;;  %v10088_v39 = vsel %vm7006_vm2, %v14346_v26, %v10087_v41  ;;  %v9344_v44 = vrot.slane %v9343_v49, 1 }
 0x51e   :  { %v9357_v62 = vmax.f32 %v9355_v59, %v9356_v31  ;;  %v10089_v57 = vsel %vm7008_vm3, %v14348_v23, %v10088_v39  ;;  %v9311_v21 = vsel %vm9030_vm1, %v8535_v12, -inf  ;;  %v9318_v26 = vsel %vm9030_vm1, %v8543_v43, -inf }
 0x51f   :  { %v9351_v18 = vrot.slane %v9350_v19, 1  ;;  %v9364_v6 = vmax.f32 %v9362_v8, %v9363_v7  ;;  %10187 = vst.msk [vmem:[%s14736_s4 + $0x20] sm:$0xff] %vm7867_vm6, %v10089_v57  ;;  %v14382_v29 = vmax.f32 %v9343_v49, %v9344_v44  ;;  %v9312_v40 = vrot.slane %v9311_v21, 4 }
 0x520   :  { %v9358_v20 = vrot.slane %v9357_v62, 1  ;;  %v9319_v54 = vrot.slane %v9318_v26, 4  ;;  %v9325_v23 = vsel %vm9030_vm1, %v8542_v4, -inf  ;;  %v9332_v0 = vsel %vm9030_vm1, %v8544_v28, -inf }
 0x521   :  { %v14385_v60 = vmax.f32 %v9350_v19, %v9351_v18  ;;  %v9365_v30 = vrot.slane %v9364_v6, 1  ;;  %v9313_v34 = vmax.f32 %v9311_v21, %v9312_v40  ;;  %v9326_v10 = vrot.slane %v9325_v23, 4 }
 0x522   :  { %v14388_v53 = vmax.f32 %v9357_v62, %v9358_v20  ;;  %v9320_v11 = vmax.f32 %v9318_v26, %v9319_v54  ;;  %v9333_v58 = vrot.slane %v9332_v0, 4  ;;  %v8307_v24 = vmax.f32 %v14358_v36, 0.0 }
 0x523   :  { %v14391_v14 = vmax.f32 %v9364_v6, %v9365_v30  ;;  %v9314_v38 = vrot.slane %v9313_v34, 2  ;;  %v9327_v3 = vmax.f32 %v9325_v23, %v9326_v10  ;;  %v8274_v61 = vadd.f32 %v14213_v45, %v14353_v47 }
 0x524   :  { %v8241_v35 = vmul.f32 %v10568_v63, %v14211_v42  ;;  %v9321_v17 = vrot.slane %v9320_v11, 2  ;;  %v9334_v15 = vmax.f32 %v9332_v0, %v9333_v58  ;;  %v8579_v27 = vcombine.high %v8307_v24, %v8307_v24 }
 0x525   :  { %v8586_v16 = vrot.slane %v8307_v24, %v15231_v1  ;;  %v9315_v13 = vmax.f32 %v9313_v34, %v9314_v38  ;;  %v9328_v52 = vrot.slane %v9327_v3, 2  ;;  %v8306_v51 = vmax.f32 %v8274_v61, 0.0 }
 0x526   :  { %v8277_v2 = vadd.f32 %v14213_v45, %v8241_v35  ;;  %v9322_v56 = vmax.f32 %v9320_v11, %v9321_v17  ;;  %v9335_v32 = vrot.slane %v9334_v15, 2  ;;  %v8593_v36 = vrot.slane %v8579_v27, %v15231_v1 }
 0x527   :  { %v8594_v9 = vcombine.high %v8586_v16, %v8586_v16  ;;  %v9316_v22 = vrot.slane %v9315_v13, 1  ;;  %v9329_v55 = vmax.f32 %v9327_v3, %v9328_v52  ;;  %v9395_v47 = vsel %vm9030_vm1, %v8586_v16, -inf }
 0x528   :  { %v8562_v5 = vcombine.high %v8306_v51, %v8306_v51  ;;  %v9323_v25 = vrot.slane %v9322_v56, 1  ;;  %v9336_v46 = vmax.f32 %v9334_v15, %v9335_v32  ;;  %v8595_v59 = vcombine.high %v8593_v36, %v8593_v36 }
 0x529   :  { %v9396_v50 = vrot.slane %v9395_v47, 4  ;;  %v9317_v33 = vmax.f32 %v9315_v13, %v9316_v22  ;;  %v9330_v37 = vrot.slane %v9329_v55, 1  ;;  %v9402_v8 = vsel %vm9030_vm1, %v8594_v9, -inf }
 0x52a   :  { %v9409_v12 = vsel %vm9030_vm1, %v8593_v36, -inf  ;;  %v9324_v48 = vmax.f32 %v9322_v56, %v9323_v25  ;;  %v9337_v49 = vrot.slane %v9336_v46, 1  ;;  %v9403_v4 = vrot.slane %v9402_v8, 4 }
 0x52b   :  { %v9397_v31 = vmax.f32 %v9395_v47, %v9396_v50  ;;  %v9331_v41 = vmax.f32 %v9329_v55, %v9330_v37  ;;  %v9410_v19 = vrot.slane %v9409_v12, 4  ;;  %v9416_v7 = vsel %vm9030_vm1, %v8595_v59, -inf }
 0x52c   :  { %v8569_v43 = vrot.slane %v8306_v51, %v15231_v1  ;;  %v9338_v39 = vmax.f32 %v9336_v46, %v9337_v49  ;;  %v10090_v44 = vsel %vm6996_vm11, %v9324_v48, %v9317_v33  ;;  %v9404_v28 = vmax.f32 %v9402_v8, %v9403_v4 }
 0x52d   :  { %v9398_v62 = vrot.slane %v9397_v31, 2  ;;  %v10091_v57 = vsel %vm6998_vm12, %v9331_v41, %v10090_v44  ;;  %v9411_v18 = vmax.f32 %v9409_v12, %v9410_v19  ;;  %v9417_v6 = vrot.slane %v9416_v7, 4 }
 0x52e   :  { %v8576_v21 = vrot.slane %v8562_v5, %v15231_v1  ;;  %v10092_v20 = vsel %vm7000_vm13, %v9338_v39, %v10091_v57  ;;  %v9405_v26 = vrot.slane %v9404_v28, 2  ;;  %v8577_v30 = vcombine.high %v8569_v43, %v8569_v43 }
 0x52f   :  { %v9399_v40 = vmax.f32 %v9397_v31, %v9398_v62  ;;  %v10093_v54 = vsel %vm7002_vm14, %v14382_v29, %v10092_v20  ;;  %v9412_v23 = vrot.slane %v9411_v18, 2  ;;  %v9418_v63 = vmax.f32 %v9416_v7, %v9417_v6 }
 0x530   :  { %v8578_v34 = vcombine.high %v8576_v21, %v8576_v21  ;;  %v10094_v10 = vsel %vm7004_vm15, %v14385_v60, %v10093_v54  ;;  %v9406_v11 = vmax.f32 %v9404_v28, %v9405_v26  ;;  %v9367_v58 = vsel %vm9030_vm1, %v8569_v43, -inf }
 0x531   :  { %v9400_v0 = vrot.slane %v9399_v40, 1  ;;  %v10095_v24 = vsel %vm7006_vm2, %v14388_v53, %v10094_v10  ;;  %v9413_v38 = vmax.f32 %v9411_v18, %v9412_v23  ;;  %v9419_v3 = vrot.slane %v9418_v63, 2 }
 0x532   :  { %v9368_v61 = vrot.slane %v9367_v58, 4  ;;  %v10096_v35 = vsel %vm7008_vm3, %v14391_v14, %v10095_v24  ;;  %v9407_v29 = vrot.slane %v9406_v11, 1  ;;  %v9374_v17 = vsel %vm9030_vm1, %v8577_v30, -inf  ;;  %v8133_v14 = vpop.f32.mrf.mxu1 }
 0x533   :  { %10188 = vst.msk [vmem:[%s14736_s4 + $0x28] sm:$0xff] %vm7867_vm6, %v10096_v35  ;;  %v9414_v60 = vrot.slane %v9413_v38, 1  ;;  %v9420_v15 = vmax.f32 %v9418_v63, %v9419_v3  ;;  %v9375_v16 = vrot.slane %v9374_v17, 4  ;;  %v14423_v13 = vmax.f32 %v9399_v40, %v9400_v0 }
 0x534   :  { %v9369_v27 = vmax.f32 %v9367_v58, %v9368_v61  ;;  %v9381_v53 = vsel %vm9030_vm1, %v8576_v21, -inf  ;;  %v9388_v52 = vsel %vm9030_vm1, %v8578_v34, -inf  ;;  %v8309_v51 = vmax.f32 %v8277_v2, 0.0  ;;  %v10571_v58 = vpop.f32.mrf.mxu1 }
 0x535   :  { %v14427_v56 = vmax.f32 %v9406_v11, %v9407_v29  ;;  %v14429_v32 = vmax.f32 %v9413_v38, %v9414_v60  ;;  %v9376_v9 = vmax.f32 %v9374_v17, %v9375_v16  ;;  %v9382_v22 = vrot.slane %v9381_v53, 4 }
 0x536   :  { %v9370_v36 = vrot.slane %v9369_v27, 2  ;;  %v9389_v55 = vrot.slane %v9388_v52, 4  ;;  %v8613_v47 = vcombine.high %v8309_v51, %v8309_v51  ;;  %v8620_v5 = vrot.slane %v8309_v51, %v15231_v1 }
 0x537   :  { %v9421_v25 = vrot.slane %v9420_v15, 1  ;;  %v9377_v59 = vrot.slane %v9376_v9, 2  ;;  %v8240_v50 = vmul.f32 %v14211_v42, %v8133_v14  ;;  %v9383_v33 = vmax.f32 %v9381_v53, %v9382_v22  ;;  %v8143_v22 = vpop.f32.mrf.mxu1 }
 0x538   :  { %v9371_v46 = vmax.f32 %v9369_v27, %v9370_v36  ;;  %v9390_v37 = vmax.f32 %v9388_v52, %v9389_v55  ;;  %v8627_v2 = vrot.slane %v8613_v47, %v15231_v1  ;;  %v8628_v8 = vcombine.high %v8620_v5, %v8620_v5 }
 0x539   :  { %v9378_v48 = vmax.f32 %v9376_v9, %v9377_v59  ;;  %v9451_v49 = vsel %vm9030_vm1, %v8620_v5, -inf  ;;  %v8276_v31 = vadd.f32 %v14213_v45, %v8240_v50  ;;  %v9384_v4 = vrot.slane %v9383_v33, 2 }
 0x53a   :  { %v9372_v12 = vrot.slane %v9371_v46, 1  ;;  %v9391_v41 = vrot.slane %v9390_v37, 2  ;;  %v8629_v19 = vcombine.high %v8627_v2, %v8627_v2  ;;  %v9452_v7 = vrot.slane %v9451_v49, 4 }
 0x53b   :  { %v9379_v39 = vrot.slane %v9378_v48, 1  ;;  %v9458_v44 = vsel %vm9030_vm1, %v8628_v8, -inf  ;;  %v9465_v62 = vsel %vm9030_vm1, %v8627_v2, -inf  ;;  %v9385_v28 = vmax.f32 %v9383_v33, %v9384_v4  ;;  %v10574_v33 = vpop.f32.mrf.mxu1 }
 0x53c   :  { %v9373_v43 = vmax.f32 %v9371_v46, %v9372_v12  ;;  %v9392_v57 = vmax.f32 %v9390_v37, %v9391_v41  ;;  %v9453_v18 = vmax.f32 %v9451_v49, %v9452_v7  ;;  %v9459_v6 = vrot.slane %v9458_v44, 4 }
 0x53d   :  { %v9380_v21 = vmax.f32 %v9378_v48, %v9379_v39  ;;  %v9466_v20 = vrot.slane %v9465_v62, 4  ;;  %v9472_v40 = vsel %vm9030_vm1, %v8629_v19, -inf  ;;  %v8308_v26 = vmax.f32 %v8276_v31, 0.0 }
 0x53e   :  { %v9386_v30 = vrot.slane %v9385_v28, 1  ;;  %v9393_v54 = vrot.slane %v9392_v57, 1  ;;  %v9454_v23 = vrot.slane %v9453_v18, 2  ;;  %v9460_v63 = vmax.f32 %v9458_v44, %v9459_v6  ;;  %v8153_v44 = vpop.f32.mrf.mxu1 }
 0x53f   :  { %v10097_v34 = vsel %vm6996_vm11, %v9380_v21, %v9373_v43  ;;  %v9467_v10 = vmax.f32 %v9465_v62, %v9466_v20  ;;  %v9473_v0 = vrot.slane %v9472_v40, 4  ;;  %v8596_v11 = vcombine.high %v8308_v26, %v8308_v26 }
 0x540   :  { %v9387_v24 = vmax.f32 %v9385_v28, %v9386_v30  ;;  %v9394_v38 = vmax.f32 %v9392_v57, %v9393_v54  ;;  %v9455_v3 = vmax.f32 %v9453_v18, %v9454_v23  ;;  %v9461_v61 = vrot.slane %v9460_v63, 2 }
 0x541   :  { %v9468_v35 = vrot.slane %v9467_v10, 2  ;;  %v9474_v29 = vmax.f32 %v9472_v40, %v9473_v0  ;;  %v8603_v17 = vrot.slane %v8308_v26, %v15231_v1  ;;  %v8610_v60 = vrot.slane %v8596_v11, %v15231_v1 }
 0x542   :  { %v9422_v27 = vmax.f32 %v9420_v15, %v9421_v25  ;;  %v10098_v16 = vsel %vm6998_vm12, %v9387_v24, %v10097_v34  ;;  %v9456_v53 = vrot.slane %v9455_v3, 1  ;;  %v9462_v52 = vmax.f32 %v9460_v63, %v9461_v61 }
 0x543   :  { %v10099_v51 = vsel %vm7000_vm13, %v9394_v38, %v10098_v16  ;;  %v9469_v14 = vmax.f32 %v9467_v10, %v9468_v35  ;;  %v9475_v36 = vrot.slane %v9474_v29, 2  ;;  %v8611_v9 = vcombine.high %v8603_v17, %v8603_v17 }
 0x544   :  { %v10100_v55 = vsel %vm7002_vm14, %v14423_v13, %v10099_v51  ;;  %v9463_v47 = vrot.slane %v9462_v52, 1  ;;  %v8612_v5 = vcombine.high %v8610_v60, %v8610_v60  ;;  %v8243_v46 = vmul.f32 %v10571_v58, %v14211_v42 }
 0x545   :  { %v10101_v15 = vsel %vm7004_vm15, %v14427_v56, %v10100_v55  ;;  %v9470_v25 = vrot.slane %v9469_v14, 1  ;;  %v9476_v59 = vmax.f32 %v9474_v29, %v9475_v36  ;;  %v9423_v50 = vsel %vm9030_vm1, %v8603_v17, -inf }
 0x546   :  { %v10102_v37 = vsel %vm7006_vm2, %v14429_v32, %v10101_v15  ;;  %v14452_v2 = vmax.f32 %v9455_v3, %v9456_v53  ;;  %v9424_v8 = vrot.slane %v9423_v50, 4  ;;  %v9430_v13 = vsel %vm9030_vm1, %v8611_v9, -inf }
 0x547   :  { %v10103_v12 = vsel %vm7008_vm3, %v9422_v27, %v10102_v37  ;;  %v14456_v48 = vmax.f32 %v9462_v52, %v9463_v47  ;;  %v9477_v49 = vrot.slane %v9476_v59, 1  ;;  %v9431_v31 = vrot.slane %v9430_v13, 4 }
 0x548   :  { %10189 = vst.msk [vmem:[%s14736_s4 + $0x30] sm:$0xff] %vm7867_vm6, %v10103_v12  ;;  %v9425_v56 = vmax.f32 %v9423_v50, %v9424_v8  ;;  %v9437_v4 = vsel %vm9030_vm1, %v8610_v60, -inf  ;;  %v9444_v32 = vsel %vm9030_vm1, %v8612_v5, -inf  ;;  %v8279_v41 = vadd.f32 %v14213_v45, %v8243_v46 }
 0x549   :  { %v14465_v19 = vmax.f32 %v9469_v14, %v9470_v25  ;;  %v9432_v7 = vmax.f32 %v9430_v13, %v9431_v31  ;;  %v9438_v43 = vrot.slane %v9437_v4, 4  ;;  %v9445_v39 = vrot.slane %v9444_v32, 4 }
 0x54a   :  { %v14467_v62 = vmax.f32 %v9476_v59, %v9477_v49  ;;  %v9426_v28 = vrot.slane %v9425_v56, 2  ;;  %v8311_v57 = vmax.f32 %v8279_v41, 0.0  ;;  %v8242_v18 = vmul.f32 %v14211_v42, %v8143_v22 }
 0x54b   :  { %v9433_v6 = vrot.slane %v9432_v7, 2  ;;  %v9439_v21 = vmax.f32 %v9437_v4, %v9438_v43  ;;  %v9446_v20 = vmax.f32 %v9444_v32, %v9445_v39  ;;  %v8245_v40 = vmul.f32 %v10574_v33, %v14211_v42 }
 0x54c   :  { %v9427_v26 = vmax.f32 %v9425_v56, %v9426_v28  ;;  %v8647_v30 = vcombine.high %v8311_v57, %v8311_v57  ;;  %v8654_v54 = vrot.slane %v8311_v57, %v15231_v1  ;;  %v14473_v23 = vmul.f32 %v14211_v42, %v8153_v44 }
 0x54d   :  { %v9434_v63 = vmax.f32 %v9432_v7, %v9433_v6  ;;  %v9440_v34 = vrot.slane %v9439_v21, 2  ;;  %v9447_v10 = vrot.slane %v9446_v20, 2  ;;  %v8278_v0 = vadd.f32 %v14213_v45, %v8242_v18 }
 0x54e   :  { %v9428_v11 = vrot.slane %v9427_v26, 1  ;;  %v8661_v58 = vrot.slane %v8647_v30, %v15231_v1  ;;  %v8662_v24 = vcombine.high %v8654_v54, %v8654_v54  ;;  %v9507_v38 = vsel %vm9030_vm1, %v8654_v54, -inf }
 0x54f   :  { %v9435_v3 = vrot.slane %v9434_v63, 1  ;;  %v9441_v61 = vmax.f32 %v9439_v21, %v9440_v34  ;;  %v9448_v35 = vmax.f32 %v9446_v20, %v9447_v10  ;;  %v9508_v29 = vrot.slane %v9507_v38, 4 }
 0x550   :  { %v9429_v17 = vmax.f32 %v9427_v26, %v9428_v11  ;;  %v8663_v60 = vcombine.high %v8661_v58, %v8661_v58  ;;  %v9514_v27 = vsel %vm9030_vm1, %v8662_v24, -inf  ;;  %v9521_v16 = vsel %vm9030_vm1, %v8661_v58, -inf }
 0x551   :  { %v9436_v53 = vmax.f32 %v9434_v63, %v9435_v3  ;;  %v9442_v52 = vrot.slane %v9441_v61, 1  ;;  %v9449_v51 = vrot.slane %v9448_v35, 1  ;;  %v9509_v14 = vmax.f32 %v9507_v38, %v9508_v29 }
 0x552   :  { %v9515_v36 = vrot.slane %v9514_v27, 4  ;;  %v9522_v9 = vrot.slane %v9521_v16, 4  ;;  %v9528_v22 = vsel %vm9030_vm1, %v8663_v60, -inf  ;;  %v8310_v55 = vmax.f32 %v8278_v0, 0.0 }
 0x553   :  { %v9443_v47 = vmax.f32 %v9441_v61, %v9442_v52  ;;  %v9450_v5 = vmax.f32 %v9448_v35, %v9449_v51  ;;  %v10104_v46 = vsel %vm6996_vm11, %v9436_v53, %v9429_v17  ;;  %v9510_v15 = vrot.slane %v9509_v14, 2 }
 0x554   :  { %v9516_v25 = vmax.f32 %v9514_v27, %v9515_v36  ;;  %v9523_v59 = vmax.f32 %v9521_v16, %v9522_v9  ;;  %v9529_v50 = vrot.slane %v9528_v22, 4  ;;  %v8630_v33 = vcombine.high %v8310_v55, %v8310_v55 }
 0x555   :  { %v10105_v37 = vsel %vm6998_vm12, %v9443_v47, %v10104_v46  ;;  %v9511_v8 = vmax.f32 %v9509_v14, %v9510_v15  ;;  %v8637_v13 = vrot.slane %v8310_v55, %v15231_v1  ;;  %v8281_v12 = vadd.f32 %v14213_v45, %v8245_v40 }
 0x556   :  { %v10106_v49 = vsel %vm7000_vm13, %v9450_v5, %v10105_v37  ;;  %v9517_v31 = vrot.slane %v9516_v25, 2  ;;  %v9524_v56 = vrot.slane %v9523_v59, 2  ;;  %v9530_v4 = vmax.f32 %v9528_v22, %v9529_v50 }
 0x557   :  { %v10107_v32 = vsel %vm7002_vm14, %v14452_v2, %v10106_v49  ;;  %v9512_v41 = vrot.slane %v9511_v8, 1  ;;  %v8644_v7 = vrot.slane %v8630_v33, %v15231_v1  ;;  %v8645_v43 = vcombine.high %v8637_v13, %v8637_v13 }
 0x558   :  { %v10108_v39 = vsel %vm7004_vm15, %v14456_v48, %v10107_v32  ;;  %v9518_v44 = vmax.f32 %v9516_v25, %v9517_v31  ;;  %v9525_v28 = vmax.f32 %v9523_v59, %v9524_v56  ;;  %v9531_v57 = vrot.slane %v9530_v4, 2 }
 0x559   :  { %v10109_v18 = vsel %vm7006_vm2, %v14465_v19, %v10108_v39  ;;  %v8646_v6 = vcombine.high %v8644_v7, %v8644_v7  ;;  %v9479_v21 = vsel %vm9030_vm1, %v8637_v13, -inf  ;;  %v8313_v20 = vmax.f32 %v8281_v12, 0.0 }
 0x55a   :  { %v10110_v2 = vsel %vm7008_vm3, %v14467_v62, %v10109_v18  ;;  %v9519_v40 = vrot.slane %v9518_v44, 1  ;;  %v9526_v26 = vrot.slane %v9525_v28, 1  ;;  %v14496_v30 = vmax.f32 %v9530_v4, %v9531_v57  ;;  %v10577_v57 = vpop.f32.mrf.mxu1 }
 0x55b   :  { %10190 = vst.msk [vmem:[%s14736_s4 + $0x38] sm:$0xff] %vm7867_vm6, %v10110_v2  ;;  %v9480_v48 = vrot.slane %v9479_v21, 4  ;;  %v9486_v54 = vsel %vm9030_vm1, %v8645_v43, -inf  ;;  %v9493_v19 = vsel %vm9030_vm1, %v8644_v7, -inf  ;;  %v9500_v63 = vsel %vm9030_vm1, %v8646_v6, -inf }
 0x55c   :  { %v9513_v34 = vmax.f32 %v9511_v8, %v9512_v41  ;;  %v14505_v10 = vmax.f32 %v9518_v44, %v9519_v40  ;;  %v14507_v62 = vmax.f32 %v9525_v28, %v9526_v26  ;;  %v9487_v0 = vrot.slane %v9486_v54, 4 }
 0x55d   :  { %v9481_v11 = vmax.f32 %v9479_v21, %v9480_v48  ;;  %v9494_v58 = vrot.slane %v9493_v19, 4  ;;  %v9501_v24 = vrot.slane %v9500_v63, 4  ;;  %v8681_v38 = vcombine.high %v8313_v20, %v8313_v20 }
 0x55e   :  { %v9533_v3 = vrot.slane %v14496_v30, 1  ;;  %v9488_v61 = vmax.f32 %v9486_v54, %v9487_v0  ;;  %v8688_v35 = vrot.slane %v8313_v20, %v15231_v1  ;;  %v8280_v29 = vadd.f32 %v14213_v45, %v14473_v23 }
 0x55f   :  { %v9482_v17 = vrot.slane %v9481_v11, 2  ;;  %v9495_v60 = vmax.f32 %v9493_v19, %v9494_v58  ;;  %v9502_v27 = vmax.f32 %v9500_v63, %v9501_v24  ;;  %v8695_v16 = vrot.slane %v8681_v38, %v15231_v1 }
 0x560   :  { %v9489_v53 = vrot.slane %v9488_v61, 2  ;;  %v8696_v52 = vcombine.high %v8688_v35, %v8688_v35  ;;  %v9563_v51 = vsel %vm9030_vm1, %v8688_v35, -inf  ;;  %v8312_v14 = vmax.f32 %v8280_v29, 0.0 }
 0x561   :  { %v9483_v36 = vmax.f32 %v9481_v11, %v9482_v17  ;;  %v9496_v9 = vrot.slane %v9495_v60, 2  ;;  %v9503_v22 = vrot.slane %v9502_v27, 2  ;;  %v8697_v55 = vcombine.high %v8695_v16, %v8695_v16 }
 0x562   :  { %v9490_v47 = vmax.f32 %v9488_v61, %v9489_v53  ;;  %v9564_v5 = vrot.slane %v9563_v51, 4  ;;  %v9570_v46 = vsel %vm9030_vm1, %v8696_v52, -inf  ;;  %v9577_v23 = vsel %vm9030_vm1, %v8695_v16, -inf  ;;  %v8163_v61 = vpop.f32.mrf.mxu1 }
 0x563   :  { %v9484_v15 = vrot.slane %v9483_v36, 1  ;;  %v9497_v25 = vmax.f32 %v9495_v60, %v9496_v9  ;;  %v9504_v59 = vmax.f32 %v9502_v27, %v9503_v22  ;;  %v9571_v50 = vrot.slane %v9570_v46, 4 }
 0x564   :  { %v9491_v33 = vrot.slane %v9490_v47, 1  ;;  %v9565_v37 = vmax.f32 %v9563_v51, %v9564_v5  ;;  %v9578_v8 = vrot.slane %v9577_v23, 4  ;;  %v9584_v13 = vsel %vm9030_vm1, %v8697_v55, -inf  ;;  %v10580_v52 = vpop.f32.mrf.mxu1 }
 0x565   :  { %v9485_v12 = vmax.f32 %v9483_v36, %v9484_v15  ;;  %v9498_v49 = vrot.slane %v9497_v25, 1  ;;  %v9505_v31 = vrot.slane %v9504_v59, 1  ;;  %v9572_v56 = vmax.f32 %v9570_v46, %v9571_v50 }
 0x566   :  { %v9492_v4 = vmax.f32 %v9490_v47, %v9491_v33  ;;  %v9566_v32 = vrot.slane %v9565_v37, 2  ;;  %v9579_v41 = vmax.f32 %v9577_v23, %v9578_v8  ;;  %v9585_v7 = vrot.slane %v9584_v13, 4 }
 0x567   :  { %v9499_v43 = vmax.f32 %v9497_v25, %v9498_v49  ;;  %v9506_v39 = vmax.f32 %v9504_v59, %v9505_v31  ;;  %v9573_v44 = vrot.slane %v9572_v56, 2  ;;  %v8664_v28 = vcombine.high %v8312_v14, %v8312_v14  ;;  %v8173_v59 = vpop.f32.mrf.mxu1 }
 0x568   :  { %v10111_v18 = vsel %vm6996_vm11, %v9492_v4, %v9485_v12  ;;  %v9567_v6 = vmax.f32 %v9565_v37, %v9566_v32  ;;  %v9580_v21 = vrot.slane %v9579_v41, 2  ;;  %v9586_v20 = vmax.f32 %v9584_v13, %v9585_v7 }
 0x569   :  { %v10112_v2 = vsel %vm6998_vm12, %v9499_v43, %v10111_v18  ;;  %v9574_v40 = vmax.f32 %v9572_v56, %v9573_v44  ;;  %v8671_v26 = vrot.slane %v8312_v14, %v15231_v1  ;;  %v8678_v48 = vrot.slane %v8664_v28, %v15231_v1 }
 0x56a   :  { %v10113_v54 = vsel %vm7000_vm13, %v9506_v39, %v10112_v2  ;;  %v9568_v19 = vrot.slane %v9567_v6, 1  ;;  %v9581_v63 = vmax.f32 %v9579_v41, %v9580_v21  ;;  %v9587_v0 = vrot.slane %v9586_v20, 2 }
 0x56b   :  { %v10114_v11 = vsel %vm7002_vm14, %v9513_v34, %v10113_v54  ;;  %v9575_v58 = vrot.slane %v9574_v40, 1  ;;  %v8679_v24 = vcombine.high %v8671_v26, %v8671_v26  ;;  %v8680_v38 = vcombine.high %v8678_v48, %v8678_v48 }
 0x56c   :  { %v9534_v35 = vmax.f32 %v14496_v30, %v9533_v3  ;;  %v10115_v29 = vsel %vm7004_vm15, %v14505_v10, %v10114_v11  ;;  %v9582_v17 = vrot.slane %v9581_v63, 1  ;;  %v9588_v60 = vmax.f32 %v9586_v20, %v9587_v0 }
 0x56d   :  { %v10116_v27 = vsel %vm7006_vm2, %v14507_v62, %v10115_v29  ;;  %v14529_v16 = vmax.f32 %v9567_v6, %v9568_v19  ;;  %v9535_v53 = vsel %vm9030_vm1, %v8671_v26, -inf  ;;  %v9542_v34 = vsel %vm9030_vm1, %v8679_v24, -inf }
 0x56e   :  { %v10117_v51 = vsel %vm7008_vm3, %v9534_v35, %v10116_v27  ;;  %v14534_v14 = vmax.f32 %v9574_v40, %v9575_v58  ;;  %v9589_v30 = vrot.slane %v9588_v60, 1  ;;  %v9536_v3 = vrot.slane %v9535_v53, 4 }
 0x56f   :  { %10191 = vst.msk [vmem:[%s14736_s4 + $0x40] sm:$0xff] %vm7867_vm6, %v10117_v51  ;;  %v9543_v10 = vrot.slane %v9542_v34, 4  ;;  %v9549_v62 = vsel %vm9030_vm1, %v8678_v48, -inf  ;;  %v9556_v36 = vsel %vm9030_vm1, %v8680_v38, -inf  ;;  %v8247_v9 = vmul.f32 %v10577_v57, %v14211_v42 }
 0x570   :  { %v14543_v22 = vmax.f32 %v9581_v63, %v9582_v17  ;;  %v9537_v55 = vmax.f32 %v9535_v53, %v9536_v3  ;;  %v9550_v47 = vrot.slane %v9549_v62, 4  ;;  %v9557_v5 = vrot.slane %v9556_v36, 4 }
 0x571   :  { %v9544_v46 = vmax.f32 %v9542_v34, %v9543_v10  ;;  %v8283_v23 = vadd.f32 %v14213_v45, %v8247_v9  ;;  %v8246_v15 = vmul.f32 %v14211_v42, %v8163_v61  ;;  %v8249_v25 = vmul.f32 %v10580_v52, %v14211_v42 }
 0x572   :  { %v9590_v50 = vmax.f32 %v9588_v60, %v9589_v30  ;;  %v9538_v33 = vrot.slane %v9537_v55, 2  ;;  %v9551_v37 = vmax.f32 %v9549_v62, %v9550_v47  ;;  %v9558_v8 = vmax.f32 %v9556_v36, %v9557_v5 }
 0x573   :  { %v9545_v13 = vrot.slane %v9544_v46, 2  ;;  %v8315_v12 = vmax.f32 %v8283_v23, 0.0  ;;  %v8282_v49 = vadd.f32 %v14213_v45, %v8246_v15  ;;  %v8285_v31 = vadd.f32 %v14213_v45, %v8249_v25 }
 0x574   :  { %v9539_v56 = vmax.f32 %v9537_v55, %v9538_v33  ;;  %v9552_v4 = vrot.slane %v9551_v37, 2  ;;  %v9559_v32 = vrot.slane %v9558_v8, 2  ;;  %v8248_v41 = vmul.f32 %v14211_v42, %v8173_v59 }
 0x575   :  { %v9546_v7 = vmax.f32 %v9544_v46, %v9545_v13  ;;  %v8715_v43 = vcombine.high %v8315_v12, %v8315_v12  ;;  %v8722_v39 = vrot.slane %v8315_v12, %v15231_v1  ;;  %v8314_v44 = vmax.f32 %v8282_v49, 0.0 }
 0x576   :  { %v9540_v28 = vrot.slane %v9539_v56, 1  ;;  %v9553_v57 = vmax.f32 %v9551_v37, %v9552_v4  ;;  %v9560_v18 = vmax.f32 %v9558_v8, %v9559_v32  ;;  %v14552_v6 = vmax.f32 %v8285_v31, 0.0 }
 0x577   :  { %v9547_v21 = vrot.slane %v9546_v7, 1  ;;  %v8729_v20 = vrot.slane %v8715_v43, %v15231_v1  ;;  %v8730_v2 = vcombine.high %v8722_v39, %v8722_v39  ;;  %v9619_v40 = vsel %vm9030_vm1, %v8722_v39, -inf }
 0x578   :  { %v9541_v26 = vmax.f32 %v9539_v56, %v9540_v28  ;;  %v9554_v48 = vrot.slane %v9553_v57, 1  ;;  %v9561_v54 = vrot.slane %v9560_v18, 1  ;;  %v9620_v19 = vrot.slane %v9619_v40, 4 }
 0x579   :  { %v9548_v63 = vmax.f32 %v9546_v7, %v9547_v21  ;;  %v8731_v0 = vcombine.high %v8729_v20, %v8729_v20  ;;  %v9626_v11 = vsel %vm9030_vm1, %v8730_v2, -inf  ;;  %v9633_v58 = vsel %vm9030_vm1, %v8729_v20, -inf }
 0x57a   :  { %v9555_v24 = vmax.f32 %v9553_v57, %v9554_v48  ;;  %v9562_v38 = vmax.f32 %v9560_v18, %v9561_v54  ;;  %v9621_v61 = vmax.f32 %v9619_v40, %v9620_v19  ;;  %v9627_v35 = vrot.slane %v9626_v11, 4 }
 0x57b   :  { %v10118_v29 = vsel %vm6996_vm11, %v9548_v63, %v9541_v26  ;;  %v9634_v17 = vrot.slane %v9633_v58, 4  ;;  %v9640_v60 = vsel %vm9030_vm1, %v8731_v0, -inf  ;;  %v8698_v27 = vcombine.high %v8314_v44, %v8314_v44 }
 0x57c   :  { %v10119_v53 = vsel %vm6998_vm12, %v9555_v24, %v10118_v29  ;;  %v9622_v34 = vrot.slane %v9621_v61, 2  ;;  %v9628_v52 = vmax.f32 %v9626_v11, %v9627_v35  ;;  %v9641_v51 = vrot.slane %v9640_v60, 4 }
 0x57d   :  { %v10120_v30 = vsel %vm7000_vm13, %v9562_v38, %v10119_v53  ;;  %v9635_v3 = vmax.f32 %v9633_v58, %v9634_v17  ;;  %v8705_v10 = vrot.slane %v8314_v44, %v15231_v1  ;;  %v8712_v62 = vrot.slane %v8698_v27, %v15231_v1 }
 0x57e   :  { %v10121_v36 = vsel %vm7002_vm14, %v14529_v16, %v10120_v30  ;;  %v9623_v9 = vmax.f32 %v9621_v61, %v9622_v34  ;;  %v9629_v55 = vrot.slane %v9628_v52, 2  ;;  %v9642_v47 = vmax.f32 %v9640_v60, %v9641_v51 }
 0x57f   :  { %v10122_v5 = vsel %vm7004_vm15, %v14534_v14, %v10121_v36  ;;  %v9636_v46 = vrot.slane %v9635_v3, 2  ;;  %v8713_v23 = vcombine.high %v8705_v10, %v8705_v10  ;;  %v8714_v15 = vcombine.high %v8712_v62, %v8712_v62 }
 0x580   :  { %v10123_v25 = vsel %vm7006_vm2, %v14543_v22, %v10122_v5  ;;  %v9624_v59 = vrot.slane %v9623_v9, 1  ;;  %v9630_v33 = vmax.f32 %v9628_v52, %v9629_v55  ;;  %v9643_v37 = vrot.slane %v9642_v47, 2 }
 0x581   :  { %v10124_v8 = vsel %vm7008_vm3, %v9590_v50, %v10123_v25  ;;  %v9637_v13 = vmax.f32 %v9635_v3, %v9636_v46  ;;  %v9591_v16 = vsel %vm9030_vm1, %v8705_v10, -inf  ;;  %v9598_v12 = vsel %vm9030_vm1, %v8713_v23, -inf }
 0x582   :  { %10192 = vst.msk [vmem:[%s14736_s4 + $0x48] sm:$0xff] %vm7867_vm6, %v10124_v8  ;;  %v9631_v14 = vrot.slane %v9630_v33, 1  ;;  %v14577_v49 = vmax.f32 %v9642_v47, %v9643_v37  ;;  %v9592_v31 = vrot.slane %v9591_v16, 4  ;;  %v8284_v22 = vadd.f32 %v14213_v45, %v8248_v41  ;;  %v10583_v47 = vpop.f32.mrf.mxu1 }
 0x583   :  { %v9638_v56 = vrot.slane %v9637_v13, 1  ;;  %v9599_v4 = vrot.slane %v9598_v12, 4  ;;  %v9605_v50 = vsel %vm9030_vm1, %v8712_v62, -inf  ;;  %v9612_v32 = vsel %vm9030_vm1, %v8714_v15, -inf }
 0x584   :  { %v9625_v7 = vmax.f32 %v9623_v9, %v9624_v59  ;;  %v14582_v43 = vmax.f32 %v9630_v33, %v9631_v14  ;;  %v9593_v39 = vmax.f32 %v9591_v16, %v9592_v31  ;;  %v9606_v44 = vrot.slane %v9605_v50, 4 }
 0x585   :  { %v9645_v28 = vrot.slane %v14577_v49, 1  ;;  %v9600_v57 = vmax.f32 %v9598_v12, %v9599_v4  ;;  %v9613_v18 = vrot.slane %v9612_v32, 4  ;;  %v8749_v21 = vcombine.high %v14552_v6, %v14552_v6  ;;  %v8183_v4 = vpop.f32.mrf.mxu1 }
 0x586   :  { %v9639_v20 = vmax.f32 %v9637_v13, %v9638_v56  ;;  %v9594_v41 = vrot.slane %v9593_v39, 2  ;;  %v9607_v2 = vmax.f32 %v9605_v50, %v9606_v44  ;;  %v8756_v40 = vrot.slane %v14552_v6, %v15231_v1 }
 0x587   :  { %v9601_v26 = vrot.slane %v9600_v57, 2  ;;  %v9614_v48 = vmax.f32 %v9612_v32, %v9613_v18  ;;  %v8763_v54 = vrot.slane %v8749_v21, %v15231_v1  ;;  %v8316_v19 = vmax.f32 %v8284_v22, 0.0 }
 0x588   :  { %v9595_v63 = vmax.f32 %v9593_v39, %v9594_v41  ;;  %v9608_v0 = vrot.slane %v9607_v2, 2  ;;  %v8764_v11 = vcombine.high %v8756_v40, %v8756_v40  ;;  %v9675_v58 = vsel %vm9030_vm1, %v8756_v40, -inf }
 0x589   :  { %v9602_v24 = vmax.f32 %v9600_v57, %v9601_v26  ;;  %v9615_v38 = vrot.slane %v9614_v48, 2  ;;  %v8765_v61 = vcombine.high %v8763_v54, %v8763_v54  ;;  %v9676_v35 = vrot.slane %v9675_v58, 4 }
 0x58a   :  { %v9596_v29 = vrot.slane %v9595_v63, 1  ;;  %v9609_v17 = vmax.f32 %v9607_v2, %v9608_v0  ;;  %v9682_v60 = vsel %vm9030_vm1, %v8764_v11, -inf  ;;  %v9689_v6 = vsel %vm9030_vm1, %v8763_v54, -inf }
 0x58b   :  { %v9603_v27 = vrot.slane %v9602_v24, 1  ;;  %v9616_v53 = vmax.f32 %v9614_v48, %v9615_v38  ;;  %v9677_v34 = vmax.f32 %v9675_v58, %v9676_v35  ;;  %v9683_v52 = vrot.slane %v9682_v60, 4 }
 0x58c   :  { %v9597_v51 = vmax.f32 %v9595_v63, %v9596_v29  ;;  %v9610_v30 = vrot.slane %v9609_v17, 1  ;;  %v9690_v3 = vrot.slane %v9689_v6, 4  ;;  %v9696_v10 = vsel %vm9030_vm1, %v8765_v61, -inf  ;;  %v10586_v63 = vpop.f32.mrf.mxu1 }
 0x58d   :  { %v9604_v62 = vmax.f32 %v9602_v24, %v9603_v27  ;;  %v9617_v36 = vrot.slane %v9616_v53, 1  ;;  %v9678_v9 = vrot.slane %v9677_v34, 2  ;;  %v9684_v55 = vmax.f32 %v9682_v60, %v9683_v52 }
 0x58e   :  { %v9611_v5 = vmax.f32 %v9609_v17, %v9610_v30  ;;  %v9691_v46 = vmax.f32 %v9689_v6, %v9690_v3  ;;  %v9697_v23 = vrot.slane %v9696_v10, 4  ;;  %v8732_v15 = vcombine.high %v8316_v19, %v8316_v19 }
 0x58f   :  { %v9618_v25 = vmax.f32 %v9616_v53, %v9617_v36  ;;  %v10125_v59 = vsel %vm6996_vm11, %v9604_v62, %v9597_v51  ;;  %v9679_v33 = vmax.f32 %v9677_v34, %v9678_v9  ;;  %v9685_v37 = vrot.slane %v9684_v55, 2  ;;  %v8193_v53 = vpop.f32.mrf.mxu1 }
 0x590   :  { %v10126_v8 = vsel %vm6998_vm12, %v9611_v5, %v10125_v59  ;;  %v9692_v13 = vrot.slane %v9691_v46, 2  ;;  %v9698_v16 = vmax.f32 %v9696_v10, %v9697_v23  ;;  %v8739_v12 = vrot.slane %v8316_v19, %v15231_v1 }
 0x591   :  { %v10127_v14 = vsel %vm7000_vm13, %v9618_v25, %v10126_v8  ;;  %v9680_v31 = vrot.slane %v9679_v33, 1  ;;  %v9686_v22 = vmax.f32 %v9684_v55, %v9685_v37  ;;  %v8746_v56 = vrot.slane %v8732_v15, %v15231_v1 }
 0x592   :  { %v10128_v50 = vsel %vm7002_vm14, %v9625_v7, %v10127_v14  ;;  %v9693_v32 = vmax.f32 %v9691_v46, %v9692_v13  ;;  %v9699_v39 = vrot.slane %v9698_v16, 2  ;;  %v8747_v44 = vcombine.high %v8739_v12, %v8739_v12 }
 0x593   :  { %v9646_v57 = vmax.f32 %v14577_v49, %v9645_v28  ;;  %v10129_v18 = vsel %vm7004_vm15, %v14582_v43, %v10128_v50  ;;  %v8748_v21 = vcombine.high %v8746_v56, %v8746_v56  ;;  %v9687_v2 = vrot.slane %v9686_v22, 1 }
 0x594   :  { %v10130_v41 = vsel %vm7006_vm2, %v9639_v20, %v10129_v18  ;;  %v9700_v40 = vmax.f32 %v9698_v16, %v9699_v39  ;;  %v9647_v26 = vsel %vm9030_vm1, %v8739_v12, -inf  ;;  %v9694_v54 = vrot.slane %v9693_v32, 1 }
 0x595   :  { %v10131_v48 = vsel %vm7008_vm3, %v9646_v57, %v10130_v41  ;;  %v9648_v19 = vrot.slane %v9647_v26, 4  ;;  %v9654_v7 = vsel %vm9030_vm1, %v8747_v44, -inf  ;;  %v9681_v49 = vmax.f32 %v9679_v33, %v9680_v31 }
 0x596   :  { %10193 = vst.msk [vmem:[%s14736_s4 + $0x50] sm:$0xff] %vm7867_vm6, %v10131_v48  ;;  %v9701_v43 = vrot.slane %v9700_v40, 1  ;;  %v9655_v28 = vrot.slane %v9654_v7, 4  ;;  %v9661_v20 = vsel %vm9030_vm1, %v8746_v56, -inf  ;;  %v9668_v58 = vsel %vm9030_vm1, %v8748_v21, -inf }
 0x597   :  { %v9649_v0 = vmax.f32 %v9647_v26, %v9648_v19  ;;  %v9662_v11 = vrot.slane %v9661_v20, 4  ;;  %v8251_v24 = vmul.f32 %v10583_v47, %v14211_v42  ;;  %v9688_v38 = vmax.f32 %v9686_v22, %v9687_v2 }
 0x598   :  { %v9656_v61 = vmax.f32 %v9654_v7, %v9655_v28  ;;  %v9669_v35 = vrot.slane %v9668_v58, 4  ;;  %v8250_v29 = vmul.f32 %v14211_v42, %v8183_v4  ;;  %v9695_v17 = vmax.f32 %v9693_v32, %v9694_v54 }
 0x599   :  { %v9650_v60 = vrot.slane %v9649_v0, 2  ;;  %v9663_v6 = vmax.f32 %v9661_v20, %v9662_v11  ;;  %v8287_v27 = vadd.f32 %v14213_v45, %v8251_v24  ;;  %v9702_v34 = vmax.f32 %v9700_v40, %v9701_v43 }
 0x59a   :  { %v9657_v52 = vrot.slane %v9656_v61, 2  ;;  %v9670_v51 = vmax.f32 %v9668_v58, %v9669_v35  ;;  %v8286_v30 = vadd.f32 %v14213_v45, %v8250_v29  ;;  %v8253_v36 = vmul.f32 %v10586_v63, %v14211_v42 }
 0x59b   :  { %v9651_v3 = vmax.f32 %v9649_v0, %v9650_v60  ;;  %v9664_v10 = vrot.slane %v9663_v6, 2  ;;  %v8319_v62 = vmax.f32 %v8287_v27, 0.0  ;;  %v8252_v5 = vmul.f32 %v14211_v42, %v8193_v53 }
 0x59c   :  { %v9658_v9 = vmax.f32 %v9656_v61, %v9657_v52  ;;  %v9671_v55 = vrot.slane %v9670_v51, 2  ;;  %v8318_v47 = vmax.f32 %v8286_v30, 0.0  ;;  %v8289_v30 = vadd.f32 %v14213_v45, %v8253_v36 }
 0x59d   :  { %v9652_v46 = vrot.slane %v9651_v3, 1  ;;  %v9665_v23 = vmax.f32 %v9663_v6, %v9664_v10  ;;  %v8783_v15 = vcombine.high %v8319_v62, %v8319_v62  ;;  %v8790_v25 = vrot.slane %v8319_v62, %v15231_v1 }
 0x59e   :  { %v9659_v59 = vrot.slane %v9658_v9, 1  ;;  %v9672_v33 = vmax.f32 %v9670_v51, %v9671_v55  ;;  %v8766_v37 = vcombine.high %v8318_v47, %v8318_v47  ;;  %v8773_v8 = vrot.slane %v8318_v47, %v15231_v1 }
 0x59f   :  { %v9653_v13 = vmax.f32 %v9651_v3, %v9652_v46  ;;  %v9666_v16 = vrot.slane %v9665_v23, 1  ;;  %v8797_v12 = vrot.slane %v8783_v15, %v15231_v1  ;;  %v8798_v14 = vcombine.high %v8790_v25, %v8790_v25 }
 0x5a0   :  { %v9660_v31 = vmax.f32 %v9658_v9, %v9659_v59  ;;  %v9673_v22 = vrot.slane %v9672_v33, 1  ;;  %v9731_v56 = vsel %vm9030_vm1, %v8790_v25, -inf  ;;  %v8780_v4 = vrot.slane %v8766_v37, %v15231_v1 }
 0x5a1   :  { %v9667_v50 = vmax.f32 %v9665_v23, %v9666_v16  ;;  %v8799_v32 = vcombine.high %v8797_v12, %v8797_v12  ;;  %v9732_v39 = vrot.slane %v9731_v56, 4  ;;  %v9738_v44 = vsel %vm9030_vm1, %v8798_v14, -inf }
 0x5a2   :  { %v9674_v57 = vmax.f32 %v9672_v33, %v9673_v22  ;;  %v10132_v18 = vsel %vm6996_vm11, %v9660_v31, %v9653_v13  ;;  %v9739_v21 = vrot.slane %v9738_v44, 4  ;;  %v9745_v41 = vsel %vm9030_vm1, %v8797_v12, -inf }
 0x5a3   :  { %v10133_v2 = vsel %vm6998_vm12, %v9667_v50, %v10132_v18  ;;  %v9733_v40 = vmax.f32 %v9731_v56, %v9732_v39  ;;  %v9746_v26 = vrot.slane %v9745_v41, 4  ;;  %v9752_v48 = vsel %vm9030_vm1, %v8799_v32, -inf }
 0x5a4   :  { %v10134_v54 = vsel %vm7000_vm13, %v9674_v57, %v10133_v2  ;;  %v9740_v19 = vmax.f32 %v9738_v44, %v9739_v21  ;;  %v9753_v7 = vrot.slane %v9752_v48, 4  ;;  %v8781_v63 = vcombine.high %v8773_v8, %v8773_v8 }
 0x5a5   :  { %v10135_v43 = vsel %vm7002_vm14, %v9681_v49, %v10134_v54  ;;  %v9734_v28 = vrot.slane %v9733_v40, 2  ;;  %v9747_v20 = vmax.f32 %v9745_v41, %v9746_v26  ;;  %v8782_v0 = vcombine.high %v8780_v4, %v8780_v4 }
 0x5a6   :  { %v10136_v11 = vsel %vm7004_vm15, %v9688_v38, %v10135_v43  ;;  %v9741_v58 = vrot.slane %v9740_v19, 2  ;;  %v9754_v24 = vmax.f32 %v9752_v48, %v9753_v7  ;;  %v9703_v61 = vsel %vm9030_vm1, %v8773_v8, -inf }
 0x5a7   :  { %v10137_v35 = vsel %vm7006_vm2, %v9695_v17, %v10136_v11  ;;  %v9748_v29 = vrot.slane %v9747_v20, 2  ;;  %v9704_v60 = vrot.slane %v9703_v61, 4  ;;  %v9735_v27 = vmax.f32 %v9733_v40, %v9734_v28 }
 0x5a8   :  { %v10138_v6 = vsel %vm7008_vm3, %v9702_v34, %v10137_v35  ;;  %v9755_v53 = vrot.slane %v9754_v24, 2  ;;  %v9710_v52 = vsel %vm9030_vm1, %v8781_v63, -inf  ;;  %v9742_v49 = vmax.f32 %v9740_v19, %v9741_v58 }
 0x5a9   :  { %10194 = vst.msk [vmem:[%s14736_s4 + $0x58] sm:$0xff] %vm7867_vm6, %v10138_v6  ;;  %v9705_v38 = vmax.f32 %v9703_v61, %v9704_v60  ;;  %v9711_v51 = vrot.slane %v9710_v52, 4  ;;  %v9749_v3 = vmax.f32 %v9747_v20, %v9748_v29  ;;  %v9717_v17 = vsel %vm9030_vm1, %v8780_v4, -inf }
 0x5aa   :  { %v9724_v10 = vsel %vm9030_vm1, %v8782_v0, -inf  ;;  %v8288_v34 = vadd.f32 %v14213_v45, %v8252_v5  ;;  %v9736_v55 = vrot.slane %v9735_v27, 1  ;;  %v9756_v47 = vmax.f32 %v9754_v24, %v9755_v53 }
 0x5ab   :  { %v9706_v62 = vrot.slane %v9705_v38, 2  ;;  %v9712_v9 = vmax.f32 %v9710_v52, %v9711_v51  ;;  %v9718_v46 = vrot.slane %v9717_v17, 4  ;;  %v9725_v23 = vrot.slane %v9724_v10, 4 }
 0x5ac   :  { %v9743_v15 = vrot.slane %v9742_v49, 1  ;;  %v8321_v33 = vmax.f32 %v8289_v30, 0.0  ;;  %v9750_v37 = vrot.slane %v9749_v3, 1  ;;  %v8320_v13 = vmax.f32 %v8288_v34, 0.0 }
 0x5ad   :  { %v9707_v25 = vmax.f32 %v9705_v38, %v9706_v62  ;;  %v9713_v59 = vrot.slane %v9712_v9, 2  ;;  %v9719_v8 = vmax.f32 %v9717_v17, %v9718_v46  ;;  %v9726_v36 = vmax.f32 %v9724_v10, %v9725_v23 }
 0x5ae   :  { %v8817_v14 = vcombine.high %v8321_v33, %v8321_v33  ;;  %v8824_v31 = vrot.slane %v8321_v33, %v15231_v1  ;;  %v9757_v5 = vrot.slane %v9756_v47, 1  ;;  %v8800_v4 = vcombine.high %v8320_v13, %v8320_v13 }
 0x5af   :  { %v9708_v16 = vrot.slane %v9707_v25, 1  ;;  %v9714_v12 = vmax.f32 %v9712_v9, %v9713_v59  ;;  %v9720_v22 = vrot.slane %v9719_v8, 2  ;;  %v9727_v56 = vrot.slane %v9726_v36, 2 }
 0x5b0   :  { %v8831_v32 = vrot.slane %v8817_v14, %v15231_v1  ;;  %v8832_v39 = vcombine.high %v8824_v31, %v8824_v31  ;;  %v8807_v44 = vrot.slane %v8320_v13, %v15231_v1  ;;  %v9787_v41 = vsel %vm9030_vm1, %v8824_v31, -inf }
 0x5b1   :  { %v9715_v50 = vrot.slane %v9714_v12, 1  ;;  %v9709_v57 = vmax.f32 %v9707_v25, %v9708_v16  ;;  %v9721_v18 = vmax.f32 %v9719_v8, %v9720_v22  ;;  %v9728_v21 = vmax.f32 %v9726_v36, %v9727_v56 }
 0x5b2   :  { %v8833_v40 = vcombine.high %v8831_v32, %v8831_v32  ;;  %v9788_v26 = vrot.slane %v9787_v41, 4  ;;  %v9794_v48 = vsel %vm9030_vm1, %v8832_v39, -inf  ;;  %v9801_v63 = vsel %vm9030_vm1, %v8831_v32, -inf }
 0x5b3   :  { %v9716_v2 = vmax.f32 %v9714_v12, %v9715_v50  ;;  %v9722_v54 = vrot.slane %v9721_v18, 1  ;;  %v9729_v19 = vrot.slane %v9728_v21, 1  ;;  %v9795_v7 = vrot.slane %v9794_v48, 4 }
 0x5b4   :  { %v9789_v28 = vmax.f32 %v9787_v41, %v9788_v26  ;;  %v9802_v20 = vrot.slane %v9801_v63, 4  ;;  %v9808_v0 = vsel %vm9030_vm1, %v8833_v40, -inf  ;;  %v9737_v35 = vmax.f32 %v9735_v27, %v9736_v55  ;;  %v10589_v55 = vpop.f32.mrf.mxu1 }
 0x5b5   :  { %v10139_v43 = vsel %vm6996_vm11, %v9716_v2, %v9709_v57  ;;  %v9723_v11 = vmax.f32 %v9721_v18, %v9722_v54  ;;  %v9730_v58 = vmax.f32 %v9728_v21, %v9729_v19  ;;  %v9796_v24 = vmax.f32 %v9794_v48, %v9795_v7 }
 0x5b6   :  { %v9809_v61 = vrot.slane %v9808_v0, 4  ;;  %v9790_v29 = vrot.slane %v9789_v28, 2  ;;  %v8814_v60 = vrot.slane %v8800_v4, %v15231_v1  ;;  %v8815_v6 = vcombine.high %v8807_v44, %v8807_v44  ;;  %v8203_v12 = vpop.f32.mrf.mxu1 }
 0x5b7   :  { %v9744_v53 = vmax.f32 %v9742_v49, %v9743_v15  ;;  %v10140_v52 = vsel %vm6998_vm12, %v9723_v11, %v10139_v43  ;;  %v9803_v38 = vmax.f32 %v9801_v63, %v9802_v20  ;;  %v9759_v51 = vsel %vm9030_vm1, %v8807_v44, -inf }
 0x5b8   :  { %v9751_v30 = vmax.f32 %v9749_v3, %v9750_v37  ;;  %v9758_v17 = vmax.f32 %v9756_v47, %v9757_v5  ;;  %v10141_v10 = vsel %vm7000_vm13, %v9730_v58, %v10140_v52  ;;  %v9760_v34 = vrot.slane %v9759_v51, 4  ;;  %v10592_v40 = vpop.f32.mrf.mxu1 }
 0x5b9   :  { %v10142_v62 = vsel %vm7002_vm14, %v9737_v35, %v10141_v10  ;;  %v9797_v9 = vrot.slane %v9796_v24, 2  ;;  %v9810_v46 = vmax.f32 %v9808_v0, %v9809_v61  ;;  %v9766_v27 = vsel %vm9030_vm1, %v8815_v6, -inf }
 0x5ba   :  { %v10143_v23 = vsel %vm7004_vm15, %v9744_v53, %v10142_v62  ;;  %v9791_v49 = vmax.f32 %v9789_v28, %v9790_v29  ;;  %v8816_v15 = vcombine.high %v8814_v60, %v8814_v60  ;;  %v9761_v25 = vmax.f32 %v9759_v51, %v9760_v34 }
 0x5bb   :  { %v10144_v59 = vsel %vm7006_vm2, %v9751_v30, %v10143_v23  ;;  %v9804_v33 = vrot.slane %v9803_v38, 2  ;;  %v9767_v3 = vrot.slane %v9766_v27, 4  ;;  %v9798_v8 = vmax.f32 %v9796_v24, %v9797_v9 }
 0x5bc   :  { %v10145_v47 = vsel %vm7008_vm3, %v9758_v17, %v10144_v59  ;;  %v9762_v37 = vrot.slane %v9761_v25, 2  ;;  %v9811_v36 = vrot.slane %v9810_v46, 2  ;;  %v9773_v16 = vsel %vm9030_vm1, %v8814_v60, -inf }
 0x5bd   :  { %10195 = vst.msk [vmem:[%s14736_s4 + $0x60] sm:$0xff] %vm7867_vm6, %v10145_v47  ;;  %v9768_v13 = vmax.f32 %v9766_v27, %v9767_v3  ;;  %v9792_v14 = vrot.slane %v9791_v49, 1  ;;  %v9774_v5 = vrot.slane %v9773_v16, 4  ;;  %v9780_v22 = vsel %vm9030_vm1, %v8816_v15, -inf }
 0x5be   :  { %v9763_v31 = vmax.f32 %v9761_v25, %v9762_v37  ;;  %v9805_v56 = vmax.f32 %v9803_v38, %v9804_v33  ;;  %v9781_v50 = vrot.slane %v9780_v22, 4  ;;  %v8255_v32 = vmul.f32 %v10589_v55, %v14211_v42 }
 0x5bf   :  { %v9769_v4 = vrot.slane %v9768_v13, 2  ;;  %v9775_v44 = vmax.f32 %v9773_v16, %v9774_v5  ;;  %v8254_v57 = vmul.f32 %v14211_v42, %v8203_v12  ;;  %v9799_v18 = vrot.slane %v9798_v8, 1 }
 0x5c0   :  { %v9764_v39 = vrot.slane %v9763_v31, 1  ;;  %v9782_v41 = vmax.f32 %v9780_v22, %v9781_v50  ;;  %v8291_v2 = vadd.f32 %v14213_v45, %v8255_v32  ;;  %v9793_v26 = vmax.f32 %v9791_v49, %v9792_v14  ;;  %v8213_v22 = vpop.f32.mrf.mxu1 }
 0x5c1   :  { %v9770_v21 = vmax.f32 %v9768_v13, %v9769_v4  ;;  %v9812_v48 = vmax.f32 %v9810_v46, %v9811_v36  ;;  %v9776_v54 = vrot.slane %v9775_v44, 2  ;;  %v8290_v19 = vadd.f32 %v14213_v45, %v8254_v57 }
 0x5c2   :  { %v9806_v7 = vrot.slane %v9805_v56, 1  ;;  %v9783_v43 = vrot.slane %v9782_v41, 2  ;;  %v8323_v28 = vmax.f32 %v8291_v2, 0.0  ;;  %v9765_v20 = vmax.f32 %v9763_v31, %v9764_v39 }
 0x5c3   :  { %v9771_v63 = vrot.slane %v9770_v21, 1  ;;  %v9777_v0 = vmax.f32 %v9775_v44, %v9776_v54  ;;  %v8322_v11 = vmax.f32 %v8290_v19, 0.0  ;;  %v8257_v58 = vmul.f32 %v10592_v40, %v14211_v42 }
 0x5c4   :  { %v9784_v61 = vmax.f32 %v9782_v41, %v9783_v43  ;;  %v8851_v35 = vcombine.high %v8323_v28, %v8323_v28  ;;  %v8858_v29 = vrot.slane %v8323_v28, %v15231_v1  ;;  %v9800_v60 = vmax.f32 %v9798_v8, %v9799_v18 }
 0x5c5   :  { %v9772_v24 = vmax.f32 %v9770_v21, %v9771_v63  ;;  %v9778_v6 = vrot.slane %v9777_v0, 1  ;;  %v8834_v53 = vcombine.high %v8322_v11, %v8322_v11  ;;  %v8841_v52 = vrot.slane %v8322_v11, %v15231_v1 }
 0x5c6   :  { %v9785_v38 = vrot.slane %v9784_v61, 1  ;;  %v8865_v30 = vrot.slane %v8851_v35, %v15231_v1  ;;  %v8866_v17 = vcombine.high %v8858_v29, %v8858_v29  ;;  %v9813_v10 = vrot.slane %v9812_v48, 1 }
 0x5c7   :  { %v10146_v51 = vsel %vm6996_vm11, %v9772_v24, %v9765_v20  ;;  %v9779_v34 = vmax.f32 %v9777_v0, %v9778_v6  ;;  %v9843_v62 = vsel %vm9030_vm1, %v8858_v29, -inf  ;;  %v8293_v9 = vadd.f32 %v14213_v45, %v8257_v58 }
 0x5c8   :  { %v9786_v46 = vmax.f32 %v9784_v61, %v9785_v38  ;;  %v8867_v27 = vcombine.high %v8865_v30, %v8865_v30  ;;  %v9844_v55 = vrot.slane %v9843_v62, 4  ;;  %v9850_v23 = vsel %vm9030_vm1, %v8866_v17, -inf }
 0x5c9   :  { %v10147_v49 = vsel %vm6998_vm12, %v9779_v34, %v10146_v51  ;;  %v9857_v15 = vsel %vm9030_vm1, %v8865_v30, -inf  ;;  %v8848_v25 = vrot.slane %v8834_v53, %v15231_v1  ;;  %v8849_v59 = vcombine.high %v8841_v52, %v8841_v52 }
 0x5ca   :  { %v9807_v33 = vmax.f32 %v9805_v56, %v9806_v7  ;;  %v10148_v3 = vsel %vm7000_vm13, %v9786_v46, %v10147_v49  ;;  %v9851_v47 = vrot.slane %v9850_v23, 4  ;;  %v9864_v37 = vsel %vm9030_vm1, %v8867_v27, -inf }
 0x5cb   :  { %v9814_v8 = vmax.f32 %v9812_v48, %v9813_v10  ;;  %v10149_v36 = vsel %vm7002_vm14, %v9793_v26, %v10148_v3  ;;  %v9858_v13 = vrot.slane %v9857_v15, 4  ;;  %v9815_v16 = vsel %vm9030_vm1, %v8841_v52, -inf }
 0x5cc   :  { %v10150_v12 = vsel %vm7004_vm15, %v9800_v60, %v10149_v36  ;;  %v9845_v14 = vmax.f32 %v9843_v62, %v9844_v55  ;;  %v9865_v31 = vrot.slane %v9864_v37, 4  ;;  %v9816_v5 = vrot.slane %v9815_v16, 4 }
 0x5cd   :  { %v10151_v4 = vsel %vm7006_vm2, %v9807_v33, %v10150_v12  ;;  %v8850_v56 = vcombine.high %v8848_v25, %v8848_v25  ;;  %v9822_v50 = vsel %vm9030_vm1, %v8849_v59, -inf  ;;  %v8325_v32 = vmax.f32 %v8293_v9, 0.0 }
 0x5ce   :  { %v10152_v39 = vsel %vm7008_vm3, %v9814_v8, %v10151_v4  ;;  %v9852_v44 = vmax.f32 %v9850_v23, %v9851_v47  ;;  %v9817_v57 = vmax.f32 %v9815_v16, %v9816_v5  ;;  %v9859_v18 = vmax.f32 %v9857_v15, %v9858_v13 }
 0x5cf   :  { %10196 = vst.msk [vmem:[%s14736_s4 + $0x68] sm:$0xff] %vm7867_vm6, %v10152_v39  ;;  %v9823_v21 = vrot.slane %v9822_v50, 4  ;;  %v9829_v41 = vsel %vm9030_vm1, %v8848_v25, -inf  ;;  %v8256_v2 = vmul.f32 %v14211_v42, %v8213_v22  ;;  %v9846_v40 = vrot.slane %v9845_v14, 2 }
 0x5d0   :  { %v9866_v26 = vmax.f32 %v9864_v37, %v9865_v31  ;;  %v9818_v48 = vrot.slane %v9817_v57, 2  ;;  %v9830_v54 = vrot.slane %v9829_v41, 4  ;;  %v9836_v7 = vsel %vm9030_vm1, %v8850_v56, -inf }
 0x5d1   :  { %v9824_v19 = vmax.f32 %v9822_v50, %v9823_v21  ;;  %v8885_v63 = vcombine.high %v8325_v32, %v8325_v32  ;;  %v9853_v43 = vrot.slane %v9852_v44, 2  ;;  %v9860_v0 = vrot.slane %v9859_v18, 2 }
 0x5d2   :  { %v9819_v28 = vmax.f32 %v9817_v57, %v9818_v48  ;;  %v9831_v20 = vmax.f32 %v9829_v41, %v9830_v54  ;;  %v9837_v58 = vrot.slane %v9836_v7, 4  ;;  %v8292_v24 = vadd.f32 %v14213_v45, %v8256_v2 }
 0x5d3   :  { %v9825_v11 = vrot.slane %v9824_v19, 2  ;;  %v9847_v61 = vmax.f32 %v9845_v14, %v9846_v40  ;;  %v9867_v35 = vrot.slane %v9866_v26, 2  ;;  %v8892_v42 = vrot.slane %v8325_v32, %v15231_v1 }
 0x5d4   :  { %v9832_v29 = vrot.slane %v9831_v20, 2  ;;  %v9820_v60 = vrot.slane %v9819_v28, 1  ;;  %v9838_v53 = vmax.f32 %v9836_v7, %v9837_v58  ;;  %v8899_v52 = vrot.slane %v8885_v63, %v15231_v1 }
 0x5d5   :  { %v9826_v6 = vmax.f32 %v9824_v19, %v9825_v11  ;;  %v9854_v38 = vmax.f32 %v9852_v44, %v9853_v43  ;;  %v9861_v30 = vmax.f32 %v9859_v18, %v9860_v0  ;;  %v8900_v34 = vcombine.high %v8892_v42, %v8892_v42 }
 0x5d6   :  { %v9833_v51 = vmax.f32 %v9831_v20, %v9832_v29  ;;  %v9839_v10 = vrot.slane %v9838_v53, 2  ;;  %v9848_v62 = vrot.slane %v9847_v61, 1  ;;  %v9868_v9 = vmax.f32 %v9866_v26, %v9867_v35 }
 0x5d7   :  { %v9827_v17 = vrot.slane %v9826_v6, 1  ;;  %v8324_v45 = vmax.f32 %v8292_v24, 0.0  ;;  %v9821_v27 = vmax.f32 %v9819_v28, %v9820_v60  ;;  %v8901_v49 = vcombine.high %v8899_v52, %v8899_v52 }
 0x5d8   :  { %v9834_v46 = vrot.slane %v9833_v51, 1  ;;  %v9840_v23 = vmax.f32 %v9838_v53, %v9839_v10  ;;  %v9855_v15 = vrot.slane %v9854_v38, 1  ;;  %v9899_v59 = vsel %vm9030_vm1, %v8892_v42, -inf }
 0x5d9   :  { %v9828_v55 = vmax.f32 %v9826_v6, %v9827_v17  ;;  %v8868_v33 = vcombine.high %v8324_v45, %v8324_v45  ;;  %v9862_v3 = vrot.slane %v9861_v30, 1  ;;  %v9906_v8 = vsel %vm9030_vm1, %v8900_v34, -inf }
 0x5da   :  { %v9835_v25 = vmax.f32 %v9833_v51, %v9834_v46  ;;  %v9841_v47 = vrot.slane %v9840_v23, 1  ;;  %v9869_v36 = vrot.slane %v9868_v9, 1  ;;  %v9913_v16 = vsel %vm9030_vm1, %v8899_v52, -inf }
 0x5db   :  { %v10153_v37 = vsel %vm6996_vm11, %v9828_v55, %v9821_v27  ;;  %v8875_v12 = vrot.slane %v8324_v45, %v15231_v1  ;;  %v9900_v31 = vrot.slane %v9899_v59, 4  ;;  %v9920_v5 = vsel %vm9030_vm1, %v8901_v49, -inf }
 0x5dc   :  { %v10154_v13 = vsel %vm6998_vm12, %v9835_v25, %v10153_v37  ;;  %v9842_v14 = vmax.f32 %v9840_v23, %v9841_v47  ;;  %v8882_v22 = vrot.slane %v8868_v33, %v15231_v1  ;;  %v9849_v4 = vmax.f32 %v9847_v61, %v9848_v62 }
 0x5dd   :  { %v9907_v56 = vrot.slane %v9906_v8, 4  ;;  %v8883_v50 = vcombine.high %v8875_v12, %v8875_v12  ;;  %v9871_v32 = vsel %vm9030_vm1, %v8875_v12, -inf  ;;  %v9856_v39 = vmax.f32 %v9854_v38, %v9855_v15 }
 0x5de   :  { %v9863_v44 = vmax.f32 %v9861_v30, %v9862_v3  ;;  %v10155_v57 = vsel %vm7000_vm13, %v9842_v14, %v10154_v13  ;;  %v9914_v18 = vrot.slane %v9913_v16, 4  ;;  %v9870_v21 = vmax.f32 %v9868_v9, %v9869_v36 }
 0x5df   :  { %v10156_v41 = vsel %vm7002_vm14, %v9849_v4, %v10155_v57  ;;  %v9921_v2 = vrot.slane %v9920_v5, 4  ;;  %v9872_v40 = vrot.slane %v9871_v32, 4  ;;  %v9901_v48 = vmax.f32 %v9899_v59, %v9900_v31 }
 0x5e0   :  { %v10157_v26 = vsel %vm7004_vm15, %v9856_v39, %v10156_v41  ;;  %v8884_v54 = vcombine.high %v8882_v22, %v8882_v22  ;;  %v9878_v1 = vsel %vm9030_vm1, %v8883_v50, -inf  ;;  %v9908_v7 = vmax.f32 %v9906_v8, %v9907_v56 }
 0x5e1   :  { %v10158_v19 = vsel %vm7006_vm2, %v9863_v44, %v10157_v26  ;;  %v9873_v63 = vmax.f32 %v9871_v32, %v9872_v40  ;;  %v9915_v28 = vmax.f32 %v9913_v16, %v9914_v18  ;;  %v9879_v20 = vrot.slane %v9878_v1, 4 }
 0x5e2   :  { %v10159_v43 = vsel %vm7008_vm3, %v9870_v21, %v10158_v19  ;;  %v9885_v0 = vsel %vm9030_vm1, %v8882_v22, -inf  ;;  %v9922_v11 = vmax.f32 %v9920_v5, %v9921_v2  ;;  %v9902_v61 = vrot.slane %v9901_v48, 2 }
 0x5e3   :  { %10197 = vst.msk [vmem:[%s14736_s4 + $0x70] sm:$0xff] %vm7867_vm6, %v10159_v43  ;;  %v9874_v58 = vrot.slane %v9873_v63, 2  ;;  %v9886_v24 = vrot.slane %v9885_v0, 4  ;;  %v9880_v35 = vmax.f32 %v9878_v1, %v9879_v20  ;;  %v9892_v29 = vsel %vm9030_vm1, %v8884_v54, -inf }
 0x5e4   :  { %v9909_v42 = vrot.slane %v9908_v7, 2  ;;  %v9893_v53 = vrot.slane %v9892_v29, 4  ;;  %v9916_v52 = vrot.slane %v9915_v28, 2  ;;  %v9923_v51 = vrot.slane %v9922_v11, 2 }
 0x5e5   :  { %v9875_v60 = vmax.f32 %v9873_v63, %v9874_v58  ;;  %v9887_v6 = vmax.f32 %v9885_v0, %v9886_v24  ;;  %v9881_v38 = vrot.slane %v9880_v35, 2  ;;  %v9903_v10 = vmax.f32 %v9901_v48, %v9902_v61 }
 0x5e6   :  { %v9894_v17 = vmax.f32 %v9892_v29, %v9893_v53  ;;  %v9910_v9 = vmax.f32 %v9908_v7, %v9909_v42  ;;  %v9917_v27 = vmax.f32 %v9915_v28, %v9916_v52  ;;  %v9924_v23 = vmax.f32 %v9922_v11, %v9923_v51 }
 0x5e7   :  { %v9888_v30 = vrot.slane %v9887_v6, 2  ;;  %v9876_v34 = vrot.slane %v9875_v60, 1  ;;  %v9882_v62 = vmax.f32 %v9880_v35, %v9881_v38  ;;  %v9904_v25 = vrot.slane %v9903_v10, 1 }
 0x5e8   :  { %v9895_v45 = vrot.slane %v9894_v17, 2  ;;  %v9911_v3 = vrot.slane %v9910_v9, 1  ;;  %v9918_v8 = vrot.slane %v9917_v27, 1  ;;  %v9925_v13 = vrot.slane %v9924_v23, 1 }
 0x5e9   :  { %v9889_v46 = vmax.f32 %v9887_v6, %v9888_v30  ;;  %v9883_v55 = vrot.slane %v9882_v62, 1  ;;  %v9877_v59 = vmax.f32 %v9875_v60, %v9876_v34  ;;  %v9905_v14 = vmax.f32 %v9903_v10, %v9904_v25 }
 0x5ea   :  { %v9896_v15 = vmax.f32 %v9894_v17, %v9895_v45  ;;  %v9912_v31 = vmax.f32 %v9910_v9, %v9911_v3  ;;  %v9919_v22 = vmax.f32 %v9917_v27, %v9918_v8  ;;  %v9926_v56 = vmax.f32 %v9924_v23, %v9925_v13 }
 0x5eb   :  { %v9890_v49 = vrot.slane %v9889_v46, 1  ;;  %v9884_v33 = vmax.f32 %v9882_v62, %v9883_v55 }
 0x5ec   :  { %v9897_v37 = vrot.slane %v9896_v15, 1 }
 0x5ed   :  { %v9891_v47 = vmax.f32 %v9889_v46, %v9890_v49  ;;  %v10160_v36 = vsel %vm6996_vm11, %v9884_v33, %v9877_v59 }
 0x5ee   :  { %v9898_v16 = vmax.f32 %v9896_v15, %v9897_v37 }
 0x5ef   :  { %v10161_v12 = vsel %vm6998_vm12, %v9891_v47, %v10160_v36 }
 0x5f0   :  { %v10162_v5 = vsel %vm7000_vm13, %v9898_v16, %v10161_v12 }
 0x5f1   :  { %v10163_v4 = vsel %vm7002_vm14, %v9905_v14, %v10162_v5 }
 0x5f2   :  { %v10164_v50 = vsel %vm7004_vm15, %v9912_v31, %v10163_v4 }
 0x5f3   :  { %v10165_v32 = vsel %vm7006_vm2, %v9919_v22, %v10164_v50 }
 0x5f4   :  { %v10166_v39 = vsel %vm7008_vm3, %v9926_v56, %v10165_v32 }
 0x5f5   :  { %10198 = vst.msk [vmem:[%s14736_s4 + $0x78] sm:$0xff] %vm7867_vm6, %v10166_v39 }

</bundles_post_ra>
